<compile_context>
chip_gen: v6e
topology: v6e:2x2x1
jax: 0.10.0
libtpu: 0.0.40
codegen_flags: <defaults>
</compile_context>

<pallas_src>
import functools
import math

import jax
import jax.numpy as jnp
from jax.experimental import pallas as pl
from jax.experimental.pallas import tpu as pltpu

SCALES_MIN = 0.11
LIKELIHOOD_BOUND = 1e-9

# Tile caps for the fused matmul kernel.
TM_CAP = 1024
TN_CAP = 256


def _rup(x, m):
    return ((x + m - 1) // m) * m


def _choose_k_tiling(K):
    """Pick (tk, Kp): largest tk in {512,256,128} whose padding overhead is
    within ~5% of the minimal 128-multiple padding."""
    k128 = _rup(K, 128)
    for tk in (512, 256, 128):
        Kp = _rup(K, tk)
        if Kp * 20 <= k128 * 21:
            return tk, Kp
    return 128, k128


def _choose_m_tiling(M, cap):
    """Pick (tm, Mp). Prefer no row padding and >=2 row blocks so both
    TensorCores get work on v7x / megacore."""
    if M <= cap:
        t = (M // 2) // 8 * 8
        while t >= 8:
            if M % t == 0:
                return t, M
            t -= 8
        return M, M                      # single full-extent block
    t = cap // 8 * 8
    while t >= 8:
        if M % t == 0:
            return t, M
        t -= 8
    t = cap // 8 * 8                     # rare fallback: pad rows
    return t, _rup(M, t)


def _pick_tile(dim_p, cap):
    # dim_p is a multiple of 128; largest multiple of 128 <= cap dividing it.
    t = max(128, min(cap, dim_p))
    t = (t // 128) * 128
    while dim_p % t:
        t -= 128
    return t


# --------------------------------------------------------------------------
# Pallas kernel 1: tiled matmul, bf16 operands, f32 accumulation resident in
# the output block, fused epilogues.
# --------------------------------------------------------------------------
def _acc_step(o_ref, prod):
    k = pl.program_id(2)

    @pl.when(k == 0)
    def _():
        o_ref[...] = prod               # direct write, no zero-fill pass

    @pl.when(k > 0)
    def _():
        o_ref[...] += prod


def _mm_bias_kernel(a_ref, b_ref, bias_ref, o_ref, *, relu):
    prod = jnp.dot(a_ref[...], b_ref[...], preferred_element_type=jnp.float32)
    _acc_step(o_ref, prod)

    @pl.when(pl.program_id(2) == pl.num_programs(2) - 1)
    def _():
        r = o_ref[...] + bias_ref[...]
        if relu:
            r = jnp.maximum(r, 0.0)
        o_ref[...] = r


def _mm_bias_gdn_kernel(a_ref, b_ref, bias_ref, g_ref, beta_ref, o_ref, *,
                        inverse):
    prod = jnp.dot(a_ref[...], b_ref[...], preferred_element_type=jnp.float32)
    _acc_step(o_ref, prod)

    @pl.when(pl.program_id(2) == pl.num_programs(2) - 1)
    def _():
        x = o_ref[...] + bias_ref[...]
        # norm = x^2 @ gamma^T + beta, kept fully in f32 (precision concern).
        norm = jnp.dot(x * x, g_ref[...],
                       preferred_element_type=jnp.float32) + beta_ref[...]
        if inverse:
            o_ref[...] = x * jnp.sqrt(norm)           # IGDN
        else:
            o_ref[...] = x * jax.lax.rsqrt(norm)      # GDN


def _mm_bias_absround_kernel(a_ref, b_ref, bias_ref, abs_ref, rnd_ref):
    # Accumulate in rnd_ref (resident f32 block); emit |y| and round(y) at end.
    prod = jnp.dot(a_ref[...], b_ref[...], preferred_element_type=jnp.float32)
    _acc_step(rnd_ref, prod)

    @pl.when(pl.program_id(2) == pl.num_programs(2) - 1)
    def _():
        y = rnd_ref[...] + bias_ref[...]
        abs_ref[...] = jnp.abs(y)
        rnd_ref[...] = jnp.round(y)


def matmul_fused_pallas(a, w_p, bias_p, *, tk, relu=False, gamma_t=None,
                        beta=None, inverse=False, emit_abs_round=False):
    """a: (M, Kp) bf16 patches (already K-padded); w_p: (Kp, Np) bf16 weight;
    bias_p: (1, Np) f32.  Optional fused GDN/IGDN or |y|/round(y) epilogue."""
    M, Kp = a.shape
    Kp_w, Np = w_p.shape
    assert Kp == Kp_w and Kp % tk == 0

    tm, Mp = _choose_m_tiling(M, TM_CAP)
    if Mp > M:                                        # rare fallback path
        a = jnp.pad(a, ((0, Mp - M), (0, 0)))
    tn = Np if gamma_t is not None else _pick_tile(Np, TN_CAP)

    in_specs = [
        pl.BlockSpec((tm, tk), lambda i, j, k: (i, k)),
        pl.BlockSpec((tk, tn), lambda i, j, k: (k, j)),
        pl.BlockSpec((1, tn), lambda i, j, k: (0, j)),
    ]
    args = [a, w_p, bias_p]
    out_block = pl.BlockSpec((tm, tn), lambda i, j, k: (i, j))

    if gamma_t is not None:
        kernel = functools.partial(_mm_bias_gdn_kernel, inverse=inverse)
        in_specs += [pl.BlockSpec((Np, Np), lambda i, j, k: (0, 0)),
                     pl.BlockSpec((1, Np), lambda i, j, k: (0, 0))]
        args += [gamma_t, beta]
        out_shape = jax.ShapeDtypeStruct((Mp, Np), jnp.float32)
        out_specs = out_block
    elif emit_abs_round:
        kernel = _mm_bias_absround_kernel
        out_shape = (jax.ShapeDtypeStruct((Mp, Np), jnp.float32),
                     jax.ShapeDtypeStruct((Mp, Np), jnp.float32))
        out_specs = [out_block, out_block]
    else:
        kernel = functools.partial(_mm_bias_kernel, relu=relu)
        out_shape = jax.ShapeDtypeStruct((Mp, Np), jnp.float32)
        out_specs = out_block

    out = pl.pallas_call(
        kernel,
        out_shape=out_shape,
        grid_spec=pltpu.PrefetchScalarGridSpec(
            num_scalar_prefetch=0,
            grid=(Mp // tm, Np // tn, Kp // tk),
            in_specs=in_specs,
            out_specs=out_specs,
        ),
        compiler_params=pltpu.CompilerParams(
            dimension_semantics=("parallel", "parallel", "arbitrary")),
    )(*args)
    if emit_abs_round:
        return out[0][:M, :], out[1][:M, :]
    return out[:M, :]


# --------------------------------------------------------------------------
# Pallas kernel 2: GaussianConditional likelihood (gridded, lane-dense,
# EUP approx reciprocals instead of divides).
# --------------------------------------------------------------------------
_INV_SQRT2 = 1.0 / math.sqrt(2.0)


def _erf_approx(t):
    # Abramowitz-Stegun 7.1.26, |err| < 1.5e-7 (plus ~1e-4 rel from approx rcp)
    s = jnp.where(t >= 0.0, 1.0, -1.0)
    a = jnp.abs(t)
    k = pl.reciprocal(1.0 + 0.3275911 * a, approx=True)
    poly = ((((1.061405429 * k - 1.453152027) * k + 1.421413741) * k
             - 0.284496736) * k + 0.254829592) * k
    return s * (1.0 - poly * jnp.exp(-a * a))


def _gauss_like_kernel(v_ref, s_ref, o_ref):
    v = jnp.abs(v_ref[...])
    s = jnp.maximum(s_ref[...], SCALES_MIN)
    inv_s = pl.reciprocal(s, approx=True)

    def phi(x):
        return 0.5 * (1.0 + _erf_approx(x * _INV_SQRT2))

    upper = phi((0.5 - v) * inv_s)
    lower = phi((-0.5 - v) * inv_s)
    o_ref[...] = jnp.maximum(upper - lower, LIKELIHOOD_BOUND)


def gaussian_likelihood_pallas(values, scales, *, width=512, row_tile=256):
    shp = values.shape
    n = values.size
    rows = _rup(max(-(-n // width), 1), 8)
    tm = min(row_tile, rows)
    rows_p = _rup(rows, tm)
    total = rows_p * width
    v = jnp.pad(values.reshape(-1).astype(jnp.float32),
                (0, total - n)).reshape(rows_p, width)
    s = jnp.pad(scales.reshape(-1).astype(jnp.float32), (0, total - n),
                constant_values=1.0).reshape(rows_p, width)
    out = pl.pallas_call(
        _gauss_like_kernel,
        out_shape=jax.ShapeDtypeStruct((rows_p, width), jnp.float32),
        grid_spec=pltpu.PrefetchScalarGridSpec(
            num_scalar_prefetch=0,
            grid=(rows_p // tm,),
            in_specs=[pl.BlockSpec((tm, width), lambda i: (i, 0)),
                      pl.BlockSpec((tm, width), lambda i: (i, 0))],
            out_specs=pl.BlockSpec((tm, width), lambda i: (i, 0)),
        ),
        compiler_params=pltpu.CompilerParams(dimension_semantics=("parallel",)),
    )(v, s)
    return out.reshape(-1)[:n].reshape(shp)


# --------------------------------------------------------------------------
# Conv / deconv wrappers (tap gather in JAX, fused GEMM in Pallas)
# --------------------------------------------------------------------------
def conv2d_nhwc(x, layer, *, stride, relu=False, fuse_gdn=False, inverse=False,
                emit_abs_round=False):
    kh, kw, cout, Kp = layer['kh'], layer['kw'], layer['cout'], layer['Kp']
    pad = layer['pad']
    xp = jnp.pad(x.astype(jnp.bfloat16),
                 ((0, 0), (pad, pad), (pad, pad), (0, 0)))
    B, Hp, Wp, C = xp.shape
    oh = (Hp - kh) // stride + 1
    ow = (Wp - kw) // stride + 1
    # TODO(synk): this tap gather still materializes a kh*kw-replicated bf16
    # patch matrix in HBM; a direct-conv kernel (in-kernel column-tap
    # extraction / manual DMA) would cut it to ~1x activation bytes.
    cols = [xp[:, di:di + stride * (oh - 1) + 1:stride,
               dj:dj + stride * (ow - 1) + 1:stride, :]
            for di in range(kh) for dj in range(kw)]
    K = kh * kw * C
    if Kp > K:
        cols.append(jnp.zeros((B, oh, ow, Kp - K), jnp.bfloat16))
    patches = jnp.concatenate(cols, axis=-1).reshape(B * oh * ow, Kp)
    res = matmul_fused_pallas(
        patches, layer['w'], layer['b'], tk=layer['tk'], relu=relu,
        gamma_t=layer.get('gamma_t') if fuse_gdn else None,
        beta=layer.get('beta') if fuse_gdn else None,
        inverse=inverse, emit_abs_round=emit_abs_round)
    if emit_abs_round:
        abs_o, rnd_o = res
        return (abs_o[:, :cout].reshape(B, oh, ow, cout),
                rnd_o[:, :cout].reshape(B, oh, ow, cout))
    return res[:, :cout].reshape(B, oh, ow, cout)


def deconv2d_nhwc(x, layer, *, relu=False, fuse_gdn=False, inverse=True):
    """ConvTranspose2d(k=5, s=2, p=2, op=1) via sub-pixel decomposition with
    all 4 output phases merged into ONE GEMM (K = 9*cin superset of 3x3
    stride-1 taps, N = 4*cout), then a single pixel-shuffle."""
    B, H, W, C = x.shape
    cout, Kp = layer['cout'], layer['Kp']
    xp = jnp.pad(x.astype(jnp.bfloat16), ((0, 0), (1, 1), (1, 1), (0, 0)))
    cols = [xp[:, ei:ei + H, ej:ej + W, :]
            for ei in range(3) for ej in range(3)]
    K = 9 * C
    if Kp > K:
        cols.append(jnp.zeros((B, H, W, Kp - K), jnp.bfloat16))
    patches = jnp.concatenate(cols, axis=-1).reshape(B * H * W, Kp)
    out = matmul_fused_pallas(
        patches, layer['w'], layer['b'], tk=layer['tk'], relu=relu,
        gamma_t=layer.get('gamma_t') if fuse_gdn else None,
        beta=layer.get('beta') if fuse_gdn else None,
        inverse=inverse)
    out = out[:, :4 * cout].reshape(B, H, W, 2, 2, cout)
    out = jnp.transpose(out, (0, 1, 3, 2, 4, 5)).reshape(B, 2 * H, 2 * W, cout)
    return out


# --------------------------------------------------------------------------
# Entropy bottleneck (factorized)
# --------------------------------------------------------------------------
def entropy_bottleneck_forward(z, logits, extrema, training=False):
    # TODO(synk): exact ICME EntropyBottleneck (pmf_linear / power / delta)
    # source is not provided; implemented as round-quantization + per-channel
    # categorical pmf lookup over the integer support [-extrema, extrema].
    z_hat = jnp.round(z)  # eval path (training=False)
    pmf = jax.nn.softmax(logits, axis=-1)                        # (N, 2E+1)
    idx = jnp.clip(z_hat.astype(jnp.int32) + extrema, 0, 2 * extrema)
    oh = jax.nn.one_hot(idx, 2 * extrema + 1, dtype=jnp.float32)
    z_like = jnp.einsum('bhwnk,nk->bhwn', oh, pmf)
    z_like = jnp.maximum(z_like, LIKELIHOOD_BOUND)
    return z_hat, z_like, pmf


# --------------------------------------------------------------------------
# Parameter init (deterministic, synthetic, PyTorch layouts)
# --------------------------------------------------------------------------
def _conv_w(key, cout, cin, k):
    std = 1.0 / math.sqrt(cin * k * k)
    return jax.random.normal(key, (cout, cin, k, k), jnp.float32) * std


def _deconv_w(key, cin, cout, k):
    std = 1.0 / math.sqrt(cin * k * k)
    return jax.random.normal(key, (cin, cout, k, k), jnp.float32) * std


def init_raw_params(key, N, M, extrema):
    ks = jax.random.split(key, 32)
    p = {}
    p['ga'] = [(_conv_w(ks[0], N, 3, 5), jnp.zeros(N)),
               (_conv_w(ks[1], N, N, 5), jnp.zeros(N)),
               (_conv_w(ks[2], N, N, 5), jnp.zeros(N)),
               (_conv_w(ks[3], M, N, 5), jnp.zeros(M))]
    p['gs'] = [(_deconv_w(ks[4], M, N, 5), jnp.zeros(N)),
               (_deconv_w(ks[5], N, N, 5), jnp.zeros(N)),
               (_deconv_w(ks[6], N, N, 5), jnp.zeros(N)),
               (_deconv_w(ks[7], N, 3, 5), jnp.zeros(3))]
    p['ha'] = [(_conv_w(ks[8], N, M, 5), jnp.zeros(N)),
               (_conv_w(ks[9], N, N, 5), jnp.zeros(N)),
               (_conv_w(ks[10], N, N, 5), jnp.zeros(N))]
    p['hs'] = [(_deconv_w(ks[11], N, N, 5), jnp.zeros(N)),
               (_deconv_w(ks[12], N, N, 5), jnp.zeros(N)),
               (_conv_w(ks[13], M, N, 3), jnp.zeros(M))]

    def gdn_params(n):
        return (0.1 * jnp.eye(n, dtype=jnp.float32) + 1e-3,
                jnp.ones(n, jnp.float32))
    p['ga_gdn'] = [gdn_params(N) for _ in range(3)]
    p['gs_gdn'] = [gdn_params(N) for _ in range(3)]
    grid = jnp.arange(-extrema, extrema + 1, dtype=jnp.float32)
    p['eb_logits'] = jnp.broadcast_to(-0.05 * grid * grid,
                                      (N, 2 * extrema + 1)).astype(jnp.float32)
    return p


# --------------------------------------------------------------------------
# One-time packing: pre-transpose / pre-pad / cast weights for the kernels
# --------------------------------------------------------------------------
def _pack_gdn(gamma, beta, Np, nrep=1):
    """gamma kept in f32 (precision); block-diagonal replication for the
    merged sub-pixel deconv (each phase is an independent pixel)."""
    C = gamma.shape[0]
    g = jnp.kron(jnp.eye(nrep, dtype=jnp.float32), gamma.T.astype(jnp.float32))
    g = jnp.pad(g, ((0, Np - nrep * C), (0, Np - nrep * C)))
    bt = jnp.pad(jnp.tile(beta.astype(jnp.float32), nrep), (0, Np - nrep * C),
                 constant_values=1.0).reshape(1, Np)
    return dict(gamma_t=g, beta=bt)


def _np_for(cout_total):
    return 128 if cout_total <= 128 else _rup(cout_total, 256)


def pack_conv(w, b, gdn=None):
    cout, cin, kh, kw = w.shape
    K = kh * kw * cin
    tk, Kp = _choose_k_tiling(K)
    Np = _np_for(cout)
    w_mat = jnp.transpose(w, (2, 3, 1, 0)).reshape(K, cout)
    layer = dict(
        w=jnp.pad(w_mat, ((0, Kp - K), (0, Np - cout))).astype(jnp.bfloat16),
        b=jnp.pad(b.astype(jnp.float32), (0, Np - cout)).reshape(1, Np),
        kh=kh, kw=kw, cout=cout, Kp=Kp, tk=tk, pad=kh // 2)
    if gdn is not None:
        layer.update(_pack_gdn(*gdn, Np, nrep=1))
    return layer


def pack_deconv(w, b, gdn=None):
    """Merged sub-pixel packing of ConvTranspose2d(k=5, s=2, p=2, op=1):
    output phase (r,t) at input-grid pixel uses input offsets e in {-1,0,1}
    with kernel index ki = 2 - 2e + r (zero weight when out of range)."""
    cin, cout, kh, kw = w.shape            # PyTorch ConvTranspose2d layout
    nm = 4 * cout
    Np = _np_for(nm)
    K = 9 * cin
    tk, Kp = _choose_k_tiling(K)

    def tap_block(ei, ej):                 # ei,ej in {0,1,2} -> offset ei-1
        cols = []
        for r in (0, 1):
            for t in (0, 1):
                ki = 4 - 2 * ei + r
                kj = 4 - 2 * ej + t
                if 0 <= ki < kh and 0 <= kj < kw:
                    cols.append(w[:, :, ki, kj])           # (cin, cout)
                else:
                    cols.append(jnp.zeros((cin, cout), w.dtype))
        return jnp.concatenate(cols, axis=1)               # (cin, 4*cout)

    w_mat = jnp.concatenate(
        [tap_block(ei, ej) for ei in range(3) for ej in range(3)], axis=0)
    layer = dict(
        w=jnp.pad(w_mat, ((0, Kp - K), (0, Np - nm))).astype(jnp.bfloat16),
        b=jnp.pad(jnp.tile(b.astype(jnp.float32), 4),
                  (0, Np - nm)).reshape(1, Np),
        cout=cout, Kp=Kp, tk=tk)
    if gdn is not None:
        layer.update(_pack_gdn(*gdn, Np, nrep=4))
    return layer


def pack_params(raw):
    p = {}
    p['ga'] = [pack_conv(*raw['ga'][i], gdn=raw['ga_gdn'][i]) for i in range(3)]
    p['ga'].append(pack_conv(*raw['ga'][3]))
    p['gs'] = [pack_deconv(*raw['gs'][i], gdn=raw['gs_gdn'][i])
               for i in range(3)]
    p['gs'].append(pack_deconv(*raw['gs'][3]))
    p['ha'] = [pack_conv(*raw['ha'][i]) for i in range(3)]
    p['hs'] = [pack_deconv(*raw['hs'][0]), pack_deconv(*raw['hs'][1]),
               pack_conv(*raw['hs'][2])]
    p['eb_logits'] = raw['eb_logits']
    return p


# --------------------------------------------------------------------------
# Full forward pass
# --------------------------------------------------------------------------
def icme_forward(params, x_nchw, extrema, training=False):
    x = jnp.transpose(x_nchw, (0, 2, 3, 1)).astype(jnp.float32)  # NCHW -> NHWC

    # ---- g_a : [conv + GDN] x3 + conv  (GDN fused into conv epilogue) ----
    h = x
    for li in range(3):
        h = conv2d_nhwc(h, params['ga'][li], stride=2,
                        fuse_gdn=True, inverse=False)
    # |y| and round(y) emitted directly from the GEMM epilogue; raw y is not
    # needed on the eval path.
    abs_y, y_hat = conv2d_nhwc(h, params['ga'][3], stride=2,
                               emit_abs_round=True)

    # ---- h_a(|y|) ----
    t = conv2d_nhwc(abs_y, params['ha'][0], stride=1, relu=True)
    t = conv2d_nhwc(t, params['ha'][1], stride=2, relu=True)
    z = conv2d_nhwc(t, params['ha'][2], stride=2)

    # ---- entropy bottleneck ----
    z_hat, z_like, z_prob = entropy_bottleneck_forward(
        z, params['eb_logits'], extrema, training)

    # ---- h_s ----
    s = deconv2d_nhwc(z_hat, params['hs'][0], relu=True)
    s = deconv2d_nhwc(s, params['hs'][1], relu=True)
    scales_hat = conv2d_nhwc(s, params['hs'][2], stride=1, relu=True)

    # ---- gaussian conditional (eval path -> round quantization) ----
    y_like = gaussian_likelihood_pallas(y_hat, scales_hat)

    # ---- g_s : [deconv + IGDN] x3 + deconv  (IGDN fused into the epilogue) --
    u = y_hat
    for li in range(3):
        u = deconv2d_nhwc(u, params['gs'][li], fuse_gdn=True, inverse=True)
    x_hat = deconv2d_nhwc(u, params['gs'][3])

    to_nchw = lambda a: jnp.transpose(a, (0, 3, 1, 2))
    return {
        'x_hat': to_nchw(x_hat),
        'likelihoods': {'y': to_nchw(y_like), 'z': to_nchw(z_like)},
        'probability': z_prob,
    }


# --------------------------------------------------------------------------
if __name__ == "__main__":
    N, M, EXTREMA = 8, 12, 30
    key = jax.random.PRNGKey(0)
    pkey, xkey = jax.random.split(key)
    raw = init_raw_params(pkey, N, M, EXTREMA)
    params = pack_params(raw)          # one-time weight packing

    # Input must be divisible by 64 (g_a downsamples x16, h_a a further x4).
    x = jax.random.uniform(xkey, (2, 3, 64, 64), jnp.float32)

    fwd = jax.jit(lambda xx: icme_forward(params, xx, EXTREMA, training=False))
    out = fwd(x)
    out = jax.tree_util.tree_map(jax.block_until_ready, out)

    assert out['x_hat'].shape == (2, 3, 64, 64)
    assert out['likelihoods']['y'].shape == (2, M, 4, 4)
    assert out['likelihoods']['z'].shape == (2, N, 1, 1)
    assert out['probability'].shape == (N, 2 * EXTREMA + 1)
    assert bool(jnp.all(jnp.isfinite(out['x_hat'])))
    assert bool(jnp.all(out['likelihoods']['y'] > 0))
    print("KERNEL_OK")
</pallas_src>

<mosaic_0001>
module attributes {stable_mosaic.version = 11 : i64} {
  func.func @_mm_bias_gdn_kernel(%arg0: i32, %arg1: i32, %arg2: i32, %arg3: memref<1024x128xbf16, #tpu.memory_space<vmem>>, %arg4: memref<128x128xbf16, #tpu.memory_space<vmem>>, %arg5: memref<1x128xf32, #tpu.memory_space<vmem>>, %arg6: memref<128x128xf32, #tpu.memory_space<vmem>>, %arg7: memref<1x128xf32, #tpu.memory_space<vmem>>, %arg8: memref<1024x128xf32, #tpu.memory_space<vmem>>) attributes {dimension_semantics = [#tpu.dimension_semantics<parallel>, #tpu.dimension_semantics<parallel>, #tpu.dimension_semantics<arbitrary>], iteration_bounds = array<i64: 2, 1, 1>, scalar_prefetch = 0 : i64, scratch_operands = 0 : i64, tpu.core_type = #tpu.core_type<tc>, window_params = [{transform_indices = @transform_0, window_bounds = array<i64: 1024, 128>}, {transform_indices = @transform_1, window_bounds = array<i64: 128, 128>}, {transform_indices = @transform_2, window_bounds = array<i64: 1, 128>}, {pipeline_mode = #tpu.pipeline_mode<synchronous>, transform_indices = @transform_3, window_bounds = array<i64: 128, 128>}, {pipeline_mode = #tpu.pipeline_mode<synchronous>, transform_indices = @transform_4, window_bounds = array<i64: 1, 128>}, {transform_indices = @transform_5, window_bounds = array<i64: 1024, 128>}]} {
    %c0 = arith.constant 0 : index
    %c0_0 = arith.constant 0 : index
    %0 = vector.load %arg3[%c0, %c0_0] : memref<1024x128xbf16, #tpu.memory_space<vmem>>, vector<1024x128xbf16>
    %c0_1 = arith.constant 0 : index
    %c0_2 = arith.constant 0 : index
    %1 = vector.load %arg4[%c0_1, %c0_2] : memref<128x128xbf16, #tpu.memory_space<vmem>>, vector<128x128xbf16>
    %cst = arith.constant dense<0.000000e+00> : vector<1024x128xf32>
    %2 = tpu.matmul %0, %1, %cst {dimension_numbers = #tpu.dot_dimension_numbers<[1], [0], [0], [1], [0, 0, 1, 1], [], []>} : vector<1024x128xbf16>, vector<128x128xbf16>, vector<1024x128xf32> -> vector<1024x128xf32>
    %c0_i32 = arith.constant 0 : i32
    %3 = arith.cmpi eq, %arg2, %c0_i32 : i32
    %4 = arith.extui %3 : i1 to i32
    %c0_i32_3 = arith.constant 0 : i32
    %5 = arith.cmpi ne, %4, %c0_i32_3 : i32
    scf.if %5 {
      %c0_8 = arith.constant 0 : index
      %c0_9 = arith.constant 0 : index
      %12 = vector.load %arg8[%c0_8, %c0_9] : memref<1024x128xf32, #tpu.memory_space<vmem>>, vector<1024x128xf32>
      tpu.vector_store %arg8[%c0_8, %c0_9], %2 {strides = array<i32>} : memref<1024x128xf32, #tpu.memory_space<vmem>>, vector<1024x128xf32>,
    } else {
    }
    %c0_i32_4 = arith.constant 0 : i32
    %6 = arith.cmpi sgt, %arg2, %c0_i32_4 : i32
    %7 = arith.extui %6 : i1 to i32
    %c0_i32_5 = arith.constant 0 : i32
    %8 = arith.cmpi ne, %7, %c0_i32_5 : i32
    scf.if %8 {
      %c0_8 = arith.constant 0 : index
      %c0_9 = arith.constant 0 : index
      %12 = vector.load %arg8[%c0_8, %c0_9] : memref<1024x128xf32, #tpu.memory_space<vmem>>, vector<1024x128xf32>
      %13 = arith.addf %12, %2 : vector<1024x128xf32>
      %c0_10 = arith.constant 0 : index
      %c0_11 = arith.constant 0 : index
      %14 = vector.load %arg8[%c0_10, %c0_11] : memref<1024x128xf32, #tpu.memory_space<vmem>>, vector<1024x128xf32>
      tpu.vector_store %arg8[%c0_10, %c0_11], %13 {strides = array<i32>} : memref<1024x128xf32, #tpu.memory_space<vmem>>, vector<1024x128xf32>,
    } else {
    }
    %c0_i32_6 = arith.constant 0 : i32
    %9 = arith.cmpi eq, %arg2, %c0_i32_6 : i32
    %10 = arith.extui %9 : i1 to i32
    %c0_i32_7 = arith.constant 0 : i32
    %11 = arith.cmpi ne, %10, %c0_i32_7 : i32
    scf.if %11 {
      %c0_8 = arith.constant 0 : index
      %c0_9 = arith.constant 0 : index
      %12 = vector.load %arg8[%c0_8, %c0_9] : memref<1024x128xf32, #tpu.memory_space<vmem>>, vector<1024x128xf32>
      %c0_10 = arith.constant 0 : index
      %c0_11 = arith.constant 0 : index
      %13 = vector.load %arg5[%c0_10, %c0_11] : memref<1x128xf32, #tpu.memory_space<vmem>>, vector<1x128xf32>
      %14 = vector.broadcast %13 : vector<1x128xf32> to vector<1024x128xf32>
      %15 = arith.addf %12, %14 : vector<1024x128xf32>
      %16 = arith.mulf %15, %15 : vector<1024x128xf32>
      %c0_12 = arith.constant 0 : index
      %c0_13 = arith.constant 0 : index
      %17 = vector.load %arg6[%c0_12, %c0_13] : memref<128x128xf32, #tpu.memory_space<vmem>>, vector<128x128xf32>
      %cst_14 = arith.constant dense<0.000000e+00> : vector<1024x128xf32>
      %18 = tpu.matmul %16, %17, %cst_14 {dimension_numbers = #tpu.dot_dimension_numbers<[1], [0], [0], [1], [0, 0, 1, 1], [], []>} : vector<1024x128xf32>, vector<128x128xf32>, vector<1024x128xf32> -> vector<1024x128xf32>
      %c0_15 = arith.constant 0 : index
      %c0_16 = arith.constant 0 : index
      %19 = vector.load %arg7[%c0_15, %c0_16] : memref<1x128xf32, #tpu.memory_space<vmem>>, vector<1x128xf32>
      %20 = vector.broadcast %19 : vector<1x128xf32> to vector<1024x128xf32>
      %21 = arith.addf %18, %20 : vector<1024x128xf32>
      %22 = math.rsqrt %21 : vector<1024x128xf32>
      %23 = arith.mulf %15, %22 : vector<1024x128xf32>
      %c0_17 = arith.constant 0 : index
      %c0_18 = arith.constant 0 : index
      %24 = vector.load %arg8[%c0_17, %c0_18] : memref<1024x128xf32, #tpu.memory_space<vmem>>, vector<1024x128xf32>
      tpu.vector_store %arg8[%c0_17, %c0_18], %23 {strides = array<i32>} : memref<1024x128xf32, #tpu.memory_space<vmem>>, vector<1024x128xf32>,
    } else {
    }
    return
  }
  func.func @transform_0(%arg0: i32, %arg1: i32, %arg2: i32) -> (i32, i32) {
    %c0_i32 = arith.constant 0 : i32
    return %arg0, %arg2 : i32, i32
  }
  func.func @transform_1(%arg0: i32, %arg1: i32, %arg2: i32) -> (i32, i32) {
    %c0_i32 = arith.constant 0 : i32
    return %arg2, %arg1 : i32, i32
  }
  func.func @transform_2(%arg0: i32, %arg1: i32, %arg2: i32) -> (i32, i32) {
    %c0_i32 = arith.constant 0 : i32
    %c0_i32_0 = arith.constant 0 : i32
    return %c0_i32, %arg1 : i32, i32
  }
  func.func @transform_3(%arg0: i32, %arg1: i32, %arg2: i32) -> (i32, i32) {
    %c0_i32 = arith.constant 0 : i32
    %c0_i32_0 = arith.constant 0 : i32
    %c0_i32_1 = arith.constant 0 : i32
    return %c0_i32, %c0_i32_0 : i32, i32
  }
  func.func @transform_4(%arg0: i32, %arg1: i32, %arg2: i32) -> (i32, i32) {
    %c0_i32 = arith.constant 0 : i32
    %c0_i32_0 = arith.constant 0 : i32
    %c0_i32_1 = arith.constant 0 : i32
    return %c0_i32, %c0_i32_0 : i32, i32
  }
  func.func @transform_5(%arg0: i32, %arg1: i32, %arg2: i32) -> (i32, i32) {
    %c0_i32 = arith.constant 0 : i32
    return %arg0, %arg1 : i32, i32
  }
}

module attributes {stable_mosaic.version = 11 : i64} {
  func.func @_mm_bias_gdn_kernel(%arg0: i32, %arg1: i32, %arg2: i32, %arg3: memref<256x256xbf16, #tpu.memory_space<vmem>>, %arg4: memref<256x128xbf16, #tpu.memory_space<vmem>>, %arg5: memref<1x128xf32, #tpu.memory_space<vmem>>, %arg6: memref<128x128xf32, #tpu.memory_space<vmem>>, %arg7: memref<1x128xf32, #tpu.memory_space<vmem>>, %arg8: memref<256x128xf32, #tpu.memory_space<vmem>>) attributes {dimension_semantics = [#tpu.dimension_semantics<parallel>, #tpu.dimension_semantics<parallel>, #tpu.dimension_semantics<arbitrary>], iteration_bounds = array<i64: 2, 1, 1>, scalar_prefetch = 0 : i64, scratch_operands = 0 : i64, tpu.core_type = #tpu.core_type<tc>, window_params = [{transform_indices = @transform_0, window_bounds = array<i64: 256, 256>}, {transform_indices = @transform_1, window_bounds = array<i64: 256, 128>}, {transform_indices = @transform_2, window_bounds = array<i64: 1, 128>}, {pipeline_mode = #tpu.pipeline_mode<synchronous>, transform_indices = @transform_3, window_bounds = array<i64: 128, 128>}, {pipeline_mode = #tpu.pipeline_mode<synchronous>, transform_indices = @transform_4, window_bounds = array<i64: 1, 128>}, {transform_indices = @transform_5, window_bounds = array<i64: 256, 128>}]} {
    %c0 = arith.constant 0 : index
    %c0_0 = arith.constant 0 : index
    %0 = vector.load %arg3[%c0, %c0_0] : memref<256x256xbf16, #tpu.memory_space<vmem>>, vector<256x256xbf16>
    %c0_1 = arith.constant 0 : index
    %c0_2 = arith.constant 0 : index
    %1 = vector.load %arg4[%c0_1, %c0_2] : memref<256x128xbf16, #tpu.memory_space<vmem>>, vector<256x128xbf16>
    %cst = arith.constant dense<0.000000e+00> : vector<256x128xf32>
    %2 = tpu.matmul %0, %1, %cst {dimension_numbers = #tpu.dot_dimension_numbers<[1], [0], [0], [1], [0, 0, 1, 1], [], []>} : vector<256x256xbf16>, vector<256x128xbf16>, vector<256x128xf32> -> vector<256x128xf32>
    %c0_i32 = arith.constant 0 : i32
    %3 = arith.cmpi eq, %arg2, %c0_i32 : i32
    %4 = arith.extui %3 : i1 to i32
    %c0_i32_3 = arith.constant 0 : i32
    %5 = arith.cmpi ne, %4, %c0_i32_3 : i32
    scf.if %5 {
      %c0_8 = arith.constant 0 : index
      %c0_9 = arith.constant 0 : index
      %12 = vector.load %arg8[%c0_8, %c0_9] : memref<256x128xf32, #tpu.memory_space<vmem>>, vector<256x128xf32>
      tpu.vector_store %arg8[%c0_8, %c0_9], %2 {strides = array<i32>} : memref<256x128xf32, #tpu.memory_space<vmem>>, vector<256x128xf32>,
    } else {
    }
    %c0_i32_4 = arith.constant 0 : i32
    %6 = arith.cmpi sgt, %arg2, %c0_i32_4 : i32
    %7 = arith.extui %6 : i1 to i32
    %c0_i32_5 = arith.constant 0 : i32
    %8 = arith.cmpi ne, %7, %c0_i32_5 : i32
    scf.if %8 {
      %c0_8 = arith.constant 0 : index
      %c0_9 = arith.constant 0 : index
      %12 = vector.load %arg8[%c0_8, %c0_9] : memref<256x128xf32, #tpu.memory_space<vmem>>, vector<256x128xf32>
      %13 = arith.addf %12, %2 : vector<256x128xf32>
      %c0_10 = arith.constant 0 : index
      %c0_11 = arith.constant 0 : index
      %14 = vector.load %arg8[%c0_10, %c0_11] : memref<256x128xf32, #tpu.memory_space<vmem>>, vector<256x128xf32>
      tpu.vector_store %arg8[%c0_10, %c0_11], %13 {strides = array<i32>} : memref<256x128xf32, #tpu.memory_space<vmem>>, vector<256x128xf32>,
    } else {
    }
    %c0_i32_6 = arith.constant 0 : i32
    %9 = arith.cmpi eq, %arg2, %c0_i32_6 : i32
    %10 = arith.extui %9 : i1 to i32
    %c0_i32_7 = arith.constant 0 : i32
    %11 = arith.cmpi ne, %10, %c0_i32_7 : i32
    scf.if %11 {
      %c0_8 = arith.constant 0 : index
      %c0_9 = arith.constant 0 : index
      %12 = vector.load %arg8[%c0_8, %c0_9] : memref<256x128xf32, #tpu.memory_space<vmem>>, vector<256x128xf32>
      %c0_10 = arith.constant 0 : index
      %c0_11 = arith.constant 0 : index
      %13 = vector.load %arg5[%c0_10, %c0_11] : memref<1x128xf32, #tpu.memory_space<vmem>>, vector<1x128xf32>
      %14 = vector.broadcast %13 : vector<1x128xf32> to vector<256x128xf32>
      %15 = arith.addf %12, %14 : vector<256x128xf32>
      %16 = arith.mulf %15, %15 : vector<256x128xf32>
      %c0_12 = arith.constant 0 : index
      %c0_13 = arith.constant 0 : index
      %17 = vector.load %arg6[%c0_12, %c0_13] : memref<128x128xf32, #tpu.memory_space<vmem>>, vector<128x128xf32>
      %cst_14 = arith.constant dense<0.000000e+00> : vector<256x128xf32>
      %18 = tpu.matmul %16, %17, %cst_14 {dimension_numbers = #tpu.dot_dimension_numbers<[1], [0], [0], [1], [0, 0, 1, 1], [], []>} : vector<256x128xf32>, vector<128x128xf32>, vector<256x128xf32> -> vector<256x128xf32>
      %c0_15 = arith.constant 0 : index
      %c0_16 = arith.constant 0 : index
      %19 = vector.load %arg7[%c0_15, %c0_16] : memref<1x128xf32, #tpu.memory_space<vmem>>, vector<1x128xf32>
      %20 = vector.broadcast %19 : vector<1x128xf32> to vector<256x128xf32>
      %21 = arith.addf %18, %20 : vector<256x128xf32>
      %22 = math.rsqrt %21 : vector<256x128xf32>
      %23 = arith.mulf %15, %22 : vector<256x128xf32>
      %c0_17 = arith.constant 0 : index
      %c0_18 = arith.constant 0 : index
      %24 = vector.load %arg8[%c0_17, %c0_18] : memref<256x128xf32, #tpu.memory_space<vmem>>, vector<256x128xf32>
      tpu.vector_store %arg8[%c0_17, %c0_18], %23 {strides = array<i32>} : memref<256x128xf32, #tpu.memory_space<vmem>>, vector<256x128xf32>,
    } else {
    }
    return
  }
  func.func @transform_0(%arg0: i32, %arg1: i32, %arg2: i32) -> (i32, i32) {
    %c0_i32 = arith.constant 0 : i32
    return %arg0, %arg2 : i32, i32
  }
  func.func @transform_1(%arg0: i32, %arg1: i32, %arg2: i32) -> (i32, i32) {
    %c0_i32 = arith.constant 0 : i32
    return %arg2, %arg1 : i32, i32
  }
  func.func @transform_2(%arg0: i32, %arg1: i32, %arg2: i32) -> (i32, i32) {
    %c0_i32 = arith.constant 0 : i32
    %c0_i32_0 = arith.constant 0 : i32
    return %c0_i32, %arg1 : i32, i32
  }
  func.func @transform_3(%arg0: i32, %arg1: i32, %arg2: i32) -> (i32, i32) {
    %c0_i32 = arith.constant 0 : i32
    %c0_i32_0 = arith.constant 0 : i32
    %c0_i32_1 = arith.constant 0 : i32
    return %c0_i32, %c0_i32_0 : i32, i32
  }
  func.func @transform_4(%arg0: i32, %arg1: i32, %arg2: i32) -> (i32, i32) {
    %c0_i32 = arith.constant 0 : i32
    %c0_i32_0 = arith.constant 0 : i32
    %c0_i32_1 = arith.constant 0 : i32
    return %c0_i32, %c0_i32_0 : i32, i32
  }
  func.func @transform_5(%arg0: i32, %arg1: i32, %arg2: i32) -> (i32, i32) {
    %c0_i32 = arith.constant 0 : i32
    return %arg0, %arg1 : i32, i32
  }
}

module attributes {stable_mosaic.version = 11 : i64} {
  func.func @_mm_bias_gdn_kernel(%arg0: i32, %arg1: i32, %arg2: i32, %arg3: memref<64x256xbf16, #tpu.memory_space<vmem>>, %arg4: memref<256x128xbf16, #tpu.memory_space<vmem>>, %arg5: memref<1x128xf32, #tpu.memory_space<vmem>>, %arg6: memref<128x128xf32, #tpu.memory_space<vmem>>, %arg7: memref<1x128xf32, #tpu.memory_space<vmem>>, %arg8: memref<64x128xf32, #tpu.memory_space<vmem>>) attributes {dimension_semantics = [#tpu.dimension_semantics<parallel>, #tpu.dimension_semantics<parallel>, #tpu.dimension_semantics<arbitrary>], iteration_bounds = array<i64: 2, 1, 1>, scalar_prefetch = 0 : i64, scratch_operands = 0 : i64, tpu.core_type = #tpu.core_type<tc>, window_params = [{transform_indices = @transform_0, window_bounds = array<i64: 64, 256>}, {transform_indices = @transform_1, window_bounds = array<i64: 256, 128>}, {transform_indices = @transform_2, window_bounds = array<i64: 1, 128>}, {pipeline_mode = #tpu.pipeline_mode<synchronous>, transform_indices = @transform_3, window_bounds = array<i64: 128, 128>}, {pipeline_mode = #tpu.pipeline_mode<synchronous>, transform_indices = @transform_4, window_bounds = array<i64: 1, 128>}, {transform_indices = @transform_5, window_bounds = array<i64: 64, 128>}]} {
    %c0 = arith.constant 0 : index
    %c0_0 = arith.constant 0 : index
    %0 = vector.load %arg3[%c0, %c0_0] : memref<64x256xbf16, #tpu.memory_space<vmem>>, vector<64x256xbf16>
    %c0_1 = arith.constant 0 : index
    %c0_2 = arith.constant 0 : index
    %1 = vector.load %arg4[%c0_1, %c0_2] : memref<256x128xbf16, #tpu.memory_space<vmem>>, vector<256x128xbf16>
    %cst = arith.constant dense<0.000000e+00> : vector<64x128xf32>
    %2 = tpu.matmul %0, %1, %cst {dimension_numbers = #tpu.dot_dimension_numbers<[1], [0], [0], [1], [0, 0, 1, 1], [], []>} : vector<64x256xbf16>, vector<256x128xbf16>, vector<64x128xf32> -> vector<64x128xf32>
    %c0_i32 = arith.constant 0 : i32
    %3 = arith.cmpi eq, %arg2, %c0_i32 : i32
    %4 = arith.extui %3 : i1 to i32
    %c0_i32_3 = arith.constant 0 : i32
    %5 = arith.cmpi ne, %4, %c0_i32_3 : i32
    scf.if %5 {
      %c0_8 = arith.constant 0 : index
      %c0_9 = arith.constant 0 : index
      %12 = vector.load %arg8[%c0_8, %c0_9] : memref<64x128xf32, #tpu.memory_space<vmem>>, vector<64x128xf32>
      tpu.vector_store %arg8[%c0_8, %c0_9], %2 {strides = array<i32>} : memref<64x128xf32, #tpu.memory_space<vmem>>, vector<64x128xf32>,
    } else {
    }
    %c0_i32_4 = arith.constant 0 : i32
    %6 = arith.cmpi sgt, %arg2, %c0_i32_4 : i32
    %7 = arith.extui %6 : i1 to i32
    %c0_i32_5 = arith.constant 0 : i32
    %8 = arith.cmpi ne, %7, %c0_i32_5 : i32
    scf.if %8 {
      %c0_8 = arith.constant 0 : index
      %c0_9 = arith.constant 0 : index
      %12 = vector.load %arg8[%c0_8, %c0_9] : memref<64x128xf32, #tpu.memory_space<vmem>>, vector<64x128xf32>
      %13 = arith.addf %12, %2 : vector<64x128xf32>
      %c0_10 = arith.constant 0 : index
      %c0_11 = arith.constant 0 : index
      %14 = vector.load %arg8[%c0_10, %c0_11] : memref<64x128xf32, #tpu.memory_space<vmem>>, vector<64x128xf32>
      tpu.vector_store %arg8[%c0_10, %c0_11], %13 {strides = array<i32>} : memref<64x128xf32, #tpu.memory_space<vmem>>, vector<64x128xf32>,
    } else {
    }
    %c0_i32_6 = arith.constant 0 : i32
    %9 = arith.cmpi eq, %arg2, %c0_i32_6 : i32
    %10 = arith.extui %9 : i1 to i32
    %c0_i32_7 = arith.constant 0 : i32
    %11 = arith.cmpi ne, %10, %c0_i32_7 : i32
    scf.if %11 {
      %c0_8 = arith.constant 0 : index
      %c0_9 = arith.constant 0 : index
      %12 = vector.load %arg8[%c0_8, %c0_9] : memref<64x128xf32, #tpu.memory_space<vmem>>, vector<64x128xf32>
      %c0_10 = arith.constant 0 : index
      %c0_11 = arith.constant 0 : index
      %13 = vector.load %arg5[%c0_10, %c0_11] : memref<1x128xf32, #tpu.memory_space<vmem>>, vector<1x128xf32>
      %14 = vector.broadcast %13 : vector<1x128xf32> to vector<64x128xf32>
      %15 = arith.addf %12, %14 : vector<64x128xf32>
      %16 = arith.mulf %15, %15 : vector<64x128xf32>
      %c0_12 = arith.constant 0 : index
      %c0_13 = arith.constant 0 : index
      %17 = vector.load %arg6[%c0_12, %c0_13] : memref<128x128xf32, #tpu.memory_space<vmem>>, vector<128x128xf32>
      %cst_14 = arith.constant dense<0.000000e+00> : vector<64x128xf32>
      %18 = tpu.matmul %16, %17, %cst_14 {dimension_numbers = #tpu.dot_dimension_numbers<[1], [0], [0], [1], [0, 0, 1, 1], [], []>} : vector<64x128xf32>, vector<128x128xf32>, vector<64x128xf32> -> vector<64x128xf32>
      %c0_15 = arith.constant 0 : index
      %c0_16 = arith.constant 0 : index
      %19 = vector.load %arg7[%c0_15, %c0_16] : memref<1x128xf32, #tpu.memory_space<vmem>>, vector<1x128xf32>
      %20 = vector.broadcast %19 : vector<1x128xf32> to vector<64x128xf32>
      %21 = arith.addf %18, %20 : vector<64x128xf32>
      %22 = math.rsqrt %21 : vector<64x128xf32>
      %23 = arith.mulf %15, %22 : vector<64x128xf32>
      %c0_17 = arith.constant 0 : index
      %c0_18 = arith.constant 0 : index
      %24 = vector.load %arg8[%c0_17, %c0_18] : memref<64x128xf32, #tpu.memory_space<vmem>>, vector<64x128xf32>
      tpu.vector_store %arg8[%c0_17, %c0_18], %23 {strides = array<i32>} : memref<64x128xf32, #tpu.memory_space<vmem>>, vector<64x128xf32>,
    } else {
    }
    return
  }
  func.func @transform_0(%arg0: i32, %arg1: i32, %arg2: i32) -> (i32, i32) {
    %c0_i32 = arith.constant 0 : i32
    return %arg0, %arg2 : i32, i32
  }
  func.func @transform_1(%arg0: i32, %arg1: i32, %arg2: i32) -> (i32, i32) {
    %c0_i32 = arith.constant 0 : i32
    return %arg2, %arg1 : i32, i32
  }
  func.func @transform_2(%arg0: i32, %arg1: i32, %arg2: i32) -> (i32, i32) {
    %c0_i32 = arith.constant 0 : i32
    %c0_i32_0 = arith.constant 0 : i32
    return %c0_i32, %arg1 : i32, i32
  }
  func.func @transform_3(%arg0: i32, %arg1: i32, %arg2: i32) -> (i32, i32) {
    %c0_i32 = arith.constant 0 : i32
    %c0_i32_0 = arith.constant 0 : i32
    %c0_i32_1 = arith.constant 0 : i32
    return %c0_i32, %c0_i32_0 : i32, i32
  }
  func.func @transform_4(%arg0: i32, %arg1: i32, %arg2: i32) -> (i32, i32) {
    %c0_i32 = arith.constant 0 : i32
    %c0_i32_0 = arith.constant 0 : i32
    %c0_i32_1 = arith.constant 0 : i32
    return %c0_i32, %c0_i32_0 : i32, i32
  }
  func.func @transform_5(%arg0: i32, %arg1: i32, %arg2: i32) -> (i32, i32) {
    %c0_i32 = arith.constant 0 : i32
    return %arg0, %arg1 : i32, i32
  }
}

module attributes {stable_mosaic.version = 11 : i64} {
  func.func @_mm_bias_absround_kernel(%arg0: i32, %arg1: i32, %arg2: i32, %arg3: memref<16x256xbf16, #tpu.memory_space<vmem>>, %arg4: memref<256x128xbf16, #tpu.memory_space<vmem>>, %arg5: memref<1x128xf32, #tpu.memory_space<vmem>>, %arg6: memref<16x128xf32, #tpu.memory_space<vmem>>, %arg7: memref<16x128xf32, #tpu.memory_space<vmem>>) attributes {dimension_semantics = [#tpu.dimension_semantics<parallel>, #tpu.dimension_semantics<parallel>, #tpu.dimension_semantics<arbitrary>], iteration_bounds = array<i64: 2, 1, 1>, scalar_prefetch = 0 : i64, scratch_operands = 0 : i64, tpu.core_type = #tpu.core_type<tc>, window_params = [{transform_indices = @transform_0, window_bounds = array<i64: 16, 256>}, {transform_indices = @transform_1, window_bounds = array<i64: 256, 128>}, {transform_indices = @transform_2, window_bounds = array<i64: 1, 128>}, {transform_indices = @transform_3, window_bounds = array<i64: 16, 128>}, {transform_indices = @transform_4, window_bounds = array<i64: 16, 128>}]} {
    %c0 = arith.constant 0 : index
    %c0_0 = arith.constant 0 : index
    %0 = vector.load %arg3[%c0, %c0_0] : memref<16x256xbf16, #tpu.memory_space<vmem>>, vector<16x256xbf16>
    %c0_1 = arith.constant 0 : index
    %c0_2 = arith.constant 0 : index
    %1 = vector.load %arg4[%c0_1, %c0_2] : memref<256x128xbf16, #tpu.memory_space<vmem>>, vector<256x128xbf16>
    %cst = arith.constant dense<0.000000e+00> : vector<16x128xf32>
    %2 = tpu.matmul %0, %1, %cst {dimension_numbers = #tpu.dot_dimension_numbers<[1], [0], [0], [1], [0, 0, 1, 1], [], []>} : vector<16x256xbf16>, vector<256x128xbf16>, vector<16x128xf32> -> vector<16x128xf32>
    %c0_i32 = arith.constant 0 : i32
    %3 = arith.cmpi eq, %arg2, %c0_i32 : i32
    %4 = arith.extui %3 : i1 to i32
    %c0_i32_3 = arith.constant 0 : i32
    %5 = arith.cmpi ne, %4, %c0_i32_3 : i32
    scf.if %5 {
      %c0_8 = arith.constant 0 : index
      %c0_9 = arith.constant 0 : index
      %12 = vector.load %arg7[%c0_8, %c0_9] : memref<16x128xf32, #tpu.memory_space<vmem>>, vector<16x128xf32>
      tpu.vector_store %arg7[%c0_8, %c0_9], %2 {strides = array<i32>} : memref<16x128xf32, #tpu.memory_space<vmem>>, vector<16x128xf32>,
    } else {
    }
    %c0_i32_4 = arith.constant 0 : i32
    %6 = arith.cmpi sgt, %arg2, %c0_i32_4 : i32
    %7 = arith.extui %6 : i1 to i32
    %c0_i32_5 = arith.constant 0 : i32
    %8 = arith.cmpi ne, %7, %c0_i32_5 : i32
    scf.if %8 {
      %c0_8 = arith.constant 0 : index
      %c0_9 = arith.constant 0 : index
      %12 = vector.load %arg7[%c0_8, %c0_9] : memref<16x128xf32, #tpu.memory_space<vmem>>, vector<16x128xf32>
      %13 = arith.addf %12, %2 : vector<16x128xf32>
      %c0_10 = arith.constant 0 : index
      %c0_11 = arith.constant 0 : index
      %14 = vector.load %arg7[%c0_10, %c0_11] : memref<16x128xf32, #tpu.memory_space<vmem>>, vector<16x128xf32>
      tpu.vector_store %arg7[%c0_10, %c0_11], %13 {strides = array<i32>} : memref<16x128xf32, #tpu.memory_space<vmem>>, vector<16x128xf32>,
    } else {
    }
    %c0_i32_6 = arith.constant 0 : i32
    %9 = arith.cmpi eq, %arg2, %c0_i32_6 : i32
    %10 = arith.extui %9 : i1 to i32
    %c0_i32_7 = arith.constant 0 : i32
    %11 = arith.cmpi ne, %10, %c0_i32_7 : i32
    scf.if %11 {
      %c0_8 = arith.constant 0 : index
      %c0_9 = arith.constant 0 : index
      %12 = vector.load %arg7[%c0_8, %c0_9] : memref<16x128xf32, #tpu.memory_space<vmem>>, vector<16x128xf32>
      %c0_10 = arith.constant 0 : index
      %c0_11 = arith.constant 0 : index
      %13 = vector.load %arg5[%c0_10, %c0_11] : memref<1x128xf32, #tpu.memory_space<vmem>>, vector<1x128xf32>
      %14 = vector.broadcast %13 : vector<1x128xf32> to vector<16x128xf32>
      %15 = arith.addf %12, %14 : vector<16x128xf32>
      %16 = math.absf %15 : vector<16x128xf32>
      %c0_12 = arith.constant 0 : index
      %c0_13 = arith.constant 0 : index
      %17 = vector.load %arg6[%c0_12, %c0_13] : memref<16x128xf32, #tpu.memory_space<vmem>>, vector<16x128xf32>
      tpu.vector_store %arg6[%c0_12, %c0_13], %16 {strides = array<i32>} : memref<16x128xf32, #tpu.memory_space<vmem>>, vector<16x128xf32>,
      %18 = math.roundeven %15 : vector<16x128xf32>
      %c0_14 = arith.constant 0 : index
      %c0_15 = arith.constant 0 : index
      %19 = vector.load %arg7[%c0_14, %c0_15] : memref<16x128xf32, #tpu.memory_space<vmem>>, vector<16x128xf32>
      tpu.vector_store %arg7[%c0_14, %c0_15], %18 {strides = array<i32>} : memref<16x128xf32, #tpu.memory_space<vmem>>, vector<16x128xf32>,
    } else {
    }
    return
  }
  func.func @transform_0(%arg0: i32, %arg1: i32, %arg2: i32) -> (i32, i32) {
    %c0_i32 = arith.constant 0 : i32
    return %arg0, %arg2 : i32, i32
  }
  func.func @transform_1(%arg0: i32, %arg1: i32, %arg2: i32) -> (i32, i32) {
    %c0_i32 = arith.constant 0 : i32
    return %arg2, %arg1 : i32, i32
  }
  func.func @transform_2(%arg0: i32, %arg1: i32, %arg2: i32) -> (i32, i32) {
    %c0_i32 = arith.constant 0 : i32
    %c0_i32_0 = arith.constant 0 : i32
    return %c0_i32, %arg1 : i32, i32
  }
  func.func @transform_3(%arg0: i32, %arg1: i32, %arg2: i32) -> (i32, i32) {
    %c0_i32 = arith.constant 0 : i32
    return %arg0, %arg1 : i32, i32
  }
  func.func @transform_4(%arg0: i32, %arg1: i32, %arg2: i32) -> (i32, i32) {
    %c0_i32 = arith.constant 0 : i32
    return %arg0, %arg1 : i32, i32
  }
}

module attributes {stable_mosaic.version = 11 : i64} {
  func.func @_mm_bias_gdn_kernel(%arg0: i32, %arg1: i32, %arg2: i32, %arg3: memref<16x128xbf16, #tpu.memory_space<vmem>>, %arg4: memref<128x128xbf16, #tpu.memory_space<vmem>>, %arg5: memref<1x128xf32, #tpu.memory_space<vmem>>, %arg6: memref<128x128xf32, #tpu.memory_space<vmem>>, %arg7: memref<1x128xf32, #tpu.memory_space<vmem>>, %arg8: memref<16x128xf32, #tpu.memory_space<vmem>>) attributes {dimension_semantics = [#tpu.dimension_semantics<parallel>, #tpu.dimension_semantics<parallel>, #tpu.dimension_semantics<arbitrary>], iteration_bounds = array<i64: 2, 1, 1>, scalar_prefetch = 0 : i64, scratch_operands = 0 : i64, tpu.core_type = #tpu.core_type<tc>, window_params = [{transform_indices = @transform_0, window_bounds = array<i64: 16, 128>}, {transform_indices = @transform_1, window_bounds = array<i64: 128, 128>}, {transform_indices = @transform_2, window_bounds = array<i64: 1, 128>}, {pipeline_mode = #tpu.pipeline_mode<synchronous>, transform_indices = @transform_3, window_bounds = array<i64: 128, 128>}, {pipeline_mode = #tpu.pipeline_mode<synchronous>, transform_indices = @transform_4, window_bounds = array<i64: 1, 128>}, {transform_indices = @transform_5, window_bounds = array<i64: 16, 128>}]} {
    %c0 = arith.constant 0 : index
    %c0_0 = arith.constant 0 : index
    %0 = vector.load %arg3[%c0, %c0_0] : memref<16x128xbf16, #tpu.memory_space<vmem>>, vector<16x128xbf16>
    %c0_1 = arith.constant 0 : index
    %c0_2 = arith.constant 0 : index
    %1 = vector.load %arg4[%c0_1, %c0_2] : memref<128x128xbf16, #tpu.memory_space<vmem>>, vector<128x128xbf16>
    %cst = arith.constant dense<0.000000e+00> : vector<16x128xf32>
    %2 = tpu.matmul %0, %1, %cst {dimension_numbers = #tpu.dot_dimension_numbers<[1], [0], [0], [1], [0, 0, 1, 1], [], []>} : vector<16x128xbf16>, vector<128x128xbf16>, vector<16x128xf32> -> vector<16x128xf32>
    %c0_i32 = arith.constant 0 : i32
    %3 = arith.cmpi eq, %arg2, %c0_i32 : i32
    %4 = arith.extui %3 : i1 to i32
    %c0_i32_3 = arith.constant 0 : i32
    %5 = arith.cmpi ne, %4, %c0_i32_3 : i32
    scf.if %5 {
      %c0_8 = arith.constant 0 : index
      %c0_9 = arith.constant 0 : index
      %12 = vector.load %arg8[%c0_8, %c0_9] : memref<16x128xf32, #tpu.memory_space<vmem>>, vector<16x128xf32>
      tpu.vector_store %arg8[%c0_8, %c0_9], %2 {strides = array<i32>} : memref<16x128xf32, #tpu.memory_space<vmem>>, vector<16x128xf32>,
    } else {
    }
    %c0_i32_4 = arith.constant 0 : i32
    %6 = arith.cmpi sgt, %arg2, %c0_i32_4 : i32
    %7 = arith.extui %6 : i1 to i32
    %c0_i32_5 = arith.constant 0 : i32
    %8 = arith.cmpi ne, %7, %c0_i32_5 : i32
    scf.if %8 {
      %c0_8 = arith.constant 0 : index
      %c0_9 = arith.constant 0 : index
      %12 = vector.load %arg8[%c0_8, %c0_9] : memref<16x128xf32, #tpu.memory_space<vmem>>, vector<16x128xf32>
      %13 = arith.addf %12, %2 : vector<16x128xf32>
      %c0_10 = arith.constant 0 : index
      %c0_11 = arith.constant 0 : index
      %14 = vector.load %arg8[%c0_10, %c0_11] : memref<16x128xf32, #tpu.memory_space<vmem>>, vector<16x128xf32>
      tpu.vector_store %arg8[%c0_10, %c0_11], %13 {strides = array<i32>} : memref<16x128xf32, #tpu.memory_space<vmem>>, vector<16x128xf32>,
    } else {
    }
    %c0_i32_6 = arith.constant 0 : i32
    %9 = arith.cmpi eq, %arg2, %c0_i32_6 : i32
    %10 = arith.extui %9 : i1 to i32
    %c0_i32_7 = arith.constant 0 : i32
    %11 = arith.cmpi ne, %10, %c0_i32_7 : i32
    scf.if %11 {
      %c0_8 = arith.constant 0 : index
      %c0_9 = arith.constant 0 : index
      %12 = vector.load %arg8[%c0_8, %c0_9] : memref<16x128xf32, #tpu.memory_space<vmem>>, vector<16x128xf32>
      %c0_10 = arith.constant 0 : index
      %c0_11 = arith.constant 0 : index
      %13 = vector.load %arg5[%c0_10, %c0_11] : memref<1x128xf32, #tpu.memory_space<vmem>>, vector<1x128xf32>
      %14 = vector.broadcast %13 : vector<1x128xf32> to vector<16x128xf32>
      %15 = arith.addf %12, %14 : vector<16x128xf32>
      %16 = arith.mulf %15, %15 : vector<16x128xf32>
      %c0_12 = arith.constant 0 : index
      %c0_13 = arith.constant 0 : index
      %17 = vector.load %arg6[%c0_12, %c0_13] : memref<128x128xf32, #tpu.memory_space<vmem>>, vector<128x128xf32>
      %cst_14 = arith.constant dense<0.000000e+00> : vector<16x128xf32>
      %18 = tpu.matmul %16, %17, %cst_14 {dimension_numbers = #tpu.dot_dimension_numbers<[1], [0], [0], [1], [0, 0, 1, 1], [], []>} : vector<16x128xf32>, vector<128x128xf32>, vector<16x128xf32> -> vector<16x128xf32>
      %c0_15 = arith.constant 0 : index
      %c0_16 = arith.constant 0 : index
      %19 = vector.load %arg7[%c0_15, %c0_16] : memref<1x128xf32, #tpu.memory_space<vmem>>, vector<1x128xf32>
      %20 = vector.broadcast %19 : vector<1x128xf32> to vector<16x128xf32>
      %21 = arith.addf %18, %20 : vector<16x128xf32>
      %22 = math.sqrt %21 : vector<16x128xf32>
      %23 = arith.mulf %15, %22 : vector<16x128xf32>
      %c0_17 = arith.constant 0 : index
      %c0_18 = arith.constant 0 : index
      %24 = vector.load %arg8[%c0_17, %c0_18] : memref<16x128xf32, #tpu.memory_space<vmem>>, vector<16x128xf32>
      tpu.vector_store %arg8[%c0_17, %c0_18], %23 {strides = array<i32>} : memref<16x128xf32, #tpu.memory_space<vmem>>, vector<16x128xf32>,
    } else {
    }
    return
  }
  func.func @transform_0(%arg0: i32, %arg1: i32, %arg2: i32) -> (i32, i32) {
    %c0_i32 = arith.constant 0 : i32
    return %arg0, %arg2 : i32, i32
  }
  func.func @transform_1(%arg0: i32, %arg1: i32, %arg2: i32) -> (i32, i32) {
    %c0_i32 = arith.constant 0 : i32
    return %arg2, %arg1 : i32, i32
  }
  func.func @transform_2(%arg0: i32, %arg1: i32, %arg2: i32) -> (i32, i32) {
    %c0_i32 = arith.constant 0 : i32
    %c0_i32_0 = arith.constant 0 : i32
    return %c0_i32, %arg1 : i32, i32
  }
  func.func @transform_3(%arg0: i32, %arg1: i32, %arg2: i32) -> (i32, i32) {
    %c0_i32 = arith.constant 0 : i32
    %c0_i32_0 = arith.constant 0 : i32
    %c0_i32_1 = arith.constant 0 : i32
    return %c0_i32, %c0_i32_0 : i32, i32
  }
  func.func @transform_4(%arg0: i32, %arg1: i32, %arg2: i32) -> (i32, i32) {
    %c0_i32 = arith.constant 0 : i32
    %c0_i32_0 = arith.constant 0 : i32
    %c0_i32_1 = arith.constant 0 : i32
    return %c0_i32, %c0_i32_0 : i32, i32
  }
  func.func @transform_5(%arg0: i32, %arg1: i32, %arg2: i32) -> (i32, i32) {
    %c0_i32 = arith.constant 0 : i32
    return %arg0, %arg1 : i32, i32
  }
}

module attributes {stable_mosaic.version = 11 : i64} {
  func.func @_mm_bias_gdn_kernel(%arg0: i32, %arg1: i32, %arg2: i32, %arg3: memref<64x128xbf16, #tpu.memory_space<vmem>>, %arg4: memref<128x128xbf16, #tpu.memory_space<vmem>>, %arg5: memref<1x128xf32, #tpu.memory_space<vmem>>, %arg6: memref<128x128xf32, #tpu.memory_space<vmem>>, %arg7: memref<1x128xf32, #tpu.memory_space<vmem>>, %arg8: memref<64x128xf32, #tpu.memory_space<vmem>>) attributes {dimension_semantics = [#tpu.dimension_semantics<parallel>, #tpu.dimension_semantics<parallel>, #tpu.dimension_semantics<arbitrary>], iteration_bounds = array<i64: 2, 1, 1>, scalar_prefetch = 0 : i64, scratch_operands = 0 : i64, tpu.core_type = #tpu.core_type<tc>, window_params = [{transform_indices = @transform_0, window_bounds = array<i64: 64, 128>}, {transform_indices = @transform_1, window_bounds = array<i64: 128, 128>}, {transform_indices = @transform_2, window_bounds = array<i64: 1, 128>}, {pipeline_mode = #tpu.pipeline_mode<synchronous>, transform_indices = @transform_3, window_bounds = array<i64: 128, 128>}, {pipeline_mode = #tpu.pipeline_mode<synchronous>, transform_indices = @transform_4, window_bounds = array<i64: 1, 128>}, {transform_indices = @transform_5, window_bounds = array<i64: 64, 128>}]} {
    %c0 = arith.constant 0 : index
    %c0_0 = arith.constant 0 : index
    %0 = vector.load %arg3[%c0, %c0_0] : memref<64x128xbf16, #tpu.memory_space<vmem>>, vector<64x128xbf16>
    %c0_1 = arith.constant 0 : index
    %c0_2 = arith.constant 0 : index
    %1 = vector.load %arg4[%c0_1, %c0_2] : memref<128x128xbf16, #tpu.memory_space<vmem>>, vector<128x128xbf16>
    %cst = arith.constant dense<0.000000e+00> : vector<64x128xf32>
    %2 = tpu.matmul %0, %1, %cst {dimension_numbers = #tpu.dot_dimension_numbers<[1], [0], [0], [1], [0, 0, 1, 1], [], []>} : vector<64x128xbf16>, vector<128x128xbf16>, vector<64x128xf32> -> vector<64x128xf32>
    %c0_i32 = arith.constant 0 : i32
    %3 = arith.cmpi eq, %arg2, %c0_i32 : i32
    %4 = arith.extui %3 : i1 to i32
    %c0_i32_3 = arith.constant 0 : i32
    %5 = arith.cmpi ne, %4, %c0_i32_3 : i32
    scf.if %5 {
      %c0_8 = arith.constant 0 : index
      %c0_9 = arith.constant 0 : index
      %12 = vector.load %arg8[%c0_8, %c0_9] : memref<64x128xf32, #tpu.memory_space<vmem>>, vector<64x128xf32>
      tpu.vector_store %arg8[%c0_8, %c0_9], %2 {strides = array<i32>} : memref<64x128xf32, #tpu.memory_space<vmem>>, vector<64x128xf32>,
    } else {
    }
    %c0_i32_4 = arith.constant 0 : i32
    %6 = arith.cmpi sgt, %arg2, %c0_i32_4 : i32
    %7 = arith.extui %6 : i1 to i32
    %c0_i32_5 = arith.constant 0 : i32
    %8 = arith.cmpi ne, %7, %c0_i32_5 : i32
    scf.if %8 {
      %c0_8 = arith.constant 0 : index
      %c0_9 = arith.constant 0 : index
      %12 = vector.load %arg8[%c0_8, %c0_9] : memref<64x128xf32, #tpu.memory_space<vmem>>, vector<64x128xf32>
      %13 = arith.addf %12, %2 : vector<64x128xf32>
      %c0_10 = arith.constant 0 : index
      %c0_11 = arith.constant 0 : index
      %14 = vector.load %arg8[%c0_10, %c0_11] : memref<64x128xf32, #tpu.memory_space<vmem>>, vector<64x128xf32>
      tpu.vector_store %arg8[%c0_10, %c0_11], %13 {strides = array<i32>} : memref<64x128xf32, #tpu.memory_space<vmem>>, vector<64x128xf32>,
    } else {
    }
    %c0_i32_6 = arith.constant 0 : i32
    %9 = arith.cmpi eq, %arg2, %c0_i32_6 : i32
    %10 = arith.extui %9 : i1 to i32
    %c0_i32_7 = arith.constant 0 : i32
    %11 = arith.cmpi ne, %10, %c0_i32_7 : i32
    scf.if %11 {
      %c0_8 = arith.constant 0 : index
      %c0_9 = arith.constant 0 : index
      %12 = vector.load %arg8[%c0_8, %c0_9] : memref<64x128xf32, #tpu.memory_space<vmem>>, vector<64x128xf32>
      %c0_10 = arith.constant 0 : index
      %c0_11 = arith.constant 0 : index
      %13 = vector.load %arg5[%c0_10, %c0_11] : memref<1x128xf32, #tpu.memory_space<vmem>>, vector<1x128xf32>
      %14 = vector.broadcast %13 : vector<1x128xf32> to vector<64x128xf32>
      %15 = arith.addf %12, %14 : vector<64x128xf32>
      %16 = arith.mulf %15, %15 : vector<64x128xf32>
      %c0_12 = arith.constant 0 : index
      %c0_13 = arith.constant 0 : index
      %17 = vector.load %arg6[%c0_12, %c0_13] : memref<128x128xf32, #tpu.memory_space<vmem>>, vector<128x128xf32>
      %cst_14 = arith.constant dense<0.000000e+00> : vector<64x128xf32>
      %18 = tpu.matmul %16, %17, %cst_14 {dimension_numbers = #tpu.dot_dimension_numbers<[1], [0], [0], [1], [0, 0, 1, 1], [], []>} : vector<64x128xf32>, vector<128x128xf32>, vector<64x128xf32> -> vector<64x128xf32>
      %c0_15 = arith.constant 0 : index
      %c0_16 = arith.constant 0 : index
      %19 = vector.load %arg7[%c0_15, %c0_16] : memref<1x128xf32, #tpu.memory_space<vmem>>, vector<1x128xf32>
      %20 = vector.broadcast %19 : vector<1x128xf32> to vector<64x128xf32>
      %21 = arith.addf %18, %20 : vector<64x128xf32>
      %22 = math.sqrt %21 : vector<64x128xf32>
      %23 = arith.mulf %15, %22 : vector<64x128xf32>
      %c0_17 = arith.constant 0 : index
      %c0_18 = arith.constant 0 : index
      %24 = vector.load %arg8[%c0_17, %c0_18] : memref<64x128xf32, #tpu.memory_space<vmem>>, vector<64x128xf32>
      tpu.vector_store %arg8[%c0_17, %c0_18], %23 {strides = array<i32>} : memref<64x128xf32, #tpu.memory_space<vmem>>, vector<64x128xf32>,
    } else {
    }
    return
  }
  func.func @transform_0(%arg0: i32, %arg1: i32, %arg2: i32) -> (i32, i32) {
    %c0_i32 = arith.constant 0 : i32
    return %arg0, %arg2 : i32, i32
  }
  func.func @transform_1(%arg0: i32, %arg1: i32, %arg2: i32) -> (i32, i32) {
    %c0_i32 = arith.constant 0 : i32
    return %arg2, %arg1 : i32, i32
  }
  func.func @transform_2(%arg0: i32, %arg1: i32, %arg2: i32) -> (i32, i32) {
    %c0_i32 = arith.constant 0 : i32
    %c0_i32_0 = arith.constant 0 : i32
    return %c0_i32, %arg1 : i32, i32
  }
  func.func @transform_3(%arg0: i32, %arg1: i32, %arg2: i32) -> (i32, i32) {
    %c0_i32 = arith.constant 0 : i32
    %c0_i32_0 = arith.constant 0 : i32
    %c0_i32_1 = arith.constant 0 : i32
    return %c0_i32, %c0_i32_0 : i32, i32
  }
  func.func @transform_4(%arg0: i32, %arg1: i32, %arg2: i32) -> (i32, i32) {
    %c0_i32 = arith.constant 0 : i32
    %c0_i32_0 = arith.constant 0 : i32
    %c0_i32_1 = arith.constant 0 : i32
    return %c0_i32, %c0_i32_0 : i32, i32
  }
  func.func @transform_5(%arg0: i32, %arg1: i32, %arg2: i32) -> (i32, i32) {
    %c0_i32 = arith.constant 0 : i32
    return %arg0, %arg1 : i32, i32
  }
}

module attributes {stable_mosaic.version = 11 : i64} {
  func.func @_mm_bias_gdn_kernel(%arg0: i32, %arg1: i32, %arg2: i32, %arg3: memref<256x128xbf16, #tpu.memory_space<vmem>>, %arg4: memref<128x128xbf16, #tpu.memory_space<vmem>>, %arg5: memref<1x128xf32, #tpu.memory_space<vmem>>, %arg6: memref<128x128xf32, #tpu.memory_space<vmem>>, %arg7: memref<1x128xf32, #tpu.memory_space<vmem>>, %arg8: memref<256x128xf32, #tpu.memory_space<vmem>>) attributes {dimension_semantics = [#tpu.dimension_semantics<parallel>, #tpu.dimension_semantics<parallel>, #tpu.dimension_semantics<arbitrary>], iteration_bounds = array<i64: 2, 1, 1>, scalar_prefetch = 0 : i64, scratch_operands = 0 : i64, tpu.core_type = #tpu.core_type<tc>, window_params = [{transform_indices = @transform_0, window_bounds = array<i64: 256, 128>}, {transform_indices = @transform_1, window_bounds = array<i64: 128, 128>}, {transform_indices = @transform_2, window_bounds = array<i64: 1, 128>}, {pipeline_mode = #tpu.pipeline_mode<synchronous>, transform_indices = @transform_3, window_bounds = array<i64: 128, 128>}, {pipeline_mode = #tpu.pipeline_mode<synchronous>, transform_indices = @transform_4, window_bounds = array<i64: 1, 128>}, {transform_indices = @transform_5, window_bounds = array<i64: 256, 128>}]} {
    %c0 = arith.constant 0 : index
    %c0_0 = arith.constant 0 : index
    %0 = vector.load %arg3[%c0, %c0_0] : memref<256x128xbf16, #tpu.memory_space<vmem>>, vector<256x128xbf16>
    %c0_1 = arith.constant 0 : index
    %c0_2 = arith.constant 0 : index
    %1 = vector.load %arg4[%c0_1, %c0_2] : memref<128x128xbf16, #tpu.memory_space<vmem>>, vector<128x128xbf16>
    %cst = arith.constant dense<0.000000e+00> : vector<256x128xf32>
    %2 = tpu.matmul %0, %1, %cst {dimension_numbers = #tpu.dot_dimension_numbers<[1], [0], [0], [1], [0, 0, 1, 1], [], []>} : vector<256x128xbf16>, vector<128x128xbf16>, vector<256x128xf32> -> vector<256x128xf32>
    %c0_i32 = arith.constant 0 : i32
    %3 = arith.cmpi eq, %arg2, %c0_i32 : i32
    %4 = arith.extui %3 : i1 to i32
    %c0_i32_3 = arith.constant 0 : i32
    %5 = arith.cmpi ne, %4, %c0_i32_3 : i32
    scf.if %5 {
      %c0_8 = arith.constant 0 : index
      %c0_9 = arith.constant 0 : index
      %12 = vector.load %arg8[%c0_8, %c0_9] : memref<256x128xf32, #tpu.memory_space<vmem>>, vector<256x128xf32>
      tpu.vector_store %arg8[%c0_8, %c0_9], %2 {strides = array<i32>} : memref<256x128xf32, #tpu.memory_space<vmem>>, vector<256x128xf32>,
    } else {
    }
    %c0_i32_4 = arith.constant 0 : i32
    %6 = arith.cmpi sgt, %arg2, %c0_i32_4 : i32
    %7 = arith.extui %6 : i1 to i32
    %c0_i32_5 = arith.constant 0 : i32
    %8 = arith.cmpi ne, %7, %c0_i32_5 : i32
    scf.if %8 {
      %c0_8 = arith.constant 0 : index
      %c0_9 = arith.constant 0 : index
      %12 = vector.load %arg8[%c0_8, %c0_9] : memref<256x128xf32, #tpu.memory_space<vmem>>, vector<256x128xf32>
      %13 = arith.addf %12, %2 : vector<256x128xf32>
      %c0_10 = arith.constant 0 : index
      %c0_11 = arith.constant 0 : index
      %14 = vector.load %arg8[%c0_10, %c0_11] : memref<256x128xf32, #tpu.memory_space<vmem>>, vector<256x128xf32>
      tpu.vector_store %arg8[%c0_10, %c0_11], %13 {strides = array<i32>} : memref<256x128xf32, #tpu.memory_space<vmem>>, vector<256x128xf32>,
    } else {
    }
    %c0_i32_6 = arith.constant 0 : i32
    %9 = arith.cmpi eq, %arg2, %c0_i32_6 : i32
    %10 = arith.extui %9 : i1 to i32
    %c0_i32_7 = arith.constant 0 : i32
    %11 = arith.cmpi ne, %10, %c0_i32_7 : i32
    scf.if %11 {
      %c0_8 = arith.constant 0 : index
      %c0_9 = arith.constant 0 : index
      %12 = vector.load %arg8[%c0_8, %c0_9] : memref<256x128xf32, #tpu.memory_space<vmem>>, vector<256x128xf32>
      %c0_10 = arith.constant 0 : index
      %c0_11 = arith.constant 0 : index
      %13 = vector.load %arg5[%c0_10, %c0_11] : memref<1x128xf32, #tpu.memory_space<vmem>>, vector<1x128xf32>
      %14 = vector.broadcast %13 : vector<1x128xf32> to vector<256x128xf32>
      %15 = arith.addf %12, %14 : vector<256x128xf32>
      %16 = arith.mulf %15, %15 : vector<256x128xf32>
      %c0_12 = arith.constant 0 : index
      %c0_13 = arith.constant 0 : index
      %17 = vector.load %arg6[%c0_12, %c0_13] : memref<128x128xf32, #tpu.memory_space<vmem>>, vector<128x128xf32>
      %cst_14 = arith.constant dense<0.000000e+00> : vector<256x128xf32>
      %18 = tpu.matmul %16, %17, %cst_14 {dimension_numbers = #tpu.dot_dimension_numbers<[1], [0], [0], [1], [0, 0, 1, 1], [], []>} : vector<256x128xf32>, vector<128x128xf32>, vector<256x128xf32> -> vector<256x128xf32>
      %c0_15 = arith.constant 0 : index
      %c0_16 = arith.constant 0 : index
      %19 = vector.load %arg7[%c0_15, %c0_16] : memref<1x128xf32, #tpu.memory_space<vmem>>, vector<1x128xf32>
      %20 = vector.broadcast %19 : vector<1x128xf32> to vector<256x128xf32>
      %21 = arith.addf %18, %20 : vector<256x128xf32>
      %22 = math.sqrt %21 : vector<256x128xf32>
      %23 = arith.mulf %15, %22 : vector<256x128xf32>
      %c0_17 = arith.constant 0 : index
      %c0_18 = arith.constant 0 : index
      %24 = vector.load %arg8[%c0_17, %c0_18] : memref<256x128xf32, #tpu.memory_space<vmem>>, vector<256x128xf32>
      tpu.vector_store %arg8[%c0_17, %c0_18], %23 {strides = array<i32>} : memref<256x128xf32, #tpu.memory_space<vmem>>, vector<256x128xf32>,
    } else {
    }
    return
  }
  func.func @transform_0(%arg0: i32, %arg1: i32, %arg2: i32) -> (i32, i32) {
    %c0_i32 = arith.constant 0 : i32
    return %arg0, %arg2 : i32, i32
  }
  func.func @transform_1(%arg0: i32, %arg1: i32, %arg2: i32) -> (i32, i32) {
    %c0_i32 = arith.constant 0 : i32
    return %arg2, %arg1 : i32, i32
  }
  func.func @transform_2(%arg0: i32, %arg1: i32, %arg2: i32) -> (i32, i32) {
    %c0_i32 = arith.constant 0 : i32
    %c0_i32_0 = arith.constant 0 : i32
    return %c0_i32, %arg1 : i32, i32
  }
  func.func @transform_3(%arg0: i32, %arg1: i32, %arg2: i32) -> (i32, i32) {
    %c0_i32 = arith.constant 0 : i32
    %c0_i32_0 = arith.constant 0 : i32
    %c0_i32_1 = arith.constant 0 : i32
    return %c0_i32, %c0_i32_0 : i32, i32
  }
  func.func @transform_4(%arg0: i32, %arg1: i32, %arg2: i32) -> (i32, i32) {
    %c0_i32 = arith.constant 0 : i32
    %c0_i32_0 = arith.constant 0 : i32
    %c0_i32_1 = arith.constant 0 : i32
    return %c0_i32, %c0_i32_0 : i32, i32
  }
  func.func @transform_5(%arg0: i32, %arg1: i32, %arg2: i32) -> (i32, i32) {
    %c0_i32 = arith.constant 0 : i32
    return %arg0, %arg1 : i32, i32
  }
}

module attributes {stable_mosaic.version = 11 : i64} {
  func.func @_mm_bias_kernel(%arg0: i32, %arg1: i32, %arg2: i32, %arg3: memref<1024x128xbf16, #tpu.memory_space<vmem>>, %arg4: memref<128x128xbf16, #tpu.memory_space<vmem>>, %arg5: memref<1x128xf32, #tpu.memory_space<vmem>>, %arg6: memref<1024x128xf32, #tpu.memory_space<vmem>>) attributes {dimension_semantics = [#tpu.dimension_semantics<parallel>, #tpu.dimension_semantics<parallel>, #tpu.dimension_semantics<arbitrary>], iteration_bounds = array<i64: 2, 1, 1>, scalar_prefetch = 0 : i64, scratch_operands = 0 : i64, tpu.core_type = #tpu.core_type<tc>, window_params = [{transform_indices = @transform_0, window_bounds = array<i64: 1024, 128>}, {transform_indices = @transform_1, window_bounds = array<i64: 128, 128>}, {transform_indices = @transform_2, window_bounds = array<i64: 1, 128>}, {transform_indices = @transform_3, window_bounds = array<i64: 1024, 128>}]} {
    %c0 = arith.constant 0 : index
    %c0_0 = arith.constant 0 : index
    %0 = vector.load %arg3[%c0, %c0_0] : memref<1024x128xbf16, #tpu.memory_space<vmem>>, vector<1024x128xbf16>
    %c0_1 = arith.constant 0 : index
    %c0_2 = arith.constant 0 : index
    %1 = vector.load %arg4[%c0_1, %c0_2] : memref<128x128xbf16, #tpu.memory_space<vmem>>, vector<128x128xbf16>
    %cst = arith.constant dense<0.000000e+00> : vector<1024x128xf32>
    %2 = tpu.matmul %0, %1, %cst {dimension_numbers = #tpu.dot_dimension_numbers<[1], [0], [0], [1], [0, 0, 1, 1], [], []>} : vector<1024x128xbf16>, vector<128x128xbf16>, vector<1024x128xf32> -> vector<1024x128xf32>
    %c0_i32 = arith.constant 0 : i32
    %3 = arith.cmpi eq, %arg2, %c0_i32 : i32
    %4 = arith.extui %3 : i1 to i32
    %c0_i32_3 = arith.constant 0 : i32
    %5 = arith.cmpi ne, %4, %c0_i32_3 : i32
    scf.if %5 {
      %c0_8 = arith.constant 0 : index
      %c0_9 = arith.constant 0 : index
      %12 = vector.load %arg6[%c0_8, %c0_9] : memref<1024x128xf32, #tpu.memory_space<vmem>>, vector<1024x128xf32>
      tpu.vector_store %arg6[%c0_8, %c0_9], %2 {strides = array<i32>} : memref<1024x128xf32, #tpu.memory_space<vmem>>, vector<1024x128xf32>,
    } else {
    }
    %c0_i32_4 = arith.constant 0 : i32
    %6 = arith.cmpi sgt, %arg2, %c0_i32_4 : i32
    %7 = arith.extui %6 : i1 to i32
    %c0_i32_5 = arith.constant 0 : i32
    %8 = arith.cmpi ne, %7, %c0_i32_5 : i32
    scf.if %8 {
      %c0_8 = arith.constant 0 : index
      %c0_9 = arith.constant 0 : index
      %12 = vector.load %arg6[%c0_8, %c0_9] : memref<1024x128xf32, #tpu.memory_space<vmem>>, vector<1024x128xf32>
      %13 = arith.addf %12, %2 : vector<1024x128xf32>
      %c0_10 = arith.constant 0 : index
      %c0_11 = arith.constant 0 : index
      %14 = vector.load %arg6[%c0_10, %c0_11] : memref<1024x128xf32, #tpu.memory_space<vmem>>, vector<1024x128xf32>
      tpu.vector_store %arg6[%c0_10, %c0_11], %13 {strides = array<i32>} : memref<1024x128xf32, #tpu.memory_space<vmem>>, vector<1024x128xf32>,
    } else {
    }
    %c0_i32_6 = arith.constant 0 : i32
    %9 = arith.cmpi eq, %arg2, %c0_i32_6 : i32
    %10 = arith.extui %9 : i1 to i32
    %c0_i32_7 = arith.constant 0 : i32
    %11 = arith.cmpi ne, %10, %c0_i32_7 : i32
    scf.if %11 {
      %c0_8 = arith.constant 0 : index
      %c0_9 = arith.constant 0 : index
      %12 = vector.load %arg6[%c0_8, %c0_9] : memref<1024x128xf32, #tpu.memory_space<vmem>>, vector<1024x128xf32>
      %c0_10 = arith.constant 0 : index
      %c0_11 = arith.constant 0 : index
      %13 = vector.load %arg5[%c0_10, %c0_11] : memref<1x128xf32, #tpu.memory_space<vmem>>, vector<1x128xf32>
      %14 = vector.broadcast %13 : vector<1x128xf32> to vector<1024x128xf32>
      %15 = arith.addf %12, %14 : vector<1024x128xf32>
      %c0_12 = arith.constant 0 : index
      %c0_13 = arith.constant 0 : index
      %16 = vector.load %arg6[%c0_12, %c0_13] : memref<1024x128xf32, #tpu.memory_space<vmem>>, vector<1024x128xf32>
      tpu.vector_store %arg6[%c0_12, %c0_13], %15 {strides = array<i32>} : memref<1024x128xf32, #tpu.memory_space<vmem>>, vector<1024x128xf32>,
    } else {
    }
    return
  }
  func.func @transform_0(%arg0: i32, %arg1: i32, %arg2: i32) -> (i32, i32) {
    %c0_i32 = arith.constant 0 : i32
    return %arg0, %arg2 : i32, i32
  }
  func.func @transform_1(%arg0: i32, %arg1: i32, %arg2: i32) -> (i32, i32) {
    %c0_i32 = arith.constant 0 : i32
    return %arg2, %arg1 : i32, i32
  }
  func.func @transform_2(%arg0: i32, %arg1: i32, %arg2: i32) -> (i32, i32) {
    %c0_i32 = arith.constant 0 : i32
    %c0_i32_0 = arith.constant 0 : i32
    return %c0_i32, %arg1 : i32, i32
  }
  func.func @transform_3(%arg0: i32, %arg1: i32, %arg2: i32) -> (i32, i32) {
    %c0_i32 = arith.constant 0 : i32
    return %arg0, %arg1 : i32, i32
  }
}

module attributes {stable_mosaic.version = 11 : i64} {
  func.func @_mm_bias_kernel(%arg0: i32, %arg1: i32, %arg2: i32, %arg3: memref<16x128xbf16, #tpu.memory_space<vmem>>, %arg4: memref<128x128xbf16, #tpu.memory_space<vmem>>, %arg5: memref<1x128xf32, #tpu.memory_space<vmem>>, %arg6: memref<16x128xf32, #tpu.memory_space<vmem>>) attributes {dimension_semantics = [#tpu.dimension_semantics<parallel>, #tpu.dimension_semantics<parallel>, #tpu.dimension_semantics<arbitrary>], iteration_bounds = array<i64: 2, 1, 3>, scalar_prefetch = 0 : i64, scratch_operands = 0 : i64, tpu.core_type = #tpu.core_type<tc>, window_params = [{transform_indices = @transform_0, window_bounds = array<i64: 16, 128>}, {transform_indices = @transform_1, window_bounds = array<i64: 128, 128>}, {transform_indices = @transform_2, window_bounds = array<i64: 1, 128>}, {transform_indices = @transform_3, window_bounds = array<i64: 16, 128>}]} {
    %c0 = arith.constant 0 : index
    %c0_0 = arith.constant 0 : index
    %0 = vector.load %arg3[%c0, %c0_0] : memref<16x128xbf16, #tpu.memory_space<vmem>>, vector<16x128xbf16>
    %c0_1 = arith.constant 0 : index
    %c0_2 = arith.constant 0 : index
    %1 = vector.load %arg4[%c0_1, %c0_2] : memref<128x128xbf16, #tpu.memory_space<vmem>>, vector<128x128xbf16>
    %cst = arith.constant dense<0.000000e+00> : vector<16x128xf32>
    %2 = tpu.matmul %0, %1, %cst {dimension_numbers = #tpu.dot_dimension_numbers<[1], [0], [0], [1], [0, 0, 1, 1], [], []>} : vector<16x128xbf16>, vector<128x128xbf16>, vector<16x128xf32> -> vector<16x128xf32>
    %c0_i32 = arith.constant 0 : i32
    %3 = arith.cmpi eq, %arg2, %c0_i32 : i32
    %4 = arith.extui %3 : i1 to i32
    %c0_i32_3 = arith.constant 0 : i32
    %5 = arith.cmpi ne, %4, %c0_i32_3 : i32
    scf.if %5 {
      %c0_7 = arith.constant 0 : index
      %c0_8 = arith.constant 0 : index
      %12 = vector.load %arg6[%c0_7, %c0_8] : memref<16x128xf32, #tpu.memory_space<vmem>>, vector<16x128xf32>
      tpu.vector_store %arg6[%c0_7, %c0_8], %2 {strides = array<i32>} : memref<16x128xf32, #tpu.memory_space<vmem>>, vector<16x128xf32>,
    } else {
    }
    %c0_i32_4 = arith.constant 0 : i32
    %6 = arith.cmpi sgt, %arg2, %c0_i32_4 : i32
    %7 = arith.extui %6 : i1 to i32
    %c0_i32_5 = arith.constant 0 : i32
    %8 = arith.cmpi ne, %7, %c0_i32_5 : i32
    scf.if %8 {
      %c0_7 = arith.constant 0 : index
      %c0_8 = arith.constant 0 : index
      %12 = vector.load %arg6[%c0_7, %c0_8] : memref<16x128xf32, #tpu.memory_space<vmem>>, vector<16x128xf32>
      %13 = arith.addf %12, %2 : vector<16x128xf32>
      %c0_9 = arith.constant 0 : index
      %c0_10 = arith.constant 0 : index
      %14 = vector.load %arg6[%c0_9, %c0_10] : memref<16x128xf32, #tpu.memory_space<vmem>>, vector<16x128xf32>
      tpu.vector_store %arg6[%c0_9, %c0_10], %13 {strides = array<i32>} : memref<16x128xf32, #tpu.memory_space<vmem>>, vector<16x128xf32>,
    } else {
    }
    %c2_i32 = arith.constant 2 : i32
    %9 = arith.cmpi eq, %arg2, %c2_i32 : i32
    %10 = arith.extui %9 : i1 to i32
    %c0_i32_6 = arith.constant 0 : i32
    %11 = arith.cmpi ne, %10, %c0_i32_6 : i32
    scf.if %11 {
      %c0_7 = arith.constant 0 : index
      %c0_8 = arith.constant 0 : index
      %12 = vector.load %arg6[%c0_7, %c0_8] : memref<16x128xf32, #tpu.memory_space<vmem>>, vector<16x128xf32>
      %c0_9 = arith.constant 0 : index
      %c0_10 = arith.constant 0 : index
      %13 = vector.load %arg5[%c0_9, %c0_10] : memref<1x128xf32, #tpu.memory_space<vmem>>, vector<1x128xf32>
      %14 = vector.broadcast %13 : vector<1x128xf32> to vector<16x128xf32>
      %15 = arith.addf %12, %14 : vector<16x128xf32>
      %cst_11 = arith.constant 0.000000e+00 : f32
      %16 = vector.broadcast %cst_11 : f32 to vector<16x128xf32>
      %17 = arith.maximumf %15, %16 : vector<16x128xf32>
      %c0_12 = arith.constant 0 : index
      %c0_13 = arith.constant 0 : index
      %18 = vector.load %arg6[%c0_12, %c0_13] : memref<16x128xf32, #tpu.memory_space<vmem>>, vector<16x128xf32>
      tpu.vector_store %arg6[%c0_12, %c0_13], %17 {strides = array<i32>} : memref<16x128xf32, #tpu.memory_space<vmem>>, vector<16x128xf32>,
    } else {
    }
    return
  }
  func.func @transform_0(%arg0: i32, %arg1: i32, %arg2: i32) -> (i32, i32) {
    %c0_i32 = arith.constant 0 : i32
    return %arg0, %arg2 : i32, i32
  }
  func.func @transform_1(%arg0: i32, %arg1: i32, %arg2: i32) -> (i32, i32) {
    %c0_i32 = arith.constant 0 : i32
    return %arg2, %arg1 : i32, i32
  }
  func.func @transform_2(%arg0: i32, %arg1: i32, %arg2: i32) -> (i32, i32) {
    %c0_i32 = arith.constant 0 : i32
    %c0_i32_0 = arith.constant 0 : i32
    return %c0_i32, %arg1 : i32, i32
  }
  func.func @transform_3(%arg0: i32, %arg1: i32, %arg2: i32) -> (i32, i32) {
    %c0_i32 = arith.constant 0 : i32
    return %arg0, %arg1 : i32, i32
  }
}

module attributes {stable_mosaic.version = 11 : i64} {
  func.func @_mm_bias_kernel(%arg0: i32, %arg1: i32, %arg2: i32, %arg3: memref<8x256xbf16, #tpu.memory_space<vmem>>, %arg4: memref<256x128xbf16, #tpu.memory_space<vmem>>, %arg5: memref<1x128xf32, #tpu.memory_space<vmem>>, %arg6: memref<8x128xf32, #tpu.memory_space<vmem>>) attributes {dimension_semantics = [#tpu.dimension_semantics<parallel>, #tpu.dimension_semantics<parallel>, #tpu.dimension_semantics<arbitrary>], iteration_bounds = array<i64: 1, 1, 1>, scalar_prefetch = 0 : i64, scratch_operands = 0 : i64, tpu.core_type = #tpu.core_type<tc>, window_params = [{transform_indices = @transform_0, window_bounds = array<i64: 8, 256>}, {transform_indices = @transform_1, window_bounds = array<i64: 256, 128>}, {transform_indices = @transform_2, window_bounds = array<i64: 1, 128>}, {transform_indices = @transform_3, window_bounds = array<i64: 8, 128>}]} {
    %c0 = arith.constant 0 : index
    %c0_0 = arith.constant 0 : index
    %0 = vector.load %arg3[%c0, %c0_0] : memref<8x256xbf16, #tpu.memory_space<vmem>>, vector<8x256xbf16>
    %c0_1 = arith.constant 0 : index
    %c0_2 = arith.constant 0 : index
    %1 = vector.load %arg4[%c0_1, %c0_2] : memref<256x128xbf16, #tpu.memory_space<vmem>>, vector<256x128xbf16>
    %cst = arith.constant dense<0.000000e+00> : vector<8x128xf32>
    %2 = tpu.matmul %0, %1, %cst {dimension_numbers = #tpu.dot_dimension_numbers<[1], [0], [0], [1], [0, 0, 1, 1], [], []>} : vector<8x256xbf16>, vector<256x128xbf16>, vector<8x128xf32> -> vector<8x128xf32>
    %c0_i32 = arith.constant 0 : i32
    %3 = arith.cmpi eq, %arg2, %c0_i32 : i32
    %4 = arith.extui %3 : i1 to i32
    %c0_i32_3 = arith.constant 0 : i32
    %5 = arith.cmpi ne, %4, %c0_i32_3 : i32
    scf.if %5 {
      %c0_8 = arith.constant 0 : index
      %c0_9 = arith.constant 0 : index
      %12 = vector.load %arg6[%c0_8, %c0_9] : memref<8x128xf32, #tpu.memory_space<vmem>>, vector<8x128xf32>
      tpu.vector_store %arg6[%c0_8, %c0_9], %2 {strides = array<i32>} : memref<8x128xf32, #tpu.memory_space<vmem>>, vector<8x128xf32>,
    } else {
    }
    %c0_i32_4 = arith.constant 0 : i32
    %6 = arith.cmpi sgt, %arg2, %c0_i32_4 : i32
    %7 = arith.extui %6 : i1 to i32
    %c0_i32_5 = arith.constant 0 : i32
    %8 = arith.cmpi ne, %7, %c0_i32_5 : i32
    scf.if %8 {
      %c0_8 = arith.constant 0 : index
      %c0_9 = arith.constant 0 : index
      %12 = vector.load %arg6[%c0_8, %c0_9] : memref<8x128xf32, #tpu.memory_space<vmem>>, vector<8x128xf32>
      %13 = arith.addf %12, %2 : vector<8x128xf32>
      %c0_10 = arith.constant 0 : index
      %c0_11 = arith.constant 0 : index
      %14 = vector.load %arg6[%c0_10, %c0_11] : memref<8x128xf32, #tpu.memory_space<vmem>>, vector<8x128xf32>
      tpu.vector_store %arg6[%c0_10, %c0_11], %13 {strides = array<i32>} : memref<8x128xf32, #tpu.memory_space<vmem>>, vector<8x128xf32>,
    } else {
    }
    %c0_i32_6 = arith.constant 0 : i32
    %9 = arith.cmpi eq, %arg2, %c0_i32_6 : i32
    %10 = arith.extui %9 : i1 to i32
    %c0_i32_7 = arith.constant 0 : i32
    %11 = arith.cmpi ne, %10, %c0_i32_7 : i32
    scf.if %11 {
      %c0_8 = arith.constant 0 : index
      %c0_9 = arith.constant 0 : index
      %12 = vector.load %arg6[%c0_8, %c0_9] : memref<8x128xf32, #tpu.memory_space<vmem>>, vector<8x128xf32>
      %c0_10 = arith.constant 0 : index
      %c0_11 = arith.constant 0 : index
      %13 = vector.load %arg5[%c0_10, %c0_11] : memref<1x128xf32, #tpu.memory_space<vmem>>, vector<1x128xf32>
      %14 = vector.broadcast %13 : vector<1x128xf32> to vector<8x128xf32>
      %15 = arith.addf %12, %14 : vector<8x128xf32>
      %cst_12 = arith.constant 0.000000e+00 : f32
      %16 = vector.broadcast %cst_12 : f32 to vector<8x128xf32>
      %17 = arith.maximumf %15, %16 : vector<8x128xf32>
      %c0_13 = arith.constant 0 : index
      %c0_14 = arith.constant 0 : index
      %18 = vector.load %arg6[%c0_13, %c0_14] : memref<8x128xf32, #tpu.memory_space<vmem>>, vector<8x128xf32>
      tpu.vector_store %arg6[%c0_13, %c0_14], %17 {strides = array<i32>} : memref<8x128xf32, #tpu.memory_space<vmem>>, vector<8x128xf32>,
    } else {
    }
    return
  }
  func.func @transform_0(%arg0: i32, %arg1: i32, %arg2: i32) -> (i32, i32) {
    %c0_i32 = arith.constant 0 : i32
    return %arg0, %arg2 : i32, i32
  }
  func.func @transform_1(%arg0: i32, %arg1: i32, %arg2: i32) -> (i32, i32) {
    %c0_i32 = arith.constant 0 : i32
    return %arg2, %arg1 : i32, i32
  }
  func.func @transform_2(%arg0: i32, %arg1: i32, %arg2: i32) -> (i32, i32) {
    %c0_i32 = arith.constant 0 : i32
    %c0_i32_0 = arith.constant 0 : i32
    return %c0_i32, %arg1 : i32, i32
  }
  func.func @transform_3(%arg0: i32, %arg1: i32, %arg2: i32) -> (i32, i32) {
    %c0_i32 = arith.constant 0 : i32
    return %arg0, %arg1 : i32, i32
  }
}

module attributes {stable_mosaic.version = 11 : i64} {
  func.func @_mm_bias_kernel(%arg0: i32, %arg1: i32, %arg2: i32, %arg3: memref<2x256xbf16, #tpu.memory_space<vmem>>, %arg4: memref<256x128xbf16, #tpu.memory_space<vmem>>, %arg5: memref<1x128xf32, #tpu.memory_space<vmem>>, %arg6: memref<2x128xf32, #tpu.memory_space<vmem>>) attributes {dimension_semantics = [#tpu.dimension_semantics<parallel>, #tpu.dimension_semantics<parallel>, #tpu.dimension_semantics<arbitrary>], iteration_bounds = array<i64: 1, 1, 1>, scalar_prefetch = 0 : i64, scratch_operands = 0 : i64, tpu.core_type = #tpu.core_type<tc>, window_params = [{transform_indices = @transform_0, window_bounds = array<i64: 2, 256>}, {transform_indices = @transform_1, window_bounds = array<i64: 256, 128>}, {transform_indices = @transform_2, window_bounds = array<i64: 1, 128>}, {transform_indices = @transform_3, window_bounds = array<i64: 2, 128>}]} {
    %c0 = arith.constant 0 : index
    %c0_0 = arith.constant 0 : index
    %0 = vector.load %arg3[%c0, %c0_0] : memref<2x256xbf16, #tpu.memory_space<vmem>>, vector<2x256xbf16>
    %c0_1 = arith.constant 0 : index
    %c0_2 = arith.constant 0 : index
    %1 = vector.load %arg4[%c0_1, %c0_2] : memref<256x128xbf16, #tpu.memory_space<vmem>>, vector<256x128xbf16>
    %cst = arith.constant dense<0.000000e+00> : vector<2x128xf32>
    %2 = tpu.matmul %0, %1, %cst {dimension_numbers = #tpu.dot_dimension_numbers<[1], [0], [0], [1], [0, 0, 1, 1], [], []>} : vector<2x256xbf16>, vector<256x128xbf16>, vector<2x128xf32> -> vector<2x128xf32>
    %c0_i32 = arith.constant 0 : i32
    %3 = arith.cmpi eq, %arg2, %c0_i32 : i32
    %4 = arith.extui %3 : i1 to i32
    %c0_i32_3 = arith.constant 0 : i32
    %5 = arith.cmpi ne, %4, %c0_i32_3 : i32
    scf.if %5 {
      %c0_8 = arith.constant 0 : index
      %c0_9 = arith.constant 0 : index
      %12 = vector.load %arg6[%c0_8, %c0_9] : memref<2x128xf32, #tpu.memory_space<vmem>>, vector<2x128xf32>
      tpu.vector_store %arg6[%c0_8, %c0_9], %2 {strides = array<i32>} : memref<2x128xf32, #tpu.memory_space<vmem>>, vector<2x128xf32>,
    } else {
    }
    %c0_i32_4 = arith.constant 0 : i32
    %6 = arith.cmpi sgt, %arg2, %c0_i32_4 : i32
    %7 = arith.extui %6 : i1 to i32
    %c0_i32_5 = arith.constant 0 : i32
    %8 = arith.cmpi ne, %7, %c0_i32_5 : i32
    scf.if %8 {
      %c0_8 = arith.constant 0 : index
      %c0_9 = arith.constant 0 : index
      %12 = vector.load %arg6[%c0_8, %c0_9] : memref<2x128xf32, #tpu.memory_space<vmem>>, vector<2x128xf32>
      %13 = arith.addf %12, %2 : vector<2x128xf32>
      %c0_10 = arith.constant 0 : index
      %c0_11 = arith.constant 0 : index
      %14 = vector.load %arg6[%c0_10, %c0_11] : memref<2x128xf32, #tpu.memory_space<vmem>>, vector<2x128xf32>
      tpu.vector_store %arg6[%c0_10, %c0_11], %13 {strides = array<i32>} : memref<2x128xf32, #tpu.memory_space<vmem>>, vector<2x128xf32>,
    } else {
    }
    %c0_i32_6 = arith.constant 0 : i32
    %9 = arith.cmpi eq, %arg2, %c0_i32_6 : i32
    %10 = arith.extui %9 : i1 to i32
    %c0_i32_7 = arith.constant 0 : i32
    %11 = arith.cmpi ne, %10, %c0_i32_7 : i32
    scf.if %11 {
      %c0_8 = arith.constant 0 : index
      %c0_9 = arith.constant 0 : index
      %12 = vector.load %arg6[%c0_8, %c0_9] : memref<2x128xf32, #tpu.memory_space<vmem>>, vector<2x128xf32>
      %c0_10 = arith.constant 0 : index
      %c0_11 = arith.constant 0 : index
      %13 = vector.load %arg5[%c0_10, %c0_11] : memref<1x128xf32, #tpu.memory_space<vmem>>, vector<1x128xf32>
      %14 = vector.broadcast %13 : vector<1x128xf32> to vector<2x128xf32>
      %15 = arith.addf %12, %14 : vector<2x128xf32>
      %c0_12 = arith.constant 0 : index
      %c0_13 = arith.constant 0 : index
      %16 = vector.load %arg6[%c0_12, %c0_13] : memref<2x128xf32, #tpu.memory_space<vmem>>, vector<2x128xf32>
      tpu.vector_store %arg6[%c0_12, %c0_13], %15 {strides = array<i32>} : memref<2x128xf32, #tpu.memory_space<vmem>>, vector<2x128xf32>,
    } else {
    }
    return
  }
  func.func @transform_0(%arg0: i32, %arg1: i32, %arg2: i32) -> (i32, i32) {
    %c0_i32 = arith.constant 0 : i32
    return %arg0, %arg2 : i32, i32
  }
  func.func @transform_1(%arg0: i32, %arg1: i32, %arg2: i32) -> (i32, i32) {
    %c0_i32 = arith.constant 0 : i32
    return %arg2, %arg1 : i32, i32
  }
  func.func @transform_2(%arg0: i32, %arg1: i32, %arg2: i32) -> (i32, i32) {
    %c0_i32 = arith.constant 0 : i32
    %c0_i32_0 = arith.constant 0 : i32
    return %c0_i32, %arg1 : i32, i32
  }
  func.func @transform_3(%arg0: i32, %arg1: i32, %arg2: i32) -> (i32, i32) {
    %c0_i32 = arith.constant 0 : i32
    return %arg0, %arg1 : i32, i32
  }
}

module attributes {stable_mosaic.version = 11 : i64} {
  func.func @_mm_bias_kernel(%arg0: i32, %arg1: i32, %arg2: i32, %arg3: memref<2x128xbf16, #tpu.memory_space<vmem>>, %arg4: memref<128x128xbf16, #tpu.memory_space<vmem>>, %arg5: memref<1x128xf32, #tpu.memory_space<vmem>>, %arg6: memref<2x128xf32, #tpu.memory_space<vmem>>) attributes {dimension_semantics = [#tpu.dimension_semantics<parallel>, #tpu.dimension_semantics<parallel>, #tpu.dimension_semantics<arbitrary>], iteration_bounds = array<i64: 1, 1, 1>, scalar_prefetch = 0 : i64, scratch_operands = 0 : i64, tpu.core_type = #tpu.core_type<tc>, window_params = [{transform_indices = @transform_0, window_bounds = array<i64: 2, 128>}, {transform_indices = @transform_1, window_bounds = array<i64: 128, 128>}, {transform_indices = @transform_2, window_bounds = array<i64: 1, 128>}, {transform_indices = @transform_3, window_bounds = array<i64: 2, 128>}]} {
    %c0 = arith.constant 0 : index
    %c0_0 = arith.constant 0 : index
    %0 = vector.load %arg3[%c0, %c0_0] : memref<2x128xbf16, #tpu.memory_space<vmem>>, vector<2x128xbf16>
    %c0_1 = arith.constant 0 : index
    %c0_2 = arith.constant 0 : index
    %1 = vector.load %arg4[%c0_1, %c0_2] : memref<128x128xbf16, #tpu.memory_space<vmem>>, vector<128x128xbf16>
    %cst = arith.constant dense<0.000000e+00> : vector<2x128xf32>
    %2 = tpu.matmul %0, %1, %cst {dimension_numbers = #tpu.dot_dimension_numbers<[1], [0], [0], [1], [0, 0, 1, 1], [], []>} : vector<2x128xbf16>, vector<128x128xbf16>, vector<2x128xf32> -> vector<2x128xf32>
    %c0_i32 = arith.constant 0 : i32
    %3 = arith.cmpi eq, %arg2, %c0_i32 : i32
    %4 = arith.extui %3 : i1 to i32
    %c0_i32_3 = arith.constant 0 : i32
    %5 = arith.cmpi ne, %4, %c0_i32_3 : i32
    scf.if %5 {
      %c0_8 = arith.constant 0 : index
      %c0_9 = arith.constant 0 : index
      %12 = vector.load %arg6[%c0_8, %c0_9] : memref<2x128xf32, #tpu.memory_space<vmem>>, vector<2x128xf32>
      tpu.vector_store %arg6[%c0_8, %c0_9], %2 {strides = array<i32>} : memref<2x128xf32, #tpu.memory_space<vmem>>, vector<2x128xf32>,
    } else {
    }
    %c0_i32_4 = arith.constant 0 : i32
    %6 = arith.cmpi sgt, %arg2, %c0_i32_4 : i32
    %7 = arith.extui %6 : i1 to i32
    %c0_i32_5 = arith.constant 0 : i32
    %8 = arith.cmpi ne, %7, %c0_i32_5 : i32
    scf.if %8 {
      %c0_8 = arith.constant 0 : index
      %c0_9 = arith.constant 0 : index
      %12 = vector.load %arg6[%c0_8, %c0_9] : memref<2x128xf32, #tpu.memory_space<vmem>>, vector<2x128xf32>
      %13 = arith.addf %12, %2 : vector<2x128xf32>
      %c0_10 = arith.constant 0 : index
      %c0_11 = arith.constant 0 : index
      %14 = vector.load %arg6[%c0_10, %c0_11] : memref<2x128xf32, #tpu.memory_space<vmem>>, vector<2x128xf32>
      tpu.vector_store %arg6[%c0_10, %c0_11], %13 {strides = array<i32>} : memref<2x128xf32, #tpu.memory_space<vmem>>, vector<2x128xf32>,
    } else {
    }
    %c0_i32_6 = arith.constant 0 : i32
    %9 = arith.cmpi eq, %arg2, %c0_i32_6 : i32
    %10 = arith.extui %9 : i1 to i32
    %c0_i32_7 = arith.constant 0 : i32
    %11 = arith.cmpi ne, %10, %c0_i32_7 : i32
    scf.if %11 {
      %c0_8 = arith.constant 0 : index
      %c0_9 = arith.constant 0 : index
      %12 = vector.load %arg6[%c0_8, %c0_9] : memref<2x128xf32, #tpu.memory_space<vmem>>, vector<2x128xf32>
      %c0_10 = arith.constant 0 : index
      %c0_11 = arith.constant 0 : index
      %13 = vector.load %arg5[%c0_10, %c0_11] : memref<1x128xf32, #tpu.memory_space<vmem>>, vector<1x128xf32>
      %14 = vector.broadcast %13 : vector<1x128xf32> to vector<2x128xf32>
      %15 = arith.addf %12, %14 : vector<2x128xf32>
      %cst_12 = arith.constant 0.000000e+00 : f32
      %16 = vector.broadcast %cst_12 : f32 to vector<2x128xf32>
      %17 = arith.maximumf %15, %16 : vector<2x128xf32>
      %c0_13 = arith.constant 0 : index
      %c0_14 = arith.constant 0 : index
      %18 = vector.load %arg6[%c0_13, %c0_14] : memref<2x128xf32, #tpu.memory_space<vmem>>, vector<2x128xf32>
      tpu.vector_store %arg6[%c0_13, %c0_14], %17 {strides = array<i32>} : memref<2x128xf32, #tpu.memory_space<vmem>>, vector<2x128xf32>,
    } else {
    }
    return
  }
  func.func @transform_0(%arg0: i32, %arg1: i32, %arg2: i32) -> (i32, i32) {
    %c0_i32 = arith.constant 0 : i32
    return %arg0, %arg2 : i32, i32
  }
  func.func @transform_1(%arg0: i32, %arg1: i32, %arg2: i32) -> (i32, i32) {
    %c0_i32 = arith.constant 0 : i32
    return %arg2, %arg1 : i32, i32
  }
  func.func @transform_2(%arg0: i32, %arg1: i32, %arg2: i32) -> (i32, i32) {
    %c0_i32 = arith.constant 0 : i32
    %c0_i32_0 = arith.constant 0 : i32
    return %c0_i32, %arg1 : i32, i32
  }
  func.func @transform_3(%arg0: i32, %arg1: i32, %arg2: i32) -> (i32, i32) {
    %c0_i32 = arith.constant 0 : i32
    return %arg0, %arg1 : i32, i32
  }
}

module attributes {stable_mosaic.version = 11 : i64} {
  func.func @_mm_bias_kernel(%arg0: i32, %arg1: i32, %arg2: i32, %arg3: memref<8x128xbf16, #tpu.memory_space<vmem>>, %arg4: memref<128x128xbf16, #tpu.memory_space<vmem>>, %arg5: memref<1x128xf32, #tpu.memory_space<vmem>>, %arg6: memref<8x128xf32, #tpu.memory_space<vmem>>) attributes {dimension_semantics = [#tpu.dimension_semantics<parallel>, #tpu.dimension_semantics<parallel>, #tpu.dimension_semantics<arbitrary>], iteration_bounds = array<i64: 1, 1, 1>, scalar_prefetch = 0 : i64, scratch_operands = 0 : i64, tpu.core_type = #tpu.core_type<tc>, window_params = [{transform_indices = @transform_0, window_bounds = array<i64: 8, 128>}, {transform_indices = @transform_1, window_bounds = array<i64: 128, 128>}, {transform_indices = @transform_2, window_bounds = array<i64: 1, 128>}, {transform_indices = @transform_3, window_bounds = array<i64: 8, 128>}]} {
    %c0 = arith.constant 0 : index
    %c0_0 = arith.constant 0 : index
    %0 = vector.load %arg3[%c0, %c0_0] : memref<8x128xbf16, #tpu.memory_space<vmem>>, vector<8x128xbf16>
    %c0_1 = arith.constant 0 : index
    %c0_2 = arith.constant 0 : index
    %1 = vector.load %arg4[%c0_1, %c0_2] : memref<128x128xbf16, #tpu.memory_space<vmem>>, vector<128x128xbf16>
    %cst = arith.constant dense<0.000000e+00> : vector<8x128xf32>
    %2 = tpu.matmul %0, %1, %cst {dimension_numbers = #tpu.dot_dimension_numbers<[1], [0], [0], [1], [0, 0, 1, 1], [], []>} : vector<8x128xbf16>, vector<128x128xbf16>, vector<8x128xf32> -> vector<8x128xf32>
    %c0_i32 = arith.constant 0 : i32
    %3 = arith.cmpi eq, %arg2, %c0_i32 : i32
    %4 = arith.extui %3 : i1 to i32
    %c0_i32_3 = arith.constant 0 : i32
    %5 = arith.cmpi ne, %4, %c0_i32_3 : i32
    scf.if %5 {
      %c0_8 = arith.constant 0 : index
      %c0_9 = arith.constant 0 : index
      %12 = vector.load %arg6[%c0_8, %c0_9] : memref<8x128xf32, #tpu.memory_space<vmem>>, vector<8x128xf32>
      tpu.vector_store %arg6[%c0_8, %c0_9], %2 {strides = array<i32>} : memref<8x128xf32, #tpu.memory_space<vmem>>, vector<8x128xf32>,
    } else {
    }
    %c0_i32_4 = arith.constant 0 : i32
    %6 = arith.cmpi sgt, %arg2, %c0_i32_4 : i32
    %7 = arith.extui %6 : i1 to i32
    %c0_i32_5 = arith.constant 0 : i32
    %8 = arith.cmpi ne, %7, %c0_i32_5 : i32
    scf.if %8 {
      %c0_8 = arith.constant 0 : index
      %c0_9 = arith.constant 0 : index
      %12 = vector.load %arg6[%c0_8, %c0_9] : memref<8x128xf32, #tpu.memory_space<vmem>>, vector<8x128xf32>
      %13 = arith.addf %12, %2 : vector<8x128xf32>
      %c0_10 = arith.constant 0 : index
      %c0_11 = arith.constant 0 : index
      %14 = vector.load %arg6[%c0_10, %c0_11] : memref<8x128xf32, #tpu.memory_space<vmem>>, vector<8x128xf32>
      tpu.vector_store %arg6[%c0_10, %c0_11], %13 {strides = array<i32>} : memref<8x128xf32, #tpu.memory_space<vmem>>, vector<8x128xf32>,
    } else {
    }
    %c0_i32_6 = arith.constant 0 : i32
    %9 = arith.cmpi eq, %arg2, %c0_i32_6 : i32
    %10 = arith.extui %9 : i1 to i32
    %c0_i32_7 = arith.constant 0 : i32
    %11 = arith.cmpi ne, %10, %c0_i32_7 : i32
    scf.if %11 {
      %c0_8 = arith.constant 0 : index
      %c0_9 = arith.constant 0 : index
      %12 = vector.load %arg6[%c0_8, %c0_9] : memref<8x128xf32, #tpu.memory_space<vmem>>, vector<8x128xf32>
      %c0_10 = arith.constant 0 : index
      %c0_11 = arith.constant 0 : index
      %13 = vector.load %arg5[%c0_10, %c0_11] : memref<1x128xf32, #tpu.memory_space<vmem>>, vector<1x128xf32>
      %14 = vector.broadcast %13 : vector<1x128xf32> to vector<8x128xf32>
      %15 = arith.addf %12, %14 : vector<8x128xf32>
      %cst_12 = arith.constant 0.000000e+00 : f32
      %16 = vector.broadcast %cst_12 : f32 to vector<8x128xf32>
      %17 = arith.maximumf %15, %16 : vector<8x128xf32>
      %c0_13 = arith.constant 0 : index
      %c0_14 = arith.constant 0 : index
      %18 = vector.load %arg6[%c0_13, %c0_14] : memref<8x128xf32, #tpu.memory_space<vmem>>, vector<8x128xf32>
      tpu.vector_store %arg6[%c0_13, %c0_14], %17 {strides = array<i32>} : memref<8x128xf32, #tpu.memory_space<vmem>>, vector<8x128xf32>,
    } else {
    }
    return
  }
  func.func @transform_0(%arg0: i32, %arg1: i32, %arg2: i32) -> (i32, i32) {
    %c0_i32 = arith.constant 0 : i32
    return %arg0, %arg2 : i32, i32
  }
  func.func @transform_1(%arg0: i32, %arg1: i32, %arg2: i32) -> (i32, i32) {
    %c0_i32 = arith.constant 0 : i32
    return %arg2, %arg1 : i32, i32
  }
  func.func @transform_2(%arg0: i32, %arg1: i32, %arg2: i32) -> (i32, i32) {
    %c0_i32 = arith.constant 0 : i32
    %c0_i32_0 = arith.constant 0 : i32
    return %c0_i32, %arg1 : i32, i32
  }
  func.func @transform_3(%arg0: i32, %arg1: i32, %arg2: i32) -> (i32, i32) {
    %c0_i32 = arith.constant 0 : i32
    return %arg0, %arg1 : i32, i32
  }
}

module attributes {stable_mosaic.version = 11 : i64} {
  func.func @_mm_bias_kernel(%arg0: i32, %arg1: i32, %arg2: i32, %arg3: memref<16x128xbf16, #tpu.memory_space<vmem>>, %arg4: memref<128x128xbf16, #tpu.memory_space<vmem>>, %arg5: memref<1x128xf32, #tpu.memory_space<vmem>>, %arg6: memref<16x128xf32, #tpu.memory_space<vmem>>) attributes {dimension_semantics = [#tpu.dimension_semantics<parallel>, #tpu.dimension_semantics<parallel>, #tpu.dimension_semantics<arbitrary>], iteration_bounds = array<i64: 2, 1, 1>, scalar_prefetch = 0 : i64, scratch_operands = 0 : i64, tpu.core_type = #tpu.core_type<tc>, window_params = [{transform_indices = @transform_0, window_bounds = array<i64: 16, 128>}, {transform_indices = @transform_1, window_bounds = array<i64: 128, 128>}, {transform_indices = @transform_2, window_bounds = array<i64: 1, 128>}, {transform_indices = @transform_3, window_bounds = array<i64: 16, 128>}]} {
    %c0 = arith.constant 0 : index
    %c0_0 = arith.constant 0 : index
    %0 = vector.load %arg3[%c0, %c0_0] : memref<16x128xbf16, #tpu.memory_space<vmem>>, vector<16x128xbf16>
    %c0_1 = arith.constant 0 : index
    %c0_2 = arith.constant 0 : index
    %1 = vector.load %arg4[%c0_1, %c0_2] : memref<128x128xbf16, #tpu.memory_space<vmem>>, vector<128x128xbf16>
    %cst = arith.constant dense<0.000000e+00> : vector<16x128xf32>
    %2 = tpu.matmul %0, %1, %cst {dimension_numbers = #tpu.dot_dimension_numbers<[1], [0], [0], [1], [0, 0, 1, 1], [], []>} : vector<16x128xbf16>, vector<128x128xbf16>, vector<16x128xf32> -> vector<16x128xf32>
    %c0_i32 = arith.constant 0 : i32
    %3 = arith.cmpi eq, %arg2, %c0_i32 : i32
    %4 = arith.extui %3 : i1 to i32
    %c0_i32_3 = arith.constant 0 : i32
    %5 = arith.cmpi ne, %4, %c0_i32_3 : i32
    scf.if %5 {
      %c0_8 = arith.constant 0 : index
      %c0_9 = arith.constant 0 : index
      %12 = vector.load %arg6[%c0_8, %c0_9] : memref<16x128xf32, #tpu.memory_space<vmem>>, vector<16x128xf32>
      tpu.vector_store %arg6[%c0_8, %c0_9], %2 {strides = array<i32>} : memref<16x128xf32, #tpu.memory_space<vmem>>, vector<16x128xf32>,
    } else {
    }
    %c0_i32_4 = arith.constant 0 : i32
    %6 = arith.cmpi sgt, %arg2, %c0_i32_4 : i32
    %7 = arith.extui %6 : i1 to i32
    %c0_i32_5 = arith.constant 0 : i32
    %8 = arith.cmpi ne, %7, %c0_i32_5 : i32
    scf.if %8 {
      %c0_8 = arith.constant 0 : index
      %c0_9 = arith.constant 0 : index
      %12 = vector.load %arg6[%c0_8, %c0_9] : memref<16x128xf32, #tpu.memory_space<vmem>>, vector<16x128xf32>
      %13 = arith.addf %12, %2 : vector<16x128xf32>
      %c0_10 = arith.constant 0 : index
      %c0_11 = arith.constant 0 : index
      %14 = vector.load %arg6[%c0_10, %c0_11] : memref<16x128xf32, #tpu.memory_space<vmem>>, vector<16x128xf32>
      tpu.vector_store %arg6[%c0_10, %c0_11], %13 {strides = array<i32>} : memref<16x128xf32, #tpu.memory_space<vmem>>, vector<16x128xf32>,
    } else {
    }
    %c0_i32_6 = arith.constant 0 : i32
    %9 = arith.cmpi eq, %arg2, %c0_i32_6 : i32
    %10 = arith.extui %9 : i1 to i32
    %c0_i32_7 = arith.constant 0 : i32
    %11 = arith.cmpi ne, %10, %c0_i32_7 : i32
    scf.if %11 {
      %c0_8 = arith.constant 0 : index
      %c0_9 = arith.constant 0 : index
      %12 = vector.load %arg6[%c0_8, %c0_9] : memref<16x128xf32, #tpu.memory_space<vmem>>, vector<16x128xf32>
      %c0_10 = arith.constant 0 : index
      %c0_11 = arith.constant 0 : index
      %13 = vector.load %arg5[%c0_10, %c0_11] : memref<1x128xf32, #tpu.memory_space<vmem>>, vector<1x128xf32>
      %14 = vector.broadcast %13 : vector<1x128xf32> to vector<16x128xf32>
      %15 = arith.addf %12, %14 : vector<16x128xf32>
      %cst_12 = arith.constant 0.000000e+00 : f32
      %16 = vector.broadcast %cst_12 : f32 to vector<16x128xf32>
      %17 = arith.maximumf %15, %16 : vector<16x128xf32>
      %c0_13 = arith.constant 0 : index
      %c0_14 = arith.constant 0 : index
      %18 = vector.load %arg6[%c0_13, %c0_14] : memref<16x128xf32, #tpu.memory_space<vmem>>, vector<16x128xf32>
      tpu.vector_store %arg6[%c0_13, %c0_14], %17 {strides = array<i32>} : memref<16x128xf32, #tpu.memory_space<vmem>>, vector<16x128xf32>,
    } else {
    }
    return
  }
  func.func @transform_0(%arg0: i32, %arg1: i32, %arg2: i32) -> (i32, i32) {
    %c0_i32 = arith.constant 0 : i32
    return %arg0, %arg2 : i32, i32
  }
  func.func @transform_1(%arg0: i32, %arg1: i32, %arg2: i32) -> (i32, i32) {
    %c0_i32 = arith.constant 0 : i32
    return %arg2, %arg1 : i32, i32
  }
  func.func @transform_2(%arg0: i32, %arg1: i32, %arg2: i32) -> (i32, i32) {
    %c0_i32 = arith.constant 0 : i32
    %c0_i32_0 = arith.constant 0 : i32
    return %c0_i32, %arg1 : i32, i32
  }
  func.func @transform_3(%arg0: i32, %arg1: i32, %arg2: i32) -> (i32, i32) {
    %c0_i32 = arith.constant 0 : i32
    return %arg0, %arg1 : i32, i32
  }
}

module attributes {stable_mosaic.version = 11 : i64} {
  func.func @_gauss_like_kernel(%arg0: i32, %arg1: memref<8x512xf32, #tpu.memory_space<vmem>>, %arg2: memref<8x512xf32, #tpu.memory_space<vmem>>, %arg3: memref<8x512xf32, #tpu.memory_space<vmem>>) attributes {dimension_semantics = [#tpu.dimension_semantics<parallel>], iteration_bounds = array<i64: 1>, scalar_prefetch = 0 : i64, scratch_operands = 0 : i64, tpu.core_type = #tpu.core_type<tc>, window_params = [{transform_indices = @transform_0, window_bounds = array<i64: 8, 512>}, {transform_indices = @transform_1, window_bounds = array<i64: 8, 512>}, {transform_indices = @transform_2, window_bounds = array<i64: 8, 512>}]} {
    %c0 = arith.constant 0 : index
    %c0_0 = arith.constant 0 : index
    %0 = vector.load %arg1[%c0, %c0_0] : memref<8x512xf32, #tpu.memory_space<vmem>>, vector<8x512xf32>
    %1 = math.absf %0 : vector<8x512xf32>
    %c0_1 = arith.constant 0 : index
    %c0_2 = arith.constant 0 : index
    %2 = vector.load %arg2[%c0_1, %c0_2] : memref<8x512xf32, #tpu.memory_space<vmem>>, vector<8x512xf32>
    %cst = arith.constant 1.100000e-01 : f32
    %3 = vector.broadcast %cst : f32 to vector<8x512xf32>
    %4 = arith.maximumf %2, %3 : vector<8x512xf32>
    %5 = tpu.reciprocal %4 {approx = true} : vector<8x512xf32> -> vector<8x512xf32>
    %cst_3 = arith.constant 5.000000e-01 : f32
    %6 = vector.broadcast %cst_3 : f32 to vector<8x512xf32>
    %7 = arith.subf %6, %1 : vector<8x512xf32>
    %8 = arith.mulf %7, %5 : vector<8x512xf32>
    %cst_4 = arith.constant 0.707106769 : f32
    %9 = vector.broadcast %cst_4 : f32 to vector<8x512xf32>
    %10 = arith.mulf %8, %9 : vector<8x512xf32>
    %cst_5 = arith.constant 0.000000e+00 : f32
    %11 = vector.broadcast %cst_5 : f32 to vector<8x512xf32>
    %12 = arith.cmpf oge, %10, %11 : vector<8x512xf32>
    %cst_6 = arith.constant 1.000000e+00 : f32
    %cst_7 = arith.constant -1.000000e+00 : f32
    %13 = vector.broadcast %cst_6 : f32 to vector<8x512xf32>
    %14 = vector.broadcast %cst_7 : f32 to vector<8x512xf32>
    %15 = arith.select %12, %13, %14 : vector<8x512xi1>, vector<8x512xf32>
    %16 = math.absf %10 : vector<8x512xf32>
    %cst_8 = arith.constant 0.327591091 : f32
    %17 = vector.broadcast %cst_8 : f32 to vector<8x512xf32>
    %18 = arith.mulf %17, %16 : vector<8x512xf32>
    %cst_9 = arith.constant 1.000000e+00 : f32
    %19 = vector.broadcast %cst_9 : f32 to vector<8x512xf32>
    %20 = arith.addf %19, %18 : vector<8x512xf32>
    %21 = tpu.reciprocal %20 {approx = true} : vector<8x512xf32> -> vector<8x512xf32>
    %cst_10 = arith.constant 1.06140542 : f32
    %22 = vector.broadcast %cst_10 : f32 to vector<8x512xf32>
    %23 = arith.mulf %22, %21 : vector<8x512xf32>
    %cst_11 = arith.constant 1.45315206 : f32
    %24 = vector.broadcast %cst_11 : f32 to vector<8x512xf32>
    %25 = arith.subf %23, %24 : vector<8x512xf32>
    %26 = arith.mulf %25, %21 : vector<8x512xf32>
    %cst_12 = arith.constant 1.42141378 : f32
    %27 = vector.broadcast %cst_12 : f32 to vector<8x512xf32>
    %28 = arith.addf %26, %27 : vector<8x512xf32>
    %29 = arith.mulf %28, %21 : vector<8x512xf32>
    %cst_13 = arith.constant 0.284496725 : f32
    %30 = vector.broadcast %cst_13 : f32 to vector<8x512xf32>
    %31 = arith.subf %29, %30 : vector<8x512xf32>
    %32 = arith.mulf %31, %21 : vector<8x512xf32>
    %cst_14 = arith.constant 0.254829586 : f32
    %33 = vector.broadcast %cst_14 : f32 to vector<8x512xf32>
    %34 = arith.addf %32, %33 : vector<8x512xf32>
    %35 = arith.mulf %34, %21 : vector<8x512xf32>
    %cst_15 = arith.constant 0.000000e+00 : f32
    %36 = vector.broadcast %cst_15 : f32 to vector<8x512xf32>
    %37 = arith.subf %36, %16 : vector<8x512xf32>
    %38 = arith.mulf %37, %16 : vector<8x512xf32>
    %39 = math.exp %38 : vector<8x512xf32>
    %40 = arith.mulf %35, %39 : vector<8x512xf32>
    %cst_16 = arith.constant 1.000000e+00 : f32
    %41 = vector.broadcast %cst_16 : f32 to vector<8x512xf32>
    %42 = arith.subf %41, %40 : vector<8x512xf32>
    %43 = arith.mulf %15, %42 : vector<8x512xf32>
    %cst_17 = arith.constant 1.000000e+00 : f32
    %44 = vector.broadcast %cst_17 : f32 to vector<8x512xf32>
    %45 = arith.addf %44, %43 : vector<8x512xf32>
    %cst_18 = arith.constant 5.000000e-01 : f32
    %46 = vector.broadcast %cst_18 : f32 to vector<8x512xf32>
    %47 = arith.mulf %46, %45 : vector<8x512xf32>
    %cst_19 = arith.constant -5.000000e-01 : f32
    %48 = vector.broadcast %cst_19 : f32 to vector<8x512xf32>
    %49 = arith.subf %48, %1 : vector<8x512xf32>
    %50 = arith.mulf %49, %5 : vector<8x512xf32>
    %cst_20 = arith.constant 0.707106769 : f32
    %51 = vector.broadcast %cst_20 : f32 to vector<8x512xf32>
    %52 = arith.mulf %50, %51 : vector<8x512xf32>
    %cst_21 = arith.constant 0.000000e+00 : f32
    %53 = vector.broadcast %cst_21 : f32 to vector<8x512xf32>
    %54 = arith.cmpf oge, %52, %53 : vector<8x512xf32>
    %cst_22 = arith.constant 1.000000e+00 : f32
    %cst_23 = arith.constant -1.000000e+00 : f32
    %55 = vector.broadcast %cst_22 : f32 to vector<8x512xf32>
    %56 = vector.broadcast %cst_23 : f32 to vector<8x512xf32>
    %57 = arith.select %54, %55, %56 : vector<8x512xi1>, vector<8x512xf32>
    %58 = math.absf %52 : vector<8x512xf32>
    %cst_24 = arith.constant 0.327591091 : f32
    %59 = vector.broadcast %cst_24 : f32 to vector<8x512xf32>
    %60 = arith.mulf %59, %58 : vector<8x512xf32>
    %cst_25 = arith.constant 1.000000e+00 : f32
    %61 = vector.broadcast %cst_25 : f32 to vector<8x512xf32>
    %62 = arith.addf %61, %60 : vector<8x512xf32>
    %63 = tpu.reciprocal %62 {approx = true} : vector<8x512xf32> -> vector<8x512xf32>
    %cst_26 = arith.constant 1.06140542 : f32
    %64 = vector.broadcast %cst_26 : f32 to vector<8x512xf32>
    %65 = arith.mulf %64, %63 : vector<8x512xf32>
    %cst_27 = arith.constant 1.45315206 : f32
    %66 = vector.broadcast %cst_27 : f32 to vector<8x512xf32>
    %67 = arith.subf %65, %66 : vector<8x512xf32>
    %68 = arith.mulf %67, %63 : vector<8x512xf32>
    %cst_28 = arith.constant 1.42141378 : f32
    %69 = vector.broadcast %cst_28 : f32 to vector<8x512xf32>
    %70 = arith.addf %68, %69 : vector<8x512xf32>
    %71 = arith.mulf %70, %63 : vector<8x512xf32>
    %cst_29 = arith.constant 0.284496725 : f32
    %72 = vector.broadcast %cst_29 : f32 to vector<8x512xf32>
    %73 = arith.subf %71, %72 : vector<8x512xf32>
    %74 = arith.mulf %73, %63 : vector<8x512xf32>
    %cst_30 = arith.constant 0.254829586 : f32
    %75 = vector.broadcast %cst_30 : f32 to vector<8x512xf32>
    %76 = arith.addf %74, %75 : vector<8x512xf32>
    %77 = arith.mulf %76, %63 : vector<8x512xf32>
    %cst_31 = arith.constant 0.000000e+00 : f32
    %78 = vector.broadcast %cst_31 : f32 to vector<8x512xf32>
    %79 = arith.subf %78, %58 : vector<8x512xf32>
    %80 = arith.mulf %79, %58 : vector<8x512xf32>
    %81 = math.exp %80 : vector<8x512xf32>
    %82 = arith.mulf %77, %81 : vector<8x512xf32>
    %cst_32 = arith.constant 1.000000e+00 : f32
    %83 = vector.broadcast %cst_32 : f32 to vector<8x512xf32>
    %84 = arith.subf %83, %82 : vector<8x512xf32>
    %85 = arith.mulf %57, %84 : vector<8x512xf32>
    %cst_33 = arith.constant 1.000000e+00 : f32
    %86 = vector.broadcast %cst_33 : f32 to vector<8x512xf32>
    %87 = arith.addf %86, %85 : vector<8x512xf32>
    %cst_34 = arith.constant 5.000000e-01 : f32
    %88 = vector.broadcast %cst_34 : f32 to vector<8x512xf32>
    %89 = arith.mulf %88, %87 : vector<8x512xf32>
    %90 = arith.subf %47, %89 : vector<8x512xf32>
    %cst_35 = arith.constant 9.99999971E-10 : f32
    %91 = vector.broadcast %cst_35 : f32 to vector<8x512xf32>
    %92 = arith.maximumf %90, %91 : vector<8x512xf32>
    %c0_36 = arith.constant 0 : index
    %c0_37 = arith.constant 0 : index
    %93 = vector.load %arg3[%c0_36, %c0_37] : memref<8x512xf32, #tpu.memory_space<vmem>>, vector<8x512xf32>
    tpu.vector_store %arg3[%c0_36, %c0_37], %92 {strides = array<i32>} : memref<8x512xf32, #tpu.memory_space<vmem>>, vector<8x512xf32>,
    return
  }
  func.func @transform_0(%arg0: i32) -> (i32, i32) {
    %c0_i32 = arith.constant 0 : i32
    %c0_i32_0 = arith.constant 0 : i32
    return %arg0, %c0_i32 : i32, i32
  }
  func.func @transform_1(%arg0: i32) -> (i32, i32) {
    %c0_i32 = arith.constant 0 : i32
    %c0_i32_0 = arith.constant 0 : i32
    return %arg0, %c0_i32 : i32, i32
  }
  func.func @transform_2(%arg0: i32) -> (i32, i32) {
    %c0_i32 = arith.constant 0 : i32
    %c0_i32_0 = arith.constant 0 : i32
    return %arg0, %c0_i32 : i32, i32
  }
}

</mosaic_0001>

<bundles_post_ra>
// kernel: _lambda_.15
= control target key start
LH: loop header
LB: loop body
LE: loop exit
PB: predicated region body
PF: predicated region fallthrough
CT: control target
= control target key end

     0   :  { %s4651_s18 = smov 0   ;;  %s4653_s19 = smov 0   ;;  %s5872_s0 = inlined_call_operand.vmem [shape: bf16[2048,128], index: 0, kind: input, shape index: {}]   ;;  %s5873_s1 = inlined_call_operand.vmem [shape: bf16[128,128], index: 1, kind: input, shape index: {}]   ;;  %s5874_s2 = inlined_call_operand.vmem [shape: f32[1,128], index: 2, kind: input, shape index: {}]   ;;  %s5875_s3 = inlined_call_operand.vmem [shape: f32[128,128], index: 3, kind: input, shape index: {}]   ;;  %s5876_s4 = inlined_call_operand.vmem [shape: f32[1,128], index: 4, kind: input, shape index: {}]   ;;  %s5877_s5 = inlined_call_operand.vmem [shape: f32[2048,128], index: 5, kind: output, shape index: {}]  }
   0x1   :  { %s4655_s20 = smov 0  }
   0x2 LB: > { %s34_s21 = sadd.s32 1, %s4615_s19  ;;  %p3578_p0 = scmp.ge.s32.totalorder %s4619_s20, 1  ;;  %s4619_s20 = sphi %s4655_s20, %s15_s20   ;;  %s4615_s19 = sphi %s4653_s19, %s6065_s19   ;;  %s4611_s18 = sphi %s4651_s18, %s6064_s18  }
   0x3   : > { %p36_p1 = scmp.ge.s32.totalorder %s34_s21, 2  ;;  %p238_p2 = scmp.lt.s32.totalorder %s4619_s20, 3 }
   0x5   : > { %s6067_s21 = smov (%p36_p1, %s34_s21), 0  ;;  %p239_p3 = pnand %p3578_p0, %p238_p2 }
   0x7   : > { %242 = sbr.rel (%p239_p3) target bundleno = 714 (0x2ca), region = 40 }
   0xc   : > { %v4267_v0 = vld [vmem:[%s5873_s1 + $0x38] sm:$0xff]   ;;  %s3579_s24 = sshll.u32 %s4611_s18, 7  ;;  %v4268_v1 = vld [vmem:[%s5873_s1 + $0x30] sm:$0xff]   ;;  %v4269_v2 = vld [vmem:[%s5873_s1 + $0x28] sm:$0xff]  }
   0xd   : > { %p284_p4 = scmp.lt.s32.totalorder %s3579_s24, 255  ;;  %3875 = vmatprep.subr.bf16.mxu0 %v4267_v0  ;;  %v4270_v3 = vld [vmem:[%s5873_s1 + $0x20] sm:$0xff]   ;;  %v4271_v5 = vld [vmem:[%s5873_s1 + $0x18] sm:$0xff]   ;;  %v4272_v6 = vld [vmem:[%s5873_s1 + $0x10] sm:$0xff]  }
   0xe   : > { %3876 = vmatpush3.bf16.msra.mxu0 %v4267_v0  ;;  %v4273_v7 = vld [vmem:[%s5873_s1 + $0x8] sm:$0xff]   ;;  %v4274_v8 = vld [vmem:[%s5873_s1] sm:$0xff]   ;;  %v2364_v21 = vld [vmem:[%s5875_s3 + $0x78] sm:$0xff] }
   0xf   : > { %s6069_s24 = smov (!%p284_p4, %s3579_s24), 255  ;;  %3877 = vmatprep.subr.bf16.mxu0 %v4268_v1  ;;  %4019 = vmatprep.subr.mxu1 %v2364_v21  ;;  %v2363_v23 = vld [vmem:[%s5875_s3 + $0x70] sm:$0xff]  ;;  %v2362_v25 = vld [vmem:[%s5875_s3 + $0x68] sm:$0xff]  ;;  %v2361_v26 = vld [vmem:[%s5875_s3 + $0x60] sm:$0xff] }
  0x10   : > { %s3580_s29 = sshll.u32 %s6069_s24, 2  ;;  %4020 = vmatpush3.msra.mxu1 %v2364_v21  ;;  %v2360_v27 = vld [vmem:[%s5875_s3 + $0x58] sm:$0xff]  ;;  %v2359_v29 = vld [vmem:[%s5875_s3 + $0x50] sm:$0xff]  ;;  %v2358_v31 = vld [vmem:[%s5875_s3 + $0x48] sm:$0xff]  ;;  %s3582_s13 = sshll.u32 %s6069_s24, 3 }
  0x11   : > { %s4684_s7 = scalar_lea.vmem %s5872_s0, %s3580_s29  ;;  %4021 = vmatprep.subr.mxu1 %v2363_v23  ;;  %v2357_v32 = vld [vmem:[%s5875_s3 + $0x40] sm:$0xff]  ;;  %v2356_v33 = vld [vmem:[%s5875_s3 + $0x38] sm:$0xff]  ;;  %v2355_v35 = vld [vmem:[%s5875_s3 + $0x30] sm:$0xff]  ;;  %s5373_s15 = scalar_lea.vmem %s5877_s5, %s3582_s13 }
  0x12   : > { %3878 = vmatpush3.bf16.msra.mxu0 %v4268_v1  ;;  %v4275_v4 = vld [vmem:[%s4684_s7] sm:$0xff]   ;;  %v4276_v9 = vld [vmem:[%s4684_s7 + $0x8] sm:$0xff]   ;;  %v4277_v10 = vld [vmem:[%s4684_s7 + $0x10] sm:$0xff]   ;;  %4022 = vmatpush3.msra.mxu1 %v2363_v23 }
  0x13   : > { %3879 = vmatprep.subr.bf16.mxu0 %v4269_v2  ;;  %3891 = vmatprep.mubr.bf16.mxu0 %v4275_v4  ;;  %v4278_v11 = vld [vmem:[%s4684_s7 + $0x18] sm:$0xff]   ;;  %v4279_v12 = vld [vmem:[%s4684_s7 + $0x20] sm:$0xff]   ;;  %v4280_v13 = vld [vmem:[%s4684_s7 + $0x28] sm:$0xff]  }
  0x14   : > { %v4281_v14 = vld [vmem:[%s4684_s7 + $0x30] sm:$0xff]   ;;  %v4282_v15 = vld [vmem:[%s4684_s7 + $0x38] sm:$0xff]   ;;  %v4283_v16 = vld [vmem:[%s4684_s7 + $0x40] sm:$0xff]   ;;  %4023 = vmatprep.subr.mxu1 %v2362_v25 }
  0x15   : > { %v4284_v17 = vld [vmem:[%s4684_s7 + $0x48] sm:$0xff]   ;;  %v4285_v18 = vld [vmem:[%s4684_s7 + $0x50] sm:$0xff]   ;;  %v4286_v19 = vld [vmem:[%s4684_s7 + $0x58] sm:$0xff]   ;;  %4024 = vmatpush3.msra.mxu1 %v2362_v25 }
  0x16   : > { %3880 = vmatpush3.bf16.msra.mxu0 %v4269_v2  ;;  %v4287_v20 = vld [vmem:[%s4684_s7 + $0x60] sm:$0xff]   ;;  %v4288_v22 = vld [vmem:[%s4684_s7 + $0x68] sm:$0xff]   ;;  %v4289_v24 = vld [vmem:[%s4684_s7 + $0x70] sm:$0xff]   ;;  %4025 = vmatprep.subr.mxu1 %v2361_v26 }
  0x17   : > { %3881 = vmatprep.subr.bf16.mxu0 %v4270_v3  ;;  %4026 = vmatpush3.msra.mxu1 %v2361_v26  ;;  %v4290_v28 = vld [vmem:[%s4684_s7 + $0x78] sm:$0xff]   ;;  %v4291_v30 = vld [vmem:[%s4684_s7 + $0x80] sm:$0xff]   ;;  %v4292_v34 = vld [vmem:[%s4684_s7 + $0x88] sm:$0xff]  }
  0x18   : > { %4027 = vmatprep.subr.mxu1 %v2360_v27  ;;  %v4293_v36 = vld [vmem:[%s4684_s7 + $0x90] sm:$0xff]   ;;  %v2354_v37 = vld [vmem:[%s5875_s3 + $0x28] sm:$0xff]  ;;  %v2353_v38 = vld [vmem:[%s5875_s3 + $0x20] sm:$0xff] }
  0x19   : > { %4028 = vmatpush3.msra.mxu1 %v2360_v27  ;;  %v2352_v39 = vld [vmem:[%s5875_s3 + $0x18] sm:$0xff]  ;;  %v2351_v41 = vld [vmem:[%s5875_s3 + $0x10] sm:$0xff]  ;;  %v4295_v42 = vld [vmem:[%s4684_s7 + $0xa0] sm:$0xff]  }
  0x1a   : > { %3882 = vmatpush3.bf16.msra.mxu0 %v4270_v3  ;;  %4029 = vmatprep.subr.mxu1 %v2359_v29  ;;  %v4294_v40 = vld [vmem:[%s4684_s7 + $0x98] sm:$0xff]   ;;  %v2350_v43 = vld [vmem:[%s5875_s3 + $0x8] sm:$0xff]  ;;  %v2349_v44 = vld [vmem:[%s5875_s3] sm:$0xff] }
  0x1b   : > { %3883 = vmatprep.subr.bf16.mxu0 %v4271_v5  ;;  %4030 = vmatpush3.msra.mxu1 %v2359_v29  ;;  %v4296_v45 = vld [vmem:[%s4684_s7 + $0xa8] sm:$0xff]   ;;  %v4297_v46 = vld [vmem:[%s4684_s7 + $0xb0] sm:$0xff]   ;;  %v4298_v47 = vld [vmem:[%s4684_s7 + $0xb8] sm:$0xff]  }
  0x1c   : > { %4031 = vmatprep.subr.mxu1 %v2358_v31  ;;  %v4299_v48 = vld [vmem:[%s4684_s7 + $0xc0] sm:$0xff]   ;;  %v4300_v49 = vld [vmem:[%s4684_s7 + $0xc8] sm:$0xff]   ;;  %v4301_v50 = vld [vmem:[%s4684_s7 + $0xd0] sm:$0xff]  }
  0x1d   : > { %4032 = vmatpush3.msra.mxu1 %v2358_v31  ;;  %v4302_v51 = vld [vmem:[%s4684_s7 + $0xd8] sm:$0xff]   ;;  %v4303_v52 = vld [vmem:[%s4684_s7 + $0xe0] sm:$0xff]   ;;  %v4304_v53 = vld [vmem:[%s4684_s7 + $0xe8] sm:$0xff]  }
  0x1e   : > { %3884 = vmatpush3.bf16.msra.mxu0 %v4271_v5  ;;  %4033 = vmatprep.subr.mxu1 %v2357_v32  ;;  %v4305_v54 = vld [vmem:[%s4684_s7 + $0xf0] sm:$0xff]   ;;  %v4306_v55 = vld [vmem:[%s4684_s7 + $0xf8] sm:$0xff]   ;;  %v4307_v56 = vld [vmem:[%s4684_s7 + $0x100] sm:$0xff]  }
  0x1f   : > { %3885 = vmatprep.subr.bf16.mxu0 %v4272_v6  ;;  %4034 = vmatpush3.msra.mxu1 %v2357_v32  ;;  %v4308_v57 = vld [vmem:[%s4684_s7 + $0x108] sm:$0xff]   ;;  %v4309_v58 = vld [vmem:[%s4684_s7 + $0x110] sm:$0xff]   ;;  %v4310_v59 = vld [vmem:[%s4684_s7 + $0x118] sm:$0xff]  }
  0x20   : > { %4035 = vmatprep.subr.mxu1 %v2356_v33  ;;  %v4311_v60 = vld [vmem:[%s4684_s7 + $0x120] sm:$0xff]   ;;  %v4312_v61 = vld [vmem:[%s4684_s7 + $0x128] sm:$0xff]   ;;  %v4313_v62 = vld [vmem:[%s4684_s7 + $0x130] sm:$0xff]  }
  0x21   : > { %4036 = vmatpush3.msra.mxu1 %v2356_v33  ;;  %v4314_v63 = vld [vmem:[%s4684_s7 + $0x138] sm:$0xff]   ;;  %v4315_v0 = vld [vmem:[%s4684_s7 + $0x140] sm:$0xff]   ;;  %v4316_v1 = vld [vmem:[%s4684_s7 + $0x148] sm:$0xff]  }
  0x22   : > { %3886 = vmatpush3.bf16.msra.mxu0 %v4272_v6  ;;  %4037 = vmatprep.subr.mxu1 %v2355_v35  ;;  %v4317_v2 = vld [vmem:[%s4684_s7 + $0x150] sm:$0xff]   ;;  %v4318_v3 = vld [vmem:[%s4684_s7 + $0x158] sm:$0xff]   ;;  %v4319_v4 = vld [vmem:[%s4684_s7 + $0x160] sm:$0xff]  }
  0x23   : > { %3887 = vmatprep.subr.bf16.mxu0 %v4273_v7  ;;  %4038 = vmatpush3.msra.mxu1 %v2355_v35  ;;  %v4320_v5 = vld [vmem:[%s4684_s7 + $0x168] sm:$0xff]   ;;  %v4321_v6 = vld [vmem:[%s4684_s7 + $0x170] sm:$0xff]  }
  0x24   : > { %4039 = vmatprep.subr.mxu1 %v2354_v37  ;;  %v4328_v29 = vld [vmem:[%s4684_s7 + $0x1a8] sm:$0xff]  }
  0x25   : > { %4040 = vmatpush3.msra.mxu1 %v2354_v37 }
  0x26   : > { %3888 = vmatpush3.bf16.msra.mxu0 %v4273_v7  ;;  %4041 = vmatprep.subr.mxu1 %v2353_v38  ;;  %v4322_v7 = vld [vmem:[%s4684_s7 + $0x178] sm:$0xff]  }
  0x27   : > { %3889 = vmatprep.subr.bf16.mxu0 %v4274_v8  ;;  %4042 = vmatpush3.msra.mxu1 %v2353_v38 }
  0x28   : > { %4043 = vmatprep.subr.mxu1 %v2352_v39 }
  0x29   : > { %4044 = vmatpush3.msra.mxu1 %v2352_v39 }
  0x2a   : > { %3890 = vmatpush3.bf16.msra.mxu0 %v4274_v8  ;;  %4045 = vmatprep.subr.mxu1 %v2351_v41  ;;  %v4323_v8 = vld [vmem:[%s4684_s7 + $0x180] sm:$0xff]  }
  0x2b   : > { %4046 = vmatpush3.msra.mxu1 %v2351_v41 }
  0x2c   : > { %4047 = vmatprep.subr.mxu1 %v2350_v43 }
  0x2d   : > { %3892 = vmatmul.mubr.bf16.vlgmr.msra.gmra.mxu0 %v4276_v9  ;;  %4048 = vmatpush3.msra.mxu1 %v2350_v43  ;;  %v4324_v9 = vld [vmem:[%s4684_s7 + $0x188] sm:$0xff]   ;;  %v4330_v43 = vld [vmem:[%s4684_s7 + $0x1b8] sm:$0xff]  }
  0x2e   : > { %3895 = vmatprep.mubr.bf16.mxu0 %v4277_v10  ;;  %4049 = vmatprep.subr.mxu1 %v2349_v44  ;;  %v4325_v10 = vld [vmem:[%s4684_s7 + $0x190] sm:$0xff]  }
  0x2f   : > { %4050 = vmatpush3.msra.mxu1 %v2349_v44  ;;  %v4331_v44 = vld [vmem:[%s4684_s7 + $0x1c0] sm:$0xff]  }
  0x35   : > { %3896 = vmatmul.mubr.bf16.gmra.mxu0 %v4278_v11 }
  0x36   : > { %3899 = vmatprep.mubr.bf16.mxu0 %v4279_v12 }
  0x3d   : > { %3900 = vmatmul.mubr.bf16.gmra.mxu0 %v4280_v13  ;;  %v4803_v13 = vld [vmem:[%s5874_s2] ss:$0 sm:$0xff] }
  0x3e   : > { %3903 = vmatprep.mubr.bf16.mxu0 %v4281_v14 }
  0x45   : > { %3904 = vmatmul.mubr.bf16.gmra.mxu0 %v4282_v15 }
  0x46   : > { %3907 = vmatprep.mubr.bf16.mxu0 %v4283_v16  ;;  %v4326_v16 = vld [vmem:[%s4684_s7 + $0x198] sm:$0xff]  }
  0x4d   : > { %3908 = vmatmul.mubr.bf16.gmra.mxu0 %v4284_v17  ;;  %v4327_v17 = vld [vmem:[%s4684_s7 + $0x1a0] sm:$0xff]  }
  0x4e   : > { %3911 = vmatprep.mubr.bf16.mxu0 %v4285_v18 }
  0x55   : > { %3912 = vmatmul.mubr.bf16.gmra.mxu0 %v4286_v19 }
  0x56   : > { %3915 = vmatprep.mubr.bf16.mxu0 %v4287_v20 }
  0x5d   : > { %3916 = vmatmul.mubr.bf16.gmra.mxu0 %v4288_v22 }
  0x5e   : > { %3919 = vmatprep.mubr.bf16.mxu0 %v4289_v24 }
  0x65   : > { %3920 = vmatmul.mubr.bf16.gmra.mxu0 %v4290_v28 }
  0x66   : > { %3923 = vmatprep.mubr.bf16.mxu0 %v4291_v30  ;;  %v4329_v30 = vld [vmem:[%s4684_s7 + $0x1b0] sm:$0xff]  }
  0x6d   : > { %3924 = vmatmul.mubr.bf16.gmra.mxu0 %v4292_v34 }
  0x6e   : > { %3927 = vmatprep.mubr.bf16.mxu0 %v4293_v36 }
  0x75   : > { %3928 = vmatmul.mubr.bf16.gmra.mxu0 %v4294_v40 }
  0x76   : > { %3931 = vmatprep.mubr.bf16.mxu0 %v4295_v42 }
  0x7d   : > { %3932 = vmatmul.mubr.bf16.gmra.mxu0 %v4296_v45 }
  0x7e   : > { %3935 = vmatprep.mubr.bf16.mxu0 %v4297_v46 }
  0x85   : > { %3936 = vmatmul.mubr.bf16.gmra.mxu0 %v4298_v47 }
  0x86   : > { %3939 = vmatprep.mubr.bf16.mxu0 %v4299_v48 }
  0x8d   : > { %3940 = vmatmul.mubr.bf16.gmra.mxu0 %v4300_v49 }
  0x8e   : > { %3943 = vmatprep.mubr.bf16.mxu0 %v4301_v50 }
  0x95   : > { %3944 = vmatmul.mubr.bf16.gmra.mxu0 %v4302_v51 }
  0x96   : > { %3947 = vmatprep.mubr.bf16.mxu0 %v4303_v52 }
  0x9d   : > { %3948 = vmatmul.mubr.bf16.gmra.mxu0 %v4304_v53 }
  0x9e   : > { %3951 = vmatprep.mubr.bf16.mxu0 %v4305_v54 }
  0xa5   : > { %3952 = vmatmul.mubr.bf16.gmra.mxu0 %v4306_v55 }
  0xa6   : > { %3955 = vmatprep.mubr.bf16.mxu0 %v4307_v56 }
  0xad   : > { %3956 = vmatmul.mubr.bf16.gmra.mxu0 %v4308_v57  ;;  %v4332_v57 = vld [vmem:[%s4684_s7 + $0x1c8] sm:$0xff]  }
  0xae   : > { %3959 = vmatprep.mubr.bf16.mxu0 %v4309_v58  ;;  %v4333_v58 = vld [vmem:[%s4684_s7 + $0x1d0] sm:$0xff]  }
  0xb5   : > { %3960 = vmatmul.mubr.bf16.gmra.mxu0 %v4310_v59 }
  0xb6   : > { %3963 = vmatprep.mubr.bf16.mxu0 %v4311_v60 }
  0xbd   : > { %3964 = vmatmul.mubr.bf16.gmra.mxu0 %v4312_v61 }
  0xbe   : > { %3967 = vmatprep.mubr.bf16.mxu0 %v4313_v62 }
  0xc5   : > { %3968 = vmatmul.mubr.bf16.gmra.mxu0 %v4314_v63 }
  0xc6   : > { %3971 = vmatprep.mubr.bf16.mxu0 %v4315_v0 }
  0xcd   : > { %3972 = vmatmul.mubr.bf16.gmra.mxu0 %v4316_v1 }
  0xce   : > { %3975 = vmatprep.mubr.bf16.mxu0 %v4317_v2 }
  0xd5   : > { %3976 = vmatmul.mubr.bf16.gmra.mxu0 %v4318_v3 }
  0xd6   : > { %3979 = vmatprep.mubr.bf16.mxu0 %v4319_v4 }
  0xdd   : > { %3980 = vmatmul.mubr.bf16.gmra.mxu0 %v4320_v5 }
  0xde   : > { %3983 = vmatprep.mubr.bf16.mxu0 %v4321_v6 }
  0xe5   : > { %3984 = vmatmul.mubr.bf16.gmra.mxu0 %v4322_v7  ;;  %v4334_v7 = vld [vmem:[%s4684_s7 + $0x1d8] sm:$0xff]  }
  0xe6   : > { %3987 = vmatprep.mubr.bf16.mxu0 %v4323_v8  ;;  %v4335_v8 = vld [vmem:[%s4684_s7 + $0x1e0] sm:$0xff]  }
  0xed   : > { %v3893_v11 = vpop.f32.mrf.mxu0  ;;  %3988 = vmatmul.mubr.bf16.gmra.mxu0 %v4324_v9 }
  0xee   : > { %3991 = vmatprep.mubr.bf16.mxu0 %v4325_v10  ;;  %v4813_v20 = vadd.f32 %v3893_v11, %v4803_v13 }
  0xef   : > { %v924_v12 = vpop.f32.mrf.mxu0 }
  0xf0   : > { %v4806_v14 = vadd.f32 %v4803_v13, %v924_v12  ;;  %v2223_v26 = vmul.f32 %v4813_v20, %v4813_v20 }
  0xf1   : > { %v3894_v15 = vpop.f32.mrf.mxu0 }
  0xf2   : > { %v2221_v18 = vmul.f32 %v4806_v14, %v4806_v14  ;;  %v4821_v24 = vadd.f32 %v3894_v15, %v4803_v13 }
  0xf3   : > { %v927_v19 = vpop.f32.mrf.mxu0 }
  0xf4   : > { %4051 = vmatprep.mubr.f32.mxu1 %v2221_v18  ;;  %v4816_v21 = vadd.f32 %v4803_v13, %v927_v19  ;;  %v2224_v31 = vmul.f32 %v4821_v24, %v4821_v24 }
  0xf5   : > { %v3897_v22 = vpop.f32.mrf.mxu0  ;;  %3992 = vmatmul.mubr.bf16.gmra.mxu0 %v4326_v16 }
  0xf6   : > { %3995 = vmatprep.mubr.bf16.mxu0 %v4327_v17  ;;  %v2222_v23 = vmul.f32 %v4816_v21, %v4816_v21  ;;  %v4835_v34 = vadd.f32 %v3897_v22, %v4803_v13 }
  0xf7   : > { %v940_v25 = vpop.f32.mrf.mxu0 }
  0xf8   : > { %4052 = vmatmul.mubr.f32.vlgmr.msra.gmra.mxu1 %v2222_v23  ;;  %v4826_v27 = vadd.f32 %v4803_v13, %v940_v25  ;;  %v2227_v40 = vmul.f32 %v4835_v34, %v4835_v34 }
  0xf9   : > { %v3898_v28 = vpop.f32.mrf.mxu0  ;;  %4054 = vmatprep.mubr.f32.mxu1 %v2223_v26  ;;  %v4336_v26 = vld [vmem:[%s4684_s7 + $0x1e8] sm:$0xff]  }
  0xfa   : > { %v2225_v32 = vmul.f32 %v4826_v27, %v4826_v27  ;;  %v4843_v38 = vadd.f32 %v3898_v28, %v4803_v13  ;;  %v4337_v28 = vld [vmem:[%s4684_s7 + $0x1f0] sm:$0xff]  }
  0xfb   : > { %v943_v33 = vpop.f32.mrf.mxu0 }
  0xfc   : > { %4055 = vmatmul.mubr.f32.gmra.mxu1 %v2224_v31  ;;  %v4838_v35 = vadd.f32 %v4803_v13, %v943_v33  ;;  %v2228_v45 = vmul.f32 %v4843_v38, %v4843_v38 }
  0xfd   : > { %v3901_v36 = vpop.f32.mrf.mxu0  ;;  %3996 = vmatmul.mubr.bf16.gmra.mxu0 %v4328_v29  ;;  %4057 = vmatprep.mubr.f32.mxu1 %v2225_v32 }
  0xfe   : > { %3999 = vmatprep.mubr.bf16.mxu0 %v4329_v30  ;;  %v2226_v37 = vmul.f32 %v4838_v35, %v4838_v35  ;;  %v4857_v48 = vadd.f32 %v3901_v36, %v4803_v13 }
  0xff   : > { %v956_v39 = vpop.f32.mrf.mxu0 }
 0x100   : > { %4058 = vmatmul.mubr.f32.gmra.mxu1 %v2226_v37  ;;  %v4848_v41 = vadd.f32 %v4803_v13, %v956_v39  ;;  %v2231_v54 = vmul.f32 %v4857_v48, %v4857_v48 }
 0x101   : > { %v3902_v42 = vpop.f32.mrf.mxu0  ;;  %4060 = vmatprep.mubr.f32.mxu1 %v2227_v40 }
 0x102   : > { %v2229_v46 = vmul.f32 %v4848_v41, %v4848_v41  ;;  %v4865_v52 = vadd.f32 %v3902_v42, %v4803_v13 }
 0x103   : > { %v959_v47 = vpop.f32.mrf.mxu0 }
 0x104   : > { %4061 = vmatmul.mubr.f32.gmra.mxu1 %v2228_v45  ;;  %v4860_v49 = vadd.f32 %v4803_v13, %v959_v47  ;;  %v2232_v59 = vmul.f32 %v4865_v52, %v4865_v52  ;;  %v4338_v45 = vld [vmem:[%s4684_s7 + $0x1f8] sm:$0xff]  }
 0x105   : > { %v3905_v50 = vpop.f32.mrf.mxu0  ;;  %4000 = vmatmul.mubr.bf16.gmra.mxu0 %v4330_v43  ;;  %4063 = vmatprep.mubr.f32.mxu1 %v2229_v46 }
 0x106   : > { %4003 = vmatprep.mubr.bf16.mxu0 %v4331_v44  ;;  %v2230_v51 = vmul.f32 %v4860_v49, %v4860_v49  ;;  %v4879_v62 = vadd.f32 %v3905_v50, %v4803_v13 }
 0x107   : > { %v972_v53 = vpop.f32.mrf.mxu0 }
 0x108   : > { %4064 = vmatmul.mubr.f32.gmra.mxu1 %v2230_v51  ;;  %v4870_v55 = vadd.f32 %v4803_v13, %v972_v53  ;;  %v2235_v4 = vmul.f32 %v4879_v62, %v4879_v62 }
 0x109   : > { %v3906_v56 = vpop.f32.mrf.mxu0  ;;  %4066 = vmatprep.mubr.f32.mxu1 %v2231_v54 }
 0x10a   : > { %v2233_v60 = vmul.f32 %v4870_v55, %v4870_v55  ;;  %v4887_v2 = vadd.f32 %v3906_v56, %v4803_v13 }
 0x10b   : > { %v975_v61 = vpop.f32.mrf.mxu0 }
 0x10c   : > { %4067 = vmatmul.mubr.f32.gmra.mxu1 %v2232_v59  ;;  %v4882_v63 = vadd.f32 %v4803_v13, %v975_v61  ;;  %v2236_v9 = vmul.f32 %v4887_v2, %v4887_v2 }
 0x10d   : > { %v3909_v0 = vpop.f32.mrf.mxu0  ;;  %4004 = vmatmul.mubr.bf16.gmra.mxu0 %v4332_v57  ;;  %4069 = vmatprep.mubr.f32.mxu1 %v2233_v60 }
 0x10e   : > { %4007 = vmatprep.mubr.bf16.mxu0 %v4333_v58  ;;  %v2234_v1 = vmul.f32 %v4882_v63, %v4882_v63  ;;  %v4901_v12 = vadd.f32 %v3909_v0, %v4803_v13 }
 0x10f   : > { %v988_v3 = vpop.f32.mrf.mxu0 }
 0x110   : > { %4070 = vmatmul.mubr.f32.gmra.mxu1 %v2234_v1  ;;  %v4892_v5 = vadd.f32 %v4803_v13, %v988_v3  ;;  %v2239_v22 = vmul.f32 %v4901_v12, %v4901_v12 }
 0x111   : > { %v3910_v6 = vpop.f32.mrf.mxu0  ;;  %4072 = vmatprep.mubr.f32.mxu1 %v2235_v4 }
 0x112   : > { %v2237_v10 = vmul.f32 %v4892_v5, %v4892_v5  ;;  %v4909_v18 = vadd.f32 %v3910_v6, %v4803_v13 }
 0x113   : > { %v991_v11 = vpop.f32.mrf.mxu0 }
 0x114   : > { %4073 = vmatmul.mubr.f32.gmra.mxu1 %v2236_v9  ;;  %v4904_v15 = vadd.f32 %v4803_v13, %v991_v11  ;;  %v2240_v29 = vmul.f32 %v4909_v18, %v4909_v18 }
 0x115   : > { %v3913_v16 = vpop.f32.mrf.mxu0  ;;  %4008 = vmatmul.mubr.bf16.gmra.mxu0 %v4334_v7  ;;  %4075 = vmatprep.mubr.f32.mxu1 %v2237_v10 }
 0x116   : > { %4011 = vmatprep.mubr.bf16.mxu0 %v4335_v8  ;;  %v2238_v17 = vmul.f32 %v4904_v15, %v4904_v15  ;;  %v4923_v32 = vadd.f32 %v3913_v16, %v4803_v13 }
 0x117   : > { %v1004_v19 = vpop.f32.mrf.mxu0 }
 0x118   : > { %4076 = vmatmul.mubr.f32.gmra.mxu1 %v2238_v17  ;;  %v4914_v23 = vadd.f32 %v4803_v13, %v1004_v19  ;;  %v2243_v42 = vmul.f32 %v4923_v32, %v4923_v32 }
 0x119   : > { %v3914_v25 = vpop.f32.mrf.mxu0  ;;  %4078 = vmatprep.mubr.f32.mxu1 %v2239_v22 }
 0x11a   : > { %v2241_v30 = vmul.f32 %v4914_v23, %v4914_v23  ;;  %v4931_v39 = vadd.f32 %v3914_v25, %v4803_v13 }
 0x11b   : > { %v1007_v31 = vpop.f32.mrf.mxu0 }
 0x11c   : > { %4079 = vmatmul.mubr.f32.gmra.mxu1 %v2240_v29  ;;  %v4926_v33 = vadd.f32 %v4803_v13, %v1007_v31  ;;  %v2244_v46 = vmul.f32 %v4931_v39, %v4931_v39 }
 0x11d   : > { %v3917_v36 = vpop.f32.mrf.mxu0  ;;  %4012 = vmatmul.mubr.bf16.gmra.mxu0 %v4336_v26  ;;  %4081 = vmatprep.mubr.f32.mxu1 %v2241_v30 }
 0x11e   : > { %4015 = vmatprep.mubr.bf16.mxu0 %v4337_v28  ;;  %v2242_v37 = vmul.f32 %v4926_v33, %v4926_v33  ;;  %v4944_v51 = vadd.f32 %v3917_v36, %v4803_v13 }
 0x11f   : > { %v1020_v40 = vpop.f32.mrf.mxu0 }
 0x120   : > { %4082 = vmatmul.mubr.f32.gmra.mxu1 %v2242_v37  ;;  %v4936_v43 = vadd.f32 %v4803_v13, %v1020_v40  ;;  %v2247_v59 = vmul.f32 %v4944_v51, %v4944_v51 }
 0x121   : > { %v3918_v44 = vpop.f32.mrf.mxu0  ;;  %4084 = vmatprep.mubr.f32.mxu1 %v2243_v42 }
 0x122   : > { %v2245_v47 = vmul.f32 %v4936_v43, %v4936_v43  ;;  %v4952_v57 = vadd.f32 %v3918_v44, %v4803_v13 }
 0x123   : > { %v1023_v50 = vpop.f32.mrf.mxu0 }
 0x124   : > { %4085 = vmatmul.mubr.f32.gmra.mxu1 %v2244_v46  ;;  %v4947_v53 = vadd.f32 %v4803_v13, %v1023_v50  ;;  %v2248_v0 = vmul.f32 %v4952_v57, %v4952_v57 }
 0x125   : > { %v3921_v54 = vpop.f32.mrf.mxu0  ;;  %4016 = vmatmul.mubr.bf16.gmra.mxu0 %v4338_v45  ;;  %4087 = vmatprep.mubr.f32.mxu1 %v2245_v47 }
 0x126   : > { %v2246_v56 = vmul.f32 %v4947_v53, %v4947_v53  ;;  %v4964_v4 = vadd.f32 %v3921_v54, %v4803_v13 }
 0x127   : > { %v1036_v58 = vpop.f32.mrf.mxu0 }
 0x128   : > { %4088 = vmatmul.mubr.f32.gmra.mxu1 %v2246_v56  ;;  %v4957_v60 = vadd.f32 %v4803_v13, %v1036_v58  ;;  %v2251_v11 = vmul.f32 %v4964_v4, %v4964_v4 }
 0x129   : > { %v3922_v61 = vpop.f32.mrf.mxu0  ;;  %4090 = vmatprep.mubr.f32.mxu1 %v2247_v59 }
 0x12a   : > { %v2249_v1 = vmul.f32 %v4957_v60, %v4957_v60  ;;  %v4972_v9 = vadd.f32 %v3922_v61, %v4803_v13 }
 0x12b   : > { %v1039_v3 = vpop.f32.mrf.mxu0 }
 0x12c   : > { %4091 = vmatmul.mubr.f32.gmra.mxu1 %v2248_v0  ;;  %v4967_v6 = vadd.f32 %v4803_v13, %v1039_v3  ;;  %v2252_v19 = vmul.f32 %v4972_v9, %v4972_v9 }
 0x12d   : > { %v3925_v7 = vpop.f32.mrf.mxu0  ;;  %4093 = vmatprep.mubr.f32.mxu1 %v2249_v1 }
 0x12e   : > { %v2250_v8 = vmul.f32 %v4967_v6, %v4967_v6  ;;  %v4984_v26 = vadd.f32 %v3925_v7, %v4803_v13 }
 0x12f   : > { %v1052_v10 = vpop.f32.mrf.mxu0 }
 0x130   : > { %4094 = vmatmul.mubr.f32.gmra.mxu1 %v2250_v8  ;;  %v4977_v16 = vadd.f32 %v4803_v13, %v1052_v10  ;;  %v2255_v37 = vmul.f32 %v4984_v26, %v4984_v26 }
 0x131   : > { %v3926_v17 = vpop.f32.mrf.mxu0  ;;  %4096 = vmatprep.mubr.f32.mxu1 %v2251_v11 }
 0x132   : > { %v2253_v22 = vmul.f32 %v4977_v16, %v4977_v16  ;;  %v4992_v31 = vadd.f32 %v3926_v17, %v4803_v13 }
 0x133   : > { %v1055_v25 = vpop.f32.mrf.mxu0 }
 0x134   : > { %4097 = vmatmul.mubr.f32.gmra.mxu1 %v2252_v19  ;;  %v4987_v28 = vadd.f32 %v4803_v13, %v1055_v25  ;;  %v2256_v44 = vmul.f32 %v4992_v31, %v4992_v31 }
 0x135   : > { %v3929_v29 = vpop.f32.mrf.mxu0  ;;  %4099 = vmatprep.mubr.f32.mxu1 %v2253_v22 }
 0x136   : > { %v2254_v30 = vmul.f32 %v4987_v28, %v4987_v28  ;;  %v5004_v47 = vadd.f32 %v3929_v29, %v4803_v13 }
 0x137   : > { %v1068_v36 = vpop.f32.mrf.mxu0 }
 0x138   : > { %4100 = vmatmul.mubr.f32.gmra.mxu1 %v2254_v30  ;;  %v4997_v40 = vadd.f32 %v4803_v13, %v1068_v36  ;;  %v2259_v61 = vmul.f32 %v5004_v47, %v5004_v47 }
 0x139   : > { %v3930_v42 = vpop.f32.mrf.mxu0  ;;  %4102 = vmatprep.mubr.f32.mxu1 %v2255_v37 }
 0x13a   : > { %v2257_v45 = vmul.f32 %v4997_v40, %v4997_v40  ;;  %v5012_v58 = vadd.f32 %v3930_v42, %v4803_v13 }
 0x13b   : > { %v1071_v46 = vpop.f32.mrf.mxu0 }
 0x13c   : > { %4103 = vmatmul.mubr.f32.gmra.mxu1 %v2256_v44  ;;  %v5007_v50 = vadd.f32 %v4803_v13, %v1071_v46  ;;  %v2260_v3 = vmul.f32 %v5012_v58, %v5012_v58 }
 0x13d   : > { %v3933_v54 = vpop.f32.mrf.mxu0  ;;  %4105 = vmatprep.mubr.f32.mxu1 %v2257_v45 }
 0x13e   : > { %v2258_v56 = vmul.f32 %v5007_v50, %v5007_v50  ;;  %v5024_v10 = vadd.f32 %v3933_v54, %v4803_v13 }
 0x13f   : > { %v1084_v59 = vpop.f32.mrf.mxu0 }
 0x140   : > { %4106 = vmatmul.mubr.f32.gmra.mxu1 %v2258_v56  ;;  %v5017_v0 = vadd.f32 %v4803_v13, %v1084_v59  ;;  %v2263_v29 = vmul.f32 %v5024_v10, %v5024_v10 }
 0x141   : > { %v3934_v1 = vpop.f32.mrf.mxu0  ;;  %4108 = vmatprep.mubr.f32.mxu1 %v2259_v61 }
 0x142   : > { %v2261_v7 = vmul.f32 %v5017_v0, %v5017_v0  ;;  %v5032_v22 = vadd.f32 %v3934_v1, %v4803_v13 }
 0x143   : > { %v1087_v8 = vpop.f32.mrf.mxu0 }
 0x144   : > { %4109 = vmatmul.mubr.f32.gmra.mxu1 %v2260_v3  ;;  %v5027_v11 = vadd.f32 %v4803_v13, %v1087_v8  ;;  %v2264_v37 = vmul.f32 %v5032_v22, %v5032_v22 }
 0x145   : > { %v3937_v17 = vpop.f32.mrf.mxu0  ;;  %4111 = vmatprep.mubr.f32.mxu1 %v2261_v7 }
 0x146   : > { %v2262_v19 = vmul.f32 %v5027_v11, %v5027_v11  ;;  %v5044_v45 = vadd.f32 %v3937_v17, %v4803_v13 }
 0x147   : > { %v1100_v25 = vpop.f32.mrf.mxu0 }
 0x148   : > { %4112 = vmatmul.mubr.f32.gmra.mxu1 %v2262_v19  ;;  %v5037_v30 = vadd.f32 %v4803_v13, %v1100_v25  ;;  %5940 = vst [vmem:[#allocation2_spill] sm:$0xff] %v5044_v45  ;;  %v2267_v1 = vmul.f32 %v5044_v45, %v5044_v45 }
 0x149   : > { %v3938_v36 = vpop.f32.mrf.mxu0  ;;  %4114 = vmatprep.mubr.f32.mxu1 %v2263_v29 }
 0x14a   : > { %v2265_v42 = vmul.f32 %v5037_v30, %v5037_v30  ;;  %v5052_v59 = vadd.f32 %v3938_v36, %v4803_v13 }
 0x14b   : > { %v1103_v44 = vpop.f32.mrf.mxu0 }
 0x14c   : > { %4115 = vmatmul.mubr.f32.gmra.mxu1 %v2264_v37  ;;  %v5047_v46 = vadd.f32 %v4803_v13, %v1103_v44  ;;  %5941 = vst [vmem:[#allocation3_spill] sm:$0xff] %v5052_v59  ;;  %v2268_v8 = vmul.f32 %v5052_v59, %v5052_v59 }
 0x14d   : > { %v3941_v54 = vpop.f32.mrf.mxu0  ;;  %4117 = vmatprep.mubr.f32.mxu1 %v2265_v42 }
 0x14e   : > { %v2266_v56 = vmul.f32 %v5047_v46, %v5047_v46  ;;  %v5064_v25 = vadd.f32 %v3941_v54, %v4803_v13 }
 0x14f   : > { %v1116_v61 = vpop.f32.mrf.mxu0 }
 0x150   : > { %4118 = vmatmul.mubr.f32.gmra.mxu1 %v2266_v56  ;;  %v5057_v3 = vadd.f32 %v4803_v13, %v1116_v61  ;;  %5943 = vst [vmem:[#allocation5_spill] sm:$0xff] %v5064_v25  ;;  %v2271_v56 = vmul.f32 %v5064_v25, %v5064_v25 }
 0x151   : > { %v3942_v7 = vpop.f32.mrf.mxu0  ;;  %4120 = vmatprep.mubr.f32.mxu1 %v2267_v1 }
 0x152   : > { %5942 = vst [vmem:[#allocation4_spill] sm:$0xff] %v5057_v3  ;;  %v2269_v17 = vmul.f32 %v5057_v3, %v5057_v3  ;;  %v5072_v42 = vadd.f32 %v3942_v7, %v4803_v13 }
 0x153   : > { %v1119_v19 = vpop.f32.mrf.mxu0 }
 0x154   : > { %4121 = vmatmul.mubr.f32.gmra.mxu1 %v2268_v8  ;;  %v5067_v29 = vadd.f32 %v4803_v13, %v1119_v19  ;;  %5945 = vst [vmem:[#allocation7_spill] sm:$0xff] %v5072_v42  ;;  %v2272_v1 = vmul.f32 %v5072_v42, %v5072_v42 }
 0x155   : > { %v3945_v36 = vpop.f32.mrf.mxu0  ;;  %4123 = vmatprep.mubr.f32.mxu1 %v2269_v17 }
 0x156   : > { %5944 = vst [vmem:[#allocation6_spill] sm:$0xff] %v5067_v29  ;;  %v2270_v37 = vmul.f32 %v5067_v29, %v5067_v29  ;;  %v5084_v7 = vadd.f32 %v3945_v36, %v4803_v13 }
 0x157   : > { %v1132_v44 = vpop.f32.mrf.mxu0 }
 0x158   : > { %4124 = vmatmul.mubr.f32.gmra.mxu1 %v2270_v37  ;;  %v5077_v54 = vadd.f32 %v4803_v13, %v1132_v44  ;;  %5947 = vst [vmem:[#allocation9_spill] sm:$0xff] %v5084_v7 }
 0x159   : > { %v3946_v61 = vpop.f32.mrf.mxu0  ;;  %4126 = vmatprep.mubr.f32.mxu1 %v2271_v56 }
 0x15a   : > { %5946 = vst [vmem:[#allocation8_spill] sm:$0xff] %v5077_v54  ;;  %v2273_v8 = vmul.f32 %v5077_v54, %v5077_v54  ;;  %v5092_v56 = vadd.f32 %v3946_v61, %v4803_v13  ;;  %v2275_v54 = vmul.f32 %v5084_v7, %v5084_v7 }
 0x15b   : > { %v1135_v17 = vpop.f32.mrf.mxu0 }
 0x15c   : > { %4127 = vmatmul.mubr.f32.gmra.mxu1 %v2272_v1  ;;  %v5087_v19 = vadd.f32 %v4803_v13, %v1135_v17  ;;  %5949 = vst [vmem:[#allocation11_spill] sm:$0xff] %v5092_v56  ;;  %v2276_v17 = vmul.f32 %v5092_v56, %v5092_v56 }
 0x15d   : > { %v3949_v37 = vpop.f32.mrf.mxu0  ;;  %4129 = vmatprep.mubr.f32.mxu1 %v2273_v8 }
 0x15e   : > { %5948 = vst [vmem:[#allocation10_spill] sm:$0xff] %v5087_v19  ;;  %v2274_v44 = vmul.f32 %v5087_v19, %v5087_v19  ;;  %v5104_v61 = vadd.f32 %v3949_v37, %v4803_v13 }
 0x15f   : > { %v1148_v25 = vpop.f32.mrf.mxu0 }
 0x160   : > { %4130 = vmatmul.mubr.f32.gmra.mxu1 %v2274_v44  ;;  %v5097_v36 = vadd.f32 %v4803_v13, %v1148_v25  ;;  %5951 = vst [vmem:[#allocation13_spill] sm:$0xff] %v5104_v61 }
 0x161   : > { %v3950_v1 = vpop.f32.mrf.mxu0  ;;  %4132 = vmatprep.mubr.f32.mxu1 %v2275_v54 }
 0x162   : > { %5950 = vst [vmem:[#allocation12_spill] sm:$0xff] %v5097_v36  ;;  %v2277_v8 = vmul.f32 %v5097_v36, %v5097_v36  ;;  %v5112_v54 = vadd.f32 %v3950_v1, %v4803_v13  ;;  %v2279_v36 = vmul.f32 %v5104_v61, %v5104_v61 }
 0x163   : > { %v1151_v19 = vpop.f32.mrf.mxu0 }
 0x164   : > { %4133 = vmatmul.mubr.f32.gmra.mxu1 %v2276_v17  ;;  %v5107_v42 = vadd.f32 %v4803_v13, %v1151_v19  ;;  %5953 = vst [vmem:[#allocation15_spill] sm:$0xff] %v5112_v54  ;;  %v2280_v19 = vmul.f32 %v5112_v54, %v5112_v54 }
 0x165   : > { %v3953_v44 = vpop.f32.mrf.mxu0  ;;  %4135 = vmatprep.mubr.f32.mxu1 %v2277_v8 }
 0x166   : > { %5952 = vst [vmem:[#allocation14_spill] sm:$0xff] %v5107_v42  ;;  %v2278_v25 = vmul.f32 %v5107_v42, %v5107_v42  ;;  %v5124_v1 = vadd.f32 %v3953_v44, %v4803_v13 }
 0x167   : > { %v1164_v7 = vpop.f32.mrf.mxu0 }
 0x168   : > { %4136 = vmatmul.mubr.f32.gmra.mxu1 %v2278_v25  ;;  %v5117_v37 = vadd.f32 %v4803_v13, %v1164_v7  ;;  %5955 = vst [vmem:[#allocation17_spill] sm:$0xff] %v5124_v1 }
 0x169   : > { %v3954_v17 = vpop.f32.mrf.mxu0  ;;  %4138 = vmatprep.mubr.f32.mxu1 %v2279_v36 }
 0x16a   : > { %5954 = vst [vmem:[#allocation16_spill] sm:$0xff] %v5117_v37  ;;  %v2281_v8 = vmul.f32 %v5117_v37, %v5117_v37  ;;  %v5132_v36 = vadd.f32 %v3954_v17, %v4803_v13  ;;  %v2283_v37 = vmul.f32 %v5124_v1, %v5124_v1 }
 0x16b   : > { %v1167_v42 = vpop.f32.mrf.mxu0 }
 0x16c   : > { %4139 = vmatmul.mubr.f32.gmra.mxu1 %v2280_v19  ;;  %v5127_v56 = vadd.f32 %v4803_v13, %v1167_v42  ;;  %5957 = vst [vmem:[#allocation19_spill] sm:$0xff] %v5132_v36  ;;  %v2284_v42 = vmul.f32 %v5132_v36, %v5132_v36 }
 0x16d   : > { %v3957_v25 = vpop.f32.mrf.mxu0  ;;  %4141 = vmatprep.mubr.f32.mxu1 %v2281_v8 }
 0x16e   : > { %5956 = vst [vmem:[#allocation18_spill] sm:$0xff] %v5127_v56  ;;  %v2282_v7 = vmul.f32 %v5127_v56, %v5127_v56  ;;  %v5144_v17 = vadd.f32 %v3957_v25, %v4803_v13 }
 0x16f   : > { %v1180_v61 = vpop.f32.mrf.mxu0 }
 0x170   : > { %4142 = vmatmul.mubr.f32.gmra.mxu1 %v2282_v7  ;;  %v5137_v44 = vadd.f32 %v4803_v13, %v1180_v61  ;;  %5959 = vst [vmem:[#allocation21_spill] sm:$0xff] %v5144_v17 }
 0x171   : > { %v3958_v19 = vpop.f32.mrf.mxu0  ;;  %4144 = vmatprep.mubr.f32.mxu1 %v2283_v37 }
 0x172   : > { %5958 = vst [vmem:[#allocation20_spill] sm:$0xff] %v5137_v44  ;;  %v2285_v8 = vmul.f32 %v5137_v44, %v5137_v44  ;;  %v5152_v37 = vadd.f32 %v3958_v19, %v4803_v13  ;;  %v2287_v44 = vmul.f32 %v5144_v17, %v5144_v17 }
 0x173   : > { %v1183_v56 = vpop.f32.mrf.mxu0 }
 0x174   : > { %4145 = vmatmul.mubr.f32.gmra.mxu1 %v2284_v42  ;;  %v5147_v54 = vadd.f32 %v4803_v13, %v1183_v56  ;;  %5961 = vst [vmem:[#allocation23_spill] sm:$0xff] %v5152_v37  ;;  %v2288_v56 = vmul.f32 %v5152_v37, %v5152_v37 }
 0x175   : > { %v3961_v7 = vpop.f32.mrf.mxu0  ;;  %4147 = vmatprep.mubr.f32.mxu1 %v2285_v8 }
 0x176   : > { %5960 = vst [vmem:[#allocation22_spill] sm:$0xff] %v5147_v54  ;;  %v2286_v61 = vmul.f32 %v5147_v54, %v5147_v54  ;;  %v5164_v19 = vadd.f32 %v3961_v7, %v4803_v13 }
 0x177   : > { %v1196_v1 = vpop.f32.mrf.mxu0 }
 0x178   : > { %4148 = vmatmul.mubr.f32.gmra.mxu1 %v2286_v61  ;;  %v5157_v25 = vadd.f32 %v4803_v13, %v1196_v1  ;;  %5963 = vst [vmem:[#allocation25_spill] sm:$0xff] %v5164_v19 }
 0x179   : > { %v3962_v42 = vpop.f32.mrf.mxu0  ;;  %4150 = vmatprep.mubr.f32.mxu1 %v2287_v44 }
 0x17a   : > { %5962 = vst [vmem:[#allocation24_spill] sm:$0xff] %v5157_v25  ;;  %v2289_v8 = vmul.f32 %v5157_v25, %v5157_v25  ;;  %v5172_v44 = vadd.f32 %v3962_v42, %v4803_v13  ;;  %v2291_v25 = vmul.f32 %v5164_v19, %v5164_v19 }
 0x17b   : > { %v1199_v54 = vpop.f32.mrf.mxu0 }
 0x17c   : > { %4151 = vmatmul.mubr.f32.gmra.mxu1 %v2288_v56  ;;  %v5167_v36 = vadd.f32 %v4803_v13, %v1199_v54  ;;  %5965 = vst [vmem:[#allocation27_spill] sm:$0xff] %v5172_v44  ;;  %v2292_v54 = vmul.f32 %v5172_v44, %v5172_v44 }
 0x17d   : > { %v3965_v61 = vpop.f32.mrf.mxu0  ;;  %4153 = vmatprep.mubr.f32.mxu1 %v2289_v8 }
 0x17e   : > { %5964 = vst [vmem:[#allocation26_spill] sm:$0xff] %v5167_v36  ;;  %v2290_v1 = vmul.f32 %v5167_v36, %v5167_v36  ;;  %v5184_v42 = vadd.f32 %v3965_v61, %v4803_v13 }
 0x17f   : > { %v1212_v17 = vpop.f32.mrf.mxu0 }
 0x180   : > { %4154 = vmatmul.mubr.f32.gmra.mxu1 %v2290_v1  ;;  %v5177_v7 = vadd.f32 %v4803_v13, %v1212_v17  ;;  %5967 = vst [vmem:[#allocation29_spill] sm:$0xff] %v5184_v42 }
 0x181   : > { %v3966_v56 = vpop.f32.mrf.mxu0  ;;  %4156 = vmatprep.mubr.f32.mxu1 %v2291_v25 }
 0x182   : > { %5966 = vst [vmem:[#allocation28_spill] sm:$0xff] %v5177_v7  ;;  %v2293_v8 = vmul.f32 %v5177_v7, %v5177_v7  ;;  %v5192_v25 = vadd.f32 %v3966_v56, %v4803_v13  ;;  %v2295_v7 = vmul.f32 %v5184_v42, %v5184_v42 }
 0x183   : > { %v1215_v36 = vpop.f32.mrf.mxu0 }
 0x184   : > { %4157 = vmatmul.mubr.f32.gmra.mxu1 %v2292_v54  ;;  %v5187_v37 = vadd.f32 %v4803_v13, %v1215_v36  ;;  %5969 = vst [vmem:[#allocation31_spill] sm:$0xff] %v5192_v25  ;;  %v2296_v36 = vmul.f32 %v5192_v25, %v5192_v25 }
 0x185   : > { %v3969_v1 = vpop.f32.mrf.mxu0  ;;  %4159 = vmatprep.mubr.f32.mxu1 %v2293_v8 }
 0x186   : > { %5968 = vst [vmem:[#allocation30_spill] sm:$0xff] %v5187_v37  ;;  %v2294_v17 = vmul.f32 %v5187_v37, %v5187_v37  ;;  %v5204_v56 = vadd.f32 %v3969_v1, %v4803_v13 }
 0x187   : > { %v1228_v19 = vpop.f32.mrf.mxu0 }
 0x188   : > { %4160 = vmatmul.mubr.f32.gmra.mxu1 %v2294_v17  ;;  %v5197_v61 = vadd.f32 %v4803_v13, %v1228_v19  ;;  %5971 = vst [vmem:[#allocation33_spill] sm:$0xff] %v5204_v56 }
 0x189   : > { %v3970_v54 = vpop.f32.mrf.mxu0  ;;  %4162 = vmatprep.mubr.f32.mxu1 %v2295_v7 }
 0x18a   : > { %5970 = vst [vmem:[#allocation32_spill] sm:$0xff] %v5197_v61  ;;  %v2297_v8 = vmul.f32 %v5197_v61, %v5197_v61  ;;  %v5212_v7 = vadd.f32 %v3970_v54, %v4803_v13  ;;  %v2299_v61 = vmul.f32 %v5204_v56, %v5204_v56 }
 0x18b   : > { %v1231_v37 = vpop.f32.mrf.mxu0 }
 0x18c   : > { %4163 = vmatmul.mubr.f32.gmra.mxu1 %v2296_v36  ;;  %v5207_v44 = vadd.f32 %v4803_v13, %v1231_v37  ;;  %5973 = vst [vmem:[#allocation35_spill] sm:$0xff] %v5212_v7  ;;  %v2300_v37 = vmul.f32 %v5212_v7, %v5212_v7 }
 0x18d   : > { %v3973_v17 = vpop.f32.mrf.mxu0  ;;  %4165 = vmatprep.mubr.f32.mxu1 %v2297_v8 }
 0x18e   : > { %5972 = vst [vmem:[#allocation34_spill] sm:$0xff] %v5207_v44  ;;  %v2298_v19 = vmul.f32 %v5207_v44, %v5207_v44  ;;  %v5224_v54 = vadd.f32 %v3973_v17, %v4803_v13 }
 0x18f   : > { %v1244_v42 = vpop.f32.mrf.mxu0 }
 0x190   : > { %4166 = vmatmul.mubr.f32.gmra.mxu1 %v2298_v19  ;;  %v5217_v1 = vadd.f32 %v4803_v13, %v1244_v42  ;;  %5975 = vst [vmem:[#allocation37_spill] sm:$0xff] %v5224_v54 }
 0x191   : > { %v3974_v36 = vpop.f32.mrf.mxu0  ;;  %4168 = vmatprep.mubr.f32.mxu1 %v2299_v61 }
 0x192   : > { %5974 = vst [vmem:[#allocation36_spill] sm:$0xff] %v5217_v1  ;;  %v2301_v8 = vmul.f32 %v5217_v1, %v5217_v1  ;;  %v5232_v61 = vadd.f32 %v3974_v36, %v4803_v13  ;;  %v2303_v1 = vmul.f32 %v5224_v54, %v5224_v54 }
 0x193   : > { %v1247_v44 = vpop.f32.mrf.mxu0 }
 0x194   : > { %4169 = vmatmul.mubr.f32.gmra.mxu1 %v2300_v37  ;;  %v5227_v25 = vadd.f32 %v4803_v13, %v1247_v44  ;;  %5977 = vst [vmem:[#allocation39_spill] sm:$0xff] %v5232_v61  ;;  %v2304_v44 = vmul.f32 %v5232_v61, %v5232_v61 }
 0x195   : > { %v3977_v19 = vpop.f32.mrf.mxu0  ;;  %4171 = vmatprep.mubr.f32.mxu1 %v2301_v8 }
 0x196   : > { %5976 = vst [vmem:[#allocation38_spill] sm:$0xff] %v5227_v25  ;;  %v2302_v42 = vmul.f32 %v5227_v25, %v5227_v25  ;;  %v5244_v36 = vadd.f32 %v3977_v19, %v4803_v13 }
 0x197   : > { %v1260_v56 = vpop.f32.mrf.mxu0 }
 0x198   : > { %4172 = vmatmul.mubr.f32.gmra.mxu1 %v2302_v42  ;;  %v5237_v17 = vadd.f32 %v4803_v13, %v1260_v56  ;;  %5979 = vst [vmem:[#allocation41_spill] sm:$0xff] %v5244_v36 }
 0x199   : > { %v3978_v37 = vpop.f32.mrf.mxu0  ;;  %4174 = vmatprep.mubr.f32.mxu1 %v2303_v1 }
 0x19a   : > { %5978 = vst [vmem:[#allocation40_spill] sm:$0xff] %v5237_v17  ;;  %v2305_v8 = vmul.f32 %v5237_v17, %v5237_v17  ;;  %v5252_v1 = vadd.f32 %v3978_v37, %v4803_v13  ;;  %v2307_v17 = vmul.f32 %v5244_v36, %v5244_v36 }
 0x19b   : > { %v1263_v25 = vpop.f32.mrf.mxu0 }
 0x19c   : > { %4175 = vmatmul.mubr.f32.gmra.mxu1 %v2304_v44  ;;  %v5247_v7 = vadd.f32 %v4803_v13, %v1263_v25  ;;  %5981 = vst [vmem:[#allocation43_spill] sm:$0xff] %v5252_v1  ;;  %v2308_v25 = vmul.f32 %v5252_v1, %v5252_v1 }
 0x19d   : > { %v3981_v42 = vpop.f32.mrf.mxu0  ;;  %4177 = vmatprep.mubr.f32.mxu1 %v2305_v8 }
 0x19e   : > { %5980 = vst [vmem:[#allocation42_spill] sm:$0xff] %v5247_v7  ;;  %v2306_v56 = vmul.f32 %v5247_v7, %v5247_v7  ;;  %v5264_v37 = vadd.f32 %v3981_v42, %v4803_v13 }
 0x19f   : > { %v1276_v54 = vpop.f32.mrf.mxu0 }
 0x1a0   : > { %4178 = vmatmul.mubr.f32.gmra.mxu1 %v2306_v56  ;;  %v5257_v19 = vadd.f32 %v4803_v13, %v1276_v54  ;;  %5983 = vst [vmem:[#allocation45_spill] sm:$0xff] %v5264_v37 }
 0x1a1   : > { %v3982_v44 = vpop.f32.mrf.mxu0  ;;  %4180 = vmatprep.mubr.f32.mxu1 %v2307_v17 }
 0x1a2   : > { %5982 = vst [vmem:[#allocation44_spill] sm:$0xff] %v5257_v19  ;;  %v2309_v8 = vmul.f32 %v5257_v19, %v5257_v19  ;;  %v5272_v17 = vadd.f32 %v3982_v44, %v4803_v13  ;;  %v2311_v19 = vmul.f32 %v5264_v37, %v5264_v37 }
 0x1a3   : > { %v1279_v7 = vpop.f32.mrf.mxu0 }
 0x1a4   : > { %4181 = vmatmul.mubr.f32.gmra.mxu1 %v2308_v25  ;;  %v5267_v61 = vadd.f32 %v4803_v13, %v1279_v7  ;;  %5985 = vst [vmem:[#allocation47_spill] sm:$0xff] %v5272_v17  ;;  %v2312_v7 = vmul.f32 %v5272_v17, %v5272_v17 }
 0x1a5   : > { %v3985_v56 = vpop.f32.mrf.mxu0  ;;  %4183 = vmatprep.mubr.f32.mxu1 %v2309_v8 }
 0x1a6   : > { %5984 = vst [vmem:[#allocation46_spill] sm:$0xff] %v5267_v61  ;;  %v2310_v54 = vmul.f32 %v5267_v61, %v5267_v61  ;;  %v5284_v44 = vadd.f32 %v3985_v56, %v4803_v13 }
 0x1a7   : > { %v1292_v36 = vpop.f32.mrf.mxu0 }
 0x1a8   : > { %4184 = vmatmul.mubr.f32.gmra.mxu1 %v2310_v54  ;;  %v5277_v42 = vadd.f32 %v4803_v13, %v1292_v36  ;;  %5987 = vst [vmem:[#allocation49_spill] sm:$0xff] %v5284_v44 }
 0x1a9   : > { %v3986_v25 = vpop.f32.mrf.mxu0  ;;  %4186 = vmatprep.mubr.f32.mxu1 %v2311_v19 }
 0x1aa   : > { %5986 = vst [vmem:[#allocation48_spill] sm:$0xff] %v5277_v42  ;;  %v2313_v8 = vmul.f32 %v5277_v42, %v5277_v42  ;;  %v5292_v19 = vadd.f32 %v3986_v25, %v4803_v13  ;;  %v2315_v42 = vmul.f32 %v5284_v44, %v5284_v44 }
 0x1ab   : > { %v1295_v61 = vpop.f32.mrf.mxu0 }
 0x1ac   : > { %4187 = vmatmul.mubr.f32.gmra.mxu1 %v2312_v7  ;;  %v5287_v1 = vadd.f32 %v4803_v13, %v1295_v61  ;;  %5989 = vst [vmem:[#allocation51_spill] sm:$0xff] %v5292_v19  ;;  %v2316_v61 = vmul.f32 %v5292_v19, %v5292_v19 }
 0x1ad   : > { %v3989_v54 = vpop.f32.mrf.mxu0  ;;  %4189 = vmatprep.mubr.f32.mxu1 %v2313_v8 }
 0x1ae   : > { %5988 = vst [vmem:[#allocation50_spill] sm:$0xff] %v5287_v1  ;;  %v2314_v36 = vmul.f32 %v5287_v1, %v5287_v1  ;;  %v5304_v25 = vadd.f32 %v3989_v54, %v4803_v13 }
 0x1af   : > { %v1308_v37 = vpop.f32.mrf.mxu0 }
 0x1b0   : > { %4190 = vmatmul.mubr.f32.gmra.mxu1 %v2314_v36  ;;  %v5297_v56 = vadd.f32 %v4803_v13, %v1308_v37  ;;  %5991 = vst [vmem:[#allocation53_spill] sm:$0xff] %v5304_v25  ;;  %v5312_v37 = vld [vmem:[%s5876_s4] ss:$0 sm:$0xff]  ;;  %v2319_v54 = vmul.f32 %v5304_v25, %v5304_v25 }
 0x1b1   : > { %v3990_v7 = vpop.f32.mrf.mxu0  ;;  %4192 = vmatprep.mubr.f32.mxu1 %v2315_v42 }
 0x1b2   : > { %5990 = vst [vmem:[#allocation52_spill] sm:$0xff] %v5297_v56  ;;  %v2317_v8 = vmul.f32 %v5297_v56, %v5297_v56  ;;  %v5317_v56 = vadd.f32 %v3990_v7, %v4803_v13 }
 0x1b3   : > { %v1311_v1 = vpop.f32.mrf.mxu0 }
 0x1b4   : > { %4193 = vmatmul.mubr.f32.gmra.mxu1 %v2316_v61  ;;  %v5307_v17 = vadd.f32 %v4803_v13, %v1311_v1  ;;  %5993 = vst [vmem:[#allocation55_spill] sm:$0xff] %v5317_v56 }
 0x1b5   : > { %v3993_v36 = vpop.f32.mrf.mxu0  ;;  %4195 = vmatprep.mubr.f32.mxu1 %v2317_v8 }
 0x1b6   : > { %5992 = vst [vmem:[#allocation54_spill] sm:$0xff] %v5307_v17  ;;  %v2318_v42 = vmul.f32 %v5307_v17, %v5307_v17  ;;  %v2320_v17 = vmul.f32 %v5317_v56, %v5317_v56 }
 0x1b7   : > { %v1324_v44 = vpop.f32.mrf.mxu0 }
 0x1b8   : > { %v4053_v61 = vpop.f32.mrf.mxu1  ;;  %4196 = vmatmul.mubr.f32.gmra.mxu1 %v2318_v42  ;;  %v5322_v1 = vadd.f32 %v4803_v13, %v1324_v44  ;;  %v5331_v42 = vadd.f32 %v3993_v36, %v4803_v13 }
 0x1b9   : > { %v3994_v8 = vpop.f32.mrf.mxu0  ;;  %v2444_v19 = vadd.f32 %v4053_v61, %v5312_v37  ;;  %4198 = vmatprep.mubr.f32.mxu1 %v2319_v54 }
 0x1ba   : > { %5994 = vst [vmem:[#allocation56_spill] sm:$0xff] %v5322_v1  ;;  %v2438_v3 = vpop.f32.mrf.mxu1  ;;  %v2321_v7 = vmul.f32 %v5322_v1, %v5322_v1  ;;  %5995 = vst [vmem:[#allocation57_spill] sm:$0xff] %v5331_v42 }
 0x1bb   : > { %v1327_v29 = vpop.f32.mrf.mxu0  ;;  %4339 = vrsqrt.f32 %v2444_v19  ;;  %v2439_v25 = vadd.f32 %v5312_v37, %v2438_v3  ;;  %v5340_v19 = vadd.f32 %v3994_v8, %v4803_v13 }
 0x1bc   : > { %v4056_v44 = vpop.f32.mrf.mxu1  ;;  %4199 = vmatmul.mubr.f32.gmra.mxu1 %v2320_v17  ;;  %v5334_v45 = vadd.f32 %v4803_v13, %v1327_v29  ;;  %v2323_v29 = vmul.f32 %v5331_v42, %v5331_v42 }
 0x1bd   : > { %v3997_v54 = vpop.f32.mrf.mxu0  ;;  %4341 = vrsqrt.f32 %v2439_v25  ;;  %v2454_v61 = vadd.f32 %v4056_v44, %v5312_v37  ;;  %4201 = vmatprep.mubr.f32.mxu1 %v2321_v7  ;;  %5997 = vst [vmem:[#allocation59_spill] sm:$0xff] %v5340_v19 }
 0x1be   : > { %5996 = vst [vmem:[#allocation58_spill] sm:$0xff] %v5334_v45  ;;  %v2448_v56 = vpop.f32.mrf.mxu1  ;;  %v2322_v1 = vmul.f32 %v5334_v45, %v5334_v45  ;;  %v5355_v42 = vadd.f32 %v3997_v54, %v4803_v13 }
 0x1bf   : > { %v1340_v3 = vpop.f32.mrf.mxu0  ;;  %4343 = vrsqrt.f32 %v2454_v61  ;;  %v2449_v36 = vadd.f32 %v5312_v37, %v2448_v56  ;;  %v2324_v61 = vmul.f32 %v5340_v19, %v5340_v19 }
 0x1c0   : > { %v4059_v17 = vpop.f32.mrf.mxu1  ;;  %4202 = vmatmul.mubr.f32.gmra.mxu1 %v2322_v1  ;;  %v5346_v25 = vadd.f32 %v4803_v13, %v1340_v3  ;;  %5999 = vst [vmem:[#allocation61_spill] sm:$0xff] %v5355_v42 }
 0x1c1   : > { %v3998_v7 = vpop.f32.mrf.mxu0  ;;  %4345 = vrsqrt.f32 %v2449_v36  ;;  %v2464_v44 = vadd.f32 %v4059_v17, %v5312_v37  ;;  %4204 = vmatprep.mubr.f32.mxu1 %v2323_v29 }
 0x1c2   : > { %5998 = vst [vmem:[#allocation60_spill] sm:$0xff] %v5346_v25  ;;  %v2458_v8 = vpop.f32.mrf.mxu1  ;;  %v2325_v56 = vmul.f32 %v5346_v25, %v5346_v25 }
 0x1c3   : > { %v1343_v45 = vpop.f32.mrf.mxu0  ;;  %4347 = vrsqrt.f32 %v2464_v44  ;;  %v2459_v1 = vadd.f32 %v5312_v37, %v2458_v8  ;;  %v5365_v8 = vadd.f32 %v3998_v7, %v4803_v13 }
 0x1c4   : > { %v4062_v3 = vpop.f32.mrf.mxu1  ;;  %4205 = vmatmul.mubr.f32.gmra.mxu1 %v2324_v61  ;;  %v5358_v36 = vadd.f32 %v4803_v13, %v1343_v45  ;;  %v2327_v45 = vmul.f32 %v5355_v42, %v5355_v42 }
 0x1c5   : > { %v4001_v29 = vpop.f32.mrf.mxu0  ;;  %4349 = vrsqrt.f32 %v2459_v1  ;;  %v2474_v17 = vadd.f32 %v4062_v3, %v5312_v37  ;;  %4207 = vmatprep.mubr.f32.mxu1 %v2325_v56 }
 0x1c6   : > { %6000 = vst [vmem:[#allocation62_spill] sm:$0xff] %v5358_v36  ;;  %v2468_v19 = vpop.f32.mrf.mxu1  ;;  %v2326_v44 = vmul.f32 %v5358_v36, %v5358_v36  ;;  %v2328_v36 = vmul.f32 %v5365_v8, %v5365_v8 }
 0x1c7   : > { %v1356_v54 = vpop.f32.mrf.mxu0  ;;  %4351 = vrsqrt.f32 %v2474_v17  ;;  %v2469_v61 = vadd.f32 %v5312_v37, %v2468_v19 }
 0x1c8   : > { %v4340_v25 = vpop.eup %4339  ;;  %v4065_v56 = vpop.f32.mrf.mxu1  ;;  %4208 = vmatmul.mubr.f32.gmra.mxu1 %v2326_v44  ;;  %v5376_v1 = vadd.f32 %v4803_v13, %v1356_v54 }
 0x1c9   : > { %v3206_v7 = vmul.f32 %v4340_v25, %v4816_v21  ;;  %v4002_v3 = vpop.f32.mrf.mxu0  ;;  %4353 = vrsqrt.f32 %v2469_v61  ;;  %v2484_v19 = vadd.f32 %v4065_v56, %v5312_v37  ;;  %4210 = vmatprep.mubr.f32.mxu1 %v2327_v45  ;;  %v5388_v25 = vadd.f32 %v4001_v29, %v4803_v13 }
 0x1ca   : > { %6001 = vst [vmem:[#allocation63_spill] sm:$0xff] %v5376_v1  ;;  %v4342_v17 = vpop.eup %4341  ;;  %v2478_v42 = vpop.f32.mrf.mxu1  ;;  %v2329_v59 = vmul.f32 %v5376_v1, %v5376_v1 }
 0x1cb   : > { %3334 = vst [vmem:[%s5373_s15 + $0x8] sm:$0xff] %v3206_v7  ;;  %v3205_v44 = vmul.f32 %v4342_v17, %v4806_v14  ;;  %v1359_v54 = vpop.f32.mrf.mxu0  ;;  %4355 = vrsqrt.f32 %v2484_v19  ;;  %v2479_v21 = vadd.f32 %v5312_v37, %v2478_v42 }
 0x1cc   : > { %v4344_v61 = vpop.eup %4343  ;;  %v4068_v45 = vpop.f32.mrf.mxu1  ;;  %4211 = vmatmul.mubr.f32.gmra.mxu1 %v2328_v36  ;;  %v5391_v56 = vadd.f32 %v4803_v13, %v1359_v54  ;;  %v5401_v36 = vld [vmem:[%s5874_s2] ss:$0 sm:$0xff] }
 0x1cd   : > { %3333 = vst [vmem:[%s5373_s15] sm:$0xff] %v3205_v44  ;;  %v3208_v1 = vmul.f32 %v4344_v61, %v4821_v24  ;;  %v4005_v7 = vpop.f32.mrf.mxu0  ;;  %4357 = vrsqrt.f32 %v2479_v21  ;;  %v2494_v14 = vadd.f32 %v4068_v45, %v5312_v37  ;;  %4213 = vmatprep.mubr.f32.mxu1 %v2329_v59  ;;  %v5404_v13 = vadd.f32 %v5401_v36, %v4002_v3 }
 0x1ce   : > { %v4346_v42 = vpop.eup %4345  ;;  %v2488_v19 = vpop.f32.mrf.mxu1  ;;  %v2330_v29 = vmul.f32 %v5391_v56, %v5391_v56  ;;  %v2331_v44 = vmul.f32 %v5388_v25, %v5388_v25 }
 0x1cf   : > { %3336 = vst [vmem:[%s5373_s15 + $0x18] sm:$0xff] %v3208_v1  ;;  %v3207_v24 = vmul.f32 %v4346_v42, %v4813_v20  ;;  %v1372_v17 = vpop.f32.mrf.mxu0  ;;  %4359 = vrsqrt.f32 %v2494_v14  ;;  %v2489_v59 = vadd.f32 %v5312_v37, %v2488_v19  ;;  %v2332_v42 = vmul.f32 %v5404_v13, %v5404_v13 }
 0x1d0   : > { %v4348_v54 = vpop.eup %4347  ;;  %v4071_v21 = vpop.f32.mrf.mxu1  ;;  %4214 = vmatmul.mubr.f32.gmra.mxu1 %v2330_v29  ;;  %v5412_v61 = vadd.f32 %v5401_v36, %v1372_v17  ;;  %v5425_v17 = vadd.f32 %v5401_v36, %v4005_v7 }
 0x1d1   : > { %3335 = vst [vmem:[%s5373_s15 + $0x10] sm:$0xff] %v3207_v24  ;;  %v3210_v3 = vmul.f32 %v4348_v54, %v4838_v35  ;;  %v4006_v1 = vpop.f32.mrf.mxu0  ;;  %4361 = vrsqrt.f32 %v2489_v59  ;;  %v2504_v20 = vadd.f32 %v4071_v21, %v5312_v37  ;;  %4216 = vmatprep.mubr.f32.mxu1 %v2331_v44 }
 0x1d2   : > { %v4350_v45 = vpop.eup %4349  ;;  %v2498_v14 = vpop.f32.mrf.mxu1  ;;  %v2333_v19 = vmul.f32 %v5412_v61, %v5412_v61 }
 0x1d3   : > { %3338 = vst [vmem:[%s5373_s15 + $0x28] sm:$0xff] %v3210_v3  ;;  %v3209_v29 = vmul.f32 %v4350_v45, %v4826_v27  ;;  %v1375_v24 = vpop.f32.mrf.mxu0  ;;  %4363 = vrsqrt.f32 %v2504_v20  ;;  %v2499_v35 = vadd.f32 %v5312_v37, %v2498_v14  ;;  %v5436_v14 = vadd.f32 %v5401_v36, %v4006_v1 }
 0x1d4   : > { %v4352_v59 = vpop.eup %4351  ;;  %v4074_v44 = vpop.f32.mrf.mxu1  ;;  %4217 = vmatmul.mubr.f32.gmra.mxu1 %v2332_v42  ;;  %v5428_v54 = vadd.f32 %v5401_v36, %v1375_v24  ;;  %v2335_v24 = vmul.f32 %v5425_v17, %v5425_v17 }
 0x1d5   : > { %3337 = vst [vmem:[%s5373_s15 + $0x20] sm:$0xff] %v3209_v29  ;;  %v3212_v21 = vmul.f32 %v4352_v59, %v4843_v38  ;;  %v4009_v3 = vpop.f32.mrf.mxu0  ;;  %4365 = vrsqrt.f32 %v2499_v35  ;;  %v2514_v27 = vadd.f32 %v4074_v44, %v5312_v37  ;;  %4219 = vmatprep.mubr.f32.mxu1 %v2333_v19 }
 0x1d6   : > { %v4354_v20 = vpop.eup %4353  ;;  %v2508_v45 = vpop.f32.mrf.mxu1  ;;  %v2334_v7 = vmul.f32 %v5428_v54, %v5428_v54 }
 0x1d7   : > { %3340 = vst [vmem:[%s5373_s15 + $0x38] sm:$0xff] %v3212_v21  ;;  %v3211_v42 = vmul.f32 %v4354_v20, %v4835_v34  ;;  %v1388_v29 = vpop.f32.mrf.mxu0  ;;  %4367 = vrsqrt.f32 %v2514_v27  ;;  %v2509_v38 = vadd.f32 %v5312_v37, %v2508_v45  ;;  %v2336_v20 = vmul.f32 %v5436_v14, %v5436_v14 }
 0x1d8   : > { %v4356_v19 = vpop.eup %4355  ;;  %v4077_v35 = vpop.f32.mrf.mxu1  ;;  %4220 = vmatmul.mubr.f32.gmra.mxu1 %v2334_v7  ;;  %v5444_v59 = vadd.f32 %v5401_v36, %v1388_v29  ;;  %v5457_v29 = vadd.f32 %v5401_v36, %v4009_v3 }
 0x1d9   : > { %3339 = vst [vmem:[%s5373_s15 + $0x30] sm:$0xff] %v3211_v42  ;;  %v3214_v1 = vmul.f32 %v4356_v19, %v4860_v49  ;;  %v4010_v44 = vpop.f32.mrf.mxu0  ;;  %4369 = vrsqrt.f32 %v2509_v38  ;;  %v2524_v34 = vadd.f32 %v4077_v35, %v5312_v37  ;;  %4222 = vmatprep.mubr.f32.mxu1 %v2335_v24 }
 0x1da   : > { %v4358_v21 = vpop.eup %4357  ;;  %v2518_v27 = vpop.f32.mrf.mxu1  ;;  %v2337_v45 = vmul.f32 %v5444_v59, %v5444_v59 }
 0x1db   : > { %3342 = vst [vmem:[%s5373_s15 + $0x48] sm:$0xff] %v3214_v1  ;;  %v3213_v7 = vmul.f32 %v4358_v21, %v4848_v41  ;;  %v1391_v42 = vpop.f32.mrf.mxu0  ;;  %4371 = vrsqrt.f32 %v2524_v34  ;;  %v2519_v49 = vadd.f32 %v5312_v37, %v2518_v27  ;;  %v5468_v27 = vadd.f32 %v5401_v36, %v4010_v44 }
 0x1dc   : > { %v4360_v38 = vpop.eup %4359  ;;  %v4080_v24 = vpop.f32.mrf.mxu1  ;;  %4223 = vmatmul.mubr.f32.gmra.mxu1 %v2336_v20  ;;  %v5460_v19 = vadd.f32 %v5401_v36, %v1391_v42  ;;  %v2339_v42 = vmul.f32 %v5457_v29, %v5457_v29 }
 0x1dd   : > { %3341 = vst [vmem:[%s5373_s15 + $0x40] sm:$0xff] %v3213_v7  ;;  %v3216_v35 = vmul.f32 %v4360_v38, %v4865_v52  ;;  %v4013_v1 = vpop.f32.mrf.mxu0  ;;  %4373 = vrsqrt.f32 %v2519_v49  ;;  %v2534_v41 = vadd.f32 %v4080_v24, %v5312_v37  ;;  %4225 = vmatprep.mubr.f32.mxu1 %v2337_v45 }
 0x1de   : > { %v4362_v34 = vpop.eup %4361  ;;  %v2528_v21 = vpop.f32.mrf.mxu1  ;;  %v2338_v3 = vmul.f32 %v5460_v19, %v5460_v19 }
 0x1df   : > { %3344 = vst [vmem:[%s5373_s15 + $0x58] sm:$0xff] %v3216_v35  ;;  %v3215_v20 = vmul.f32 %v4362_v34, %v4857_v48  ;;  %v1404_v7 = vpop.f32.mrf.mxu0  ;;  %4375 = vrsqrt.f32 %v2534_v41  ;;  %v2529_v52 = vadd.f32 %v5312_v37, %v2528_v21  ;;  %v2340_v34 = vmul.f32 %v5468_v27, %v5468_v27 }
 0x1e0   : > { %v4364_v45 = vpop.eup %4363  ;;  %v4083_v49 = vpop.f32.mrf.mxu1  ;;  %4226 = vmatmul.mubr.f32.gmra.mxu1 %v2338_v3  ;;  %v5476_v38 = vadd.f32 %v5401_v36, %v1404_v7  ;;  %v5489_v7 = vadd.f32 %v5401_v36, %v4013_v1 }
 0x1e1   : > { %3343 = vst [vmem:[%s5373_s15 + $0x50] sm:$0xff] %v3215_v20  ;;  %v3218_v44 = vmul.f32 %v4364_v45, %v4882_v63  ;;  %v4014_v24 = vpop.f32.mrf.mxu0  ;;  %4377 = vrsqrt.f32 %v2529_v52  ;;  %v2544_v48 = vadd.f32 %v4083_v49, %v5312_v37  ;;  %4228 = vmatprep.mubr.f32.mxu1 %v2339_v42 }
 0x1e2   : > { %v4366_v35 = vpop.eup %4365  ;;  %v2538_v41 = vpop.f32.mrf.mxu1  ;;  %v2341_v21 = vmul.f32 %v5476_v38, %v5476_v38 }
 0x1e3   : > { %3346 = vst [vmem:[%s5373_s15 + $0x68] sm:$0xff] %v3218_v44  ;;  %v3217_v3 = vmul.f32 %v4366_v35, %v4870_v55  ;;  %v1407_v20 = vpop.f32.mrf.mxu0  ;;  %4379 = vrsqrt.f32 %v2544_v48  ;;  %v2539_v63 = vadd.f32 %v5312_v37, %v2538_v41  ;;  %v5500_v41 = vadd.f32 %v5401_v36, %v4014_v24 }
 0x1e4   : > { %v4368_v52 = vpop.eup %4367  ;;  %v4086_v42 = vpop.f32.mrf.mxu1  ;;  %4229 = vmatmul.mubr.f32.gmra.mxu1 %v2340_v34  ;;  %v5492_v45 = vadd.f32 %v5401_v36, %v1407_v20  ;;  %v2343_v20 = vmul.f32 %v5489_v7, %v5489_v7 }
 0x1e5   : > { %3345 = vst [vmem:[%s5373_s15 + $0x60] sm:$0xff] %v3217_v3  ;;  %v3220_v49 = vmul.f32 %v4368_v52, %v4887_v2  ;;  %v4017_v44 = vpop.f32.mrf.mxu0  ;;  %4381 = vrsqrt.f32 %v2539_v63  ;;  %v2554_v55 = vadd.f32 %v4086_v42, %v5312_v37  ;;  %4231 = vmatprep.mubr.f32.mxu1 %v2341_v21 }
 0x1e6   : > { %v4370_v48 = vpop.eup %4369  ;;  %v2548_v35 = vpop.f32.mrf.mxu1  ;;  %v2342_v1 = vmul.f32 %v5492_v45, %v5492_v45 }
 0x1e7   : > { %3348 = vst [vmem:[%s5373_s15 + $0x78] sm:$0xff] %v3220_v49  ;;  %v3219_v34 = vmul.f32 %v4370_v48, %v4879_v62  ;;  %v1420_v3 = vpop.f32.mrf.mxu0  ;;  %4383 = vrsqrt.f32 %v2554_v55  ;;  %v2549_v2 = vadd.f32 %v5312_v37, %v2548_v35  ;;  %v2344_v48 = vmul.f32 %v5500_v41, %v5500_v41 }
 0x1e8   : > { %v4372_v21 = vpop.eup %4371  ;;  %v4089_v63 = vpop.f32.mrf.mxu1  ;;  %4232 = vmatmul.mubr.f32.gmra.mxu1 %v2342_v1  ;;  %v5508_v52 = vadd.f32 %v5401_v36, %v1420_v3  ;;  %v5521_v3 = vadd.f32 %v5401_v36, %v4017_v44 }
 0x1e9   : > { %3347 = vst [vmem:[%s5373_s15 + $0x70] sm:$0xff] %v3219_v34  ;;  %v3222_v24 = vmul.f32 %v4372_v21, %v4904_v15  ;;  %v4018_v42 = vpop.f32.mrf.mxu0  ;;  %4385 = vrsqrt.f32 %v2549_v2  ;;  %v2564_v62 = vadd.f32 %v4089_v63, %v5312_v37  ;;  %4234 = vmatprep.mubr.f32.mxu1 %v2343_v20 }
 0x1ea   : > { %v4374_v49 = vpop.eup %4373  ;;  %v2558_v55 = vpop.f32.mrf.mxu1  ;;  %v2345_v35 = vmul.f32 %v5508_v52, %v5508_v52 }
 0x1eb   : > { %3350 = vst [vmem:[%s5373_s15 + $0x88] sm:$0xff] %v3222_v24  ;;  %v3221_v1 = vmul.f32 %v4374_v49, %v4892_v5  ;;  %v1423_v34 = vpop.f32.mrf.mxu0  ;;  %4387 = vrsqrt.f32 %v2564_v62  ;;  %v2559_v15 = vadd.f32 %v5312_v37, %v2558_v55  ;;  %v5532_v49 = vadd.f32 %v5401_v36, %v4018_v42 }
 0x1ec   : > { %v4376_v2 = vpop.eup %4375  ;;  %v4092_v20 = vpop.f32.mrf.mxu1  ;;  %4235 = vmatmul.mubr.f32.gmra.mxu1 %v2344_v48  ;;  %v5524_v21 = vadd.f32 %v5401_v36, %v1423_v34  ;;  %v2347_v48 = vmul.f32 %v5521_v3, %v5521_v3 }
 0x1ed   : > { %3349 = vst [vmem:[%s5373_s15 + $0x80] sm:$0xff] %v3221_v1  ;;  %v3224_v63 = vmul.f32 %v4376_v2, %v4909_v18  ;;  %4389 = vrsqrt.f32 %v2559_v15  ;;  %v2574_v5 = vadd.f32 %v4092_v20, %v5312_v37  ;;  %4237 = vmatprep.mubr.f32.mxu1 %v2345_v35  ;;  %v2348_v15 = vmul.f32 %v5532_v49, %v5532_v49 }
 0x1ee   : > { %v4378_v24 = vpop.eup %4377  ;;  %v2568_v62 = vpop.f32.mrf.mxu1  ;;  %v2346_v44 = vmul.f32 %v5524_v21, %v5524_v21 }
 0x1ef   : > { %3352 = vst [vmem:[%s5373_s15 + $0x98] sm:$0xff] %v3224_v63  ;;  %v3223_v55 = vmul.f32 %v4378_v24, %v4901_v12  ;;  %4391 = vrsqrt.f32 %v2574_v5  ;;  %v2569_v18 = vadd.f32 %v5312_v37, %v2568_v62 }
 0x1f0   : > { %v4380_v1 = vpop.eup %4379  ;;  %v4095_v35 = vpop.f32.mrf.mxu1  ;;  %4238 = vmatmul.mubr.f32.gmra.mxu1 %v2346_v44 }
 0x1f1   : > { %3351 = vst [vmem:[%s5373_s15 + $0x90] sm:$0xff] %v3223_v55  ;;  %v3226_v34 = vmul.f32 %v4380_v1, %v4926_v33  ;;  %4393 = vrsqrt.f32 %v2569_v18  ;;  %v2584_v36 = vadd.f32 %v4095_v35, %v5312_v37  ;;  %4240 = vmatprep.mubr.f32.mxu1 %v2347_v48 }
 0x1f2   : > { %v4382_v42 = vpop.eup %4381  ;;  %v2578_v12 = vpop.f32.mrf.mxu1 }
 0x1f3   : > { %3354 = vst [vmem:[%s5373_s15 + $0xa8] sm:$0xff] %v3226_v34  ;;  %v3225_v2 = vmul.f32 %v4382_v42, %v4914_v23  ;;  %4395 = vrsqrt.f32 %v2584_v36  ;;  %v2579_v20 = vadd.f32 %v5312_v37, %v2578_v12 }
 0x1f4   : > { %v4384_v63 = vpop.eup %4383  ;;  %v4098_v5 = vpop.f32.mrf.mxu1  ;;  %4241 = vmatmul.mubr.f32.gmra.mxu1 %v2348_v15 }
 0x1f5   : > { %3353 = vst [vmem:[%s5373_s15 + $0xa0] sm:$0xff] %v3225_v2  ;;  %v3228_v33 = vmul.f32 %v4384_v63, %v4931_v39  ;;  %4397 = vrsqrt.f32 %v2579_v20  ;;  %v2594_v24 = vadd.f32 %v4098_v5, %v5312_v37 }
 0x1f6   : > { %v4386_v62 = vpop.eup %4385  ;;  %v2588_v44 = vpop.f32.mrf.mxu1 }
 0x1f7   : > { %3356 = vst [vmem:[%s5373_s15 + $0xb8] sm:$0xff] %v3228_v33  ;;  %v3227_v55 = vmul.f32 %v4386_v62, %v4923_v32  ;;  %4399 = vrsqrt.f32 %v2594_v24  ;;  %v2589_v23 = vadd.f32 %v5312_v37, %v2588_v44 }
 0x1f8   : > { %v4388_v18 = vpop.eup %4387  ;;  %v4101_v48 = vpop.f32.mrf.mxu1 }
 0x1f9   : > { %3355 = vst [vmem:[%s5373_s15 + $0xb0] sm:$0xff] %v3227_v55  ;;  %v3230_v1 = vmul.f32 %v4388_v18, %v4947_v53  ;;  %4401 = vrsqrt.f32 %v2589_v23  ;;  %v2604_v39 = vadd.f32 %v4101_v48, %v5312_v37 }
 0x1fa   : > { %v4390_v35 = vpop.eup %4389  ;;  %v2598_v34 = vpop.f32.mrf.mxu1 }
 0x1fb   : > { %3358 = vst [vmem:[%s5373_s15 + $0xc8] sm:$0xff] %v3230_v1  ;;  %v3229_v36 = vmul.f32 %v4390_v35, %v4936_v43  ;;  %4403 = vrsqrt.f32 %v2604_v39  ;;  %v2599_v32 = vadd.f32 %v5312_v37, %v2598_v34 }
 0x1fc   : > { %v4392_v42 = vpop.eup %4391  ;;  %v4104_v12 = vpop.f32.mrf.mxu1 }
 0x1fd   : > { %3357 = vst [vmem:[%s5373_s15 + $0xc0] sm:$0xff] %v3229_v36  ;;  %v3232_v15 = vmul.f32 %v4392_v42, %v4952_v57  ;;  %4405 = vrsqrt.f32 %v2599_v32  ;;  %v2614_v53 = vadd.f32 %v4104_v12, %v5312_v37 }
 0x1fe   : > { %v4394_v2 = vpop.eup %4393  ;;  %v2608_v20 = vpop.f32.mrf.mxu1 }
 0x1ff   : > { %3360 = vst [vmem:[%s5373_s15 + $0xd8] sm:$0xff] %v3232_v15  ;;  %v3231_v63 = vmul.f32 %v4394_v2, %v4944_v51  ;;  %4407 = vrsqrt.f32 %v2614_v53  ;;  %v2609_v43 = vadd.f32 %v5312_v37, %v2608_v20 }
 0x200   : > { %v4396_v5 = vpop.eup %4395  ;;  %v4107_v33 = vpop.f32.mrf.mxu1 }
 0x201   : > { %3359 = vst [vmem:[%s5373_s15 + $0xd0] sm:$0xff] %v3231_v63  ;;  %v3234_v24 = vmul.f32 %v4396_v5, %v4967_v6  ;;  %4409 = vrsqrt.f32 %v2609_v43  ;;  %v2624_v57 = vadd.f32 %v4107_v33, %v5312_v37 }
 0x202   : > { %v4398_v62 = vpop.eup %4397  ;;  %v2618_v44 = vpop.f32.mrf.mxu1 }
 0x203   : > { %3362 = vst [vmem:[%s5373_s15 + $0xe8] sm:$0xff] %v3234_v24  ;;  %v3233_v55 = vmul.f32 %v4398_v62, %v4957_v60  ;;  %4411 = vrsqrt.f32 %v2624_v57  ;;  %v2619_v51 = vadd.f32 %v5312_v37, %v2618_v44 }
 0x204   : > { %v4400_v23 = vpop.eup %4399  ;;  %v4110_v18 = vpop.f32.mrf.mxu1 }
 0x205   : > { %3361 = vst [vmem:[%s5373_s15 + $0xe0] sm:$0xff] %v3233_v55  ;;  %v3236_v48 = vmul.f32 %v4400_v23, %v4972_v9  ;;  %4413 = vrsqrt.f32 %v2619_v51  ;;  %v2634_v6 = vadd.f32 %v4110_v18, %v5312_v37 }
 0x206   : > { %v4402_v1 = vpop.eup %4401  ;;  %v2628_v39 = vpop.f32.mrf.mxu1 }
 0x207   : > { %3364 = vst [vmem:[%s5373_s15 + $0xf8] sm:$0xff] %v3236_v48  ;;  %v3235_v35 = vmul.f32 %v4402_v1, %v4964_v4  ;;  %4415 = vrsqrt.f32 %v2634_v6  ;;  %v2629_v60 = vadd.f32 %v5312_v37, %v2628_v39 }
 0x208   : > { %v4404_v34 = vpop.eup %4403  ;;  %v4113_v36 = vpop.f32.mrf.mxu1 }
 0x209   : > { %3363 = vst [vmem:[%s5373_s15 + $0xf0] sm:$0xff] %v3235_v35  ;;  %v3238_v32 = vmul.f32 %v4404_v34, %v4987_v28  ;;  %4417 = vrsqrt.f32 %v2629_v60  ;;  %v2644_v9 = vadd.f32 %v4113_v36, %v5312_v37 }
 0x20a   : > { %v4406_v42 = vpop.eup %4405  ;;  %v2638_v12 = vpop.f32.mrf.mxu1 }
 0x20b   : > { %3366 = vst [vmem:[%s5373_s15 + $0x108] sm:$0xff] %v3238_v32  ;;  %v3237_v15 = vmul.f32 %v4406_v42, %v4977_v16  ;;  %4419 = vrsqrt.f32 %v2644_v9  ;;  %v2639_v4 = vadd.f32 %v5312_v37, %v2638_v12 }
 0x20c   : > { %v4408_v53 = vpop.eup %4407  ;;  %v4116_v2 = vpop.f32.mrf.mxu1 }
 0x20d   : > { %3365 = vst [vmem:[%s5373_s15 + $0x100] sm:$0xff] %v3237_v15  ;;  %v3240_v20 = vmul.f32 %v4408_v53, %v4992_v31  ;;  %4421 = vrsqrt.f32 %v2639_v4  ;;  %v2654_v28 = vadd.f32 %v4116_v2, %v5312_v37 }
 0x20e   : > { %v4410_v63 = vpop.eup %4409  ;;  %v2648_v43 = vpop.f32.mrf.mxu1 }
 0x20f   : > { %3368 = vst [vmem:[%s5373_s15 + $0x118] sm:$0xff] %v3240_v20  ;;  %v3239_v5 = vmul.f32 %v4410_v63, %v4984_v26  ;;  %4423 = vrsqrt.f32 %v2654_v28  ;;  %v2649_v16 = vadd.f32 %v5312_v37, %v2648_v43 }
 0x210   : > { %v4412_v33 = vpop.eup %4411  ;;  %v4119_v24 = vpop.f32.mrf.mxu1 }
 0x211   : > { %3367 = vst [vmem:[%s5373_s15 + $0x110] sm:$0xff] %v3239_v5  ;;  %v3242_v57 = vmul.f32 %v4412_v33, %v5007_v50  ;;  %4425 = vrsqrt.f32 %v2649_v16  ;;  %v2664_v31 = vadd.f32 %v4119_v24, %v5312_v37  ;;  %v6002_v24 = vld [vmem:[#allocation3_spill] sm:$0xff] }
 0x212   : > { %v4414_v62 = vpop.eup %4413  ;;  %v2658_v44 = vpop.f32.mrf.mxu1 }
 0x213   : > { %3370 = vst [vmem:[%s5373_s15 + $0x128] sm:$0xff] %v3242_v57  ;;  %v3241_v55 = vmul.f32 %v4414_v62, %v4997_v40  ;;  %4427 = vrsqrt.f32 %v2664_v31  ;;  %v2659_v26 = vadd.f32 %v5312_v37, %v2658_v44  ;;  %v6003_v44 = vld [vmem:[#allocation2_spill] sm:$0xff] }
 0x214   : > { %v4416_v51 = vpop.eup %4415  ;;  %v4122_v23 = vpop.f32.mrf.mxu1 }
 0x215   : > { %3369 = vst [vmem:[%s5373_s15 + $0x120] sm:$0xff] %v3241_v55  ;;  %v3244_v18 = vmul.f32 %v4416_v51, %v5012_v58  ;;  %4429 = vrsqrt.f32 %v2659_v26  ;;  %v2674_v50 = vadd.f32 %v4122_v23, %v5312_v37  ;;  %v6004_v23 = vld [vmem:[#allocation6_spill] sm:$0xff] }
 0x216   : > { %v4418_v48 = vpop.eup %4417  ;;  %v2668_v6 = vpop.f32.mrf.mxu1 }
 0x217   : > { %3372 = vst [vmem:[%s5373_s15 + $0x138] sm:$0xff] %v3244_v18  ;;  %v3243_v1 = vmul.f32 %v4418_v48, %v5004_v47  ;;  %4431 = vrsqrt.f32 %v2674_v50  ;;  %v2669_v40 = vadd.f32 %v5312_v37, %v2668_v6 }
 0x218   : > { %v4420_v39 = vpop.eup %4419  ;;  %v4125_v35 = vpop.f32.mrf.mxu1 }
 0x219   : > { %3371 = vst [vmem:[%s5373_s15 + $0x130] sm:$0xff] %v3243_v1  ;;  %v3246_v60 = vmul.f32 %v4420_v39, %v5027_v11  ;;  %4433 = vrsqrt.f32 %v2669_v40  ;;  %v2684_v58 = vadd.f32 %v4125_v35, %v5312_v37  ;;  %v6005_v1 = vld [vmem:[#allocation4_spill] sm:$0xff] }
 0x21a   : > { %v4422_v34 = vpop.eup %4421  ;;  %v2678_v36 = vpop.f32.mrf.mxu1 }
 0x21b   : > { %3374 = vst [vmem:[%s5373_s15 + $0x148] sm:$0xff] %v3246_v60  ;;  %v3245_v32 = vmul.f32 %v4422_v34, %v5017_v0  ;;  %4435 = vrsqrt.f32 %v2684_v58  ;;  %v2679_v47 = vadd.f32 %v5312_v37, %v2678_v36  ;;  %v6006_v58 = vld [vmem:[#allocation7_spill] sm:$0xff] }
 0x21c   : > { %v4424_v9 = vpop.eup %4423  ;;  %v4128_v42 = vpop.f32.mrf.mxu1 }
 0x21d   : > { %3373 = vst [vmem:[%s5373_s15 + $0x140] sm:$0xff] %v3245_v32  ;;  %v3248_v12 = vmul.f32 %v4424_v9, %v5032_v22  ;;  %4437 = vrsqrt.f32 %v2679_v47  ;;  %v2694_v11 = vadd.f32 %v4128_v42, %v5312_v37  ;;  %v6007_v9 = vld [vmem:[#allocation5_spill] sm:$0xff] }
 0x21e   : > { %v4426_v15 = vpop.eup %4425  ;;  %v2688_v4 = vpop.f32.mrf.mxu1 }
 0x21f   : > { %3376 = vst [vmem:[%s5373_s15 + $0x158] sm:$0xff] %v3248_v12  ;;  %v3247_v53 = vmul.f32 %v4426_v15, %v5024_v10  ;;  %4439 = vrsqrt.f32 %v2694_v11  ;;  %v2689_v0 = vadd.f32 %v5312_v37, %v2688_v4  ;;  %v6008_v4 = vld [vmem:[#allocation10_spill] sm:$0xff] }
 0x220   : > { %v4428_v2 = vpop.eup %4427  ;;  %v4131_v20 = vpop.f32.mrf.mxu1 }
 0x221   : > { %3375 = vst [vmem:[%s5373_s15 + $0x150] sm:$0xff] %v3247_v53  ;;  %v3250_v28 = vmul.f32 %v4428_v2, %v5047_v46  ;;  %4441 = vrsqrt.f32 %v2689_v0  ;;  %v2704_v22 = vadd.f32 %v4131_v20, %v5312_v37 }
 0x222   : > { %v4430_v63 = vpop.eup %4429  ;;  %v2698_v43 = vpop.f32.mrf.mxu1 }
 0x223   : > { %3378 = vst [vmem:[%s5373_s15 + $0x168] sm:$0xff] %v3250_v28  ;;  %v3249_v5 = vmul.f32 %v4430_v63, %v5037_v30  ;;  %4443 = vrsqrt.f32 %v2704_v22  ;;  %v2699_v10 = vadd.f32 %v5312_v37, %v2698_v43  ;;  %v6009_v28 = vld [vmem:[#allocation8_spill] sm:$0xff] }
 0x224   : > { %v4432_v16 = vpop.eup %4431  ;;  %v4134_v33 = vpop.f32.mrf.mxu1 }
 0x225   : > { %3377 = vst [vmem:[%s5373_s15 + $0x160] sm:$0xff] %v3249_v5  ;;  %v3252_v57 = vmul.f32 %v4432_v16, %v6002_v24  ;;  %4445 = vrsqrt.f32 %v2699_v10  ;;  %v2714_v46 = vadd.f32 %v4134_v33, %v5312_v37  ;;  %v6010_v10 = vld [vmem:[#allocation11_spill] sm:$0xff] }
 0x226   : > { %v4434_v31 = vpop.eup %4433  ;;  %v2708_v62 = vpop.f32.mrf.mxu1 }
 0x227   : > { %3380 = vst [vmem:[%s5373_s15 + $0x178] sm:$0xff] %v3252_v57  ;;  %v3251_v55 = vmul.f32 %v4434_v31, %v6003_v44  ;;  %4447 = vrsqrt.f32 %v2714_v46  ;;  %v2709_v30 = vadd.f32 %v5312_v37, %v2708_v62  ;;  %v6011_v46 = vld [vmem:[#allocation9_spill] sm:$0xff] }
 0x228   : > { %v4436_v26 = vpop.eup %4435  ;;  %v4137_v51 = vpop.f32.mrf.mxu1 }
 0x229   : > { %3379 = vst [vmem:[%s5373_s15 + $0x170] sm:$0xff] %v3251_v55  ;;  %v3254_v18 = vmul.f32 %v4436_v26, %v6004_v23  ;;  %4449 = vrsqrt.f32 %v2709_v30  ;;  %v2724_v50 = vadd.f32 %v4137_v51, %v5312_v37  ;;  %v6012_v30 = vld [vmem:[#allocation14_spill] sm:$0xff] }
 0x22a   : > { %v4438_v48 = vpop.eup %4437  ;;  %v2718_v6 = vpop.f32.mrf.mxu1 }
 0x22b   : > { %3382 = vst [vmem:[%s5373_s15 + $0x188] sm:$0xff] %v3254_v18  ;;  %v3253_v40 = vmul.f32 %v4438_v48, %v6005_v1  ;;  %4451 = vrsqrt.f32 %v2724_v50  ;;  %v2719_v39 = vadd.f32 %v5312_v37, %v2718_v6  ;;  %v6013_v50 = vld [vmem:[#allocation12_spill] sm:$0xff] }
 0x22c   : > { %v4440_v35 = vpop.eup %4439  ;;  %v4140_v60 = vpop.f32.mrf.mxu1 }
 0x22d   : > { %3381 = vst [vmem:[%s5373_s15 + $0x180] sm:$0xff] %v3253_v40  ;;  %v3256_v34 = vmul.f32 %v4440_v35, %v6006_v58  ;;  %4453 = vrsqrt.f32 %v2719_v39  ;;  %v2734_v36 = vadd.f32 %v4140_v60, %v5312_v37  ;;  %v6014_v39 = vld [vmem:[#allocation15_spill] sm:$0xff] }
 0x22e   : > { %v4442_v32 = vpop.eup %4441  ;;  %v2728_v47 = vpop.f32.mrf.mxu1 }
 0x22f   : > { %3384 = vst [vmem:[%s5373_s15 + $0x198] sm:$0xff] %v3256_v34  ;;  %v3255_v42 = vmul.f32 %v4442_v32, %v6007_v9  ;;  %4455 = vrsqrt.f32 %v2734_v36  ;;  %v2729_v12 = vadd.f32 %v5312_v37, %v2728_v47  ;;  %v6015_v36 = vld [vmem:[#allocation13_spill] sm:$0xff] }
 0x230   : > { %v4444_v11 = vpop.eup %4443  ;;  %v4143_v15 = vpop.f32.mrf.mxu1 }
 0x231   : > { %3383 = vst [vmem:[%s5373_s15 + $0x190] sm:$0xff] %v3255_v42  ;;  %v3258_v53 = vmul.f32 %v4444_v11, %v6008_v4  ;;  %4457 = vrsqrt.f32 %v2729_v12  ;;  %v2744_v0 = vadd.f32 %v4143_v15, %v5312_v37  ;;  %v6016_v12 = vld [vmem:[#allocation18_spill] sm:$0xff] }
 0x232   : > { %v4446_v2 = vpop.eup %4445  ;;  %v2738_v20 = vpop.f32.mrf.mxu1 }
 0x233   : > { %3386 = vst [vmem:[%s5373_s15 + $0x1a8] sm:$0xff] %v3258_v53  ;;  %v3257_v22 = vmul.f32 %v4446_v2, %v6009_v28  ;;  %4459 = vrsqrt.f32 %v2744_v0  ;;  %v2739_v63 = vadd.f32 %v5312_v37, %v2738_v20  ;;  %v6017_v0 = vld [vmem:[#allocation16_spill] sm:$0xff]  ;;  %v5669_v20 = vld [vmem:[%s5876_s4] ss:$0 sm:$0xff] }
 0x234   : > { %v4448_v43 = vpop.eup %4447  ;;  %v4146_v5 = vpop.f32.mrf.mxu1 }
 0x235   : > { %3385 = vst [vmem:[%s5373_s15 + $0x1a0] sm:$0xff] %v3257_v22  ;;  %v3260_v16 = vmul.f32 %v4448_v43, %v6010_v10  ;;  %4461 = vrsqrt.f32 %v2739_v63  ;;  %v2754_v33 = vadd.f32 %v4146_v5, %v5312_v37  ;;  %v6018_v43 = vld [vmem:[#allocation19_spill] sm:$0xff] }
 0x236   : > { %v4450_v24 = vpop.eup %4449  ;;  %v2748_v57 = vpop.f32.mrf.mxu1 }
 0x237   : > { %3388 = vst [vmem:[%s5373_s15 + $0x1b8] sm:$0xff] %v3260_v16  ;;  %v3259_v31 = vmul.f32 %v4450_v24, %v6011_v46  ;;  %4463 = vrsqrt.f32 %v2754_v33  ;;  %v2749_v62 = vadd.f32 %v5312_v37, %v2748_v57  ;;  %v6019_v33 = vld [vmem:[#allocation17_spill] sm:$0xff] }
 0x238   : > { %v4452_v44 = vpop.eup %4451  ;;  %v4149_v55 = vpop.f32.mrf.mxu1 }
 0x239   : > { %3387 = vst [vmem:[%s5373_s15 + $0x1b0] sm:$0xff] %v3259_v31  ;;  %v3262_v26 = vmul.f32 %v4452_v44, %v6012_v30  ;;  %4465 = vrsqrt.f32 %v2749_v62  ;;  %v2764_v51 = vadd.f32 %v4149_v55, %v5312_v37  ;;  %v6020_v62 = vld [vmem:[#allocation22_spill] sm:$0xff] }
 0x23a   : > { %v4454_v23 = vpop.eup %4453  ;;  %v2758_v18 = vpop.f32.mrf.mxu1 }
 0x23b   : > { %3390 = vst [vmem:[%s5373_s15 + $0x1c8] sm:$0xff] %v3262_v26  ;;  %v3261_v48 = vmul.f32 %v4454_v23, %v6013_v50  ;;  %4467 = vrsqrt.f32 %v2764_v51  ;;  %v2759_v6 = vadd.f32 %v5312_v37, %v2758_v18  ;;  %v6021_v51 = vld [vmem:[#allocation20_spill] sm:$0xff] }
 0x23c   : > { %v4456_v1 = vpop.eup %4455  ;;  %v4152_v40 = vpop.f32.mrf.mxu1 }
 0x23d   : > { %3389 = vst [vmem:[%s5373_s15 + $0x1c0] sm:$0xff] %v3261_v48  ;;  %v3264_v35 = vmul.f32 %v4456_v1, %v6014_v39  ;;  %4469 = vrsqrt.f32 %v2759_v6  ;;  %v2774_v60 = vadd.f32 %v4152_v40, %v5312_v37  ;;  %v6022_v6 = vld [vmem:[#allocation23_spill] sm:$0xff] }
 0x23e   : > { %v4458_v58 = vpop.eup %4457  ;;  %v2768_v34 = vpop.f32.mrf.mxu1 }
 0x23f   : > { %3392 = vst [vmem:[%s5373_s15 + $0x1d8] sm:$0xff] %v3264_v35  ;;  %v3263_v32 = vmul.f32 %v4458_v58, %v6015_v36  ;;  %4471 = vrsqrt.f32 %v2774_v60  ;;  %v2769_v47 = vadd.f32 %v5312_v37, %v2768_v34  ;;  %v6023_v60 = vld [vmem:[#allocation21_spill] sm:$0xff] }
 0x240   : > { %v4460_v9 = vpop.eup %4459  ;;  %v4155_v42 = vpop.f32.mrf.mxu1 }
 0x241   : > { %3391 = vst [vmem:[%s5373_s15 + $0x1d0] sm:$0xff] %v3263_v32  ;;  %v3266_v11 = vmul.f32 %v4460_v9, %v6016_v12  ;;  %4473 = vrsqrt.f32 %v2769_v47  ;;  %v2784_v15 = vadd.f32 %v4155_v42, %v5312_v37  ;;  %v6024_v47 = vld [vmem:[#allocation26_spill] sm:$0xff] }
 0x242   : > { %v4462_v4 = vpop.eup %4461  ;;  %v2778_v53 = vpop.f32.mrf.mxu1 }
 0x243   : > { %3394 = vst [vmem:[%s5373_s15 + $0x1e8] sm:$0xff] %v3266_v11  ;;  %v3265_v2 = vmul.f32 %v4462_v4, %v6017_v0  ;;  %4475 = vrsqrt.f32 %v2784_v15  ;;  %v2779_v28 = vadd.f32 %v5669_v20, %v2778_v53  ;;  %v6025_v15 = vld [vmem:[#allocation24_spill] sm:$0xff] }
 0x244   : > { %v4464_v22 = vpop.eup %4463  ;;  %v4158_v63 = vpop.f32.mrf.mxu1 }
 0x245   : > { %3393 = vst [vmem:[%s5373_s15 + $0x1e0] sm:$0xff] %v3265_v2  ;;  %v3268_v37 = vmul.f32 %v4464_v22, %v6018_v43  ;;  %4477 = vrsqrt.f32 %v2779_v28  ;;  %v2794_v5 = vadd.f32 %v5669_v20, %v4158_v63  ;;  %v6026_v28 = vld [vmem:[#allocation27_spill] sm:$0xff] }
 0x246   : > { %v4466_v10 = vpop.eup %4465  ;;  %v2788_v16 = vpop.f32.mrf.mxu1 }
 0x247   : > { %3396 = vst [vmem:[%s5373_s15 + $0x1f8] sm:$0xff] %v3268_v37  ;;  %v3267_v24 = vmul.f32 %v4466_v10, %v6019_v33  ;;  %4479 = vrsqrt.f32 %v2794_v5  ;;  %v2789_v57 = vadd.f32 %v5669_v20, %v2788_v16  ;;  %v6027_v5 = vld [vmem:[#allocation25_spill] sm:$0xff] }
 0x248   : > { %v4468_v46 = vpop.eup %4467  ;;  %v4161_v31 = vpop.f32.mrf.mxu1 }
 0x249   : > { %3395 = vst [vmem:[%s5373_s15 + $0x1f0] sm:$0xff] %v3267_v24  ;;  %v3270_v44 = vmul.f32 %v4468_v46, %v6020_v62  ;;  %4481 = vrsqrt.f32 %v2789_v57  ;;  %v2804_v55 = vadd.f32 %v5669_v20, %v4161_v31  ;;  %v6028_v57 = vld [vmem:[#allocation30_spill] sm:$0xff] }
 0x24a   : > { %v4470_v30 = vpop.eup %4469  ;;  %v2798_v26 = vpop.f32.mrf.mxu1 }
 0x24b   : > { %3398 = vst [vmem:[%s5373_s15 + $0x208] sm:$0xff] %v3270_v44  ;;  %v3269_v23 = vmul.f32 %v4470_v30, %v6021_v51  ;;  %4483 = vrsqrt.f32 %v2804_v55  ;;  %v2799_v18 = vadd.f32 %v5669_v20, %v2798_v26  ;;  %v6029_v55 = vld [vmem:[#allocation28_spill] sm:$0xff] }
 0x24c   : > { %v4472_v50 = vpop.eup %4471  ;;  %v4164_v48 = vpop.f32.mrf.mxu1 }
 0x24d   : > { %3397 = vst [vmem:[%s5373_s15 + $0x200] sm:$0xff] %v3269_v23  ;;  %v3272_v1 = vmul.f32 %v4472_v50, %v6022_v6  ;;  %4485 = vrsqrt.f32 %v2799_v18  ;;  %v2814_v40 = vadd.f32 %v5669_v20, %v4164_v48  ;;  %v6030_v18 = vld [vmem:[#allocation31_spill] sm:$0xff] }
 0x24e   : > { %v4474_v39 = vpop.eup %4473  ;;  %v2808_v35 = vpop.f32.mrf.mxu1 }
 0x24f   : > { %3400 = vst [vmem:[%s5373_s15 + $0x218] sm:$0xff] %v3272_v1  ;;  %v3271_v58 = vmul.f32 %v4474_v39, %v6023_v60  ;;  %4487 = vrsqrt.f32 %v2814_v40  ;;  %v2809_v34 = vadd.f32 %v5669_v20, %v2808_v35  ;;  %v6031_v40 = vld [vmem:[#allocation29_spill] sm:$0xff] }
 0x250   : > { %v4476_v36 = vpop.eup %4475  ;;  %v4167_v32 = vpop.f32.mrf.mxu1 }
 0x251   : > { %3399 = vst [vmem:[%s5373_s15 + $0x210] sm:$0xff] %v3271_v58  ;;  %v3274_v9 = vmul.f32 %v4476_v36, %v6024_v47  ;;  %4489 = vrsqrt.f32 %v2809_v34  ;;  %v2824_v42 = vadd.f32 %v5669_v20, %v4167_v32  ;;  %v6032_v34 = vld [vmem:[#allocation34_spill] sm:$0xff] }
 0x252   : > { %v4478_v12 = vpop.eup %4477  ;;  %v2818_v11 = vpop.f32.mrf.mxu1 }
 0x253   : > { %3402 = vst [vmem:[%s5373_s15 + $0x228] sm:$0xff] %v3274_v9  ;;  %v3273_v4 = vmul.f32 %v4478_v12, %v6025_v15  ;;  %4491 = vrsqrt.f32 %v2824_v42  ;;  %v2819_v53 = vadd.f32 %v5669_v20, %v2818_v11  ;;  %v6033_v42 = vld [vmem:[#allocation32_spill] sm:$0xff] }
 0x254   : > { %v4480_v0 = vpop.eup %4479  ;;  %v4170_v2 = vpop.f32.mrf.mxu1 }
 0x255   : > { %3401 = vst [vmem:[%s5373_s15 + $0x220] sm:$0xff] %v3273_v4  ;;  %v3276_v22 = vmul.f32 %v4480_v0, %v6026_v28  ;;  %4493 = vrsqrt.f32 %v2819_v53  ;;  %v2834_v63 = vadd.f32 %v5669_v20, %v4170_v2  ;;  %v6034_v53 = vld [vmem:[#allocation35_spill] sm:$0xff] }
 0x256   : > { %v4482_v43 = vpop.eup %4481  ;;  %v2828_v37 = vpop.f32.mrf.mxu1 }
 0x257   : > { %3404 = vst [vmem:[%s5373_s15 + $0x238] sm:$0xff] %v3276_v22  ;;  %v3275_v10 = vmul.f32 %v4482_v43, %v6027_v5  ;;  %4495 = vrsqrt.f32 %v2834_v63  ;;  %v2829_v16 = vadd.f32 %v5669_v20, %v2828_v37  ;;  %v6035_v63 = vld [vmem:[#allocation33_spill] sm:$0xff] }
 0x258   : > { %v4484_v33 = vpop.eup %4483  ;;  %v4173_v24 = vpop.f32.mrf.mxu1 }
 0x259   : > { %3403 = vst [vmem:[%s5373_s15 + $0x230] sm:$0xff] %v3275_v10  ;;  %v3278_v46 = vmul.f32 %v4484_v33, %v6028_v57  ;;  %4497 = vrsqrt.f32 %v2829_v16  ;;  %v2844_v31 = vadd.f32 %v5669_v20, %v4173_v24  ;;  %v6036_v16 = vld [vmem:[#allocation38_spill] sm:$0xff] }
 0x25a   : > { %v4486_v62 = vpop.eup %4485  ;;  %v2838_v44 = vpop.f32.mrf.mxu1 }
 0x25b   : > { %3406 = vst [vmem:[%s5373_s15 + $0x248] sm:$0xff] %v3278_v46  ;;  %v3277_v30 = vmul.f32 %v4486_v62, %v6029_v55  ;;  %4499 = vrsqrt.f32 %v2844_v31  ;;  %v2839_v26 = vadd.f32 %v5669_v20, %v2838_v44  ;;  %v6037_v31 = vld [vmem:[#allocation36_spill] sm:$0xff] }
 0x25c   : > { %v4488_v51 = vpop.eup %4487  ;;  %v4176_v23 = vpop.f32.mrf.mxu1 }
 0x25d   : > { %3405 = vst [vmem:[%s5373_s15 + $0x240] sm:$0xff] %v3277_v30  ;;  %v3280_v50 = vmul.f32 %v4488_v51, %v6030_v18  ;;  %4501 = vrsqrt.f32 %v2839_v26  ;;  %v2854_v48 = vadd.f32 %v5669_v20, %v4176_v23  ;;  %v6038_v26 = vld [vmem:[#allocation39_spill] sm:$0xff] }
 0x25e   : > { %v4490_v6 = vpop.eup %4489  ;;  %v2848_v1 = vpop.f32.mrf.mxu1 }
 0x25f   : > { %3408 = vst [vmem:[%s5373_s15 + $0x258] sm:$0xff] %v3280_v50  ;;  %v3279_v39 = vmul.f32 %v4490_v6, %v6031_v40  ;;  %4503 = vrsqrt.f32 %v2854_v48  ;;  %v2849_v35 = vadd.f32 %v5669_v20, %v2848_v1  ;;  %v6039_v48 = vld [vmem:[#allocation37_spill] sm:$0xff] }
 0x260   : > { %v4492_v60 = vpop.eup %4491  ;;  %v4179_v58 = vpop.f32.mrf.mxu1 }
 0x261   : > { %3407 = vst [vmem:[%s5373_s15 + $0x250] sm:$0xff] %v3279_v39  ;;  %v3282_v36 = vmul.f32 %v4492_v60, %v6032_v34  ;;  %4505 = vrsqrt.f32 %v2849_v35  ;;  %v2864_v32 = vadd.f32 %v5669_v20, %v4179_v58  ;;  %v6040_v35 = vld [vmem:[#allocation42_spill] sm:$0xff] }
 0x262   : > { %v4494_v47 = vpop.eup %4493  ;;  %v2858_v9 = vpop.f32.mrf.mxu1 }
 0x263   : > { %3410 = vst [vmem:[%s5373_s15 + $0x268] sm:$0xff] %v3282_v36  ;;  %v3281_v12 = vmul.f32 %v4494_v47, %v6033_v42  ;;  %4507 = vrsqrt.f32 %v2864_v32  ;;  %v2859_v11 = vadd.f32 %v5669_v20, %v2858_v9  ;;  %v6041_v32 = vld [vmem:[#allocation40_spill] sm:$0xff] }
 0x264   : > { %v4496_v15 = vpop.eup %4495  ;;  %v4182_v4 = vpop.f32.mrf.mxu1 }
 0x265   : > { %3409 = vst [vmem:[%s5373_s15 + $0x260] sm:$0xff] %v3281_v12  ;;  %v3284_v0 = vmul.f32 %v4496_v15, %v6034_v53  ;;  %4509 = vrsqrt.f32 %v2859_v11  ;;  %v2874_v2 = vadd.f32 %v5669_v20, %v4182_v4  ;;  %v6042_v11 = vld [vmem:[#allocation43_spill] sm:$0xff] }
 0x266   : > { %v4498_v28 = vpop.eup %4497  ;;  %v2868_v22 = vpop.f32.mrf.mxu1 }
 0x267   : > { %3412 = vst [vmem:[%s5373_s15 + $0x278] sm:$0xff] %v3284_v0  ;;  %v3283_v43 = vmul.f32 %v4498_v28, %v6035_v63  ;;  %4511 = vrsqrt.f32 %v2874_v2  ;;  %v2869_v37 = vadd.f32 %v5669_v20, %v2868_v22  ;;  %v6043_v2 = vld [vmem:[#allocation41_spill] sm:$0xff] }
 0x268   : > { %v4500_v5 = vpop.eup %4499  ;;  %v4185_v10 = vpop.f32.mrf.mxu1 }
 0x269   : > { %3411 = vst [vmem:[%s5373_s15 + $0x270] sm:$0xff] %v3283_v43  ;;  %v3286_v33 = vmul.f32 %v4500_v5, %v6036_v16  ;;  %4513 = vrsqrt.f32 %v2869_v37  ;;  %v2884_v24 = vadd.f32 %v5669_v20, %v4185_v10  ;;  %v6044_v37 = vld [vmem:[#allocation46_spill] sm:$0xff] }
 0x26a   : > { %v4502_v57 = vpop.eup %4501  ;;  %v2878_v46 = vpop.f32.mrf.mxu1 }
 0x26b   : > { %3414 = vst [vmem:[%s5373_s15 + $0x288] sm:$0xff] %v3286_v33  ;;  %v3285_v62 = vmul.f32 %v4502_v57, %v6037_v31  ;;  %4515 = vrsqrt.f32 %v2884_v24  ;;  %v2879_v44 = vadd.f32 %v5669_v20, %v2878_v46  ;;  %v6045_v24 = vld [vmem:[#allocation44_spill] sm:$0xff] }
 0x26c   : > { %v4504_v55 = vpop.eup %4503  ;;  %v4188_v30 = vpop.f32.mrf.mxu1 }
 0x26d   : > { %3413 = vst [vmem:[%s5373_s15 + $0x280] sm:$0xff] %v3285_v62  ;;  %v3288_v51 = vmul.f32 %v4504_v55, %v6038_v26  ;;  %4517 = vrsqrt.f32 %v2879_v44  ;;  %v2894_v23 = vadd.f32 %v5669_v20, %v4188_v30  ;;  %v6046_v44 = vld [vmem:[#allocation47_spill] sm:$0xff] }
 0x26e   : > { %v4506_v18 = vpop.eup %4505  ;;  %v2888_v50 = vpop.f32.mrf.mxu1 }
 0x26f   : > { %3416 = vst [vmem:[%s5373_s15 + $0x298] sm:$0xff] %v3288_v51  ;;  %v3287_v6 = vmul.f32 %v4506_v18, %v6039_v48  ;;  %4519 = vrsqrt.f32 %v2894_v23  ;;  %v2889_v1 = vadd.f32 %v5669_v20, %v2888_v50  ;;  %v6047_v23 = vld [vmem:[#allocation45_spill] sm:$0xff] }
 0x270   : > { %v4508_v40 = vpop.eup %4507  ;;  %v4191_v39 = vpop.f32.mrf.mxu1 }
 0x271   : > { %3415 = vst [vmem:[%s5373_s15 + $0x290] sm:$0xff] %v3287_v6  ;;  %v3290_v60 = vmul.f32 %v4508_v40, %v6040_v35  ;;  %4521 = vrsqrt.f32 %v2889_v1  ;;  %v2904_v58 = vadd.f32 %v5669_v20, %v4191_v39  ;;  %v6048_v1 = vld [vmem:[#allocation50_spill] sm:$0xff] }
 0x272   : > { %v4510_v34 = vpop.eup %4509  ;;  %v2898_v36 = vpop.f32.mrf.mxu1 }
 0x273   : > { %3418 = vst [vmem:[%s5373_s15 + $0x2a8] sm:$0xff] %v3290_v60  ;;  %v3289_v47 = vmul.f32 %v4510_v34, %v6041_v32  ;;  %4523 = vrsqrt.f32 %v2904_v58  ;;  %v2899_v9 = vadd.f32 %v5669_v20, %v2898_v36  ;;  %v6049_v58 = vld [vmem:[#allocation48_spill] sm:$0xff] }
 0x274   : > { %v4512_v42 = vpop.eup %4511  ;;  %v4194_v12 = vpop.f32.mrf.mxu1 }
 0x275   : > { %3417 = vst [vmem:[%s5373_s15 + $0x2a0] sm:$0xff] %v3289_v47  ;;  %v3292_v15 = vmul.f32 %v4512_v42, %v6042_v11  ;;  %4525 = vrsqrt.f32 %v2899_v9  ;;  %v2914_v4 = vadd.f32 %v5669_v20, %v4194_v12  ;;  %v6050_v9 = vld [vmem:[#allocation51_spill] sm:$0xff] }
 0x276   : > { %v4514_v53 = vpop.eup %4513  ;;  %v2908_v0 = vpop.f32.mrf.mxu1 }
 0x277   : > { %3420 = vst [vmem:[%s5373_s15 + $0x2b8] sm:$0xff] %v3292_v15  ;;  %v3291_v28 = vmul.f32 %v4514_v53, %v6043_v2  ;;  %4527 = vrsqrt.f32 %v2914_v4  ;;  %v2909_v22 = vadd.f32 %v5669_v20, %v2908_v0  ;;  %v6051_v4 = vld [vmem:[#allocation49_spill] sm:$0xff] }
 0x278   : > { %v4516_v63 = vpop.eup %4515  ;;  %v4197_v43 = vpop.f32.mrf.mxu1 }
 0x279   : > { %3419 = vst [vmem:[%s5373_s15 + $0x2b0] sm:$0xff] %v3291_v28  ;;  %v3294_v5 = vmul.f32 %v4516_v63, %v6044_v37  ;;  %4529 = vrsqrt.f32 %v2909_v22  ;;  %v2924_v10 = vadd.f32 %v5669_v20, %v4197_v43  ;;  %v6052_v22 = vld [vmem:[#allocation54_spill] sm:$0xff] }
 0x27a   : > { %v4518_v16 = vpop.eup %4517  ;;  %v2918_v33 = vpop.f32.mrf.mxu1 }
 0x27b   : > { %3422 = vst [vmem:[%s5373_s15 + $0x2c8] sm:$0xff] %v3294_v5  ;;  %v3293_v57 = vmul.f32 %v4518_v16, %v6045_v24  ;;  %4531 = vrsqrt.f32 %v2924_v10  ;;  %v2919_v46 = vadd.f32 %v5669_v20, %v2918_v33  ;;  %v6053_v10 = vld [vmem:[#allocation52_spill] sm:$0xff] }
 0x27c   : > { %v4520_v31 = vpop.eup %4519  ;;  %v4200_v62 = vpop.f32.mrf.mxu1 }
 0x27d   : > { %3421 = vst [vmem:[%s5373_s15 + $0x2c0] sm:$0xff] %v3293_v57  ;;  %v3296_v55 = vmul.f32 %v4520_v31, %v6046_v44  ;;  %4533 = vrsqrt.f32 %v2919_v46  ;;  %v2934_v30 = vadd.f32 %v5669_v20, %v4200_v62  ;;  %v6054_v46 = vld [vmem:[#allocation55_spill] sm:$0xff] }
 0x27e   : > { %v4522_v26 = vpop.eup %4521  ;;  %v2928_v51 = vpop.f32.mrf.mxu1 }
 0x27f   : > { %3424 = vst [vmem:[%s5373_s15 + $0x2d8] sm:$0xff] %v3296_v55  ;;  %v3295_v18 = vmul.f32 %v4522_v26, %v6047_v23  ;;  %4535 = vrsqrt.f32 %v2934_v30  ;;  %v2929_v50 = vadd.f32 %v5669_v20, %v2928_v51  ;;  %v6055_v30 = vld [vmem:[#allocation53_spill] sm:$0xff] }
 0x280   : > { %v4524_v48 = vpop.eup %4523  ;;  %v4203_v6 = vpop.f32.mrf.mxu1 }
 0x281   : > { %3423 = vst [vmem:[%s5373_s15 + $0x2d0] sm:$0xff] %v3295_v18  ;;  %v3298_v40 = vmul.f32 %v4524_v48, %v6048_v1  ;;  %4537 = vrsqrt.f32 %v2929_v50  ;;  %v2944_v39 = vadd.f32 %v5669_v20, %v4203_v6  ;;  %v6056_v50 = vld [vmem:[#allocation58_spill] sm:$0xff] }
 0x282   : > { %v4526_v35 = vpop.eup %4525  ;;  %v2938_v60 = vpop.f32.mrf.mxu1 }
 0x283   : > { %3426 = vst [vmem:[%s5373_s15 + $0x2e8] sm:$0xff] %v3298_v40  ;;  %v3297_v34 = vmul.f32 %v4526_v35, %v6049_v58  ;;  %4539 = vrsqrt.f32 %v2944_v39  ;;  %v2939_v36 = vadd.f32 %v5669_v20, %v2938_v60  ;;  %v6057_v39 = vld [vmem:[#allocation56_spill] sm:$0xff] }
 0x284   : > { %v4528_v32 = vpop.eup %4527  ;;  %v4206_v47 = vpop.f32.mrf.mxu1 }
 0x285   : > { %3425 = vst [vmem:[%s5373_s15 + $0x2e0] sm:$0xff] %v3297_v34  ;;  %v3300_v42 = vmul.f32 %v4528_v32, %v6050_v9  ;;  %4541 = vrsqrt.f32 %v2939_v36  ;;  %v2954_v12 = vadd.f32 %v5669_v20, %v4206_v47  ;;  %v6058_v36 = vld [vmem:[#allocation59_spill] sm:$0xff] }
 0x286   : > { %v4530_v11 = vpop.eup %4529  ;;  %v2948_v15 = vpop.f32.mrf.mxu1 }
 0x287   : > { %3428 = vst [vmem:[%s5373_s15 + $0x2f8] sm:$0xff] %v3300_v42  ;;  %v3299_v53 = vmul.f32 %v4530_v11, %v6051_v4  ;;  %4543 = vrsqrt.f32 %v2954_v12  ;;  %v2949_v0 = vadd.f32 %v5669_v20, %v2948_v15  ;;  %v6059_v12 = vld [vmem:[#allocation57_spill] sm:$0xff] }
 0x288   : > { %v4532_v2 = vpop.eup %4531  ;;  %v4209_v28 = vpop.f32.mrf.mxu1 }
 0x289   : > { %3427 = vst [vmem:[%s5373_s15 + $0x2f0] sm:$0xff] %v3299_v53  ;;  %v3302_v63 = vmul.f32 %v4532_v2, %v6052_v22  ;;  %4545 = vrsqrt.f32 %v2949_v0  ;;  %v2964_v43 = vadd.f32 %v5669_v20, %v4209_v28  ;;  %v6060_v0 = vld [vmem:[#allocation62_spill] sm:$0xff] }
 0x28a   : > { %v4534_v37 = vpop.eup %4533  ;;  %v2958_v5 = vpop.f32.mrf.mxu1 }
 0x28b   : > { %3430 = vst [vmem:[%s5373_s15 + $0x308] sm:$0xff] %v3302_v63  ;;  %v3301_v16 = vmul.f32 %v4534_v37, %v6053_v10  ;;  %4547 = vrsqrt.f32 %v2964_v43  ;;  %v2959_v33 = vadd.f32 %v5669_v20, %v2958_v5  ;;  %v6061_v43 = vld [vmem:[#allocation60_spill] sm:$0xff] }
 0x28c   : > { %v4536_v24 = vpop.eup %4535  ;;  %v4212_v57 = vpop.f32.mrf.mxu1 }
 0x28d   : > { %3429 = vst [vmem:[%s5373_s15 + $0x300] sm:$0xff] %v3301_v16  ;;  %v3304_v31 = vmul.f32 %v4536_v24, %v6054_v46  ;;  %4549 = vrsqrt.f32 %v2959_v33  ;;  %v2974_v62 = vadd.f32 %v5669_v20, %v4212_v57 }
 0x28e   : > { %v4538_v44 = vpop.eup %4537  ;;  %v2968_v55 = vpop.f32.mrf.mxu1 }
 0x28f   : > { %3432 = vst [vmem:[%s5373_s15 + $0x318] sm:$0xff] %v3304_v31  ;;  %v3303_v26 = vmul.f32 %v4538_v44, %v6055_v30  ;;  %4551 = vrsqrt.f32 %v2974_v62  ;;  %v2969_v51 = vadd.f32 %v5669_v20, %v2968_v55  ;;  %v6062_v31 = vld [vmem:[#allocation61_spill] sm:$0xff] }
 0x290   : > { %v4540_v23 = vpop.eup %4539  ;;  %v4215_v18 = vpop.f32.mrf.mxu1 }
 0x291   : > { %3431 = vst [vmem:[%s5373_s15 + $0x310] sm:$0xff] %v3303_v26  ;;  %v3306_v48 = vmul.f32 %v4540_v23, %v6056_v50  ;;  %4553 = vrsqrt.f32 %v2969_v51  ;;  %v2984_v6 = vadd.f32 %v5669_v20, %v4215_v18  ;;  %v6063_v18 = vld [vmem:[#allocation63_spill] sm:$0xff] }
 0x292   : > { %v4542_v1 = vpop.eup %4541  ;;  %v2978_v40 = vpop.f32.mrf.mxu1 }
 0x293   : > { %3434 = vst [vmem:[%s5373_s15 + $0x328] sm:$0xff] %v3306_v48  ;;  %v3305_v35 = vmul.f32 %v4542_v1, %v6057_v39  ;;  %4555 = vrsqrt.f32 %v2984_v6  ;;  %v2979_v60 = vadd.f32 %v5669_v20, %v2978_v40 }
 0x294   : > { %v4544_v58 = vpop.eup %4543  ;;  %v4218_v34 = vpop.f32.mrf.mxu1 }
 0x295   : > { %3433 = vst [vmem:[%s5373_s15 + $0x320] sm:$0xff] %v3305_v35  ;;  %v3308_v32 = vmul.f32 %v4544_v58, %v6058_v36  ;;  %4557 = vrsqrt.f32 %v2979_v60  ;;  %v2994_v47 = vadd.f32 %v5669_v20, %v4218_v34 }
 0x296   : > { %v4546_v9 = vpop.eup %4545  ;;  %v2988_v42 = vpop.f32.mrf.mxu1 }
 0x297   : > { %3436 = vst [vmem:[%s5373_s15 + $0x338] sm:$0xff] %v3308_v32  ;;  %v3307_v11 = vmul.f32 %v4546_v9, %v6059_v12  ;;  %4559 = vrsqrt.f32 %v2994_v47  ;;  %v2989_v15 = vadd.f32 %v5669_v20, %v2988_v42 }
 0x298   : > { %v4548_v4 = vpop.eup %4547  ;;  %v4221_v53 = vpop.f32.mrf.mxu1 }
 0x299   : > { %3435 = vst [vmem:[%s5373_s15 + $0x330] sm:$0xff] %v3307_v11  ;;  %v3310_v2 = vmul.f32 %v4548_v4, %v6060_v0  ;;  %4561 = vrsqrt.f32 %v2989_v15  ;;  %v3004_v28 = vadd.f32 %v5669_v20, %v4221_v53 }
 0x29a   : > { %v4550_v22 = vpop.eup %4549  ;;  %v2998_v63 = vpop.f32.mrf.mxu1 }
 0x29b   : > { %3438 = vst [vmem:[%s5373_s15 + $0x348] sm:$0xff] %v3310_v2  ;;  %v3309_v37 = vmul.f32 %v4550_v22, %v6061_v43  ;;  %4563 = vrsqrt.f32 %v3004_v28  ;;  %v2999_v5 = vadd.f32 %v5669_v20, %v2998_v63 }
 0x29c   : > { %v4552_v10 = vpop.eup %4551  ;;  %v4224_v16 = vpop.f32.mrf.mxu1 }
 0x29d   : > { %3437 = vst [vmem:[%s5373_s15 + $0x340] sm:$0xff] %v3309_v37  ;;  %v3312_v33 = vmul.f32 %v4552_v10, %v5365_v8  ;;  %4565 = vrsqrt.f32 %v2999_v5  ;;  %v3014_v24 = vadd.f32 %v5669_v20, %v4224_v16 }
 0x29e   : > { %v4554_v57 = vpop.eup %4553  ;;  %v3008_v46 = vpop.f32.mrf.mxu1 }
 0x29f   : > { %3440 = vst [vmem:[%s5373_s15 + $0x358] sm:$0xff] %v3312_v33  ;;  %v3311_v62 = vmul.f32 %v4554_v57, %v6062_v31  ;;  %4567 = vrsqrt.f32 %v3014_v24  ;;  %v3009_v44 = vadd.f32 %v5669_v20, %v3008_v46 }
 0x2a0   : > { %v4556_v55 = vpop.eup %4555  ;;  %v4227_v30 = vpop.f32.mrf.mxu1 }
 0x2a1   : > { %3439 = vst [vmem:[%s5373_s15 + $0x350] sm:$0xff] %v3311_v62  ;;  %v3314_v26 = vmul.f32 %v4556_v55, %v5391_v56  ;;  %4569 = vrsqrt.f32 %v3009_v44  ;;  %v3024_v8 = vadd.f32 %v5669_v20, %v4227_v30 }
 0x2a2   : > { %v4558_v51 = vpop.eup %4557  ;;  %v3018_v23 = vpop.f32.mrf.mxu1 }
 0x2a3   : > { %3442 = vst [vmem:[%s5373_s15 + $0x368] sm:$0xff] %v3314_v26  ;;  %v3313_v50 = vmul.f32 %v4558_v51, %v6063_v18  ;;  %4571 = vrsqrt.f32 %v3024_v8  ;;  %v3019_v48 = vadd.f32 %v5669_v20, %v3018_v23 }
 0x2a4   : > { %v4560_v6 = vpop.eup %4559  ;;  %v4230_v1 = vpop.f32.mrf.mxu1 }
 0x2a5   : > { %3441 = vst [vmem:[%s5373_s15 + $0x360] sm:$0xff] %v3313_v50  ;;  %v3316_v40 = vmul.f32 %v4560_v6, %v5404_v13  ;;  %4573 = vrsqrt.f32 %v3019_v48  ;;  %v3034_v56 = vadd.f32 %v5669_v20, %v4230_v1 }
 0x2a6   : > { %v4562_v39 = vpop.eup %4561  ;;  %v3028_v35 = vpop.f32.mrf.mxu1 }
 0x2a7   : > { %3444 = vst [vmem:[%s5373_s15 + $0x378] sm:$0xff] %v3316_v40  ;;  %v3315_v60 = vmul.f32 %v4562_v39, %v5388_v25  ;;  %4575 = vrsqrt.f32 %v3034_v56  ;;  %v3029_v58 = vadd.f32 %v5669_v20, %v3028_v35 }
 0x2a8   : > { %v4564_v34 = vpop.eup %4563  ;;  %v4233_v36 = vpop.f32.mrf.mxu1 }
 0x2a9   : > { %3443 = vst [vmem:[%s5373_s15 + $0x370] sm:$0xff] %v3315_v60  ;;  %v3318_v32 = vmul.f32 %v4564_v34, %v5428_v54  ;;  %4577 = vrsqrt.f32 %v3029_v58  ;;  %v3044_v13 = vadd.f32 %v5669_v20, %v4233_v36 }
 0x2aa   : > { %v4566_v47 = vpop.eup %4565  ;;  %v3038_v9 = vpop.f32.mrf.mxu1 }
 0x2ab   : > { %3446 = vst [vmem:[%s5373_s15 + $0x388] sm:$0xff] %v3318_v32  ;;  %v3317_v42 = vmul.f32 %v4566_v47, %v5412_v61  ;;  %4579 = vrsqrt.f32 %v3044_v13  ;;  %v3039_v25 = vadd.f32 %v5669_v20, %v3038_v9 }
 0x2ac   : > { %v4568_v12 = vpop.eup %4567  ;;  %v4236_v11 = vpop.f32.mrf.mxu1 }
 0x2ad   : > { %3445 = vst [vmem:[%s5373_s15 + $0x380] sm:$0xff] %v3317_v42  ;;  %v3320_v15 = vmul.f32 %v4568_v12, %v5436_v14  ;;  %4581 = vrsqrt.f32 %v3039_v25  ;;  %v3054_v54 = vadd.f32 %v5669_v20, %v4236_v11 }
 0x2ae   : > { %v4570_v4 = vpop.eup %4569  ;;  %v3048_v53 = vpop.f32.mrf.mxu1 }
 0x2af   : > { %3448 = vst [vmem:[%s5373_s15 + $0x398] sm:$0xff] %v3320_v15  ;;  %v3319_v0 = vmul.f32 %v4570_v4, %v5425_v17  ;;  %4583 = vrsqrt.f32 %v3054_v54  ;;  %v3049_v61 = vadd.f32 %v5669_v20, %v3048_v53 }
 0x2b0   : > { %v4572_v2 = vpop.eup %4571  ;;  %v4239_v28 = vpop.f32.mrf.mxu1 }
 0x2b1   : > { %3447 = vst [vmem:[%s5373_s15 + $0x390] sm:$0xff] %v3319_v0  ;;  %v3322_v22 = vmul.f32 %v4572_v2, %v5460_v19  ;;  %4585 = vrsqrt.f32 %v3049_v61  ;;  %v3064_v14 = vadd.f32 %v5669_v20, %v4239_v28 }
 0x2b2   : > { %v4574_v63 = vpop.eup %4573  ;;  %v3058_v43 = vpop.f32.mrf.mxu1 }
 0x2b3   : > { %3450 = vst [vmem:[%s5373_s15 + $0x3a8] sm:$0xff] %v3322_v22  ;;  %v3321_v37 = vmul.f32 %v4574_v63, %v5444_v59  ;;  %4587 = vrsqrt.f32 %v3064_v14  ;;  %v3059_v17 = vadd.f32 %v5669_v20, %v3058_v43 }
 0x2b4   : > { %v4576_v5 = vpop.eup %4575  ;;  %v4242_v10 = vpop.f32.mrf.mxu1 }
 0x2b5   : > { %3449 = vst [vmem:[%s5373_s15 + $0x3a0] sm:$0xff] %v3321_v37  ;;  %v3324_v16 = vmul.f32 %v4576_v5, %v5468_v27  ;;  %4589 = vrsqrt.f32 %v3059_v17  ;;  %v3074_v19 = vadd.f32 %v5669_v20, %v4242_v10 }
 0x2b6   : > { %v4578_v33 = vpop.eup %4577  ;;  %v3068_v24 = vpop.f32.mrf.mxu1 }
 0x2b7   : > { %3452 = vst [vmem:[%s5373_s15 + $0x3b8] sm:$0xff] %v3324_v16  ;;  %v3323_v59 = vmul.f32 %v4578_v33, %v5457_v29  ;;  %4591 = vrsqrt.f32 %v3074_v19  ;;  %v3069_v57 = vadd.f32 %v5669_v20, %v3068_v24 }
 0x2b8   : > { %v4580_v46 = vpop.eup %4579 }
 0x2b9   : > { %3451 = vst [vmem:[%s5373_s15 + $0x3b0] sm:$0xff] %v3323_v59  ;;  %v3326_v31 = vmul.f32 %v4580_v46, %v5492_v45  ;;  %4593 = vrsqrt.f32 %v3069_v57 }
 0x2ba   : > { %v4582_v27 = vpop.eup %4581 }
 0x2bb   : > { %3454 = vst [vmem:[%s5373_s15 + $0x3c8] sm:$0xff] %v3326_v31  ;;  %v3325_v62 = vmul.f32 %v4582_v27, %v5476_v38 }
 0x2bc   : > { %v4584_v44 = vpop.eup %4583 }
 0x2bd   : > { %3453 = vst [vmem:[%s5373_s15 + $0x3c0] sm:$0xff] %v3325_v62  ;;  %v3328_v29 = vmul.f32 %v4584_v44, %v5500_v41 }
 0x2be   : > { %v4586_v55 = vpop.eup %4585 }
 0x2bf   : > { %3456 = vst [vmem:[%s5373_s15 + $0x3d8] sm:$0xff] %v3328_v29  ;;  %v3327_v20 = vmul.f32 %v4586_v55, %v5489_v7 }
 0x2c0   : > { %v4588_v30 = vpop.eup %4587 }
 0x2c1   : > { %3455 = vst [vmem:[%s5373_s15 + $0x3d0] sm:$0xff] %v3327_v20  ;;  %v3330_v45 = vmul.f32 %v4588_v30, %v5524_v21 }
 0x2c2   : > { %v4590_v26 = vpop.eup %4589 }
 0x2c3   : > { %3458 = vst [vmem:[%s5373_s15 + $0x3e8] sm:$0xff] %v3330_v45  ;;  %v3329_v8 = vmul.f32 %v4590_v26, %v5508_v52 }
 0x2c4   : > { %v4592_v51 = vpop.eup %4591 }
 0x2c5   : > { %3457 = vst [vmem:[%s5373_s15 + $0x3e0] sm:$0xff] %v3329_v8  ;;  %v3332_v38 = vmul.f32 %v4592_v51, %v5532_v49 }
 0x2c6   : > { %v4594_v23 = vpop.eup %4593 }
 0x2c7   : > { %3460 = vst [vmem:[%s5373_s15 + $0x3f8] sm:$0xff] %v3332_v38  ;;  %v3331_v41 = vmul.f32 %v4594_v23, %v5521_v3 }
 0x2c9   : > { %3459 = vst [vmem:[%s5373_s15 + $0x3f0] sm:$0xff] %v3331_v41 }
 0x2ca PF: > { %s15_s20 = sadd.s32 1, %s4619_s20   ;;  %s6064_s18 = smov %s4615_s19 }
 0x2cb   : > { %p12_p5 = scmp.ge.s32.totalorder %s15_s20, 4   ;;  %s6065_s19 = smov %s6067_s21 }
 0x2cd   :  { %14 = sbr.rel (!%p12_p5) target bundleno = 2 (0x2), region = 88 }

// kernel: _lambda_.16
= control target key start
LH: loop header
LB: loop body
LE: loop exit
PB: predicated region body
PF: predicated region fallthrough
CT: control target
= control target key end

     0   :  { %s2030_s18 = smov 0   ;;  %s2032_s19 = smov 0   ;;  %s2483_s0 = inlined_call_operand.vmem [shape: bf16[512,256], index: 0, kind: input, shape index: {}]   ;;  %s2484_s1 = inlined_call_operand.vmem [shape: bf16[256,128], index: 1, kind: input, shape index: {}]   ;;  %s2485_s2 = inlined_call_operand.vmem [shape: f32[1,128], index: 2, kind: input, shape index: {}]   ;;  %s2486_s3 = inlined_call_operand.vmem [shape: f32[128,128], index: 3, kind: input, shape index: {}]   ;;  %s2487_s4 = inlined_call_operand.vmem [shape: f32[1,128], index: 4, kind: input, shape index: {}]   ;;  %s2488_s5 = inlined_call_operand.vmem [shape: f32[512,128], index: 5, kind: output, shape index: {}]  }
   0x1   :  { %s2034_s20 = smov 0  }
   0x2 LB: > { %s34_s21 = sadd.s32 1, %s1994_s19  ;;  %p1509_p0 = scmp.ge.s32.totalorder %s1998_s20, 1  ;;  %s1998_s20 = sphi %s2034_s20, %s15_s20   ;;  %s1994_s19 = sphi %s2032_s19, %s2490_s19   ;;  %s1990_s18 = sphi %s2030_s18, %s2489_s18  }
   0x3   : > { %p36_p1 = scmp.ge.s32.totalorder %s34_s21, 2  ;;  %p241_p2 = scmp.lt.s32.totalorder %s1998_s20, 3 }
   0x5   : > { %s2492_s21 = smov (%p36_p1, %s34_s21), 0  ;;  %p242_p3 = pnand %p1509_p0, %p241_p2 }
   0x6   : > { %s1510_s24 = sshll.u32 (!%p242_p3), %s1990_s18, 5 }
   0x7   : > { %245 = sbr.rel (%p242_p3) target bundleno = 568 (0x238), region = 40  ;;  %p290_p4 = scmp.lt.s32.totalorder (!%p242_p3), %s1510_s24, 63 }
   0xc   : > { %v1848_v0 = vld [vmem:[%s2484_s1 + $0x78] sm:$0xff]   ;;  %v1850_v2 = vld [vmem:[%s2484_s1 + $0x70] sm:$0xff]   ;;  %v1852_v4 = vld [vmem:[%s2484_s1 + $0x68] sm:$0xff]   ;;  %s2494_s24 = smov (!%p290_p4, %s1510_s24), 63 }
   0xd   : > { %v1849_v1 = vld [vmem:[%s2484_s1 + $0x38] sm:$0xff]   ;;  %1568 = vmatprep.subr.bf16.mxu0 %v1848_v0  ;;  %1808 = vmatprep.subr.bf16.mxu1 %v1848_v0  ;;  %v1851_v3 = vld [vmem:[%s2484_s1 + $0x30] sm:$0xff]   ;;  %v1853_v5 = vld [vmem:[%s2484_s1 + $0x28] sm:$0xff]   ;;  %s1567_s14 = sshll.u32 %s2494_s24, 3 }
   0xe   : > { %1569 = vmatpush3.bf16.msra.mxu0 %v1849_v1  ;;  %1816 = vmatpush3.bf16.msra.mxu1 %v1849_v1  ;;  %v1854_v6 = vld [vmem:[%s2484_s1 + $0x60] sm:$0xff]   ;;  %v1856_v8 = vld [vmem:[%s2484_s1 + $0x58] sm:$0xff]   ;;  %s2083_s22 = scalar_lea.vmem %s2483_s0, %s1567_s14  ;;  %v1858_v10 = vld [vmem:[%s2484_s1 + $0x50] sm:$0xff]   ;;  %s2380_s12 = scalar_lea.vmem %s2488_s5, %s1567_s14 }
   0xf   : > { %1570 = vmatprep.subr.bf16.mxu0 %v1850_v2  ;;  %1809 = vmatprep.subr.bf16.mxu1 %v1850_v2  ;;  %v1855_v7 = vld [vmem:[%s2484_s1 + $0x20] sm:$0xff]   ;;  %v1857_v9 = vld [vmem:[%s2484_s1 + $0x18] sm:$0xff]   ;;  %v1859_v12 = vld [vmem:[%s2484_s1 + $0x10] sm:$0xff]  }
  0x10   : > { %v1866_v11 = vld [vmem:[%s2083_s22 + $0x4] ss:$8 sps:$4 sm:$0xff]   ;;  %v1864_v17 = vld [vmem:[%s2083_s22] ss:$8 sps:$4 sm:$0xff]   ;;  %v1867_v19 = vld [vmem:[%s2083_s22 + $0x14] ss:$8 sps:$4 sm:$0xff]  }
  0x11   : > { %674 = vmatprep.mubr.bf16.mxu0 %v1866_v11  ;;  %v1860_v13 = vld [vmem:[%s2484_s1 + $0x48] sm:$0xff]   ;;  %v1862_v15 = vld [vmem:[%s2484_s1 + $0x40] sm:$0xff]   ;;  %v1900_v21 = vld [vmem:[%s2083_s22 + $0xd4] ss:$8 sps:$4 sm:$0xff]  }
  0x12   : > { %1571 = vmatpush3.bf16.msra.mxu0 %v1851_v3  ;;  %1817 = vmatpush3.bf16.msra.mxu1 %v1851_v3  ;;  %v1861_v14 = vld [vmem:[%s2484_s1 + $0x8] sm:$0xff]   ;;  %v1863_v16 = vld [vmem:[%s2484_s1] sm:$0xff]   ;;  %v1060_v22 = vld [vmem:[%s2486_s3 + $0x78] sm:$0xff] }
  0x13   : > { %1572 = vmatprep.subr.bf16.mxu0 %v1852_v4  ;;  %1810 = vmatprep.subr.bf16.mxu1 %v1852_v4  ;;  %v1896_v18 = vld [vmem:[%s2083_s22 + $0xc4] ss:$8 sps:$4 sm:$0xff]   ;;  %v1894_v20 = vld [vmem:[%s2083_s22 + $0xc0] ss:$8 sps:$4 sm:$0xff]   ;;  %v1059_v23 = vld [vmem:[%s2486_s3 + $0x70] sm:$0xff] }
  0x14   : > { %770 = vmatprep.mubr.bf16.mxu1 %v1896_v18  ;;  %v1869_v24 = vld [vmem:[%s2083_s22 + $0x10] ss:$8 sps:$4 sm:$0xff]   ;;  %v1870_v25 = vld [vmem:[%s2083_s22 + $0x24] ss:$8 sps:$4 sm:$0xff]   ;;  %v1872_v31 = vld [vmem:[%s2083_s22 + $0x20] ss:$8 sps:$4 sm:$0xff]  }
  0x15   : > { %v1902_v26 = vld [vmem:[%s2083_s22 + $0xd0] ss:$8 sps:$4 sm:$0xff]   ;;  %v1058_v27 = vld [vmem:[%s2486_s3 + $0x68] sm:$0xff]  ;;  %v1057_v29 = vld [vmem:[%s2486_s3 + $0x60] sm:$0xff] }
  0x16   : > { %1573 = vmatpush3.bf16.msra.mxu0 %v1853_v5  ;;  %1818 = vmatpush3.bf16.msra.mxu1 %v1853_v5  ;;  %v1906_v28 = vld [vmem:[%s2083_s22 + $0xe4] ss:$8 sps:$4 sm:$0xff]   ;;  %v1056_v30 = vld [vmem:[%s2486_s3 + $0x58] sm:$0xff]  ;;  %v1055_v32 = vld [vmem:[%s2486_s3 + $0x50] sm:$0xff] }
  0x17   : > { %1574 = vmatprep.subr.bf16.mxu0 %v1854_v6  ;;  %1811 = vmatprep.subr.bf16.mxu1 %v1854_v6  ;;  %v1873_v33 = vld [vmem:[%s2083_s22 + $0x34] ss:$8 sps:$4 sm:$0xff]   ;;  %v1908_v34 = vld [vmem:[%s2083_s22 + $0xe0] ss:$8 sps:$4 sm:$0xff]   ;;  %v1875_v36 = vld [vmem:[%s2083_s22 + $0x30] ss:$8 sps:$4 sm:$0xff]  }
  0x18   : > { %v1909_v35 = vld [vmem:[%s2083_s22 + $0xf4] ss:$8 sps:$4 sm:$0xff]   ;;  %v1876_v37 = vld [vmem:[%s2083_s22 + $0x44] ss:$8 sps:$4 sm:$0xff]   ;;  %v1911_v38 = vld [vmem:[%s2083_s22 + $0xf0] ss:$8 sps:$4 sm:$0xff]  }
  0x19   : > { %v1878_v39 = vld [vmem:[%s2083_s22 + $0x40] ss:$8 sps:$4 sm:$0xff]   ;;  %v1879_v40 = vld [vmem:[%s2083_s22 + $0x54] ss:$8 sps:$4 sm:$0xff]   ;;  %v1881_v41 = vld [vmem:[%s2083_s22 + $0x50] ss:$8 sps:$4 sm:$0xff]  }
  0x1a   : > { %1575 = vmatpush3.bf16.msra.mxu0 %v1855_v7  ;;  %1819 = vmatpush3.bf16.msra.mxu1 %v1855_v7  ;;  %v1882_v42 = vld [vmem:[%s2083_s22 + $0x64] ss:$8 sps:$4 sm:$0xff]   ;;  %v1884_v43 = vld [vmem:[%s2083_s22 + $0x60] ss:$8 sps:$4 sm:$0xff]   ;;  %v1885_v44 = vld [vmem:[%s2083_s22 + $0x74] ss:$8 sps:$4 sm:$0xff]  }
  0x1b   : > { %1576 = vmatprep.subr.bf16.mxu0 %v1856_v8  ;;  %1812 = vmatprep.subr.bf16.mxu1 %v1856_v8  ;;  %v1887_v45 = vld [vmem:[%s2083_s22 + $0x70] ss:$8 sps:$4 sm:$0xff]   ;;  %v1888_v46 = vld [vmem:[%s2083_s22 + $0x84] ss:$8 sps:$4 sm:$0xff]   ;;  %v1890_v49 = vld [vmem:[%s2083_s22 + $0x80] ss:$8 sps:$4 sm:$0xff]  }
  0x1c   : > { %v1054_v47 = vld [vmem:[%s2486_s3 + $0x48] sm:$0xff]  ;;  %v1053_v48 = vld [vmem:[%s2486_s3 + $0x40] sm:$0xff]  ;;  %v1052_v50 = vld [vmem:[%s2486_s3 + $0x38] sm:$0xff] }
  0x1d   : > { %v1891_v51 = vld [vmem:[%s2083_s22 + $0x94] ss:$8 sps:$4 sm:$0xff]   ;;  %v1050_v53 = vld [vmem:[%s2486_s3 + $0x28] sm:$0xff]  ;;  %v1049_v54 = vld [vmem:[%s2486_s3 + $0x20] sm:$0xff] }
  0x1e   : > { %1577 = vmatpush3.bf16.msra.mxu0 %v1857_v9  ;;  %1820 = vmatpush3.bf16.msra.mxu1 %v1857_v9  ;;  %v1051_v52 = vld [vmem:[%s2486_s3 + $0x30] sm:$0xff]  ;;  %v1048_v56 = vld [vmem:[%s2486_s3 + $0x18] sm:$0xff]  ;;  %v1897_v57 = vld [vmem:[%s2083_s22 + $0xa4] ss:$8 sps:$4 sm:$0xff]  }
  0x1f   : > { %1578 = vmatprep.subr.bf16.mxu0 %v1858_v10  ;;  %1813 = vmatprep.subr.bf16.mxu1 %v1858_v10  ;;  %v1893_v55 = vld [vmem:[%s2083_s22 + $0x90] ss:$8 sps:$4 sm:$0xff]   ;;  %v1046_v59 = vld [vmem:[%s2486_s3 + $0x8] sm:$0xff]  ;;  %v1045_v60 = vld [vmem:[%s2486_s3] sm:$0xff] }
  0x20   : > { %v1047_v58 = vld [vmem:[%s2486_s3 + $0x10] sm:$0xff]  ;;  %v1899_v61 = vld [vmem:[%s2083_s22 + $0xa0] ss:$8 sps:$4 sm:$0xff]  }
  0x21   : > { %v1903_v62 = vld [vmem:[%s2083_s22 + $0xb4] ss:$8 sps:$4 sm:$0xff]   ;;  %v1905_v63 = vld [vmem:[%s2083_s22 + $0xb0] ss:$8 sps:$4 sm:$0xff]   ;;  %v2189_v2 = vld [vmem:[%s2485_s2] ss:$0 sm:$0xff] }
  0x22   : > { %1579 = vmatpush3.bf16.msra.mxu0 %v1859_v12  ;;  %1821 = vmatpush3.bf16.msra.mxu1 %v1859_v12 }
  0x23   : > { %1580 = vmatprep.subr.bf16.mxu0 %v1860_v13  ;;  %1814 = vmatprep.subr.bf16.mxu1 %v1860_v13 }
  0x26   : > { %1581 = vmatpush3.bf16.msra.mxu0 %v1861_v14  ;;  %1822 = vmatpush3.bf16.msra.mxu1 %v1861_v14 }
  0x27   : > { %1582 = vmatprep.subr.bf16.mxu0 %v1862_v15  ;;  %1815 = vmatprep.subr.bf16.mxu1 %v1862_v15 }
  0x2a   : > { %1583 = vmatpush3.bf16.msra.mxu0 %v1863_v16  ;;  %1823 = vmatpush3.bf16.msra.mxu1 %v1863_v16 }
  0x2b   : > { %1728 = vmatprep.subr.mxu1 %v1060_v22 }
  0x2d   : > { %675 = vmatmul.mubr.bf16.vlgmr.msra.gmra.mxu0 %v1864_v17  ;;  %771 = vmatmul.mubr.bf16.vlgmr.msra.gmra.mxu1 %v1894_v20 }
  0x2e   : > { %682 = vmatprep.mubr.bf16.mxu0 %v1867_v19  ;;  %778 = vmatprep.mubr.bf16.mxu1 %v1900_v21 }
  0x2f   : > { %1729 = vmatpush3.msra.mxu1 %v1060_v22 }
  0x30   : > { %1730 = vmatprep.subr.mxu1 %v1059_v23 }
  0x31   : > { %1731 = vmatpush3.msra.mxu1 %v1059_v23 }
  0x32   : > { %1732 = vmatprep.subr.mxu1 %v1058_v27 }
  0x33   : > { %1733 = vmatpush3.msra.mxu1 %v1058_v27 }
  0x34   : > { %1734 = vmatprep.subr.mxu1 %v1057_v29 }
  0x35   : > { %683 = vmatmul.mubr.bf16.gmra.mxu0 %v1869_v24  ;;  %779 = vmatmul.mubr.bf16.gmra.mxu1 %v1902_v26 }
  0x36   : > { %690 = vmatprep.mubr.bf16.mxu0 %v1870_v25  ;;  %786 = vmatprep.mubr.bf16.mxu1 %v1906_v28 }
  0x37   : > { %1735 = vmatpush3.msra.mxu1 %v1057_v29 }
  0x38   : > { %1736 = vmatprep.subr.mxu1 %v1056_v30 }
  0x39   : > { %1737 = vmatpush3.msra.mxu1 %v1056_v30 }
  0x3a   : > { %1738 = vmatprep.subr.mxu1 %v1055_v32 }
  0x3b   : > { %1739 = vmatpush3.msra.mxu1 %v1055_v32 }
  0x3c   : > { %1740 = vmatprep.subr.mxu1 %v1054_v47 }
  0x3d   : > { %691 = vmatmul.mubr.bf16.gmra.mxu0 %v1872_v31  ;;  %787 = vmatmul.mubr.bf16.gmra.mxu1 %v1908_v34 }
  0x3e   : > { %698 = vmatprep.mubr.bf16.mxu0 %v1873_v33  ;;  %794 = vmatprep.mubr.bf16.mxu1 %v1909_v35 }
  0x3f   : > { %1741 = vmatpush3.msra.mxu1 %v1054_v47 }
  0x40   : > { %1742 = vmatprep.subr.mxu1 %v1053_v48 }
  0x41   : > { %1743 = vmatpush3.msra.mxu1 %v1053_v48 }
  0x42   : > { %1744 = vmatprep.subr.mxu1 %v1052_v50 }
  0x43   : > { %1745 = vmatpush3.msra.mxu1 %v1052_v50 }
  0x44   : > { %1746 = vmatprep.subr.mxu1 %v1051_v52 }
  0x45   : > { %699 = vmatmul.mubr.bf16.gmra.mxu0 %v1875_v36  ;;  %795 = vmatmul.mubr.bf16.gmra.mxu1 %v1911_v38 }
  0x46   : > { %706 = vmatprep.mubr.bf16.mxu0 %v1876_v37  ;;  %1747 = vmatpush3.msra.mxu1 %v1051_v52 }
  0x47   : > { %1748 = vmatprep.subr.mxu1 %v1050_v53 }
  0x48   : > { %1749 = vmatpush3.msra.mxu1 %v1050_v53 }
  0x49   : > { %1750 = vmatprep.subr.mxu1 %v1049_v54 }
  0x4a   : > { %1751 = vmatpush3.msra.mxu1 %v1049_v54 }
  0x4b   : > { %1752 = vmatprep.subr.mxu1 %v1048_v56 }
  0x4c   : > { %1753 = vmatpush3.msra.mxu1 %v1048_v56 }
  0x4d   : > { %707 = vmatmul.mubr.bf16.gmra.mxu0 %v1878_v39  ;;  %1754 = vmatprep.subr.mxu1 %v1047_v58 }
  0x4e   : > { %714 = vmatprep.mubr.bf16.mxu0 %v1879_v40  ;;  %1755 = vmatpush3.msra.mxu1 %v1047_v58 }
  0x4f   : > { %1756 = vmatprep.subr.mxu1 %v1046_v59 }
  0x50   : > { %1757 = vmatpush3.msra.mxu1 %v1046_v59 }
  0x51   : > { %1758 = vmatprep.subr.mxu1 %v1045_v60 }
  0x52   : > { %1759 = vmatpush3.msra.mxu1 %v1045_v60 }
  0x55   : > { %715 = vmatmul.mubr.bf16.gmra.mxu0 %v1881_v41 }
  0x56   : > { %722 = vmatprep.mubr.bf16.mxu0 %v1882_v42 }
  0x5d   : > { %723 = vmatmul.mubr.bf16.gmra.mxu0 %v1884_v43 }
  0x5e   : > { %730 = vmatprep.mubr.bf16.mxu0 %v1885_v44 }
  0x65   : > { %731 = vmatmul.mubr.bf16.gmra.mxu0 %v1887_v45 }
  0x66   : > { %738 = vmatprep.mubr.bf16.mxu0 %v1888_v46 }
  0x6d   : > { %739 = vmatmul.mubr.bf16.gmra.mxu0 %v1890_v49 }
  0x6e   : > { %746 = vmatprep.mubr.bf16.mxu0 %v1891_v51 }
  0x75   : > { %747 = vmatmul.mubr.bf16.gmra.mxu0 %v1893_v55 }
  0x76   : > { %754 = vmatprep.mubr.bf16.mxu0 %v1897_v57 }
  0x7d   : > { %755 = vmatmul.mubr.bf16.gmra.mxu0 %v1899_v61 }
  0x7e   : > { %762 = vmatprep.mubr.bf16.mxu0 %v1903_v62 }
  0x85   : > { %763 = vmatmul.mubr.bf16.gmra.mxu0 %v1905_v63 }
  0xed   : > { %v1584_v0 = vpop.f32.mrf.mxu0  ;;  %v2241_v55 = vpop.f32.mrf.mxu1 }
  0xef   : > { %v1585_v1 = vpop.f32.mrf.mxu0  ;;  %v2248_v61 = vpop.f32.mrf.mxu1 }
  0xf0   : > { %v1586_v3 = vadd.f32 %v1585_v1, %v1584_v0 }
  0xf1   : > { %v1587_v4 = vpop.f32.mrf.mxu0 }
  0xf2   : > { %v2192_v5 = vadd.f32 %v1586_v3, %v2189_v2 }
  0xf3   : > { %v1588_v6 = vpop.f32.mrf.mxu0 }
  0xf4   : > { %v1589_v7 = vadd.f32 %v1588_v6, %v1587_v4  ;;  %v1013_v8 = vmul.f32 %v2192_v5, %v2192_v5  ;;  %v2255_v4 = vpop.f32.mrf.mxu1 }
  0xf5   : > { %v1590_v9 = vpop.f32.mrf.mxu0 }
  0xf6   : > { %1760 = vmatprep.mubr.f32.mxu1 %v1013_v8  ;;  %v2197_v10 = vadd.f32 %v1589_v7, %v2189_v2 }
  0xf7   : > { %v1591_v11 = vpop.f32.mrf.mxu0 }
  0xf8   : > { %v1592_v12 = vadd.f32 %v1591_v11, %v1590_v9  ;;  %v1014_v13 = vmul.f32 %v2197_v10, %v2197_v10 }
  0xf9   : > { %v1593_v14 = vpop.f32.mrf.mxu0 }
  0xfa   : > { %1761 = vmatmul.mubr.f32.vlgmr.msra.gmra.mxu1 %v1014_v13  ;;  %v2202_v15 = vadd.f32 %v1592_v12, %v2189_v2  ;;  %v2262_v12 = vpop.f32.mrf.mxu1 }
  0xfb   : > { %v1594_v16 = vpop.f32.mrf.mxu0 }
  0xfc   : > { %v1595_v17 = vadd.f32 %v1594_v16, %v1593_v14  ;;  %v1015_v18 = vmul.f32 %v2202_v15, %v2202_v15 }
  0xfd   : > { %v1596_v19 = vpop.f32.mrf.mxu0 }
  0xfe   : > { %1763 = vmatprep.mubr.f32.mxu1 %v1015_v18  ;;  %v2207_v20 = vadd.f32 %v1595_v17, %v2189_v2 }
  0xff   : > { %v1597_v21 = vpop.f32.mrf.mxu0 }
 0x100   : > { %v1598_v22 = vadd.f32 %v1597_v21, %v1596_v19  ;;  %v1016_v23 = vmul.f32 %v2207_v20, %v2207_v20  ;;  %v2269_v19 = vpop.f32.mrf.mxu1 }
 0x101   : > { %v1599_v24 = vpop.f32.mrf.mxu0 }
 0x102   : > { %1764 = vmatmul.mubr.f32.gmra.mxu1 %v1016_v23  ;;  %v2212_v25 = vadd.f32 %v1598_v22, %v2189_v2 }
 0x103   : > { %v1600_v26 = vpop.f32.mrf.mxu0 }
 0x104   : > { %v1601_v27 = vadd.f32 %v1600_v26, %v1599_v24  ;;  %v1017_v28 = vmul.f32 %v2212_v25, %v2212_v25 }
 0x105   : > { %v1602_v29 = vpop.f32.mrf.mxu0 }
 0x106   : > { %1766 = vmatprep.mubr.f32.mxu1 %v1017_v28  ;;  %v2217_v30 = vadd.f32 %v1601_v27, %v2189_v2  ;;  %v1663_v27 = vpop.f32.mrf.mxu1 }
 0x107   : > { %v1603_v31 = vpop.f32.mrf.mxu0 }
 0x108   : > { %v1604_v32 = vadd.f32 %v1603_v31, %v1602_v29  ;;  %v1018_v33 = vmul.f32 %v2217_v30, %v2217_v30 }
 0x109   : > { %v1605_v34 = vpop.f32.mrf.mxu0 }
 0x10a   : > { %1767 = vmatmul.mubr.f32.gmra.mxu1 %v1018_v33  ;;  %v2222_v35 = vadd.f32 %v1604_v32, %v2189_v2 }
 0x10b   : > { %v1606_v36 = vpop.f32.mrf.mxu0 }
 0x10c   : > { %v1607_v37 = vadd.f32 %v1606_v36, %v1605_v34  ;;  %v1019_v38 = vmul.f32 %v2222_v35, %v2222_v35  ;;  %v1665_v34 = vpop.f32.mrf.mxu1 }
 0x10d   : > { %v1608_v39 = vpop.f32.mrf.mxu0 }
 0x10e   : > { %1769 = vmatprep.mubr.f32.mxu1 %v1019_v38  ;;  %v2227_v40 = vadd.f32 %v1607_v37, %v2189_v2 }
 0x10f   : > { %v1609_v41 = vpop.f32.mrf.mxu0 }
 0x110   : > { %v1610_v42 = vadd.f32 %v1609_v41, %v1608_v39  ;;  %v1020_v43 = vmul.f32 %v2227_v40, %v2227_v40 }
 0x111   : > { %v1611_v44 = vpop.f32.mrf.mxu0 }
 0x112   : > { %1770 = vmatmul.mubr.f32.gmra.mxu1 %v1020_v43  ;;  %v2232_v45 = vadd.f32 %v1610_v42, %v2189_v2  ;;  %v1666_v42 = vpop.f32.mrf.mxu1 }
 0x113   : > { %v1612_v46 = vpop.f32.mrf.mxu0 }
 0x114   : > { %v1613_v47 = vadd.f32 %v1612_v46, %v1611_v44  ;;  %v1021_v48 = vmul.f32 %v2232_v45, %v2232_v45 }
 0x115   : > { %v1614_v49 = vpop.f32.mrf.mxu0 }
 0x116   : > { %1772 = vmatprep.mubr.f32.mxu1 %v1021_v48  ;;  %v2237_v50 = vadd.f32 %v1613_v47, %v2189_v2 }
 0x117   : > { %v1615_v51 = vpop.f32.mrf.mxu0 }
 0x118   : > { %v1616_v52 = vadd.f32 %v1615_v51, %v1614_v49  ;;  %v1022_v53 = vmul.f32 %v2237_v50, %v2237_v50  ;;  %v1668_v49 = vpop.f32.mrf.mxu1 }
 0x119   : > { %v1617_v54 = vpop.f32.mrf.mxu0 }
 0x11a   : > { %1773 = vmatmul.mubr.f32.gmra.mxu1 %v1022_v53  ;;  %v2244_v56 = vadd.f32 %v1616_v52, %v2189_v2 }
 0x11b   : > { %v1618_v57 = vpop.f32.mrf.mxu0 }
 0x11c   : > { %v1619_v58 = vadd.f32 %v1618_v57, %v1617_v54  ;;  %v1023_v59 = vmul.f32 %v2244_v56, %v2244_v56 }
 0x11d   : > { %v1620_v60 = vpop.f32.mrf.mxu0 }
 0x11e   : > { %1775 = vmatprep.mubr.f32.mxu1 %v1023_v59  ;;  %v2251_v62 = vadd.f32 %v1619_v58, %v2189_v2  ;;  %v1669_v58 = vpop.f32.mrf.mxu1 }
 0x11f   : > { %v1621_v63 = vpop.f32.mrf.mxu0 }
 0x120   : > { %v1622_v0 = vadd.f32 %v1621_v63, %v1620_v60  ;;  %v1024_v1 = vmul.f32 %v2251_v62, %v2251_v62 }
 0x121   : > { %v1623_v3 = vpop.f32.mrf.mxu0 }
 0x122   : > { %1776 = vmatmul.mubr.f32.gmra.mxu1 %v1024_v1  ;;  %v2258_v6 = vadd.f32 %v1622_v0, %v2189_v2 }
 0x123   : > { %v1624_v7 = vpop.f32.mrf.mxu0 }
 0x124   : > { %v1625_v8 = vadd.f32 %v1624_v7, %v1623_v3  ;;  %v1025_v9 = vmul.f32 %v2258_v6, %v2258_v6  ;;  %v1671_v3 = vpop.f32.mrf.mxu1 }
 0x125   : > { %v1626_v11 = vpop.f32.mrf.mxu0 }
 0x126   : > { %1778 = vmatprep.mubr.f32.mxu1 %v1025_v9  ;;  %v2265_v13 = vadd.f32 %v1625_v8, %v2189_v2 }
 0x127   : > { %v1627_v14 = vpop.f32.mrf.mxu0 }
 0x128   : > { %v1628_v16 = vadd.f32 %v1627_v14, %v1626_v11  ;;  %v1026_v17 = vmul.f32 %v2265_v13, %v2265_v13 }
 0x129   : > { %v1629_v18 = vpop.f32.mrf.mxu0 }
 0x12a   : > { %1779 = vmatmul.mubr.f32.gmra.mxu1 %v1026_v17  ;;  %v2272_v21 = vadd.f32 %v1628_v16, %v2189_v2  ;;  %v1672_v16 = vpop.f32.mrf.mxu1 }
 0x12b   : > { %v1630_v22 = vpop.f32.mrf.mxu0 }
 0x12c   : > { %v1631_v23 = vadd.f32 %v1630_v22, %v1629_v18  ;;  %v1027_v24 = vmul.f32 %v2272_v21, %v2272_v21 }
 0x12d   : > { %v1632_v26 = vpop.f32.mrf.mxu0 }
 0x12e   : > { %1781 = vmatprep.mubr.f32.mxu1 %v1027_v24  ;;  %v2277_v28 = vadd.f32 %v1631_v23, %v2189_v2  ;;  %v1658_v24 = vadd.f32 %v2248_v61, %v2241_v55  ;;  %v1667_v61 = vadd.f32 %v1666_v42, %v1665_v34 }
 0x12f   : > { %v1633_v29 = vpop.f32.mrf.mxu0 }
 0x130   : > { %v1634_v31 = vadd.f32 %v1633_v29, %v1632_v26  ;;  %v1028_v32 = vmul.f32 %v2277_v28, %v2277_v28  ;;  %v1674_v29 = vpop.f32.mrf.mxu1  ;;  %v2340_v42 = vadd.f32 %v1667_v61, %v2189_v2 }
 0x131   : > { %v1635_v33 = vpop.f32.mrf.mxu0 }
 0x132   : > { %1782 = vmatmul.mubr.f32.gmra.mxu1 %v1028_v32  ;;  %v2282_v36 = vadd.f32 %v1634_v31, %v2189_v2 }
 0x133   : > { %v1636_v37 = vpop.f32.mrf.mxu0 }
 0x134   : > { %v1637_v38 = vadd.f32 %v1636_v37, %v1635_v33  ;;  %v1029_v39 = vmul.f32 %v2282_v36, %v2282_v36  ;;  %v1661_v33 = vadd.f32 %v2262_v12, %v2255_v4  ;;  %v1670_v12 = vadd.f32 %v1669_v58, %v1668_v49 }
 0x135   : > { %v1638_v41 = vpop.f32.mrf.mxu0  ;;  %v1040_v58 = vmul.f32 %v2340_v42, %v2340_v42 }
 0x136   : > { %1784 = vmatprep.mubr.f32.mxu1 %v1029_v39  ;;  %v2287_v43 = vadd.f32 %v1637_v38, %v2189_v2  ;;  %v1664_v39 = vadd.f32 %v1663_v27, %v2269_v19  ;;  %v2330_v4 = vadd.f32 %v1661_v33, %v2189_v2 }
 0x137   : > { %v1639_v44 = vpop.f32.mrf.mxu0 }
 0x138   : > { %v1640_v46 = vadd.f32 %v1639_v44, %v1638_v41  ;;  %v1030_v47 = vmul.f32 %v2287_v43, %v2287_v43  ;;  %v1675_v41 = vpop.f32.mrf.mxu1  ;;  %v2322_v44 = vadd.f32 %v1658_v24, %v2189_v2  ;;  %v2335_v27 = vadd.f32 %v1664_v39, %v2189_v2 }
 0x139   : > { %v1641_v48 = vpop.f32.mrf.mxu0  ;;  %v1038_v34 = vmul.f32 %v2330_v4, %v2330_v4 }
 0x13a   : > { %1785 = vmatmul.mubr.f32.gmra.mxu1 %v1030_v47  ;;  %v2292_v51 = vadd.f32 %v1640_v46, %v2189_v2  ;;  %v1677_v47 = vpop.f32.mrf.mxu1  ;;  %v1037_v19 = vmul.f32 %v2322_v44, %v2322_v44  ;;  %v1039_v49 = vmul.f32 %v2335_v27, %v2335_v27 }
 0x13b   : > { %v1642_v52 = vpop.f32.mrf.mxu0 }
 0x13c   : > { %v1643_v53 = vadd.f32 %v1642_v52, %v1641_v48  ;;  %v1031_v54 = vmul.f32 %v2292_v51, %v2292_v51  ;;  %v1673_v48 = vadd.f32 %v1672_v16, %v1671_v3  ;;  %v1676_v52 = vadd.f32 %v1675_v41, %v1674_v29 }
 0x13d   : > { %v1644_v57 = vpop.f32.mrf.mxu0 }
 0x13e   : > { %1787 = vmatprep.mubr.f32.mxu1 %v1031_v54  ;;  %v2297_v59 = vadd.f32 %v1643_v53, %v2189_v2  ;;  %v1678_v53 = vpop.f32.mrf.mxu1  ;;  %v2345_v54 = vadd.f32 %v1670_v12, %v2189_v2 }
 0x13f   : > { %v1645_v60 = vpop.f32.mrf.mxu0 }
 0x140   : > { %v1646_v63 = vadd.f32 %v1645_v60, %v1644_v57  ;;  %v1032_v0 = vmul.f32 %v2297_v59, %v2297_v59  ;;  %v1679_v57 = vadd.f32 %v1678_v53, %v1677_v47  ;;  %v2350_v60 = vadd.f32 %v1673_v48, %v2189_v2 }
 0x141   : > { %v1647_v1 = vpop.f32.mrf.mxu0 }
 0x142   : > { %1788 = vmatmul.mubr.f32.gmra.mxu1 %v1032_v0  ;;  %v2302_v7 = vadd.f32 %v1646_v63, %v2189_v2  ;;  %v1041_v63 = vmul.f32 %v2345_v54, %v2345_v54  ;;  %v2355_v0 = vadd.f32 %v1676_v52, %v2189_v2  ;;  %v2360_v3 = vadd.f32 %v1679_v57, %v2189_v2 }
 0x143   : > { %v1648_v8 = vpop.f32.mrf.mxu0 }
 0x144   : > { %v1649_v9 = vadd.f32 %v1648_v8, %v1647_v1  ;;  %v1033_v11 = vmul.f32 %v2302_v7, %v2302_v7  ;;  %v1042_v1 = vmul.f32 %v2350_v60, %v2350_v60  ;;  %v1043_v8 = vmul.f32 %v2355_v0, %v2355_v0 }
 0x145   : > { %v1650_v14 = vpop.f32.mrf.mxu0 }
 0x146   : > { %1790 = vmatprep.mubr.f32.mxu1 %v1033_v11  ;;  %v2307_v17 = vadd.f32 %v1649_v9, %v2189_v2  ;;  %v1044_v9 = vmul.f32 %v2360_v3, %v2360_v3  ;;  %v2369_v11 = vld [vmem:[%s2487_s4] ss:$0 sm:$0xff] }
 0x147   : > { %v1651_v18 = vpop.f32.mrf.mxu0 }
 0x148   : > { %v1652_v22 = vadd.f32 %v1651_v18, %v1650_v14  ;;  %v1034_v23 = vmul.f32 %v2307_v17, %v2307_v17 }
 0x149   : > { %v1653_v26 = vpop.f32.mrf.mxu0 }
 0x14a   : > { %1791 = vmatmul.mubr.f32.gmra.mxu1 %v1034_v23  ;;  %v2314_v31 = vadd.f32 %v1652_v22, %v2189_v2 }
 0x14b   : > { %v1654_v32 = vpop.f32.mrf.mxu0 }
 0x14c   : > { %v1655_v37 = vadd.f32 %v1654_v32, %v1653_v26  ;;  %v1035_v38 = vmul.f32 %v2314_v31, %v2314_v31 }
 0x14e   : > { %1793 = vmatprep.mubr.f32.mxu1 %v1035_v38  ;;  %v2325_v55 = vadd.f32 %v1655_v37, %v2189_v2 }
 0x150   : > { %v1036_v46 = vmul.f32 %v2325_v55, %v2325_v55 }
 0x152   : > { %1794 = vmatmul.mubr.f32.gmra.mxu1 %v1036_v46 }
 0x153   : > { %1796 = vmatprep.mubr.f32.mxu1 %v1037_v19 }
 0x156   : > { %1797 = vmatmul.mubr.f32.gmra.mxu1 %v1038_v34 }
 0x157   : > { %1799 = vmatprep.mubr.f32.mxu1 %v1039_v49 }
 0x15a   : > { %1800 = vmatmul.mubr.f32.gmra.mxu1 %v1040_v58 }
 0x15b   : > { %1802 = vmatprep.mubr.f32.mxu1 %v1041_v63 }
 0x15e   : > { %1803 = vmatmul.mubr.f32.gmra.mxu1 %v1042_v1 }
 0x15f   : > { %1805 = vmatprep.mubr.f32.mxu1 %v1043_v8 }
 0x162   : > { %1806 = vmatmul.mubr.f32.gmra.mxu1 %v1044_v9 }
 0x1ba   : > { %v1762_v14 = vpop.f32.mrf.mxu1 }
 0x1bb   : > { %v1140_v16 = vadd.f32 %v1762_v14, %v2369_v11 }
 0x1bc   : > { %v1134_v2 = vpop.f32.mrf.mxu1 }
 0x1bd   : > { %1912 = vrsqrt.f32 %v1140_v16  ;;  %v1135_v18 = vadd.f32 %v2369_v11, %v1134_v2 }
 0x1bf   : > { %1914 = vrsqrt.f32 %v1135_v18 }
 0x1c2   : > { %v1765_v22 = vpop.f32.mrf.mxu1 }
 0x1c3   : > { %v1150_v23 = vadd.f32 %v1765_v22, %v2369_v11 }
 0x1c4   : > { %v1144_v24 = vpop.f32.mrf.mxu1 }
 0x1c5   : > { %1916 = vrsqrt.f32 %v1150_v23  ;;  %v1145_v26 = vadd.f32 %v2369_v11, %v1144_v24 }
 0x1c7   : > { %1918 = vrsqrt.f32 %v1145_v26 }
 0x1ca   : > { %v1913_v29 = vpop.eup %1912  ;;  %v1768_v32 = vpop.f32.mrf.mxu1 }
 0x1cb   : > { %v1326_v33 = vmul.f32 %v1913_v29, %v2197_v10  ;;  %v1160_v37 = vadd.f32 %v1768_v32, %v2369_v11 }
 0x1cc   : > { %v1915_v38 = vpop.eup %1914  ;;  %v1154_v39 = vpop.f32.mrf.mxu1 }
 0x1cd   : > { %1358 = vst [vmem:[%s2380_s12 + $0x8] sm:$0xff] %v1326_v33  ;;  %v1325_v41 = vmul.f32 %v1915_v38, %v2192_v5  ;;  %1920 = vrsqrt.f32 %v1160_v37  ;;  %v1155_v61 = vadd.f32 %v2369_v11, %v1154_v39 }
 0x1cf   : > { %1357 = vst [vmem:[%s2380_s12] sm:$0xff] %v1325_v41  ;;  %1922 = vrsqrt.f32 %v1155_v61 }
 0x1d2   : > { %v1917_v46 = vpop.eup %1916  ;;  %v1771_v12 = vpop.f32.mrf.mxu1 }
 0x1d3   : > { %v1328_v47 = vmul.f32 %v1917_v46, %v2207_v20  ;;  %v1170_v10 = vadd.f32 %v1771_v12, %v2369_v11 }
 0x1d4   : > { %v1919_v19 = vpop.eup %1918  ;;  %v1164_v48 = vpop.f32.mrf.mxu1 }
 0x1d5   : > { %1360 = vst [vmem:[%s2380_s12 + $0x18] sm:$0xff] %v1328_v47  ;;  %v1327_v34 = vmul.f32 %v1919_v19, %v2202_v15  ;;  %1924 = vrsqrt.f32 %v1170_v10  ;;  %v1165_v5 = vadd.f32 %v2369_v11, %v1164_v48 }
 0x1d7   : > { %1359 = vst [vmem:[%s2380_s12 + $0x10] sm:$0xff] %v1327_v34  ;;  %1926 = vrsqrt.f32 %v1165_v5 }
 0x1da   : > { %v1921_v52 = vpop.eup %1920  ;;  %v1774_v53 = vpop.f32.mrf.mxu1 }
 0x1db   : > { %v1330_v49 = vmul.f32 %v1921_v52, %v2217_v30  ;;  %v1180_v20 = vadd.f32 %v1774_v53, %v2369_v11 }
 0x1dc   : > { %v1923_v57 = vpop.eup %1922  ;;  %v1174_v58 = vpop.f32.mrf.mxu1 }
 0x1dd   : > { %1362 = vst [vmem:[%s2380_s12 + $0x28] sm:$0xff] %v1330_v49  ;;  %v1329_v63 = vmul.f32 %v1923_v57, %v2212_v25  ;;  %1928 = vrsqrt.f32 %v1180_v20  ;;  %v1175_v15 = vadd.f32 %v2369_v11, %v1174_v58 }
 0x1df   : > { %1361 = vst [vmem:[%s2380_s12 + $0x20] sm:$0xff] %v1329_v63  ;;  %1930 = vrsqrt.f32 %v1175_v15 }
 0x1e2   : > { %v1925_v1 = vpop.eup %1924  ;;  %v1777_v8 = vpop.f32.mrf.mxu1 }
 0x1e3   : > { %v1332_v9 = vmul.f32 %v1925_v1, %v2227_v40  ;;  %v1190_v30 = vadd.f32 %v1777_v8, %v2369_v11 }
 0x1e4   : > { %v1927_v14 = vpop.eup %1926  ;;  %v1184_v16 = vpop.f32.mrf.mxu1 }
 0x1e5   : > { %1364 = vst [vmem:[%s2380_s12 + $0x38] sm:$0xff] %v1332_v9  ;;  %v1331_v2 = vmul.f32 %v1927_v14, %v2222_v35  ;;  %1932 = vrsqrt.f32 %v1190_v30  ;;  %v1185_v25 = vadd.f32 %v2369_v11, %v1184_v16 }
 0x1e7   : > { %1363 = vst [vmem:[%s2380_s12 + $0x30] sm:$0xff] %v1331_v2  ;;  %1934 = vrsqrt.f32 %v1185_v25 }
 0x1ea   : > { %v1929_v18 = vpop.eup %1928  ;;  %v1780_v22 = vpop.f32.mrf.mxu1 }
 0x1eb   : > { %v1334_v23 = vmul.f32 %v1929_v18, %v2237_v50  ;;  %v1200_v40 = vadd.f32 %v1780_v22, %v2369_v11 }
 0x1ec   : > { %v1931_v24 = vpop.eup %1930  ;;  %v1194_v26 = vpop.f32.mrf.mxu1 }
 0x1ed   : > { %1366 = vst [vmem:[%s2380_s12 + $0x48] sm:$0xff] %v1334_v23  ;;  %v1333_v29 = vmul.f32 %v1931_v24, %v2232_v45  ;;  %1936 = vrsqrt.f32 %v1200_v40  ;;  %v1195_v35 = vadd.f32 %v2369_v11, %v1194_v26 }
 0x1ef   : > { %1365 = vst [vmem:[%s2380_s12 + $0x40] sm:$0xff] %v1333_v29  ;;  %1938 = vrsqrt.f32 %v1195_v35 }
 0x1f2   : > { %v1933_v32 = vpop.eup %1932  ;;  %v1783_v33 = vpop.f32.mrf.mxu1 }
 0x1f3   : > { %v1336_v37 = vmul.f32 %v1933_v32, %v2251_v62  ;;  %v1210_v50 = vadd.f32 %v1783_v33, %v2369_v11 }
 0x1f4   : > { %v1935_v38 = vpop.eup %1934  ;;  %v1204_v39 = vpop.f32.mrf.mxu1 }
 0x1f5   : > { %1368 = vst [vmem:[%s2380_s12 + $0x58] sm:$0xff] %v1336_v37  ;;  %v1335_v41 = vmul.f32 %v1935_v38, %v2244_v56  ;;  %1940 = vrsqrt.f32 %v1210_v50  ;;  %v1205_v45 = vadd.f32 %v2369_v11, %v1204_v39 }
 0x1f7   : > { %1367 = vst [vmem:[%s2380_s12 + $0x50] sm:$0xff] %v1335_v41  ;;  %1942 = vrsqrt.f32 %v1205_v45 }
 0x1fa   : > { %v1937_v61 = vpop.eup %1936  ;;  %v1786_v46 = vpop.f32.mrf.mxu1 }
 0x1fb   : > { %v1338_v12 = vmul.f32 %v1937_v61, %v2265_v13  ;;  %v1220_v62 = vadd.f32 %v1786_v46, %v2369_v11 }
 0x1fc   : > { %v1939_v47 = vpop.eup %1938  ;;  %v1214_v10 = vpop.f32.mrf.mxu1 }
 0x1fd   : > { %1370 = vst [vmem:[%s2380_s12 + $0x68] sm:$0xff] %v1338_v12  ;;  %v1337_v19 = vmul.f32 %v1939_v47, %v2258_v6  ;;  %1944 = vrsqrt.f32 %v1220_v62  ;;  %v1215_v56 = vadd.f32 %v2369_v11, %v1214_v10 }
 0x1ff   : > { %1369 = vst [vmem:[%s2380_s12 + $0x60] sm:$0xff] %v1337_v19  ;;  %1946 = vrsqrt.f32 %v1215_v56 }
 0x202   : > { %v1941_v48 = vpop.eup %1940  ;;  %v1789_v34 = vpop.f32.mrf.mxu1 }
 0x203   : > { %v1340_v5 = vmul.f32 %v1941_v48, %v2277_v28  ;;  %v1230_v13 = vadd.f32 %v1789_v34, %v2369_v11 }
 0x204   : > { %v1943_v52 = vpop.eup %1942  ;;  %v1224_v53 = vpop.f32.mrf.mxu1 }
 0x205   : > { %1372 = vst [vmem:[%s2380_s12 + $0x78] sm:$0xff] %v1340_v5  ;;  %v1339_v49 = vmul.f32 %v1943_v52, %v2272_v21  ;;  %1948 = vrsqrt.f32 %v1230_v13  ;;  %v1225_v6 = vadd.f32 %v2369_v11, %v1224_v53 }
 0x207   : > { %1371 = vst [vmem:[%s2380_s12 + $0x70] sm:$0xff] %v1339_v49  ;;  %1950 = vrsqrt.f32 %v1225_v6 }
 0x20a   : > { %v1945_v20 = vpop.eup %1944  ;;  %v1792_v57 = vpop.f32.mrf.mxu1 }
 0x20b   : > { %v1342_v58 = vmul.f32 %v1945_v20, %v2287_v43  ;;  %v1240_v28 = vadd.f32 %v1792_v57, %v2369_v11 }
 0x20c   : > { %v1947_v63 = vpop.eup %1946  ;;  %v1234_v15 = vpop.f32.mrf.mxu1 }
 0x20d   : > { %1374 = vst [vmem:[%s2380_s12 + $0x88] sm:$0xff] %v1342_v58  ;;  %v1341_v1 = vmul.f32 %v1947_v63, %v2282_v36  ;;  %1952 = vrsqrt.f32 %v1240_v28  ;;  %v1235_v21 = vadd.f32 %v2369_v11, %v1234_v15 }
 0x20f   : > { %1373 = vst [vmem:[%s2380_s12 + $0x80] sm:$0xff] %v1341_v1  ;;  %1954 = vrsqrt.f32 %v1235_v21 }
 0x212   : > { %v1949_v8 = vpop.eup %1948  ;;  %v1795_v9 = vpop.f32.mrf.mxu1 }
 0x213   : > { %v1344_v30 = vmul.f32 %v1949_v8, %v2297_v59  ;;  %v1250_v43 = vadd.f32 %v1795_v9, %v2369_v11 }
 0x214   : > { %v1951_v14 = vpop.eup %1950  ;;  %v1244_v16 = vpop.f32.mrf.mxu1 }
 0x215   : > { %1376 = vst [vmem:[%s2380_s12 + $0x98] sm:$0xff] %v1344_v30  ;;  %v1343_v2 = vmul.f32 %v1951_v14, %v2292_v51  ;;  %1956 = vrsqrt.f32 %v1250_v43  ;;  %v1245_v36 = vadd.f32 %v2369_v11, %v1244_v16 }
 0x216   : > { %v1798_v25 = vpop.f32.mrf.mxu1 }
 0x217   : > { %1375 = vst [vmem:[%s2380_s12 + $0x90] sm:$0xff] %v1343_v2  ;;  %1958 = vrsqrt.f32 %v1245_v36  ;;  %v1260_v18 = vadd.f32 %v1798_v25, %v2369_v11 }
 0x218   : > { %v1254_v22 = vpop.f32.mrf.mxu1 }
 0x219   : > { %1960 = vrsqrt.f32 %v1260_v18  ;;  %v1255_v59 = vadd.f32 %v2369_v11, %v1254_v22 }
 0x21a   : > { %v1953_v23 = vpop.eup %1952  ;;  %v1801_v40 = vpop.f32.mrf.mxu1 }
 0x21b   : > { %v1346_v24 = vmul.f32 %v1953_v23, %v2307_v17  ;;  %1962 = vrsqrt.f32 %v1255_v59  ;;  %v1270_v51 = vadd.f32 %v1801_v40, %v2369_v11 }
 0x21c   : > { %v1955_v26 = vpop.eup %1954  ;;  %v1264_v29 = vpop.f32.mrf.mxu1 }
 0x21d   : > { %1378 = vst [vmem:[%s2380_s12 + $0xa8] sm:$0xff] %v1346_v24  ;;  %v1345_v35 = vmul.f32 %v1955_v26, %v2302_v7  ;;  %1964 = vrsqrt.f32 %v1270_v51  ;;  %v1265_v32 = vadd.f32 %v2369_v11, %v1264_v29 }
 0x21e   : > { %v1804_v33 = vpop.f32.mrf.mxu1 }
 0x21f   : > { %1377 = vst [vmem:[%s2380_s12 + $0xa0] sm:$0xff] %v1345_v35  ;;  %1966 = vrsqrt.f32 %v1265_v32  ;;  %v1280_v37 = vadd.f32 %v1804_v33, %v2369_v11 }
 0x220   : > { %v1274_v50 = vpop.f32.mrf.mxu1 }
 0x221   : > { %1968 = vrsqrt.f32 %v1280_v37  ;;  %v1275_v17 = vadd.f32 %v2369_v11, %v1274_v50 }
 0x222   : > { %v1957_v38 = vpop.eup %1956  ;;  %v1807_v39 = vpop.f32.mrf.mxu1 }
 0x223   : > { %v1348_v41 = vmul.f32 %v1957_v38, %v2325_v55  ;;  %1970 = vrsqrt.f32 %v1275_v17  ;;  %v1290_v7 = vadd.f32 %v1807_v39, %v2369_v11 }
 0x224   : > { %v1959_v45 = vpop.eup %1958  ;;  %v1284_v61 = vpop.f32.mrf.mxu1 }
 0x225   : > { %1380 = vst [vmem:[%s2380_s12 + $0xb8] sm:$0xff] %v1348_v41  ;;  %v1347_v46 = vmul.f32 %v1959_v45, %v2314_v31  ;;  %1972 = vrsqrt.f32 %v1290_v7  ;;  %v1285_v12 = vadd.f32 %v2369_v11, %v1284_v61 }
 0x226   : > { %v1961_v62 = vpop.eup %1960 }
 0x227   : > { %1379 = vst [vmem:[%s2380_s12 + $0xb0] sm:$0xff] %v1347_v46  ;;  %v1350_v47 = vmul.f32 %v1961_v62, %v2330_v4  ;;  %1974 = vrsqrt.f32 %v1285_v12 }
 0x228   : > { %v1963_v55 = vpop.eup %1962 }
 0x229   : > { %1382 = vst [vmem:[%s2380_s12 + $0xc8] sm:$0xff] %v1350_v47  ;;  %v1349_v10 = vmul.f32 %v1963_v55, %v2322_v44 }
 0x22a   : > { %v1965_v19 = vpop.eup %1964 }
 0x22b   : > { %1381 = vst [vmem:[%s2380_s12 + $0xc0] sm:$0xff] %v1349_v10  ;;  %v1352_v31 = vmul.f32 %v1965_v19, %v2340_v42 }
 0x22c   : > { %v1967_v56 = vpop.eup %1966 }
 0x22d   : > { %1384 = vst [vmem:[%s2380_s12 + $0xd8] sm:$0xff] %v1352_v31  ;;  %v1351_v11 = vmul.f32 %v1967_v56, %v2335_v27 }
 0x22e   : > { %v1969_v48 = vpop.eup %1968 }
 0x22f   : > { %1383 = vst [vmem:[%s2380_s12 + $0xd0] sm:$0xff] %v1351_v11  ;;  %v1354_v4 = vmul.f32 %v1969_v48, %v2350_v60 }
 0x230   : > { %v1971_v34 = vpop.eup %1970 }
 0x231   : > { %1386 = vst [vmem:[%s2380_s12 + $0xe8] sm:$0xff] %v1354_v4  ;;  %v1353_v5 = vmul.f32 %v1971_v34, %v2345_v54 }
 0x232   : > { %v1973_v13 = vpop.eup %1972 }
 0x233   : > { %1385 = vst [vmem:[%s2380_s12 + $0xe0] sm:$0xff] %v1353_v5  ;;  %v1356_v44 = vmul.f32 %v1973_v13, %v2360_v3 }
 0x234   : > { %v1975_v52 = vpop.eup %1974 }
 0x235   : > { %1388 = vst [vmem:[%s2380_s12 + $0xf8] sm:$0xff] %v1356_v44  ;;  %v1355_v42 = vmul.f32 %v1975_v52, %v2355_v0 }
 0x237   : > { %1387 = vst [vmem:[%s2380_s12 + $0xf0] sm:$0xff] %v1355_v42 }
 0x238 PF: > { %s15_s20 = sadd.s32 1, %s1998_s20   ;;  %s2489_s18 = smov %s1994_s19 }
 0x239   : > { %p12_p5 = scmp.ge.s32.totalorder %s15_s20, 4   ;;  %s2490_s19 = smov %s2492_s21 }
 0x23b   :  { %14 = sbr.rel (!%p12_p5) target bundleno = 2 (0x2), region = 88 }

// kernel: _lambda_.17
= control target key start
LH: loop header
LB: loop body
LE: loop exit
PB: predicated region body
PF: predicated region fallthrough
CT: control target
= control target key end

     0   :  { %s1174_s18 = smov 0   ;;  %s1176_s19 = smov 0   ;;  %s1346_s0 = inlined_call_operand.vmem [shape: bf16[128,256], index: 0, kind: input, shape index: {}]   ;;  %s1347_s1 = inlined_call_operand.vmem [shape: bf16[256,128], index: 1, kind: input, shape index: {}]   ;;  %s1348_s2 = inlined_call_operand.vmem [shape: f32[1,128], index: 2, kind: input, shape index: {}]   ;;  %s1349_s3 = inlined_call_operand.vmem [shape: f32[128,128], index: 3, kind: input, shape index: {}]   ;;  %s1350_s4 = inlined_call_operand.vmem [shape: f32[1,128], index: 4, kind: input, shape index: {}]   ;;  %s1351_s5 = inlined_call_operand.vmem [shape: f32[128,128], index: 5, kind: output, shape index: {}]  }
   0x1   :  { %s1178_s20 = smov 0  }
   0x2 LB: > { %s34_s21 = sadd.s32 1, %s1138_s19  ;;  %p909_p0 = scmp.ge.s32.totalorder %s1142_s20, 1  ;;  %s1142_s20 = sphi %s1178_s20, %s15_s20   ;;  %s1138_s19 = sphi %s1176_s19, %s1353_s19   ;;  %s1134_s18 = sphi %s1174_s18, %s1352_s18  }
   0x3   : > { %p36_p1 = scmp.ge.s32.totalorder %s34_s21, 2  ;;  %p241_p2 = scmp.lt.s32.totalorder %s1142_s20, 3 }
   0x5   : > { %s1355_s21 = smov (%p36_p1, %s34_s21), 0  ;;  %p242_p3 = pnand %p909_p0, %p241_p2 }
   0x6   : > { %s910_s24 = sshll.u32 (!%p242_p3), %s1134_s18, 3 }
   0x7   : > { %245 = sbr.rel (%p242_p3) target bundleno = 488 (0x1e8), region = 40  ;;  %p290_p4 = scmp.lt.s32.totalorder (!%p242_p3), %s910_s24, 15 }
   0xc   : > { %v1076_v0 = vld [vmem:[%s1347_s1 + $0x78] sm:$0xff]   ;;  %v1078_v2 = vld [vmem:[%s1347_s1 + $0x70] sm:$0xff]   ;;  %v1080_v4 = vld [vmem:[%s1347_s1 + $0x68] sm:$0xff]   ;;  %s1357_s24 = smov (!%p290_p4, %s910_s24), 15 }
   0xd   : > { %v1077_v1 = vld [vmem:[%s1347_s1 + $0x38] sm:$0xff]   ;;  %944 = vmatprep.subr.bf16.mxu0 %v1076_v0  ;;  %v1079_v3 = vld [vmem:[%s1347_s1 + $0x30] sm:$0xff]   ;;  %v1081_v5 = vld [vmem:[%s1347_s1 + $0x28] sm:$0xff]   ;;  %s943_s14 = sshll.u32 %s1357_s24, 3 }
   0xe   : > { %945 = vmatpush3.bf16.msra.mxu0 %v1077_v1  ;;  %v1082_v6 = vld [vmem:[%s1347_s1 + $0x60] sm:$0xff]   ;;  %v1084_v8 = vld [vmem:[%s1347_s1 + $0x58] sm:$0xff]   ;;  %s1227_s22 = scalar_lea.vmem %s1346_s0, %s943_s14  ;;  %v1086_v10 = vld [vmem:[%s1347_s1 + $0x50] sm:$0xff]  }
   0xf   : > { %946 = vmatprep.subr.bf16.mxu0 %v1078_v2  ;;  %v1083_v7 = vld [vmem:[%s1347_s1 + $0x20] sm:$0xff]   ;;  %v1085_v9 = vld [vmem:[%s1347_s1 + $0x18] sm:$0xff]   ;;  %v1087_v12 = vld [vmem:[%s1347_s1 + $0x10] sm:$0xff]  }
  0x10   : > { %v1094_v11 = vld [vmem:[%s1227_s22 + $0x4] ss:$8 sps:$4 sm:$0xff]   ;;  %v652_v14 = vld [vmem:[%s1349_s3 + $0x78] sm:$0xff]  ;;  %v651_v15 = vld [vmem:[%s1349_s3 + $0x70] sm:$0xff] }
  0x11   : > { %530 = vmatprep.mubr.bf16.mxu0 %v1094_v11  ;;  %v1088_v13 = vld [vmem:[%s1347_s1 + $0x48] sm:$0xff]   ;;  %1008 = vmatprep.subr.mxu1 %v652_v14  ;;  %v1090_v18 = vld [vmem:[%s1347_s1 + $0x40] sm:$0xff]   ;;  %v648_v21 = vld [vmem:[%s1349_s3 + $0x58] sm:$0xff] }
  0x12   : > { %947 = vmatpush3.bf16.msra.mxu0 %v1079_v3  ;;  %v1089_v16 = vld [vmem:[%s1347_s1 + $0x8] sm:$0xff]   ;;  %1009 = vmatpush3.msra.mxu1 %v652_v14  ;;  %v649_v19 = vld [vmem:[%s1349_s3 + $0x60] sm:$0xff]  ;;  %v647_v22 = vld [vmem:[%s1349_s3 + $0x50] sm:$0xff] }
  0x13   : > { %948 = vmatprep.subr.bf16.mxu0 %v1080_v4  ;;  %v650_v17 = vld [vmem:[%s1349_s3 + $0x68] sm:$0xff]  ;;  %1010 = vmatprep.subr.mxu1 %v651_v15  ;;  %v1091_v20 = vld [vmem:[%s1347_s1] sm:$0xff]   ;;  %v1095_v24 = vld [vmem:[%s1227_s22 + $0x14] ss:$8 sps:$4 sm:$0xff]  }
  0x14   : > { %1011 = vmatpush3.msra.mxu1 %v651_v15  ;;  %v1092_v23 = vld [vmem:[%s1227_s22] ss:$8 sps:$4 sm:$0xff]   ;;  %v1097_v25 = vld [vmem:[%s1227_s22 + $0x10] ss:$8 sps:$4 sm:$0xff]   ;;  %v1098_v26 = vld [vmem:[%s1227_s22 + $0x24] ss:$8 sps:$4 sm:$0xff]  }
  0x15   : > { %1012 = vmatprep.subr.mxu1 %v650_v17  ;;  %v1100_v27 = vld [vmem:[%s1227_s22 + $0x20] ss:$8 sps:$4 sm:$0xff]   ;;  %v1101_v28 = vld [vmem:[%s1227_s22 + $0x34] ss:$8 sps:$4 sm:$0xff]   ;;  %v1103_v29 = vld [vmem:[%s1227_s22 + $0x30] ss:$8 sps:$4 sm:$0xff]   ;;  %s1325_s22 = scalar_lea.vmem %s1351_s5, %s943_s14 }
  0x16   : > { %949 = vmatpush3.bf16.msra.mxu0 %v1081_v5  ;;  %1013 = vmatpush3.msra.mxu1 %v650_v17  ;;  %v646_v30 = vld [vmem:[%s1349_s3 + $0x48] sm:$0xff]  ;;  %v645_v31 = vld [vmem:[%s1349_s3 + $0x40] sm:$0xff]  ;;  %v644_v32 = vld [vmem:[%s1349_s3 + $0x38] sm:$0xff] }
  0x17   : > { %950 = vmatprep.subr.bf16.mxu0 %v1082_v6  ;;  %1014 = vmatprep.subr.mxu1 %v649_v19  ;;  %v643_v33 = vld [vmem:[%s1349_s3 + $0x30] sm:$0xff]  ;;  %v642_v34 = vld [vmem:[%s1349_s3 + $0x28] sm:$0xff]  ;;  %v641_v35 = vld [vmem:[%s1349_s3 + $0x20] sm:$0xff] }
  0x18   : > { %1015 = vmatpush3.msra.mxu1 %v649_v19  ;;  %v640_v36 = vld [vmem:[%s1349_s3 + $0x18] sm:$0xff]  ;;  %v639_v37 = vld [vmem:[%s1349_s3 + $0x10] sm:$0xff]  ;;  %v638_v38 = vld [vmem:[%s1349_s3 + $0x8] sm:$0xff] }
  0x19   : > { %1016 = vmatprep.subr.mxu1 %v648_v21  ;;  %v637_v39 = vld [vmem:[%s1349_s3] sm:$0xff] }
  0x1a   : > { %951 = vmatpush3.bf16.msra.mxu0 %v1083_v7  ;;  %1017 = vmatpush3.msra.mxu1 %v648_v21  ;;  %v939_v42 = vld [vmem:[%s1348_s2] ss:$0 sm:$0xff] }
  0x1b   : > { %952 = vmatprep.subr.bf16.mxu0 %v1084_v8  ;;  %1018 = vmatprep.subr.mxu1 %v647_v22  ;;  %v940_v17 = vld [vmem:[%s1350_s4] ss:$0 sm:$0xff] }
  0x1c   : > { %1019 = vmatpush3.msra.mxu1 %v647_v22 }
  0x1d   : > { %1020 = vmatprep.subr.mxu1 %v646_v30 }
  0x1e   : > { %953 = vmatpush3.bf16.msra.mxu0 %v1085_v9  ;;  %1021 = vmatpush3.msra.mxu1 %v646_v30 }
  0x1f   : > { %954 = vmatprep.subr.bf16.mxu0 %v1086_v10  ;;  %1022 = vmatprep.subr.mxu1 %v645_v31 }
  0x20   : > { %1023 = vmatpush3.msra.mxu1 %v645_v31 }
  0x21   : > { %1024 = vmatprep.subr.mxu1 %v644_v32 }
  0x22   : > { %955 = vmatpush3.bf16.msra.mxu0 %v1087_v12  ;;  %1025 = vmatpush3.msra.mxu1 %v644_v32 }
  0x23   : > { %956 = vmatprep.subr.bf16.mxu0 %v1088_v13  ;;  %1026 = vmatprep.subr.mxu1 %v643_v33 }
  0x24   : > { %1027 = vmatpush3.msra.mxu1 %v643_v33 }
  0x25   : > { %1028 = vmatprep.subr.mxu1 %v642_v34 }
  0x26   : > { %957 = vmatpush3.bf16.msra.mxu0 %v1089_v16  ;;  %1029 = vmatpush3.msra.mxu1 %v642_v34 }
  0x27   : > { %958 = vmatprep.subr.bf16.mxu0 %v1090_v18  ;;  %1030 = vmatprep.subr.mxu1 %v641_v35 }
  0x28   : > { %1031 = vmatpush3.msra.mxu1 %v641_v35 }
  0x29   : > { %1032 = vmatprep.subr.mxu1 %v640_v36 }
  0x2a   : > { %959 = vmatpush3.bf16.msra.mxu0 %v1091_v20  ;;  %1033 = vmatpush3.msra.mxu1 %v640_v36 }
  0x2b   : > { %1034 = vmatprep.subr.mxu1 %v639_v37 }
  0x2c   : > { %1035 = vmatpush3.msra.mxu1 %v639_v37 }
  0x2d   : > { %531 = vmatmul.mubr.bf16.vlgmr.msra.gmra.mxu0 %v1092_v23  ;;  %1036 = vmatprep.subr.mxu1 %v638_v38 }
  0x2e   : > { %538 = vmatprep.mubr.bf16.mxu0 %v1095_v24  ;;  %1037 = vmatpush3.msra.mxu1 %v638_v38 }
  0x2f   : > { %1038 = vmatprep.subr.mxu1 %v637_v39 }
  0x30   : > { %1039 = vmatpush3.msra.mxu1 %v637_v39 }
  0x35   : > { %539 = vmatmul.mubr.bf16.gmra.mxu0 %v1097_v25 }
  0x36   : > { %546 = vmatprep.mubr.bf16.mxu0 %v1098_v26 }
  0x3d   : > { %547 = vmatmul.mubr.bf16.gmra.mxu0 %v1100_v27 }
  0x3e   : > { %554 = vmatprep.mubr.bf16.mxu0 %v1101_v28 }
  0x45   : > { %555 = vmatmul.mubr.bf16.gmra.mxu0 %v1103_v29 }
  0xed   : > { %v960_v40 = vpop.f32.mrf.mxu0 }
  0xef   : > { %v961_v41 = vpop.f32.mrf.mxu0 }
  0xf0   : > { %v962_v43 = vadd.f32 %v961_v41, %v960_v40 }
  0xf1   : > { %v963_v44 = vpop.f32.mrf.mxu0 }
  0xf2   : > { %v1309_v45 = vadd.f32 %v962_v43, %v939_v42 }
  0xf3   : > { %v964_v46 = vpop.f32.mrf.mxu0 }
  0xf4   : > { %v965_v47 = vadd.f32 %v964_v46, %v963_v44  ;;  %v629_v48 = vmul.f32 %v1309_v45, %v1309_v45 }
  0xf5   : > { %v966_v49 = vpop.f32.mrf.mxu0 }
  0xf6   : > { %1040 = vmatprep.mubr.f32.mxu1 %v629_v48  ;;  %v622_v50 = vadd.f32 %v965_v47, %v939_v42 }
  0xf7   : > { %v967_v51 = vpop.f32.mrf.mxu0 }
  0xf8   : > { %v968_v52 = vadd.f32 %v967_v51, %v966_v49  ;;  %v630_v53 = vmul.f32 %v622_v50, %v622_v50 }
  0xf9   : > { %v969_v54 = vpop.f32.mrf.mxu0 }
  0xfa   : > { %1041 = vmatmul.mubr.f32.vlgmr.msra.gmra.mxu1 %v630_v53  ;;  %v1313_v55 = vadd.f32 %v968_v52, %v939_v42 }
  0xfb   : > { %v970_v56 = vpop.f32.mrf.mxu0 }
  0xfc   : > { %v971_v57 = vadd.f32 %v970_v56, %v969_v54  ;;  %v631_v58 = vmul.f32 %v1313_v55, %v1313_v55 }
  0xfd   : > { %v972_v59 = vpop.f32.mrf.mxu0 }
  0xfe   : > { %1043 = vmatprep.mubr.f32.mxu1 %v631_v58  ;;  %v624_v60 = vadd.f32 %v971_v57, %v939_v42 }
  0xff   : > { %v973_v61 = vpop.f32.mrf.mxu0 }
 0x100   : > { %v974_v62 = vadd.f32 %v973_v61, %v972_v59  ;;  %v632_v63 = vmul.f32 %v624_v60, %v624_v60 }
 0x101   : > { %v975_v0 = vpop.f32.mrf.mxu0 }
 0x102   : > { %1044 = vmatmul.mubr.f32.gmra.mxu1 %v632_v63  ;;  %v625_v1 = vadd.f32 %v974_v62, %v939_v42 }
 0x103   : > { %v976_v2 = vpop.f32.mrf.mxu0 }
 0x104   : > { %v977_v3 = vadd.f32 %v976_v2, %v975_v0  ;;  %v633_v4 = vmul.f32 %v625_v1, %v625_v1 }
 0x105   : > { %v978_v5 = vpop.f32.mrf.mxu0 }
 0x106   : > { %1046 = vmatprep.mubr.f32.mxu1 %v633_v4  ;;  %v626_v6 = vadd.f32 %v977_v3, %v939_v42 }
 0x107   : > { %v979_v7 = vpop.f32.mrf.mxu0 }
 0x108   : > { %v980_v8 = vadd.f32 %v979_v7, %v978_v5  ;;  %v634_v9 = vmul.f32 %v626_v6, %v626_v6 }
 0x109   : > { %v981_v10 = vpop.f32.mrf.mxu0 }
 0x10a   : > { %1047 = vmatmul.mubr.f32.gmra.mxu1 %v634_v9  ;;  %v627_v11 = vadd.f32 %v980_v8, %v939_v42 }
 0x10b   : > { %v982_v12 = vpop.f32.mrf.mxu0 }
 0x10c   : > { %v983_v13 = vadd.f32 %v982_v12, %v981_v10  ;;  %v635_v14 = vmul.f32 %v627_v11, %v627_v11 }
 0x10e   : > { %1049 = vmatprep.mubr.f32.mxu1 %v635_v14  ;;  %v628_v15 = vadd.f32 %v983_v13, %v939_v42 }
 0x110   : > { %v636_v16 = vmul.f32 %v628_v15, %v628_v15 }
 0x112   : > { %1050 = vmatmul.mubr.f32.gmra.mxu1 %v636_v16 }
 0x1ba   : > { %v1042_v18 = vpop.f32.mrf.mxu1 }
 0x1bb   : > { %v732_v19 = vadd.f32 %v1042_v18, %v940_v17 }
 0x1bc   : > { %v726_v20 = vpop.f32.mrf.mxu1 }
 0x1bd   : > { %1104 = vrsqrt.f32 %v732_v19  ;;  %v727_v21 = vadd.f32 %v940_v17, %v726_v20 }
 0x1bf   : > { %1106 = vrsqrt.f32 %v727_v21 }
 0x1c2   : > { %v1045_v22 = vpop.f32.mrf.mxu1 }
 0x1c3   : > { %v742_v23 = vadd.f32 %v1045_v22, %v940_v17 }
 0x1c4   : > { %v736_v24 = vpop.f32.mrf.mxu1 }
 0x1c5   : > { %1108 = vrsqrt.f32 %v742_v23  ;;  %v737_v25 = vadd.f32 %v940_v17, %v736_v24 }
 0x1c7   : > { %1110 = vrsqrt.f32 %v737_v25 }
 0x1ca   : > { %v1105_v26 = vpop.eup %1104  ;;  %v1048_v27 = vpop.f32.mrf.mxu1 }
 0x1cb   : > { %v774_v28 = vmul.f32 %v1105_v26, %v622_v50  ;;  %v752_v29 = vadd.f32 %v1048_v27, %v940_v17 }
 0x1cc   : > { %v1107_v30 = vpop.eup %1106  ;;  %v746_v31 = vpop.f32.mrf.mxu1 }
 0x1cd   : > { %782 = vst [vmem:[%s1325_s22 + $0x8] sm:$0xff] %v774_v28  ;;  %v773_v32 = vmul.f32 %v1107_v30, %v1309_v45  ;;  %1112 = vrsqrt.f32 %v752_v29  ;;  %v747_v33 = vadd.f32 %v940_v17, %v746_v31 }
 0x1cf   : > { %781 = vst [vmem:[%s1325_s22] sm:$0xff] %v773_v32  ;;  %1114 = vrsqrt.f32 %v747_v33 }
 0x1d2   : > { %v1109_v34 = vpop.eup %1108  ;;  %v1051_v35 = vpop.f32.mrf.mxu1 }
 0x1d3   : > { %v776_v36 = vmul.f32 %v1109_v34, %v624_v60  ;;  %v762_v37 = vadd.f32 %v1051_v35, %v940_v17 }
 0x1d4   : > { %v1111_v38 = vpop.eup %1110  ;;  %v756_v39 = vpop.f32.mrf.mxu1 }
 0x1d5   : > { %784 = vst [vmem:[%s1325_s22 + $0x18] sm:$0xff] %v776_v36  ;;  %v775_v40 = vmul.f32 %v1111_v38, %v1313_v55  ;;  %1116 = vrsqrt.f32 %v762_v37  ;;  %v757_v41 = vadd.f32 %v940_v17, %v756_v39 }
 0x1d7   : > { %783 = vst [vmem:[%s1325_s22 + $0x10] sm:$0xff] %v775_v40  ;;  %1118 = vrsqrt.f32 %v757_v41 }
 0x1da   : > { %v1113_v42 = vpop.eup %1112 }
 0x1db   : > { %v778_v43 = vmul.f32 %v1113_v42, %v626_v6 }
 0x1dc   : > { %v1115_v44 = vpop.eup %1114 }
 0x1dd   : > { %786 = vst [vmem:[%s1325_s22 + $0x28] sm:$0xff] %v778_v43  ;;  %v777_v45 = vmul.f32 %v1115_v44, %v625_v1 }
 0x1df   : > { %785 = vst [vmem:[%s1325_s22 + $0x20] sm:$0xff] %v777_v45 }
 0x1e2   : > { %v1117_v46 = vpop.eup %1116 }
 0x1e3   : > { %v780_v47 = vmul.f32 %v1117_v46, %v628_v15 }
 0x1e4   : > { %v1119_v48 = vpop.eup %1118 }
 0x1e5   : > { %788 = vst [vmem:[%s1325_s22 + $0x38] sm:$0xff] %v780_v47  ;;  %v779_v49 = vmul.f32 %v1119_v48, %v627_v11 }
 0x1e7   : > { %787 = vst [vmem:[%s1325_s22 + $0x30] sm:$0xff] %v779_v49 }
 0x1e8 PF: > { %s15_s20 = sadd.s32 1, %s1142_s20   ;;  %s1352_s18 = smov %s1138_s19 }
 0x1e9   : > { %p12_p5 = scmp.ge.s32.totalorder %s15_s20, 4   ;;  %s1353_s19 = smov %s1355_s21 }
 0x1eb   :  { %14 = sbr.rel (!%p12_p5) target bundleno = 2 (0x2), region = 88 }

// kernel: _lambda_.18
= control target key start
LH: loop header
LB: loop body
LE: loop exit
PB: predicated region body
PF: predicated region fallthrough
CT: control target
= control target key end

     0   :  { %s860_s15 = smov 0   ;;  %s862_s16 = smov 0   ;;  %s959_s0 = inlined_call_operand.vmem [shape: bf16[32,256], index: 0, kind: input, shape index: {}]   ;;  %s960_s1 = inlined_call_operand.vmem [shape: bf16[256,128], index: 1, kind: input, shape index: {}]   ;;  %s961_s2 = inlined_call_operand.vmem [shape: f32[1,128], index: 2, kind: input, shape index: {}]   ;;  %s962_s3 = inlined_call_operand.vmem [shape: f32[32,128], index: 3, kind: output, shape index: {0}]   ;;  %s963_s4 = inlined_call_operand.vmem [shape: f32[32,128], index: 4, kind: output, shape index: {1}]  }
   0x1   :  { %s864_s17 = smov 0  }
   0x2 LB: > { %s34_s18 = sadd.s32 1, %s829_s16  ;;  %p700_p0 = scmp.ge.s32.totalorder %s833_s17, 1  ;;  %s833_s17 = sphi %s864_s17, %s15_s17   ;;  %s829_s16 = sphi %s862_s16, %s965_s16   ;;  %s825_s15 = sphi %s860_s15, %s964_s15  }
   0x3   : > { %p36_p1 = scmp.ge.s32.totalorder %s34_s18, 2  ;;  %p221_p2 = scmp.lt.s32.totalorder %s833_s17, 3 }
   0x5   : > { %s967_s18 = smov (%p36_p1, %s34_s18), 0  ;;  %p222_p3 = pnand %p700_p0, %p221_p2 }
   0x6   : > { %s701_s21 = sshll.u32 (!%p222_p3), %s825_s15, 1 }
   0x7   : > { %225 = sbr.rel (%p222_p3) target bundleno = 262 (0x106), region = 32  ;;  %p276_p4 = scmp.lt.s32.totalorder (!%p222_p3), %s701_s21, 3 }
   0xc   : > { %v792_v0 = vld [vmem:[%s960_s1 + $0x78] sm:$0xff]   ;;  %v794_v2 = vld [vmem:[%s960_s1 + $0x70] sm:$0xff]   ;;  %v796_v4 = vld [vmem:[%s960_s1 + $0x68] sm:$0xff]   ;;  %s969_s21 = smov (!%p276_p4, %s701_s21), 3 }
   0xd   : > { %v793_v1 = vld [vmem:[%s960_s1 + $0x38] sm:$0xff]   ;;  %730 = vmatprep.subr.bf16.mxu0 %v792_v0  ;;  %v795_v3 = vld [vmem:[%s960_s1 + $0x30] sm:$0xff]   ;;  %v797_v5 = vld [vmem:[%s960_s1 + $0x28] sm:$0xff]   ;;  %s902_s10 = sshll.u32 %s969_s21, 3 }
   0xe   : > { %731 = vmatpush3.bf16.msra.mxu0 %v793_v1  ;;  %v798_v6 = vld [vmem:[%s960_s1 + $0x60] sm:$0xff]   ;;  %v800_v8 = vld [vmem:[%s960_s1 + $0x58] sm:$0xff]   ;;  %s283_s15 = scalar_lea.vmem %s959_s0, %s902_s10  ;;  %v802_v10 = vld [vmem:[%s960_s1 + $0x50] sm:$0xff]   ;;  %s936_s9 = scalar_lea.vmem %s963_s4, %s902_s10 }
   0xf   : > { %732 = vmatprep.subr.bf16.mxu0 %v794_v2  ;;  %v799_v7 = vld [vmem:[%s960_s1 + $0x20] sm:$0xff]   ;;  %v801_v9 = vld [vmem:[%s960_s1 + $0x18] sm:$0xff]   ;;  %v803_v12 = vld [vmem:[%s960_s1 + $0x10] sm:$0xff]  }
  0x10   : > { %v810_v11 = vld [vmem:[%s283_s15 + $0x4] ss:$8 sps:$4 sm:$0xff]   ;;  %v808_v17 = vld [vmem:[%s283_s15] ss:$8 sps:$4 sm:$0xff]   ;;  %s305_s15 = scalar_lea.vmem %s962_s3, %s902_s10 }
  0x11   : > { %489 = vmatprep.mubr.bf16.mxu0 %v810_v11  ;;  %v804_v13 = vld [vmem:[%s960_s1 + $0x48] sm:$0xff]   ;;  %v806_v15 = vld [vmem:[%s960_s1 + $0x40] sm:$0xff]  }
  0x12   : > { %733 = vmatpush3.bf16.msra.mxu0 %v795_v3  ;;  %v805_v14 = vld [vmem:[%s960_s1 + $0x8] sm:$0xff]   ;;  %v807_v16 = vld [vmem:[%s960_s1] sm:$0xff]  }
  0x13   : > { %734 = vmatprep.subr.bf16.mxu0 %v796_v4  ;;  %v726_v23 = vld [vmem:[%s961_s2] ss:$0 sm:$0xff] }
  0x16   : > { %735 = vmatpush3.bf16.msra.mxu0 %v797_v5 }
  0x17   : > { %736 = vmatprep.subr.bf16.mxu0 %v798_v6 }
  0x1a   : > { %737 = vmatpush3.bf16.msra.mxu0 %v799_v7 }
  0x1b   : > { %738 = vmatprep.subr.bf16.mxu0 %v800_v8 }
  0x1e   : > { %739 = vmatpush3.bf16.msra.mxu0 %v801_v9 }
  0x1f   : > { %740 = vmatprep.subr.bf16.mxu0 %v802_v10 }
  0x22   : > { %741 = vmatpush3.bf16.msra.mxu0 %v803_v12 }
  0x23   : > { %742 = vmatprep.subr.bf16.mxu0 %v804_v13 }
  0x26   : > { %743 = vmatpush3.bf16.msra.mxu0 %v805_v14 }
  0x27   : > { %744 = vmatprep.subr.bf16.mxu0 %v806_v15 }
  0x2a   : > { %745 = vmatpush3.bf16.msra.mxu0 %v807_v16 }
  0x2d   : > { %490 = vmatmul.mubr.bf16.vlgmr.msra.gmra.mxu0 %v808_v17 }
  0xed   : > { %v746_v18 = vpop.f32.mrf.mxu0 }
  0xef   : > { %v747_v19 = vpop.f32.mrf.mxu0 }
  0xf0   : > { %v748_v20 = vadd.f32 %v747_v19, %v746_v18 }
  0xf1   : > { %v749_v21 = vpop.f32.mrf.mxu0 }
  0xf2   : > { %502 = vst [vmem:[%s936_s9] sm:$0xff] %v748_v20 }
  0xf3   : > { %v750_v22 = vpop.f32.mrf.mxu0 }
  0xf4   : > { %v751_v24 = vadd.f32 %v750_v22, %v749_v21 }
  0xf6   : > { %503 = vst [vmem:[%s936_s9 + $0x8] sm:$0xff] %v751_v24  ;;  %v527_v25 = vadd.f32 %v751_v24, %v726_v23 }
  0xf8   : > { %v762_v26 = vcvt.f32.s32 %v527_v25  ;;  %v529_v32 = vand.u32 2147483647, %v527_v25  ;;  %v765_v35 = vand.u32 2147483648, %v527_v25 }
  0xf9   : > { %v517_v27 = vld [vmem:[%s936_s9] sm:$0xff] }
  0xfa   : > { %v763_v28 = vcvt.s32.f32 %v762_v26  ;;  %v526_v29 = vadd.f32 %v726_v23, %v517_v27  ;;  %531 = vst [vmem:[%s305_s15 + $0x8] sm:$0xff] %v529_v32  ;;  %vm761_vm1 = vcmp.lt.f32.partialorder %v529_v32, 8388608.0 }
  0xfc   : > { %v528_v30 = vand.u32 2147483647, %v526_v29  ;;  %v754_v31 = vcvt.f32.s32 %v526_v29  ;;  %v764_v33 = vand.u32 2147483647, %v763_v28  ;;  %v757_v37 = vand.u32 2147483648, %v526_v29 }
  0xfe   : > { %530 = vst [vmem:[%s305_s15] sm:$0xff] %v528_v30  ;;  %v755_v34 = vcvt.s32.f32 %v754_v31  ;;  %v766_v38 = vor.u32 %v765_v35, %v764_v33  ;;  %vm753_vm0 = vcmp.lt.f32.partialorder %v528_v30, 8388608.0 }
 0x100   : > { %v756_v36 = vand.u32 2147483647, %v755_v34  ;;  %v767_v41 = vsel %vm761_vm1, %v766_v38, %v527_v25 }
 0x101   : > { %535 = vst [vmem:[%s936_s9 + $0x8] sm:$0xff] %v767_v41 }
 0x102   : > { %v758_v39 = vor.u32 %v757_v37, %v756_v36 }
 0x104   : > { %v759_v40 = vsel %vm753_vm0, %v758_v39, %v526_v29 }
 0x105   : > { %534 = vst [vmem:[%s936_s9] sm:$0xff] %v759_v40 }
 0x106 PF: > { %s15_s17 = sadd.s32 1, %s833_s17   ;;  %s964_s15 = smov %s829_s16 }
 0x107   : > { %p12_p5 = scmp.ge.s32.totalorder %s15_s17, 4   ;;  %s965_s16 = smov %s967_s18 }
 0x109   :  { %14 = sbr.rel (!%p12_p5) target bundleno = 2 (0x2), region = 92 }

// kernel: _lambda_.26
= control target key start
LH: loop header
LB: loop body
LE: loop exit
PB: predicated region body
PF: predicated region fallthrough
CT: control target
= control target key end

     0   :  { %s887_s18 = smov 0   ;;  %s889_s19 = smov 0   ;;  %s1012_s0 = inlined_call_operand.vmem [shape: bf16[32,128], index: 0, kind: input, shape index: {}]   ;;  %s1013_s1 = inlined_call_operand.vmem [shape: bf16[128,128], index: 1, kind: input, shape index: {}]   ;;  %s1014_s2 = inlined_call_operand.vmem [shape: f32[1,128], index: 2, kind: input, shape index: {}]   ;;  %s1015_s3 = inlined_call_operand.vmem [shape: f32[128,128], index: 3, kind: input, shape index: {}]   ;;  %s1016_s4 = inlined_call_operand.vmem [shape: f32[1,128], index: 4, kind: input, shape index: {}]   ;;  %s1017_s5 = inlined_call_operand.vmem [shape: f32[32,128], index: 5, kind: output, shape index: {}]  }
   0x1   :  { %s891_s20 = smov 0  }
   0x2 LB: > { %s34_s21 = sadd.s32 1, %s849_s19  ;;  %p692_p0 = scmp.ge.s32.totalorder %s853_s20, 1  ;;  %s853_s20 = sphi %s891_s20, %s15_s20   ;;  %s849_s19 = sphi %s889_s19, %s1019_s19   ;;  %s845_s18 = sphi %s887_s18, %s1018_s18  }
   0x3   : > { %p36_p1 = scmp.ge.s32.totalorder %s34_s21, 2  ;;  %p238_p2 = scmp.lt.s32.totalorder %s853_s20, 3 }
   0x5   : > { %s1021_s21 = smov (%p36_p1, %s34_s21), 0  ;;  %p239_p3 = pnand %p692_p0, %p238_p2 }
   0x6   : > { %s693_s26 = sshll.u32 (!%p239_p3), %s845_s18, 1 }
   0x7   : > { %242 = sbr.rel (%p239_p3) target bundleno = 469 (0x1d5), region = 40  ;;  %p284_p4 = scmp.lt.s32.totalorder (!%p239_p3), %s693_s26, 3 }
   0xc   : > { %v818_v0 = vld [vmem:[%s1013_s1 + $0x38] sm:$0xff]   ;;  %v855_v1 = vmov 0.0   ;;  %v819_v2 = vld [vmem:[%s1013_s1 + $0x30] sm:$0xff]   ;;  %vm856_vm0 = vmmov 0   ;;  %s1023_s26 = smov (!%p284_p4, %s693_s26), 3  ;;  %v820_v3 = vld [vmem:[%s1013_s1 + $0x28] sm:$0xff]  }
   0xd   : > { %737 = vmatprep.subr.bf16.mxu0 %v855_v1  ;;  %753 = vmatprep.mubr.msk.bf16.mxu0 %vm856_vm0, %v855_v1  ;;  %s694_s29 = sshll.u32 %s1023_s26, 2  ;;  %v474_v4 = vld [vmem:[%s1015_s3 + $0x78] sm:$0xff]  ;;  %v473_v5 = vld [vmem:[%s1015_s3 + $0x70] sm:$0xff]  ;;  %v821_v6 = vld [vmem:[%s1013_s1 + $0x20] sm:$0xff]   ;;  %s696_s9 = sshll.u32 %s1023_s26, 3 }
   0xe   : > { %738 = vmatpush3.bf16.msra.mxu0 %v818_v0  ;;  %s920_s7 = scalar_lea.vmem %s1012_s0, %s694_s29  ;;  %757 = vmatprep.subr.mxu1 %v474_v4  ;;  %v472_v7 = vld [vmem:[%s1015_s3 + $0x68] sm:$0xff]  ;;  %v471_v8 = vld [vmem:[%s1015_s3 + $0x60] sm:$0xff]  ;;  %v822_v9 = vld [vmem:[%s1013_s1 + $0x18] sm:$0xff]   ;;  %s990_s12 = scalar_lea.vmem %s1017_s5, %s696_s9 }
   0xf   : > { %739 = vmatprep.subr.bf16.mxu0 %v855_v1  ;;  %758 = vmatpush3.msra.mxu1 %v474_v4  ;;  %v470_v10 = vld [vmem:[%s1015_s3 + $0x58] sm:$0xff]  ;;  %v469_v11 = vld [vmem:[%s1015_s3 + $0x50] sm:$0xff]  ;;  %v468_v13 = vld [vmem:[%s1015_s3 + $0x48] sm:$0xff] }
  0x10   : > { %759 = vmatprep.subr.mxu1 %v473_v5  ;;  %v823_v12 = vld [vmem:[%s1013_s1 + $0x10] sm:$0xff]   ;;  %v824_v14 = vld [vmem:[%s1013_s1 + $0x8] sm:$0xff]   ;;  %v825_v15 = vld [vmem:[%s1013_s1] sm:$0xff]  }
  0x11   : > { %760 = vmatpush3.msra.mxu1 %v473_v5  ;;  %v826_v16 = vld [vmem:[%s920_s7] sm:$0xff]   ;;  %v466_v18 = vld [vmem:[%s1015_s3 + $0x38] sm:$0xff]  ;;  %v465_v19 = vld [vmem:[%s1015_s3 + $0x30] sm:$0xff] }
  0x12   : > { %740 = vmatpush3.bf16.msra.mxu0 %v819_v2  ;;  %761 = vmatprep.subr.mxu1 %v472_v7  ;;  %v467_v17 = vld [vmem:[%s1015_s3 + $0x40] sm:$0xff]  ;;  %v464_v20 = vld [vmem:[%s1015_s3 + $0x28] sm:$0xff]  ;;  %v462_v22 = vld [vmem:[%s1015_s3 + $0x18] sm:$0xff] }
  0x13   : > { %741 = vmatprep.subr.bf16.mxu0 %v855_v1  ;;  %762 = vmatpush3.msra.mxu1 %v472_v7  ;;  %v463_v21 = vld [vmem:[%s1015_s3 + $0x20] sm:$0xff]  ;;  %v461_v23 = vld [vmem:[%s1015_s3 + $0x10] sm:$0xff]  ;;  %v460_v24 = vld [vmem:[%s1015_s3 + $0x8] sm:$0xff] }
  0x14   : > { %763 = vmatprep.subr.mxu1 %v471_v8  ;;  %v459_v25 = vld [vmem:[%s1015_s3] sm:$0xff] }
  0x15   : > { %764 = vmatpush3.msra.mxu1 %v471_v8  ;;  %v706_v30 = vld [vmem:[%s1014_s2] ss:$0 sm:$0xff] }
  0x16   : > { %742 = vmatpush3.bf16.msra.mxu0 %v820_v3  ;;  %765 = vmatprep.subr.mxu1 %v470_v10  ;;  %v707_v36 = vld [vmem:[%s1016_s4] ss:$0 sm:$0xff] }
  0x17   : > { %743 = vmatprep.subr.bf16.mxu0 %v855_v1  ;;  %766 = vmatpush3.msra.mxu1 %v470_v10 }
  0x18   : > { %767 = vmatprep.subr.mxu1 %v469_v11 }
  0x19   : > { %768 = vmatpush3.msra.mxu1 %v469_v11 }
  0x1a   : > { %744 = vmatpush3.bf16.msra.mxu0 %v821_v6  ;;  %769 = vmatprep.subr.mxu1 %v468_v13 }
  0x1b   : > { %745 = vmatprep.subr.bf16.mxu0 %v855_v1  ;;  %770 = vmatpush3.msra.mxu1 %v468_v13 }
  0x1c   : > { %771 = vmatprep.subr.mxu1 %v467_v17 }
  0x1d   : > { %772 = vmatpush3.msra.mxu1 %v467_v17 }
  0x1e   : > { %746 = vmatpush3.bf16.msra.mxu0 %v822_v9  ;;  %773 = vmatprep.subr.mxu1 %v466_v18 }
  0x1f   : > { %747 = vmatprep.subr.bf16.mxu0 %v855_v1  ;;  %774 = vmatpush3.msra.mxu1 %v466_v18 }
  0x20   : > { %775 = vmatprep.subr.mxu1 %v465_v19 }
  0x21   : > { %776 = vmatpush3.msra.mxu1 %v465_v19 }
  0x22   : > { %748 = vmatpush3.bf16.msra.mxu0 %v823_v12  ;;  %777 = vmatprep.subr.mxu1 %v464_v20 }
  0x23   : > { %749 = vmatprep.subr.bf16.mxu0 %v855_v1  ;;  %778 = vmatpush3.msra.mxu1 %v464_v20 }
  0x24   : > { %779 = vmatprep.subr.mxu1 %v463_v21 }
  0x25   : > { %780 = vmatpush3.msra.mxu1 %v463_v21 }
  0x26   : > { %750 = vmatpush3.bf16.msra.mxu0 %v824_v14  ;;  %781 = vmatprep.subr.mxu1 %v462_v22 }
  0x27   : > { %751 = vmatprep.subr.bf16.mxu0 %v855_v1  ;;  %782 = vmatpush3.msra.mxu1 %v462_v22 }
  0x28   : > { %783 = vmatprep.subr.mxu1 %v461_v23 }
  0x29   : > { %784 = vmatpush3.msra.mxu1 %v461_v23 }
  0x2a   : > { %752 = vmatpush3.bf16.msra.mxu0 %v825_v15  ;;  %785 = vmatprep.subr.mxu1 %v460_v24 }
  0x2b   : > { %786 = vmatpush3.msra.mxu1 %v460_v24 }
  0x2c   : > { %787 = vmatprep.subr.mxu1 %v459_v25 }
  0x2d   : > { %754 = vmatmul.mubr.bf16.vlgmr.msra.gmra.mxu0 %v826_v16  ;;  %788 = vmatpush3.msra.mxu1 %v459_v25 }
  0xed   : > { %v420_v26 = vpop.f32.mrf.mxu0 }
  0xee   : > { %431 = vst [vmem:[%s990_s12] sm:$0xff] %v420_v26 }
  0xef   : > { %v755_v27 = vpop.f32.mrf.mxu0 }
  0xf1   : > { %v423_v28 = vpop.f32.mrf.mxu0 }
  0xf2   : > { %432 = vst [vmem:[%s990_s12 + $0x8] sm:$0xff] %v423_v28  ;;  %v456_v32 = vadd.f32 %v706_v30, %v423_v28 }
  0xf3   : > { %v756_v29 = vpop.f32.mrf.mxu0 }
  0xf4   : > { %v458_v35 = vmul.f32 %v456_v32, %v456_v32 }
  0xf5   : > { %v446_v31 = vld [vmem:[%s990_s12] sm:$0xff] }
  0xf6   : > { %v455_v33 = vadd.f32 %v706_v30, %v446_v31 }
  0xf8   : > { %v457_v34 = vmul.f32 %v455_v33, %v455_v33 }
  0xfa   : > { %789 = vmatprep.mubr.f32.mxu1 %v457_v34 }
  0xfb   : > { %790 = vmatmul.mubr.f32.vlgmr.msra.gmra.mxu1 %v458_v35 }
 0x1bb   : > { %v791_v37 = vpop.f32.mrf.mxu1 }
 0x1bc   : > { %v554_v38 = vadd.f32 %v791_v37, %v707_v36 }
 0x1bd   : > { %v548_v39 = vpop.f32.mrf.mxu1 }
 0x1be   : > { %827 = vrsqrt.f32 %v554_v38  ;;  %v549_v40 = vadd.f32 %v707_v36, %v548_v39  ;;  %vm566_vm1 = vcmp.eq.f32.partialorder %v554_v38, inf  ;;  %v569_v45 = vand.u32 2147483648, %v554_v38 }
 0x1bf   : > { %vm568_vm2 = vcmp.eq.f32.partialorder %v554_v38, 0.0 }
 0x1c0   : > { %829 = vrsqrt.f32 %v549_v40  ;;  %vm559_vm3 = vcmp.eq.f32.partialorder %v549_v40, inf  ;;  %v562_v47 = vand.u32 2147483648, %v549_v40  ;;  %vm561_vm4 = vcmp.eq.f32.partialorder %v549_v40, 0.0 }
 0x1cb   : > { %v828_v41 = vpop.eup %827 }
 0x1cc   : > { %v565_v42 = vmul.f32 %v828_v41, %v554_v38 }
 0x1cd   : > { %v830_v43 = vpop.eup %829 }
 0x1ce   : > { %v567_v44 = vsel %vm566_vm1, %v554_v38, %v565_v42  ;;  %v558_v46 = vmul.f32 %v830_v43, %v549_v40 }
 0x1cf   : > { %v570_v48 = vsel %vm568_vm2, %v569_v45, %v567_v44 }
 0x1d0   : > { %v560_v49 = vsel %vm559_vm3, %v549_v40, %v558_v46  ;;  %v572_v52 = vmul.f32 %v570_v48, %v456_v32 }
 0x1d1   : > { %v563_v50 = vsel %vm561_vm4, %v562_v47, %v560_v49 }
 0x1d2   : > { %v571_v51 = vmul.f32 %v563_v50, %v455_v33  ;;  %574 = vst [vmem:[%s990_s12 + $0x8] sm:$0xff] %v572_v52 }
 0x1d4   : > { %573 = vst [vmem:[%s990_s12] sm:$0xff] %v571_v51 }
 0x1d5 PF: > { %s15_s20 = sadd.s32 1, %s853_s20   ;;  %s1018_s18 = smov %s849_s19 }
 0x1d6   : > { %p12_p5 = scmp.ge.s32.totalorder %s15_s20, 4   ;;  %s1019_s19 = smov %s1021_s21 }
 0x1d8   :  { %14 = sbr.rel (!%p12_p5) target bundleno = 2 (0x2), region = 88 }

// kernel: _lambda_.27
= control target key start
LH: loop header
LB: loop body
LE: loop exit
PB: predicated region body
PF: predicated region fallthrough
CT: control target
= control target key end

     0   :  { %s1097_s18 = smov 0   ;;  %s1099_s19 = smov 0   ;;  %s1287_s0 = inlined_call_operand.vmem [shape: bf16[128,128], index: 0, kind: input, shape index: {}]   ;;  %s1288_s1 = inlined_call_operand.vmem [shape: bf16[128,128], index: 1, kind: input, shape index: {}]   ;;  %s1289_s2 = inlined_call_operand.vmem [shape: f32[1,128], index: 2, kind: input, shape index: {}]   ;;  %s1290_s3 = inlined_call_operand.vmem [shape: f32[128,128], index: 3, kind: input, shape index: {}]   ;;  %s1291_s4 = inlined_call_operand.vmem [shape: f32[1,128], index: 4, kind: input, shape index: {}]   ;;  %s1292_s5 = inlined_call_operand.vmem [shape: f32[128,128], index: 5, kind: output, shape index: {}]  }
   0x1   :  { %s1101_s20 = smov 0  }
   0x2 LB: > { %s34_s21 = sadd.s32 1, %s1061_s19  ;;  %p866_p0 = scmp.ge.s32.totalorder %s1065_s20, 1  ;;  %s1065_s20 = sphi %s1101_s20, %s15_s20   ;;  %s1061_s19 = sphi %s1099_s19, %s1294_s19   ;;  %s1057_s18 = sphi %s1097_s18, %s1293_s18  }
   0x3   : > { %p36_p1 = scmp.ge.s32.totalorder %s34_s21, 2  ;;  %p238_p2 = scmp.lt.s32.totalorder %s1065_s20, 3 }
   0x5   : > { %s1296_s21 = smov (%p36_p1, %s34_s21), 0  ;;  %p239_p3 = pnand %p866_p0, %p238_p2 }
   0x6   : > { %s867_s24 = sshll.u32 (!%p239_p3), %s1057_s18, 3 }
   0x7   : > { %242 = sbr.rel (%p239_p3) target bundleno = 478 (0x1de), region = 40  ;;  %p284_p4 = scmp.lt.s32.totalorder (!%p239_p3), %s867_s24, 15 }
   0xc   : > { %v1015_v0 = vld [vmem:[%s1288_s1 + $0x38] sm:$0xff]   ;;  %v1016_v1 = vld [vmem:[%s1288_s1 + $0x30] sm:$0xff]   ;;  %s1298_s24 = smov (!%p284_p4, %s867_s24), 15  ;;  %v1017_v2 = vld [vmem:[%s1288_s1 + $0x28] sm:$0xff]  }
   0xd   : > { %923 = vmatprep.subr.bf16.mxu0 %v1015_v0  ;;  %s868_s29 = sshll.u32 %s1298_s24, 2  ;;  %v1018_v3 = vld [vmem:[%s1288_s1 + $0x20] sm:$0xff]   ;;  %v1019_v5 = vld [vmem:[%s1288_s1 + $0x18] sm:$0xff]   ;;  %v563_v7 = vld [vmem:[%s1290_s3 + $0x70] sm:$0xff]  ;;  %s870_s13 = sshll.u32 %s1298_s24, 3 }
   0xe   : > { %924 = vmatpush3.bf16.msra.mxu0 %v1015_v0  ;;  %s1130_s7 = scalar_lea.vmem %s1287_s0, %s868_s29  ;;  %v564_v6 = vld [vmem:[%s1290_s3 + $0x78] sm:$0xff]  ;;  %v562_v8 = vld [vmem:[%s1290_s3 + $0x68] sm:$0xff]  ;;  %v1020_v9 = vld [vmem:[%s1288_s1 + $0x10] sm:$0xff]   ;;  %s1246_s16 = scalar_lea.vmem %s1292_s5, %s870_s13 }
   0xf   : > { %925 = vmatprep.subr.bf16.mxu0 %v1016_v1  ;;  %v1023_v4 = vld [vmem:[%s1130_s7] sm:$0xff]   ;;  %947 = vmatprep.subr.mxu1 %v564_v6  ;;  %v560_v11 = vld [vmem:[%s1290_s3 + $0x58] sm:$0xff]  ;;  %v1021_v12 = vld [vmem:[%s1288_s1 + $0x8] sm:$0xff]  }
  0x10   : > { %939 = vmatprep.mubr.bf16.mxu0 %v1023_v4  ;;  %948 = vmatpush3.msra.mxu1 %v564_v6  ;;  %v561_v10 = vld [vmem:[%s1290_s3 + $0x60] sm:$0xff]  ;;  %v559_v13 = vld [vmem:[%s1290_s3 + $0x50] sm:$0xff]  ;;  %v558_v14 = vld [vmem:[%s1290_s3 + $0x48] sm:$0xff] }
  0x11   : > { %949 = vmatprep.subr.mxu1 %v563_v7  ;;  %v1022_v15 = vld [vmem:[%s1288_s1] sm:$0xff]   ;;  %v1024_v16 = vld [vmem:[%s1130_s7 + $0x8] sm:$0xff]   ;;  %v1025_v17 = vld [vmem:[%s1130_s7 + $0x10] sm:$0xff]  }
  0x12   : > { %926 = vmatpush3.bf16.msra.mxu0 %v1016_v1  ;;  %950 = vmatpush3.msra.mxu1 %v563_v7  ;;  %v1026_v18 = vld [vmem:[%s1130_s7 + $0x18] sm:$0xff]   ;;  %v557_v19 = vld [vmem:[%s1290_s3 + $0x40] sm:$0xff]  ;;  %v555_v21 = vld [vmem:[%s1290_s3 + $0x30] sm:$0xff] }
  0x13   : > { %927 = vmatprep.subr.bf16.mxu0 %v1017_v2  ;;  %951 = vmatprep.subr.mxu1 %v562_v8  ;;  %v556_v20 = vld [vmem:[%s1290_s3 + $0x38] sm:$0xff]  ;;  %v554_v22 = vld [vmem:[%s1290_s3 + $0x28] sm:$0xff]  ;;  %v553_v23 = vld [vmem:[%s1290_s3 + $0x20] sm:$0xff] }
  0x14   : > { %952 = vmatpush3.msra.mxu1 %v562_v8  ;;  %v552_v24 = vld [vmem:[%s1290_s3 + $0x18] sm:$0xff]  ;;  %v551_v25 = vld [vmem:[%s1290_s3 + $0x10] sm:$0xff]  ;;  %v550_v26 = vld [vmem:[%s1290_s3 + $0x8] sm:$0xff] }
  0x15   : > { %953 = vmatprep.subr.mxu1 %v561_v10  ;;  %v549_v27 = vld [vmem:[%s1290_s3] sm:$0xff] }
  0x16   : > { %928 = vmatpush3.bf16.msra.mxu0 %v1017_v2  ;;  %954 = vmatpush3.msra.mxu1 %v561_v10  ;;  %v883_v30 = vld [vmem:[%s1289_s2] ss:$0 sm:$0xff] }
  0x17   : > { %929 = vmatprep.subr.bf16.mxu0 %v1018_v3  ;;  %955 = vmatprep.subr.mxu1 %v560_v11  ;;  %v884_v53 = vld [vmem:[%s1291_s4] ss:$0 sm:$0xff] }
  0x18   : > { %956 = vmatpush3.msra.mxu1 %v560_v11 }
  0x19   : > { %957 = vmatprep.subr.mxu1 %v559_v13 }
  0x1a   : > { %930 = vmatpush3.bf16.msra.mxu0 %v1018_v3  ;;  %958 = vmatpush3.msra.mxu1 %v559_v13 }
  0x1b   : > { %931 = vmatprep.subr.bf16.mxu0 %v1019_v5  ;;  %959 = vmatprep.subr.mxu1 %v558_v14 }
  0x1c   : > { %960 = vmatpush3.msra.mxu1 %v558_v14 }
  0x1d   : > { %961 = vmatprep.subr.mxu1 %v557_v19 }
  0x1e   : > { %932 = vmatpush3.bf16.msra.mxu0 %v1019_v5  ;;  %962 = vmatpush3.msra.mxu1 %v557_v19 }
  0x1f   : > { %933 = vmatprep.subr.bf16.mxu0 %v1020_v9  ;;  %963 = vmatprep.subr.mxu1 %v556_v20 }
  0x20   : > { %964 = vmatpush3.msra.mxu1 %v556_v20 }
  0x21   : > { %965 = vmatprep.subr.mxu1 %v555_v21 }
  0x22   : > { %934 = vmatpush3.bf16.msra.mxu0 %v1020_v9  ;;  %966 = vmatpush3.msra.mxu1 %v555_v21 }
  0x23   : > { %935 = vmatprep.subr.bf16.mxu0 %v1021_v12  ;;  %967 = vmatprep.subr.mxu1 %v554_v22 }
  0x24   : > { %968 = vmatpush3.msra.mxu1 %v554_v22 }
  0x25   : > { %969 = vmatprep.subr.mxu1 %v553_v23 }
  0x26   : > { %936 = vmatpush3.bf16.msra.mxu0 %v1021_v12  ;;  %970 = vmatpush3.msra.mxu1 %v553_v23 }
  0x27   : > { %937 = vmatprep.subr.bf16.mxu0 %v1022_v15  ;;  %971 = vmatprep.subr.mxu1 %v552_v24 }
  0x28   : > { %972 = vmatpush3.msra.mxu1 %v552_v24 }
  0x29   : > { %973 = vmatprep.subr.mxu1 %v551_v25 }
  0x2a   : > { %938 = vmatpush3.bf16.msra.mxu0 %v1022_v15  ;;  %974 = vmatpush3.msra.mxu1 %v551_v25 }
  0x2b   : > { %975 = vmatprep.subr.mxu1 %v550_v26 }
  0x2c   : > { %976 = vmatpush3.msra.mxu1 %v550_v26 }
  0x2d   : > { %940 = vmatmul.mubr.bf16.vlgmr.msra.gmra.mxu0 %v1024_v16  ;;  %977 = vmatprep.subr.mxu1 %v549_v27 }
  0x2e   : > { %943 = vmatprep.mubr.bf16.mxu0 %v1025_v17  ;;  %978 = vmatpush3.msra.mxu1 %v549_v27 }
  0x35   : > { %944 = vmatmul.mubr.bf16.gmra.mxu0 %v1026_v18 }
  0xed   : > { %v941_v28 = vpop.f32.mrf.mxu0 }
  0xee   : > { %v1206_v35 = vadd.f32 %v941_v28, %v883_v30 }
  0xef   : > { %v444_v29 = vpop.f32.mrf.mxu0 }
  0xf0   : > { %v1202_v31 = vadd.f32 %v883_v30, %v444_v29  ;;  %v543_v41 = vmul.f32 %v1206_v35, %v1206_v35 }
  0xf1   : > { %v942_v32 = vpop.f32.mrf.mxu0 }
  0xf2   : > { %v541_v33 = vmul.f32 %v1202_v31, %v1202_v31  ;;  %v1208_v39 = vadd.f32 %v942_v32, %v883_v30 }
  0xf3   : > { %v447_v34 = vpop.f32.mrf.mxu0 }
  0xf4   : > { %979 = vmatprep.mubr.f32.mxu1 %v541_v33  ;;  %v534_v36 = vadd.f32 %v883_v30, %v447_v34  ;;  %v544_v44 = vmul.f32 %v1208_v39, %v1208_v39 }
  0xf5   : > { %v945_v37 = vpop.f32.mrf.mxu0 }
  0xf6   : > { %v542_v38 = vmul.f32 %v534_v36, %v534_v36  ;;  %v1218_v47 = vadd.f32 %v945_v37, %v883_v30 }
  0xf7   : > { %v460_v40 = vpop.f32.mrf.mxu0 }
  0xf8   : > { %980 = vmatmul.mubr.f32.vlgmr.msra.gmra.mxu1 %v542_v38  ;;  %v1212_v42 = vadd.f32 %v883_v30, %v460_v40  ;;  %v547_v51 = vmul.f32 %v1218_v47, %v1218_v47 }
  0xf9   : > { %v946_v43 = vpop.f32.mrf.mxu0  ;;  %982 = vmatprep.mubr.f32.mxu1 %v543_v41 }
  0xfa   : > { %v545_v45 = vmul.f32 %v1212_v42, %v1212_v42  ;;  %v1224_v50 = vadd.f32 %v946_v43, %v883_v30 }
  0xfb   : > { %v463_v46 = vpop.f32.mrf.mxu0 }
  0xfc   : > { %983 = vmatmul.mubr.f32.gmra.mxu1 %v544_v44  ;;  %v1220_v48 = vadd.f32 %v883_v30, %v463_v46  ;;  %v548_v52 = vmul.f32 %v1224_v50, %v1224_v50 }
  0xfd   : > { %985 = vmatprep.mubr.f32.mxu1 %v545_v45 }
  0xfe   : > { %v546_v49 = vmul.f32 %v1220_v48, %v1220_v48 }
 0x100   : > { %986 = vmatmul.mubr.f32.gmra.mxu1 %v546_v49 }
 0x101   : > { %988 = vmatprep.mubr.f32.mxu1 %v547_v51 }
 0x104   : > { %989 = vmatmul.mubr.f32.gmra.mxu1 %v548_v52 }
 0x1b8   : > { %v981_v54 = vpop.f32.mrf.mxu1 }
 0x1b9   : > { %v644_v55 = vadd.f32 %v981_v54, %v884_v53 }
 0x1ba   : > { %v638_v56 = vpop.f32.mrf.mxu1 }
 0x1bb   : > { %1027 = vrsqrt.f32 %v644_v55  ;;  %v639_v57 = vadd.f32 %v884_v53, %v638_v56  ;;  %vm686_vm0 = vcmp.eq.f32.partialorder %v644_v55, inf  ;;  %v689_v8 = vand.u32 2147483648, %v644_v55 }
 0x1bc   : > { %v984_v58 = vpop.f32.mrf.mxu1  ;;  %vm688_vm1 = vcmp.eq.f32.partialorder %v644_v55, 0.0 }
 0x1bd   : > { %v654_v59 = vadd.f32 %v984_v58, %v884_v53  ;;  %1029 = vrsqrt.f32 %v639_v57  ;;  %vm679_vm2 = vcmp.eq.f32.partialorder %v639_v57, inf  ;;  %v682_v15 = vand.u32 2147483648, %v639_v57 }
 0x1be   : > { %v648_v60 = vpop.f32.mrf.mxu1  ;;  %vm681_vm3 = vcmp.eq.f32.partialorder %v639_v57, 0.0 }
 0x1bf   : > { %1031 = vrsqrt.f32 %v654_v59  ;;  %v649_v61 = vadd.f32 %v884_v53, %v648_v60  ;;  %vm700_vm4 = vcmp.eq.f32.partialorder %v654_v59, inf  ;;  %v703_v18 = vand.u32 2147483648, %v654_v59 }
 0x1c0   : > { %v987_v62 = vpop.f32.mrf.mxu1  ;;  %vm702_vm5 = vcmp.eq.f32.partialorder %v654_v59, 0.0 }
 0x1c1   : > { %v664_v63 = vadd.f32 %v987_v62, %v884_v53  ;;  %1033 = vrsqrt.f32 %v649_v61  ;;  %vm693_vm6 = vcmp.eq.f32.partialorder %v649_v61, inf  ;;  %v696_v27 = vand.u32 2147483648, %v649_v61 }
 0x1c2   : > { %v658_v0 = vpop.f32.mrf.mxu1  ;;  %vm695_vm7 = vcmp.eq.f32.partialorder %v649_v61, 0.0 }
 0x1c3   : > { %1035 = vrsqrt.f32 %v664_v63  ;;  %v1233_v1 = vadd.f32 %v884_v53, %v658_v0  ;;  %vm714_vm8 = vcmp.eq.f32.partialorder %v664_v63, inf  ;;  %v717_v30 = vand.u32 2147483648, %v664_v63 }
 0x1c4   : > { %v990_v2 = vpop.f32.mrf.mxu1  ;;  %vm716_vm9 = vcmp.eq.f32.partialorder %v664_v63, 0.0 }
 0x1c5   : > { %v1235_v3 = vadd.f32 %v990_v2, %v884_v53  ;;  %1037 = vrsqrt.f32 %v1233_v1  ;;  %vm707_vm10 = vcmp.eq.f32.partialorder %v1233_v1, inf  ;;  %v710_v40 = vand.u32 2147483648, %v1233_v1 }
 0x1c6   : > { %v668_v4 = vpop.f32.mrf.mxu1  ;;  %vm709_vm11 = vcmp.eq.f32.partialorder %v1233_v1, 0.0 }
 0x1c7   : > { %1039 = vrsqrt.f32 %v1235_v3  ;;  %v1239_v6 = vadd.f32 %v884_v53, %v668_v4  ;;  %vm728_vm12 = vcmp.eq.f32.partialorder %v1235_v3, inf  ;;  %vm730_vm13 = vcmp.eq.f32.partialorder %v1235_v3, 0.0 }
 0x1c8   : > { %v1028_v5 = vpop.eup %1027 }
 0x1c9   : > { %v685_v7 = vmul.f32 %v1028_v5, %v644_v55  ;;  %1041 = vrsqrt.f32 %v1239_v6  ;;  %vm721_vm14 = vcmp.eq.f32.partialorder %v1239_v6, inf  ;;  %v724_v53 = vand.u32 2147483648, %v1239_v6 }
 0x1ca   : > { %v1030_v9 = vpop.eup %1029  ;;  %vm723_vm15 = vcmp.eq.f32.partialorder %v1239_v6, 0.0 }
 0x1cb   : > { %v687_v10 = vsel %vm686_vm0, %v644_v55, %v685_v7  ;;  %v678_v13 = vmul.f32 %v1030_v9, %v639_v57 }
 0x1cc   : > { %v1032_v11 = vpop.eup %1031  ;;  %v690_v12 = vsel %vm688_vm1, %v689_v8, %v687_v10 }
 0x1cd   : > { %v734_v14 = vmul.f32 %v690_v12, %v534_v36  ;;  %v699_v16 = vmul.f32 %v1032_v11, %v654_v59  ;;  %v680_v17 = vsel %vm679_vm2, %v639_v57, %v678_v13 }
 0x1ce   : > { %v1034_v19 = vpop.eup %1033  ;;  %v683_v20 = vsel %vm681_vm3, %v682_v15, %v680_v17 }
 0x1cf   : > { %742 = vst [vmem:[%s1246_s16 + $0x8] sm:$0xff] %v734_v14  ;;  %v701_v21 = vsel %vm700_vm4, %v654_v59, %v699_v16  ;;  %v733_v23 = vmul.f32 %v683_v20, %v1202_v31  ;;  %v692_v25 = vmul.f32 %v1034_v19, %v649_v61 }
 0x1d0   : > { %v1036_v22 = vpop.eup %1035  ;;  %v704_v24 = vsel %vm702_vm5, %v703_v18, %v701_v21 }
 0x1d1   : > { %v736_v26 = vmul.f32 %v704_v24, %v1208_v39  ;;  %v713_v28 = vmul.f32 %v1036_v22, %v664_v63  ;;  %741 = vst [vmem:[%s1246_s16] sm:$0xff] %v733_v23  ;;  %v694_v29 = vsel %vm693_vm6, %v649_v61, %v692_v25 }
 0x1d2   : > { %v1038_v32 = vpop.eup %1037  ;;  %v697_v33 = vsel %vm695_vm7, %v696_v27, %v694_v29 }
 0x1d3   : > { %744 = vst [vmem:[%s1246_s16 + $0x18] sm:$0xff] %v736_v26  ;;  %v715_v34 = vsel %vm714_vm8, %v664_v63, %v713_v28  ;;  %v735_v36 = vmul.f32 %v697_v33, %v1206_v35  ;;  %v706_v38 = vmul.f32 %v1038_v32, %v1233_v1  ;;  %v731_v35 = vand.u32 2147483648, %v1235_v3 }
 0x1d4   : > { %v1040_v31 = vpop.eup %1039  ;;  %v718_v37 = vsel %vm716_vm9, %v717_v30, %v715_v34 }
 0x1d5   : > { %v738_v39 = vmul.f32 %v718_v37, %v1220_v48  ;;  %v727_v41 = vmul.f32 %v1040_v31, %v1235_v3  ;;  %743 = vst [vmem:[%s1246_s16 + $0x10] sm:$0xff] %v735_v36  ;;  %v708_v43 = vsel %vm707_vm10, %v1233_v1, %v706_v38 }
 0x1d6   : > { %v1042_v44 = vpop.eup %1041  ;;  %v711_v45 = vsel %vm709_vm11, %v710_v40, %v708_v43 }
 0x1d7   : > { %746 = vst [vmem:[%s1246_s16 + $0x28] sm:$0xff] %v738_v39  ;;  %v729_v46 = vsel %vm728_vm12, %v1235_v3, %v727_v41  ;;  %v737_v48 = vmul.f32 %v711_v45, %v1212_v42  ;;  %v720_v51 = vmul.f32 %v1042_v44, %v1239_v6 }
 0x1d8   : > { %v732_v49 = vsel %vm730_vm13, %v731_v35, %v729_v46 }
 0x1d9   : > { %v740_v52 = vmul.f32 %v732_v49, %v1224_v50  ;;  %745 = vst [vmem:[%s1246_s16 + $0x20] sm:$0xff] %v737_v48  ;;  %v722_v54 = vsel %vm721_vm14, %v1239_v6, %v720_v51 }
 0x1da   : > { %v725_v55 = vsel %vm723_vm15, %v724_v53, %v722_v54 }
 0x1db   : > { %748 = vst [vmem:[%s1246_s16 + $0x38] sm:$0xff] %v740_v52  ;;  %v739_v56 = vmul.f32 %v725_v55, %v1218_v47 }
 0x1dd   : > { %747 = vst [vmem:[%s1246_s16 + $0x30] sm:$0xff] %v739_v56 }
 0x1de PF: > { %s15_s20 = sadd.s32 1, %s1065_s20   ;;  %s1293_s18 = smov %s1061_s19 }
 0x1df   : > { %p12_p5 = scmp.ge.s32.totalorder %s15_s20, 4   ;;  %s1294_s19 = smov %s1296_s21 }
 0x1e1   :  { %14 = sbr.rel (!%p12_p5) target bundleno = 2 (0x2), region = 88 }

// kernel: _lambda_.28
= control target key start
LH: loop header
LB: loop body
LE: loop exit
PB: predicated region body
PF: predicated region fallthrough
CT: control target
= control target key end

     0   :  { %s1961_s18 = smov 0   ;;  %s1963_s19 = smov 0   ;;  %s2641_s0 = inlined_call_operand.vmem [shape: bf16[512,128], index: 0, kind: input, shape index: {}]   ;;  %s2642_s1 = inlined_call_operand.vmem [shape: bf16[128,128], index: 1, kind: input, shape index: {}]   ;;  %s2643_s2 = inlined_call_operand.vmem [shape: f32[1,128], index: 2, kind: input, shape index: {}]   ;;  %s2644_s3 = inlined_call_operand.vmem [shape: f32[128,128], index: 3, kind: input, shape index: {}]   ;;  %s2645_s4 = inlined_call_operand.vmem [shape: f32[1,128], index: 4, kind: input, shape index: {}]   ;;  %s2646_s5 = inlined_call_operand.vmem [shape: f32[512,128], index: 5, kind: output, shape index: {}]  }
   0x1   :  { %s1965_s20 = smov 0  }
   0x2 LB: > { %s34_s21 = sadd.s32 1, %s1925_s19  ;;  %p1562_p0 = scmp.ge.s32.totalorder %s1929_s20, 1  ;;  %s1929_s20 = sphi %s1965_s20, %s15_s20   ;;  %s1925_s19 = sphi %s1963_s19, %s2648_s19   ;;  %s1921_s18 = sphi %s1961_s18, %s2647_s18  }
   0x3   : > { %p36_p1 = scmp.ge.s32.totalorder %s34_s21, 2  ;;  %p238_p2 = scmp.lt.s32.totalorder %s1929_s20, 3 }
   0x5   : > { %s2650_s21 = smov (%p36_p1, %s34_s21), 0  ;;  %p239_p3 = pnand %p1562_p0, %p238_p2 }
   0x6   : > { %s1563_s24 = sshll.u32 (!%p239_p3), %s1921_s18, 5 }
   0x7   : > { %242 = sbr.rel (%p239_p3) target bundleno = 530 (0x212), region = 40  ;;  %p284_p4 = scmp.lt.s32.totalorder (!%p239_p3), %s1563_s24, 63 }
   0xc   : > { %v1819_v0 = vld [vmem:[%s2642_s1 + $0x38] sm:$0xff]   ;;  %v1820_v1 = vld [vmem:[%s2642_s1 + $0x30] sm:$0xff]   ;;  %s2652_s24 = smov (!%p284_p4, %s1563_s24), 63  ;;  %v1821_v2 = vld [vmem:[%s2642_s1 + $0x28] sm:$0xff]  }
   0xd   : > { %1667 = vmatprep.subr.bf16.mxu0 %v1819_v0  ;;  %s1564_s29 = sshll.u32 %s2652_s24, 2  ;;  %v1822_v3 = vld [vmem:[%s2642_s1 + $0x20] sm:$0xff]   ;;  %v1823_v5 = vld [vmem:[%s2642_s1 + $0x18] sm:$0xff]   ;;  %v1824_v6 = vld [vmem:[%s2642_s1 + $0x10] sm:$0xff]   ;;  %s1566_s13 = sshll.u32 %s2652_s24, 3 }
   0xe   : > { %1668 = vmatpush3.bf16.msra.mxu0 %v1819_v0  ;;  %s1994_s7 = scalar_lea.vmem %s2641_s0, %s1564_s29  ;;  %v1825_v7 = vld [vmem:[%s2642_s1 + $0x8] sm:$0xff]   ;;  %v1826_v8 = vld [vmem:[%s2642_s1] sm:$0xff]   ;;  %v924_v9 = vld [vmem:[%s2644_s3 + $0x78] sm:$0xff]  ;;  %s2276_s15 = scalar_lea.vmem %s2646_s5, %s1566_s13 }
   0xf   : > { %1669 = vmatprep.subr.bf16.mxu0 %v1820_v1  ;;  %v1827_v4 = vld [vmem:[%s1994_s7] sm:$0xff]   ;;  %v923_v10 = vld [vmem:[%s2644_s3 + $0x70] sm:$0xff]  ;;  %1715 = vmatprep.subr.mxu1 %v924_v9  ;;  %v922_v11 = vld [vmem:[%s2644_s3 + $0x68] sm:$0xff] }
  0x10   : > { %1683 = vmatprep.mubr.bf16.mxu0 %v1827_v4  ;;  %1716 = vmatpush3.msra.mxu1 %v924_v9  ;;  %v921_v12 = vld [vmem:[%s2644_s3 + $0x60] sm:$0xff]  ;;  %v1828_v13 = vld [vmem:[%s1994_s7 + $0x8] sm:$0xff]   ;;  %v920_v14 = vld [vmem:[%s2644_s3 + $0x58] sm:$0xff] }
  0x11   : > { %1717 = vmatprep.subr.mxu1 %v923_v10  ;;  %v1829_v15 = vld [vmem:[%s1994_s7 + $0x10] sm:$0xff]   ;;  %v918_v17 = vld [vmem:[%s2644_s3 + $0x48] sm:$0xff]  ;;  %v1830_v18 = vld [vmem:[%s1994_s7 + $0x18] sm:$0xff]  }
  0x12   : > { %1670 = vmatpush3.bf16.msra.mxu0 %v1820_v1  ;;  %1718 = vmatpush3.msra.mxu1 %v923_v10  ;;  %v919_v16 = vld [vmem:[%s2644_s3 + $0x50] sm:$0xff]  ;;  %v1831_v19 = vld [vmem:[%s1994_s7 + $0x20] sm:$0xff]   ;;  %v1832_v20 = vld [vmem:[%s1994_s7 + $0x28] sm:$0xff]  }
  0x13   : > { %1671 = vmatprep.subr.bf16.mxu0 %v1821_v2  ;;  %1719 = vmatprep.subr.mxu1 %v922_v11  ;;  %v1833_v21 = vld [vmem:[%s1994_s7 + $0x30] sm:$0xff]   ;;  %v1834_v22 = vld [vmem:[%s1994_s7 + $0x38] sm:$0xff]   ;;  %v1835_v23 = vld [vmem:[%s1994_s7 + $0x40] sm:$0xff]  }
  0x14   : > { %1720 = vmatpush3.msra.mxu1 %v922_v11  ;;  %v1836_v24 = vld [vmem:[%s1994_s7 + $0x48] sm:$0xff]   ;;  %v1837_v25 = vld [vmem:[%s1994_s7 + $0x50] sm:$0xff]   ;;  %v1838_v26 = vld [vmem:[%s1994_s7 + $0x58] sm:$0xff]  }
  0x15   : > { %1721 = vmatprep.subr.mxu1 %v921_v12  ;;  %v1839_v27 = vld [vmem:[%s1994_s7 + $0x60] sm:$0xff]   ;;  %v1840_v28 = vld [vmem:[%s1994_s7 + $0x68] sm:$0xff]   ;;  %v1841_v29 = vld [vmem:[%s1994_s7 + $0x70] sm:$0xff]  }
  0x16   : > { %1672 = vmatpush3.bf16.msra.mxu0 %v1821_v2  ;;  %1722 = vmatpush3.msra.mxu1 %v921_v12  ;;  %v1842_v30 = vld [vmem:[%s1994_s7 + $0x78] sm:$0xff]   ;;  %v917_v31 = vld [vmem:[%s2644_s3 + $0x40] sm:$0xff]  ;;  %v915_v33 = vld [vmem:[%s2644_s3 + $0x30] sm:$0xff] }
  0x17   : > { %1673 = vmatprep.subr.bf16.mxu0 %v1822_v3  ;;  %1723 = vmatprep.subr.mxu1 %v920_v14  ;;  %v916_v32 = vld [vmem:[%s2644_s3 + $0x38] sm:$0xff]  ;;  %v914_v34 = vld [vmem:[%s2644_s3 + $0x28] sm:$0xff]  ;;  %v913_v35 = vld [vmem:[%s2644_s3 + $0x20] sm:$0xff] }
  0x18   : > { %1724 = vmatpush3.msra.mxu1 %v920_v14  ;;  %v912_v36 = vld [vmem:[%s2644_s3 + $0x18] sm:$0xff]  ;;  %v911_v37 = vld [vmem:[%s2644_s3 + $0x10] sm:$0xff]  ;;  %v910_v38 = vld [vmem:[%s2644_s3 + $0x8] sm:$0xff] }
  0x19   : > { %1725 = vmatprep.subr.mxu1 %v919_v16  ;;  %v909_v39 = vld [vmem:[%s2644_s3] sm:$0xff] }
  0x1a   : > { %1674 = vmatpush3.bf16.msra.mxu0 %v1822_v3  ;;  %1726 = vmatpush3.msra.mxu1 %v919_v16  ;;  %v2078_v42 = vld [vmem:[%s2643_s2] ss:$0 sm:$0xff] }
  0x1b   : > { %1675 = vmatprep.subr.bf16.mxu0 %v1823_v5  ;;  %1727 = vmatprep.subr.mxu1 %v918_v17 }
  0x1c   : > { %1728 = vmatpush3.msra.mxu1 %v918_v17 }
  0x1d   : > { %1729 = vmatprep.subr.mxu1 %v917_v31 }
  0x1e   : > { %1676 = vmatpush3.bf16.msra.mxu0 %v1823_v5  ;;  %1730 = vmatpush3.msra.mxu1 %v917_v31 }
  0x1f   : > { %1677 = vmatprep.subr.bf16.mxu0 %v1824_v6  ;;  %1731 = vmatprep.subr.mxu1 %v916_v32 }
  0x20   : > { %1732 = vmatpush3.msra.mxu1 %v916_v32 }
  0x21   : > { %1733 = vmatprep.subr.mxu1 %v915_v33 }
  0x22   : > { %1678 = vmatpush3.bf16.msra.mxu0 %v1824_v6  ;;  %1734 = vmatpush3.msra.mxu1 %v915_v33 }
  0x23   : > { %1679 = vmatprep.subr.bf16.mxu0 %v1825_v7  ;;  %1735 = vmatprep.subr.mxu1 %v914_v34 }
  0x24   : > { %1736 = vmatpush3.msra.mxu1 %v914_v34 }
  0x25   : > { %1737 = vmatprep.subr.mxu1 %v913_v35 }
  0x26   : > { %1680 = vmatpush3.bf16.msra.mxu0 %v1825_v7  ;;  %1738 = vmatpush3.msra.mxu1 %v913_v35 }
  0x27   : > { %1681 = vmatprep.subr.bf16.mxu0 %v1826_v8  ;;  %1739 = vmatprep.subr.mxu1 %v912_v36 }
  0x28   : > { %1740 = vmatpush3.msra.mxu1 %v912_v36 }
  0x29   : > { %1741 = vmatprep.subr.mxu1 %v911_v37 }
  0x2a   : > { %1682 = vmatpush3.bf16.msra.mxu0 %v1826_v8  ;;  %1742 = vmatpush3.msra.mxu1 %v911_v37 }
  0x2b   : > { %1743 = vmatprep.subr.mxu1 %v910_v38 }
  0x2c   : > { %1744 = vmatpush3.msra.mxu1 %v910_v38 }
  0x2d   : > { %1684 = vmatmul.mubr.bf16.vlgmr.msra.gmra.mxu0 %v1828_v13  ;;  %1745 = vmatprep.subr.mxu1 %v909_v39 }
  0x2e   : > { %1687 = vmatprep.mubr.bf16.mxu0 %v1829_v15  ;;  %1746 = vmatpush3.msra.mxu1 %v909_v39 }
  0x35   : > { %1688 = vmatmul.mubr.bf16.gmra.mxu0 %v1830_v18 }
  0x36   : > { %1691 = vmatprep.mubr.bf16.mxu0 %v1831_v19 }
  0x3d   : > { %1692 = vmatmul.mubr.bf16.gmra.mxu0 %v1832_v20 }
  0x3e   : > { %1695 = vmatprep.mubr.bf16.mxu0 %v1833_v21 }
  0x45   : > { %1696 = vmatmul.mubr.bf16.gmra.mxu0 %v1834_v22 }
  0x46   : > { %1699 = vmatprep.mubr.bf16.mxu0 %v1835_v23 }
  0x4d   : > { %1700 = vmatmul.mubr.bf16.gmra.mxu0 %v1836_v24 }
  0x4e   : > { %1703 = vmatprep.mubr.bf16.mxu0 %v1837_v25 }
  0x55   : > { %1704 = vmatmul.mubr.bf16.gmra.mxu0 %v1838_v26 }
  0x56   : > { %1707 = vmatprep.mubr.bf16.mxu0 %v1839_v27 }
  0x5d   : > { %1708 = vmatmul.mubr.bf16.gmra.mxu0 %v1840_v28 }
  0x5e   : > { %1711 = vmatprep.mubr.bf16.mxu0 %v1841_v29 }
  0x65   : > { %1712 = vmatmul.mubr.bf16.gmra.mxu0 %v1842_v30 }
  0xed   : > { %v1685_v40 = vpop.f32.mrf.mxu0 }
  0xee   : > { %v2086_v47 = vadd.f32 %v1685_v40, %v2078_v42 }
  0xef   : > { %v540_v41 = vpop.f32.mrf.mxu0 }
  0xf0   : > { %v2081_v43 = vadd.f32 %v2078_v42, %v540_v41  ;;  %v879_v53 = vmul.f32 %v2086_v47, %v2086_v47 }
  0xf1   : > { %v1686_v44 = vpop.f32.mrf.mxu0 }
  0xf2   : > { %v877_v45 = vmul.f32 %v2081_v43, %v2081_v43  ;;  %v2094_v51 = vadd.f32 %v1686_v44, %v2078_v42 }
  0xf3   : > { %v543_v46 = vpop.f32.mrf.mxu0 }
  0xf4   : > { %1747 = vmatprep.mubr.f32.mxu1 %v877_v45  ;;  %v2089_v48 = vadd.f32 %v2078_v42, %v543_v46  ;;  %v880_v56 = vmul.f32 %v2094_v51, %v2094_v51 }
  0xf5   : > { %v1689_v49 = vpop.f32.mrf.mxu0 }
  0xf6   : > { %v878_v50 = vmul.f32 %v2089_v48, %v2089_v48  ;;  %v2106_v59 = vadd.f32 %v1689_v49, %v2078_v42 }
  0xf7   : > { %v556_v52 = vpop.f32.mrf.mxu0 }
  0xf8   : > { %1748 = vmatmul.mubr.f32.vlgmr.msra.gmra.mxu1 %v878_v50  ;;  %v2099_v54 = vadd.f32 %v2078_v42, %v556_v52  ;;  %v883_v1 = vmul.f32 %v2106_v59, %v2106_v59 }
  0xf9   : > { %v1690_v55 = vpop.f32.mrf.mxu0  ;;  %1750 = vmatprep.mubr.f32.mxu1 %v879_v53 }
  0xfa   : > { %v881_v57 = vmul.f32 %v2099_v54, %v2099_v54  ;;  %v2114_v63 = vadd.f32 %v1690_v55, %v2078_v42 }
  0xfb   : > { %v559_v58 = vpop.f32.mrf.mxu0 }
  0xfc   : > { %1751 = vmatmul.mubr.f32.gmra.mxu1 %v880_v56  ;;  %v2109_v60 = vadd.f32 %v2078_v42, %v559_v58  ;;  %v884_v4 = vmul.f32 %v2114_v63, %v2114_v63 }
  0xfd   : > { %v1693_v61 = vpop.f32.mrf.mxu0  ;;  %1753 = vmatprep.mubr.f32.mxu1 %v881_v57 }
  0xfe   : > { %v882_v62 = vmul.f32 %v2109_v60, %v2109_v60  ;;  %v2126_v7 = vadd.f32 %v1693_v61, %v2078_v42 }
  0xff   : > { %v572_v0 = vpop.f32.mrf.mxu0 }
 0x100   : > { %1754 = vmatmul.mubr.f32.gmra.mxu1 %v882_v62  ;;  %v2119_v2 = vadd.f32 %v2078_v42, %v572_v0  ;;  %v887_v13 = vmul.f32 %v2126_v7, %v2126_v7 }
 0x101   : > { %v1694_v3 = vpop.f32.mrf.mxu0  ;;  %1756 = vmatprep.mubr.f32.mxu1 %v883_v1 }
 0x102   : > { %v885_v5 = vmul.f32 %v2119_v2, %v2119_v2  ;;  %v2134_v11 = vadd.f32 %v1694_v3, %v2078_v42 }
 0x103   : > { %v575_v6 = vpop.f32.mrf.mxu0 }
 0x104   : > { %1757 = vmatmul.mubr.f32.gmra.mxu1 %v884_v4  ;;  %v2129_v8 = vadd.f32 %v2078_v42, %v575_v6  ;;  %v888_v16 = vmul.f32 %v2134_v11, %v2134_v11 }
 0x105   : > { %v1697_v9 = vpop.f32.mrf.mxu0  ;;  %1759 = vmatprep.mubr.f32.mxu1 %v885_v5 }
 0x106   : > { %v886_v10 = vmul.f32 %v2129_v8, %v2129_v8  ;;  %v2146_v19 = vadd.f32 %v1697_v9, %v2078_v42 }
 0x107   : > { %v588_v12 = vpop.f32.mrf.mxu0 }
 0x108   : > { %1760 = vmatmul.mubr.f32.gmra.mxu1 %v886_v10  ;;  %v2139_v14 = vadd.f32 %v2078_v42, %v588_v12  ;;  %v891_v25 = vmul.f32 %v2146_v19, %v2146_v19 }
 0x109   : > { %v1698_v15 = vpop.f32.mrf.mxu0  ;;  %1762 = vmatprep.mubr.f32.mxu1 %v887_v13 }
 0x10a   : > { %v889_v17 = vmul.f32 %v2139_v14, %v2139_v14  ;;  %v2154_v23 = vadd.f32 %v1698_v15, %v2078_v42 }
 0x10b   : > { %v591_v18 = vpop.f32.mrf.mxu0 }
 0x10c   : > { %1763 = vmatmul.mubr.f32.gmra.mxu1 %v888_v16  ;;  %v2149_v20 = vadd.f32 %v2078_v42, %v591_v18  ;;  %v892_v28 = vmul.f32 %v2154_v23, %v2154_v23 }
 0x10d   : > { %v1701_v21 = vpop.f32.mrf.mxu0  ;;  %1765 = vmatprep.mubr.f32.mxu1 %v889_v17 }
 0x10e   : > { %v890_v22 = vmul.f32 %v2149_v20, %v2149_v20  ;;  %v2166_v31 = vadd.f32 %v1701_v21, %v2078_v42 }
 0x10f   : > { %v604_v24 = vpop.f32.mrf.mxu0 }
 0x110   : > { %1766 = vmatmul.mubr.f32.gmra.mxu1 %v890_v22  ;;  %v2159_v26 = vadd.f32 %v2078_v42, %v604_v24  ;;  %v895_v37 = vmul.f32 %v2166_v31, %v2166_v31 }
 0x111   : > { %v1702_v27 = vpop.f32.mrf.mxu0  ;;  %1768 = vmatprep.mubr.f32.mxu1 %v891_v25 }
 0x112   : > { %v893_v29 = vmul.f32 %v2159_v26, %v2159_v26  ;;  %v2174_v35 = vadd.f32 %v1702_v27, %v2078_v42  ;;  %v2243_v27 = vld [vmem:[%s2645_s4] ss:$0 sm:$0xff] }
 0x113   : > { %v607_v30 = vpop.f32.mrf.mxu0 }
 0x114   : > { %1769 = vmatmul.mubr.f32.gmra.mxu1 %v892_v28  ;;  %v2169_v32 = vadd.f32 %v2078_v42, %v607_v30  ;;  %v896_v40 = vmul.f32 %v2174_v35, %v2174_v35 }
 0x115   : > { %v1705_v33 = vpop.f32.mrf.mxu0  ;;  %1771 = vmatprep.mubr.f32.mxu1 %v893_v29 }
 0x116   : > { %v894_v34 = vmul.f32 %v2169_v32, %v2169_v32  ;;  %v2186_v45 = vadd.f32 %v1705_v33, %v2078_v42 }
 0x117   : > { %v620_v36 = vpop.f32.mrf.mxu0 }
 0x118   : > { %1772 = vmatmul.mubr.f32.gmra.mxu1 %v894_v34  ;;  %v2179_v38 = vadd.f32 %v2078_v42, %v620_v36  ;;  %v899_v55 = vmul.f32 %v2186_v45, %v2186_v45 }
 0x119   : > { %v1706_v39 = vpop.f32.mrf.mxu0  ;;  %1774 = vmatprep.mubr.f32.mxu1 %v895_v37 }
 0x11a   : > { %v897_v41 = vmul.f32 %v2179_v38, %v2179_v38  ;;  %v2194_v52 = vadd.f32 %v1706_v39, %v2078_v42 }
 0x11b   : > { %v623_v44 = vpop.f32.mrf.mxu0 }
 0x11c   : > { %1775 = vmatmul.mubr.f32.gmra.mxu1 %v896_v40  ;;  %v2189_v46 = vadd.f32 %v2078_v42, %v623_v44  ;;  %v900_v58 = vmul.f32 %v2194_v52, %v2194_v52 }
 0x11d   : > { %v1709_v49 = vpop.f32.mrf.mxu0  ;;  %1777 = vmatprep.mubr.f32.mxu1 %v897_v41 }
 0x11e   : > { %v898_v50 = vmul.f32 %v2189_v46, %v2189_v46  ;;  %v2206_v0 = vadd.f32 %v1709_v49, %v2078_v42 }
 0x11f   : > { %v636_v53 = vpop.f32.mrf.mxu0 }
 0x120   : > { %1778 = vmatmul.mubr.f32.gmra.mxu1 %v898_v50  ;;  %v2199_v56 = vadd.f32 %v2078_v42, %v636_v53  ;;  %v903_v9 = vmul.f32 %v2206_v0, %v2206_v0 }
 0x121   : > { %v1710_v57 = vpop.f32.mrf.mxu0  ;;  %1780 = vmatprep.mubr.f32.mxu1 %v899_v55 }
 0x122   : > { %v901_v61 = vmul.f32 %v2199_v56, %v2199_v56  ;;  %v2214_v5 = vadd.f32 %v1710_v57, %v2078_v42 }
 0x123   : > { %v639_v62 = vpop.f32.mrf.mxu0 }
 0x124   : > { %1781 = vmatmul.mubr.f32.gmra.mxu1 %v900_v58  ;;  %v2209_v1 = vadd.f32 %v2078_v42, %v639_v62  ;;  %v904_v13 = vmul.f32 %v2214_v5, %v2214_v5 }
 0x125   : > { %v1713_v3 = vpop.f32.mrf.mxu0  ;;  %1783 = vmatprep.mubr.f32.mxu1 %v901_v61 }
 0x126   : > { %v902_v4 = vmul.f32 %v2209_v1, %v2209_v1  ;;  %v2226_v17 = vadd.f32 %v1713_v3, %v2078_v42 }
 0x127   : > { %v652_v6 = vpop.f32.mrf.mxu0 }
 0x128   : > { %1784 = vmatmul.mubr.f32.gmra.mxu1 %v902_v4  ;;  %v2219_v10 = vadd.f32 %v2078_v42, %v652_v6  ;;  %v907_v24 = vmul.f32 %v2226_v17, %v2226_v17 }
 0x129   : > { %v1714_v12 = vpop.f32.mrf.mxu0  ;;  %1786 = vmatprep.mubr.f32.mxu1 %v903_v9 }
 0x12a   : > { %v905_v15 = vmul.f32 %v2219_v10, %v2219_v10  ;;  %v2234_v22 = vadd.f32 %v1714_v12, %v2078_v42 }
 0x12b   : > { %v655_v16 = vpop.f32.mrf.mxu0 }
 0x12c   : > { %1787 = vmatmul.mubr.f32.gmra.mxu1 %v904_v13  ;;  %v2229_v18 = vadd.f32 %v2078_v42, %v655_v16  ;;  %v908_v25 = vmul.f32 %v2234_v22, %v2234_v22 }
 0x12d   : > { %1789 = vmatprep.mubr.f32.mxu1 %v905_v15 }
 0x12e   : > { %v906_v21 = vmul.f32 %v2229_v18, %v2229_v18 }
 0x130   : > { %1790 = vmatmul.mubr.f32.gmra.mxu1 %v906_v21 }
 0x131   : > { %1792 = vmatprep.mubr.f32.mxu1 %v907_v24 }
 0x134   : > { %1793 = vmatmul.mubr.f32.gmra.mxu1 %v908_v25 }
 0x1b8   : > { %v1749_v28 = vpop.f32.mrf.mxu1 }
 0x1b9   : > { %v1004_v29 = vadd.f32 %v1749_v28, %v2243_v27 }
 0x1ba   : > { %v998_v30 = vpop.f32.mrf.mxu1 }
 0x1bb   : > { %1843 = vrsqrt.f32 %v1004_v29  ;;  %v999_v42 = vadd.f32 %v2243_v27, %v998_v30  ;;  %vm1166_vm0 = vcmp.eq.f32.partialorder %v1004_v29, inf  ;;  %vm1168_vm1 = vcmp.eq.f32.partialorder %v1004_v29, 0.0 }
 0x1bc   : > { %v1752_v33 = vpop.f32.mrf.mxu1  ;;  %v1169_v62 = vand.u32 2147483648, %v1004_v29 }
 0x1bd   : > { %v1014_v34 = vadd.f32 %v1752_v33, %v2243_v27  ;;  %1845 = vrsqrt.f32 %v999_v42  ;;  %vm1159_vm2 = vcmp.eq.f32.partialorder %v999_v42, inf  ;;  %vm1161_vm3 = vcmp.eq.f32.partialorder %v999_v42, 0.0 }
 0x1be   : > { %v1008_v36 = vpop.f32.mrf.mxu1  ;;  %v1162_v4 = vand.u32 2147483648, %v999_v42 }
 0x1bf   : > { %1847 = vrsqrt.f32 %v1014_v34  ;;  %v2249_v37 = vadd.f32 %v2243_v27, %v1008_v36  ;;  %vm1180_vm4 = vcmp.eq.f32.partialorder %v1014_v34, inf  ;;  %vm1182_vm5 = vcmp.eq.f32.partialorder %v1014_v34, 0.0 }
 0x1c0   : > { %v1755_v39 = vpop.f32.mrf.mxu1  ;;  %v1183_v13 = vand.u32 2147483648, %v1014_v34 }
 0x1c1   : > { %v2252_v40 = vadd.f32 %v1755_v39, %v2243_v27  ;;  %1849 = vrsqrt.f32 %v2249_v37  ;;  %vm1173_vm6 = vcmp.eq.f32.partialorder %v2249_v37, inf  ;;  %vm1175_vm7 = vcmp.eq.f32.partialorder %v2249_v37, 0.0 }
 0x1c2   : > { %v1018_v41 = vpop.f32.mrf.mxu1 }
 0x1c3   : > { %1851 = vrsqrt.f32 %v2252_v40  ;;  %v2257_v44 = vadd.f32 %v2243_v27, %v1018_v41  ;;  %vm1194_vm8 = vcmp.eq.f32.partialorder %v2252_v40, inf  ;;  %vm1196_vm9 = vcmp.eq.f32.partialorder %v2252_v40, 0.0 }
 0x1c4   : > { %v1758_v49 = vpop.f32.mrf.mxu1 }
 0x1c5   : > { %v2260_v50 = vadd.f32 %v1758_v49, %v2243_v27  ;;  %1853 = vrsqrt.f32 %v2257_v44  ;;  %vm1187_vm10 = vcmp.eq.f32.partialorder %v2257_v44, inf  ;;  %vm1189_vm11 = vcmp.eq.f32.partialorder %v2257_v44, 0.0 }
 0x1c6   : > { %v1028_v53 = vpop.f32.mrf.mxu1 }
 0x1c7   : > { %1855 = vrsqrt.f32 %v2260_v50  ;;  %v2265_v57 = vadd.f32 %v2243_v27, %v1028_v53  ;;  %vm1208_vm12 = vcmp.eq.f32.partialorder %v2260_v50, inf  ;;  %vm1210_vm13 = vcmp.eq.f32.partialorder %v2260_v50, 0.0 }
 0x1c8   : > { %v1844_v55 = vpop.eup %1843  ;;  %v1761_v58 = vpop.f32.mrf.mxu1 }
 0x1c9   : > { %v1165_v61 = vmul.f32 %v1844_v55, %v1004_v29  ;;  %v2269_v3 = vadd.f32 %v1761_v58, %v2243_v27  ;;  %1857 = vrsqrt.f32 %v2265_v57  ;;  %vm1201_vm14 = vcmp.eq.f32.partialorder %v2265_v57, inf }
 0x1ca   : > { %v1038_v6 = vpop.f32.mrf.mxu1  ;;  %v1846_v9 = vpop.eup %1845  ;;  %vm1203_vm15 = vcmp.eq.f32.partialorder %v2265_v57, 0.0 }
 0x1cb   : > { %v1167_v12 = vsel %vm1166_vm0, %v1004_v29, %v1165_v61  ;;  %1859 = vrsqrt.f32 %v2269_v3  ;;  %v1158_v21 = vmul.f32 %v1846_v9, %v999_v42  ;;  %v2281_v24 = vadd.f32 %v2243_v27, %v1038_v6 }
 0x1cc   : > { %v1848_v15 = vpop.eup %1847  ;;  %v1170_v16 = vsel %vm1168_vm1, %v1169_v62, %v1167_v12  ;;  %v1764_v25 = vpop.f32.mrf.mxu1  ;;  %v1176_v29 = vand.u32 2147483648, %v2249_v37  ;;  %v1197_v62 = vand.u32 2147483648, %v2252_v40  ;;  %vm1222_vm0 = vcmp.eq.f32.partialorder %v2269_v3, inf }
 0x1cd   : > { %v1382_v28 = vmul.f32 %v1170_v16, %v2089_v48  ;;  %v1179_v30 = vmul.f32 %v1848_v15, %v1014_v34  ;;  %v2286_v33 = vadd.f32 %v1764_v25, %v2243_v27  ;;  %v1160_v36 = vsel %vm1159_vm2, %v999_v42, %v1158_v21 }
 0x1ce   : > { %1861 = vrsqrt.f32 %v2281_v24  ;;  %v1048_v39 = vpop.f32.mrf.mxu1  ;;  %v1850_v41 = vpop.eup %1849  ;;  %v1163_v48 = vsel %vm1161_vm3, %v1162_v4, %v1160_v36  ;;  %vm1224_vm1 = vcmp.eq.f32.partialorder %v2269_v3, 0.0  ;;  %vm1215_vm2 = vcmp.eq.f32.partialorder %v2281_v24, inf }
 0x1cf   : > { %1414 = vst [vmem:[%s2276_s15 + $0x8] sm:$0xff] %v1382_v28  ;;  %v1181_v49 = vsel %vm1180_vm4, %v1014_v34, %v1179_v30  ;;  %1863 = vrsqrt.f32 %v2286_v33  ;;  %v1381_v55 = vmul.f32 %v1163_v48, %v2081_v43  ;;  %v1172_v61 = vmul.f32 %v1850_v41, %v2249_v37 }
 0x1d0   : > { %v1852_v53 = vpop.eup %1851  ;;  %v1184_v58 = vsel %vm1182_vm5, %v1183_v13, %v1181_v49  ;;  %v1767_v6 = vpop.f32.mrf.mxu1  ;;  %v1190_v34 = vand.u32 2147483648, %v2257_v44  ;;  %v2311_v9 = vadd.f32 %v2243_v27, %v1048_v39  ;;  %v1211_v41 = vand.u32 2147483648, %v2260_v50 }
 0x1d1   : > { %v1384_v42 = vmul.f32 %v1184_v58, %v2094_v51  ;;  %v1193_v4 = vmul.f32 %v1852_v53, %v2252_v40  ;;  %1413 = vst [vmem:[%s2276_s15] sm:$0xff] %v1381_v55  ;;  %v1174_v43 = vsel %vm1173_vm6, %v2249_v37, %v1172_v61  ;;  %v2314_v12 = vadd.f32 %v1767_v6, %v2243_v27 }
 0x1d2   : > { %v1058_v51 = vpop.f32.mrf.mxu1  ;;  %v1854_v13 = vpop.eup %1853  ;;  %v1177_v15 = vsel %vm1175_vm7, %v1176_v29, %v1174_v43  ;;  %1865 = vrsqrt.f32 %v2311_v9  ;;  %v1204_v53 = vand.u32 2147483648, %v2265_v57  ;;  %vm1217_vm3 = vcmp.eq.f32.partialorder %v2281_v24, 0.0 }
 0x1d3   : > { %1416 = vst [vmem:[%s2276_s15 + $0x18] sm:$0xff] %v1384_v42  ;;  %v1195_v16 = vsel %vm1194_vm8, %v2252_v40, %v1193_v4  ;;  %v2324_v21 = vadd.f32 %v2243_v27, %v1058_v51  ;;  %v1383_v28 = vmul.f32 %v1177_v15, %v2086_v47  ;;  %v1186_v36 = vmul.f32 %v1854_v13, %v2257_v44 }
 0x1d4   : > { %v1856_v25 = vpop.eup %1855  ;;  %v1198_v30 = vsel %vm1196_vm9, %v1197_v62, %v1195_v16  ;;  %v1770_v37 = vpop.f32.mrf.mxu1  ;;  %1867 = vrsqrt.f32 %v2314_v12  ;;  %v1225_v4 = vand.u32 2147483648, %v2269_v3  ;;  %vm1236_vm4 = vcmp.eq.f32.partialorder %v2286_v33, inf }
 0x1d5   : > { %v1386_v29 = vmul.f32 %v1198_v30, %v2109_v60  ;;  %v1207_v39 = vmul.f32 %v1856_v25, %v2260_v50  ;;  %1415 = vst [vmem:[%s2276_s15 + $0x10] sm:$0xff] %v1383_v28  ;;  %v1188_v47 = vsel %vm1187_vm10, %v2257_v44, %v1186_v36  ;;  %1869 = vrsqrt.f32 %v2324_v21 }
 0x1d6   : > { %v1068_v40 = vpop.f32.mrf.mxu1  ;;  %v1858_v48 = vpop.eup %1857  ;;  %v1191_v60 = vsel %vm1189_vm11, %v1190_v34, %v1188_v47  ;;  %vm1238_vm5 = vcmp.eq.f32.partialorder %v2286_v33, 0.0  ;;  %vm1229_vm6 = vcmp.eq.f32.partialorder %v2311_v9, inf  ;;  %vm1231_vm7 = vcmp.eq.f32.partialorder %v2311_v9, 0.0 }
 0x1d7   : > { %1418 = vst [vmem:[%s2276_s15 + $0x28] sm:$0xff] %v1386_v29  ;;  %v1209_v49 = vsel %vm1208_vm12, %v2260_v50, %v1207_v39  ;;  %v1385_v58 = vmul.f32 %v1191_v60, %v2099_v54  ;;  %v1200_v62 = vmul.f32 %v1858_v48, %v2265_v57  ;;  %v2365_v50 = vadd.f32 %v1770_v37, %v2243_v27 }
 0x1d8   : > { %v1860_v55 = vpop.eup %1859  ;;  %v1212_v61 = vsel %vm1210_vm13, %v1211_v41, %v1209_v49  ;;  %v1773_v44 = vpop.f32.mrf.mxu1  ;;  %v2368_v43 = vadd.f32 %v2243_v27, %v1068_v40  ;;  %v1218_v37 = vand.u32 2147483648, %v2281_v24  ;;  %vm1250_vm8 = vcmp.eq.f32.partialorder %v2314_v12, inf }
 0x1d9   : > { %v1388_v6 = vmul.f32 %v1212_v61, %v2114_v63  ;;  %v1221_v42 = vmul.f32 %v1860_v55, %v2269_v3  ;;  %1417 = vst [vmem:[%s2276_s15 + $0x20] sm:$0xff] %v1385_v58  ;;  %v1202_v54 = vsel %vm1201_vm14, %v2265_v57, %v1200_v62  ;;  %v2378_v15 = vadd.f32 %v1773_v44, %v2243_v27 }
 0x1da   : > { %v1078_v63 = vpop.f32.mrf.mxu1  ;;  %v1205_v51 = vsel %vm1203_vm15, %v1204_v53, %v1202_v54  ;;  %1871 = vrsqrt.f32 %v2365_v50  ;;  %vm1252_vm9 = vcmp.eq.f32.partialorder %v2314_v12, 0.0  ;;  %v1253_v54 = vand.u32 2147483648, %v2314_v12 }
 0x1db   : > { %v1862_v34 = vpop.eup %1861  ;;  %1420 = vst [vmem:[%s2276_s15 + $0x38] sm:$0xff] %v1388_v6  ;;  %v1223_v13 = vsel %vm1222_vm0, %v2269_v3, %v1221_v42  ;;  %v1387_v25 = vmul.f32 %v1205_v51, %v2106_v59  ;;  %v2389_v39 = vadd.f32 %v2243_v27, %v1078_v63  ;;  %v1239_v3 = vand.u32 2147483648, %v2286_v33 }
 0x1dc   : > { %v1864_v16 = vpop.eup %1863  ;;  %v1226_v28 = vsel %vm1224_vm1, %v1225_v4, %v1223_v13  ;;  %v1214_v30 = vmul.f32 %v1862_v34, %v2281_v24  ;;  %v1776_v57 = vpop.f32.mrf.mxu1  ;;  %1873 = vrsqrt.f32 %v2368_v43  ;;  %vm1243_vm10 = vcmp.eq.f32.partialorder %v2324_v21, inf }
 0x1dd   : > { %v1390_v36 = vmul.f32 %v1226_v28, %v2129_v8  ;;  %v1235_v29 = vmul.f32 %v1864_v16, %v2286_v33  ;;  %1419 = vst [vmem:[%s2276_s15 + $0x30] sm:$0xff] %v1387_v25  ;;  %1875 = vrsqrt.f32 %v2378_v15  ;;  %v1246_v25 = vand.u32 2147483648, %v2324_v21 }
 0x1de   : > { %v1216_v59 = vsel %vm1215_vm2, %v2281_v24, %v1214_v30  ;;  %v1088_v8 = vpop.f32.mrf.mxu1  ;;  %1877 = vrsqrt.f32 %v2389_v39  ;;  %vm1245_vm11 = vcmp.eq.f32.partialorder %v2324_v21, 0.0  ;;  %vm1264_vm12 = vcmp.eq.f32.partialorder %v2365_v50, inf }
 0x1df   : > { %1422 = vst [vmem:[%s2276_s15 + $0x48] sm:$0xff] %v1390_v36  ;;  %v1219_v41 = vsel %vm1217_vm3, %v1218_v37, %v1216_v59  ;;  %v1237_v47 = vsel %vm1236_vm4, %v2286_v33, %v1235_v29  ;;  %v1866_v49 = vpop.eup %1865  ;;  %v2414_v33 = vadd.f32 %v1776_v57, %v2243_v27  ;;  %v2417_v61 = vadd.f32 %v2243_v27, %v1088_v8 }
 0x1e0   : > { %v1389_v40 = vmul.f32 %v1219_v41, %v2119_v2  ;;  %v1240_v48 = vsel %vm1238_vm5, %v1239_v3, %v1237_v47  ;;  %v1779_v60 = vpop.f32.mrf.mxu1  ;;  %v1228_v24 = vmul.f32 %v1866_v49, %v2311_v9  ;;  %v1232_v2 = vand.u32 2147483648, %v2311_v9 }
 0x1e1   : > { %v1392_v53 = vmul.f32 %v1240_v48, %v2134_v11  ;;  %v1868_v58 = vpop.eup %1867  ;;  %v2423_v44 = vadd.f32 %v1779_v60, %v2243_v27  ;;  %1879 = vrsqrt.f32 %v2414_v33  ;;  %vm1266_vm13 = vcmp.eq.f32.partialorder %v2365_v50, 0.0 }
 0x1e2   : > { %1421 = vst [vmem:[%s2276_s15 + $0x40] sm:$0xff] %v1389_v40  ;;  %v1098_v55 = vpop.f32.mrf.mxu1  ;;  %v1230_v11 = vsel %vm1229_vm6, %v2311_v9, %v1228_v24  ;;  %v1249_v62 = vmul.f32 %v1868_v58, %v2314_v12  ;;  %v1870_v42 = vpop.eup %1869  ;;  %1881 = vrsqrt.f32 %v2417_v61  ;;  %v1267_v36 = vand.u32 2147483648, %v2365_v50 }
 0x1e3   : > { %1424 = vst [vmem:[%s2276_s15 + $0x58] sm:$0xff] %v1392_v53  ;;  %v1233_v4 = vsel %vm1231_vm7, %v1232_v2, %v1230_v11  ;;  %v1242_v34 = vmul.f32 %v1870_v42, %v2324_v21  ;;  %v2432_v51 = vadd.f32 %v2243_v27, %v1098_v55  ;;  %1883 = vrsqrt.f32 %v2423_v44 }
 0x1e4   : > { %v1782_v6 = vpop.f32.mrf.mxu1  ;;  %v1391_v63 = vmul.f32 %v1233_v4, %v2126_v7  ;;  %v1251_v9 = vsel %vm1250_vm8, %v2314_v12, %v1249_v62  ;;  %vm1257_vm14 = vcmp.eq.f32.partialorder %v2368_v43, inf  ;;  %vm1259_vm15 = vcmp.eq.f32.partialorder %v2368_v43, 0.0 }
 0x1e5   : > { %v1254_v16 = vsel %vm1252_vm9, %v1253_v54, %v1251_v9  ;;  %v1244_v7 = vsel %vm1243_vm10, %v2324_v21, %v1242_v34  ;;  %1885 = vrsqrt.f32 %v2432_v51  ;;  %v1260_v59 = vand.u32 2147483648, %v2368_v43 }
 0x1e6   : > { %v1108_v13 = vpop.f32.mrf.mxu1  ;;  %1423 = vst [vmem:[%s2276_s15 + $0x50] sm:$0xff] %v1391_v63  ;;  %v1394_v28 = vmul.f32 %v1254_v16, %v2149_v20  ;;  %v1247_v57 = vsel %vm1245_vm11, %v1246_v25, %v1244_v7  ;;  %v2453_v3 = vadd.f32 %v1782_v6, %v2243_v27  ;;  %vm1278_vm0 = vcmp.eq.f32.partialorder %v2378_v15, inf }
 0x1e7   : > { %v1872_v30 = vpop.eup %1871  ;;  %v1393_v37 = vmul.f32 %v1247_v57, %v2139_v14  ;;  %v2456_v8 = vadd.f32 %v2243_v27, %v1108_v13  ;;  %vm1280_vm1 = vcmp.eq.f32.partialorder %v2378_v15, 0.0  ;;  %v1281_v60 = vand.u32 2147483648, %v2378_v15 }
 0x1e8   : > { %v1785_v12 = vpop.f32.mrf.mxu1  ;;  %1426 = vst [vmem:[%s2276_s15 + $0x68] sm:$0xff] %v1394_v28  ;;  %v1263_v20 = vmul.f32 %v1872_v30, %v2365_v50  ;;  %1887 = vrsqrt.f32 %v2453_v3  ;;  %vm1271_vm2 = vcmp.eq.f32.partialorder %v2389_v39, inf  ;;  %vm1273_vm3 = vcmp.eq.f32.partialorder %v2389_v39, 0.0 }
 0x1e9   : > { %v1874_v29 = vpop.eup %1873  ;;  %1425 = vst [vmem:[%s2276_s15 + $0x60] sm:$0xff] %v1393_v37  ;;  %v2468_v49 = vadd.f32 %v1785_v12, %v2243_v27  ;;  %1889 = vrsqrt.f32 %v2456_v8  ;;  %vm1292_vm4 = vcmp.eq.f32.partialorder %v2414_v33, inf  ;;  %vm1294_vm5 = vcmp.eq.f32.partialorder %v2414_v33, 0.0 }
 0x1ea   : > { %v1118_v21 = vpop.f32.mrf.mxu1  ;;  %v1265_v14 = vsel %vm1264_vm12, %v2365_v50, %v1263_v20  ;;  %v1256_v41 = vmul.f32 %v1874_v29, %v2368_v43  ;;  %v1876_v40 = vpop.eup %1875  ;;  %v1295_v34 = vand.u32 2147483648, %v2414_v33  ;;  %vm1285_vm6 = vcmp.eq.f32.partialorder %v2417_v61, inf }
 0x1eb   : > { %v1268_v48 = vsel %vm1266_vm13, %v1267_v36, %v1265_v14  ;;  %v1878_v53 = vpop.eup %1877  ;;  %v1277_v58 = vmul.f32 %v1876_v40, %v2378_v15  ;;  %v2481_v62 = vadd.f32 %v2243_v27, %v1118_v21  ;;  %1891 = vrsqrt.f32 %v2468_v49 }
 0x1ec   : > { %v1788_v47 = vpop.f32.mrf.mxu1  ;;  %v1396_v24 = vmul.f32 %v1268_v48, %v2154_v23  ;;  %v1258_v55 = vsel %vm1257_vm14, %v2368_v43, %v1256_v41  ;;  %v1270_v11 = vmul.f32 %v1878_v53, %v2389_v39  ;;  %v1274_v43 = vand.u32 2147483648, %v2389_v39 }
 0x1ed   : > { %v1261_v2 = vsel %vm1259_vm15, %v1260_v59, %v1258_v55  ;;  %v1279_v6 = vsel %vm1278_vm0, %v2378_v15, %v1277_v58  ;;  %1893 = vrsqrt.f32 %v2481_v62  ;;  %vm1287_vm7 = vcmp.eq.f32.partialorder %v2417_v61, 0.0 }
 0x1ee   : > { %v1128_v50 = vpop.f32.mrf.mxu1  ;;  %1428 = vst [vmem:[%s2276_s15 + $0x78] sm:$0xff] %v1396_v24  ;;  %v1395_v23 = vmul.f32 %v1261_v2, %v2146_v19  ;;  %v1282_v4 = vsel %vm1280_vm1, %v1281_v60, %v1279_v6  ;;  %v1272_v54 = vsel %vm1271_vm2, %v2389_v39, %v1270_v11  ;;  %v1880_v19 = vpop.eup %1879  ;;  %v2507_v25 = vadd.f32 %v1788_v47, %v2243_v27 }
 0x1ef   : > { %v1398_v63 = vmul.f32 %v1282_v4, %v2169_v32  ;;  %v1275_v9 = vsel %vm1273_vm3, %v1274_v43, %v1272_v54  ;;  %v1291_v13 = vmul.f32 %v1880_v19, %v2414_v33  ;;  %v1882_v16 = vpop.eup %1881  ;;  %v1288_v32 = vand.u32 2147483648, %v2417_v61 }
 0x1f0   : > { %v1791_v42 = vpop.f32.mrf.mxu1  ;;  %1427 = vst [vmem:[%s2276_s15 + $0x70] sm:$0xff] %v1395_v23  ;;  %v1397_v15 = vmul.f32 %v1275_v9, %v2159_v26  ;;  %v2510_v28 = vadd.f32 %v2243_v27, %v1128_v50  ;;  %v1884_v26 = vpop.eup %1883  ;;  %v1284_v12 = vmul.f32 %v1882_v16, %v2417_v61  ;;  %vm1306_vm8 = vcmp.eq.f32.partialorder %v2423_v44, inf }
 0x1f1   : > { %1430 = vst [vmem:[%s2276_s15 + $0x88] sm:$0xff] %v1398_v63  ;;  %v1293_v7 = vsel %vm1292_vm4, %v2414_v33, %v1291_v13  ;;  %vm1308_vm9 = vcmp.eq.f32.partialorder %v2423_v44, 0.0  ;;  %v1305_v57 = vmul.f32 %v1884_v26, %v2423_v44  ;;  %1895 = vrsqrt.f32 %v2507_v25 }
 0x1f2   : > { %v1138_v39 = vpop.f32.mrf.mxu1  ;;  %1429 = vst [vmem:[%s2276_s15 + $0x80] sm:$0xff] %v1397_v15  ;;  %v1296_v30 = vsel %vm1294_vm5, %v1295_v34, %v1293_v7  ;;  %v2524_v36 = vadd.f32 %v1791_v42, %v2243_v27  ;;  %v1886_v37 = vpop.eup %1885  ;;  %v1286_v21 = vsel %vm1285_vm6, %v2417_v61, %v1284_v12  ;;  %v1309_v29 = vand.u32 2147483648, %v2423_v44 }
 0x1f3   : > { %v1400_v20 = vmul.f32 %v1296_v30, %v2174_v35  ;;  %v2532_v59 = vadd.f32 %v2243_v27, %v1138_v39  ;;  %v1289_v14 = vsel %vm1287_vm7, %v1288_v32, %v1286_v21  ;;  %v1307_v41 = vsel %vm1306_vm8, %v2423_v44, %v1305_v57 }
 0x1f4   : > { %v1794_v33 = vpop.f32.mrf.mxu1  ;;  %v1298_v47 = vmul.f32 %v1886_v37, %v2432_v51  ;;  %1897 = vrsqrt.f32 %v2510_v28  ;;  %v1399_v35 = vmul.f32 %v1289_v14, %v2166_v31  ;;  %v1310_v40 = vsel %vm1308_vm9, %v1309_v29, %v1307_v41 }
 0x1f5   : > { %1432 = vst [vmem:[%s2276_s15 + $0x98] sm:$0xff] %v1400_v20  ;;  %vm1299_vm10 = vcmp.eq.f32.partialorder %v2432_v51, inf  ;;  %v1302_v48 = vand.u32 2147483648, %v2432_v51  ;;  %v1888_v60 = vpop.eup %1887  ;;  %v1402_v61 = vmul.f32 %v1310_v40, %v2189_v46  ;;  %vm1301_vm11 = vcmp.eq.f32.partialorder %v2432_v51, 0.0 }
 0x1f6   : > { %v1300_v53 = vsel %vm1299_vm10, %v2432_v51, %v1298_v47  ;;  %1899 = vrsqrt.f32 %v2524_v36  ;;  %1431 = vst [vmem:[%s2276_s15 + $0x90] sm:$0xff] %v1399_v35  ;;  %v1319_v31 = vmul.f32 %v1888_v60, %v2453_v3  ;;  %v1148_v44 = vpop.f32.mrf.mxu1  ;;  %v1890_v55 = vpop.eup %1889  ;;  %vm1320_vm12 = vcmp.eq.f32.partialorder %v2453_v3, inf }
 0x1f7   : > { %v1303_v24 = vsel %vm1301_vm11, %v1302_v48, %v1300_v53  ;;  %1434 = vst [vmem:[%s2276_s15 + $0xa8] sm:$0xff] %v1402_v61  ;;  %v1323_v46 = vand.u32 2147483648, %v2453_v3  ;;  %1901 = vrsqrt.f32 %v2532_v59  ;;  %vm1322_vm13 = vcmp.eq.f32.partialorder %v2453_v3, 0.0 }
 0x1f8   : > { %v1401_v58 = vmul.f32 %v1303_v24, %v2179_v38  ;;  %v1321_v51 = vsel %vm1320_vm12, %v2453_v3, %v1319_v31  ;;  %v1312_v50 = vmul.f32 %v1890_v55, %v2456_v8  ;;  %vm1313_vm14 = vcmp.eq.f32.partialorder %v2456_v8, inf  ;;  %v1892_v2 = vpop.eup %1891 }
 0x1f9   : > { %v1324_v11 = vsel %vm1322_vm13, %v1323_v46, %v1321_v51  ;;  %v1316_v38 = vand.u32 2147483648, %v2456_v8  ;;  %v2563_v23 = vadd.f32 %v1794_v33, %v2243_v27  ;;  %v2566_v6 = vadd.f32 %v2243_v27, %v1148_v44 }
 0x1fa   : > { %1433 = vst [vmem:[%s2276_s15 + $0xa0] sm:$0xff] %v1401_v58  ;;  %v1404_v43 = vmul.f32 %v1324_v11, %v2194_v52  ;;  %v1314_v3 = vsel %vm1313_vm14, %v2456_v8, %v1312_v50  ;;  %vm1315_vm15 = vcmp.eq.f32.partialorder %v2456_v8, 0.0  ;;  %v1333_v42 = vmul.f32 %v1892_v2, %v2468_v49  ;;  %v1894_v4 = vpop.eup %1893 }
 0x1fb   : > { %v1317_v54 = vsel %vm1315_vm15, %v1316_v38, %v1314_v3  ;;  %vm1334_vm0 = vcmp.eq.f32.partialorder %v2468_v49, inf  ;;  %v1337_v19 = vand.u32 2147483648, %v2468_v49  ;;  %1903 = vrsqrt.f32 %v2563_v23 }
 0x1fc   : > { %1436 = vst [vmem:[%s2276_s15 + $0xb8] sm:$0xff] %v1404_v43  ;;  %v1403_v27 = vmul.f32 %v1317_v54, %v2186_v45  ;;  %v1335_v52 = vsel %vm1334_vm0, %v2468_v49, %v1333_v42  ;;  %vm1336_vm1 = vcmp.eq.f32.partialorder %v2468_v49, 0.0  ;;  %v1326_v8 = vmul.f32 %v1894_v4, %v2481_v62 }
 0x1fd   : > { %v1338_v63 = vsel %vm1336_vm1, %v1337_v19, %v1335_v52  ;;  %vm1327_vm2 = vcmp.eq.f32.partialorder %v2481_v62, inf  ;;  %v1330_v9 = vand.u32 2147483648, %v2481_v62  ;;  %1905 = vrsqrt.f32 %v2566_v6 }
 0x1fe   : > { %v1896_v34 = vpop.eup %1895  ;;  %1435 = vst [vmem:[%s2276_s15 + $0xb0] sm:$0xff] %v1403_v27  ;;  %v1406_v15 = vmul.f32 %v1338_v63, %v2209_v1  ;;  %v1328_v45 = vsel %vm1327_vm2, %v2481_v62, %v1326_v8  ;;  %vm1329_vm3 = vcmp.eq.f32.partialorder %v2481_v62, 0.0  ;;  %vm1348_vm4 = vcmp.eq.f32.partialorder %v2507_v25, inf }
 0x1ff   : > { %v1331_v13 = vsel %vm1329_vm3, %v1330_v9, %v1328_v45  ;;  %v1347_v49 = vmul.f32 %v1896_v34, %v2507_v25  ;;  %v1351_v32 = vand.u32 2147483648, %v2507_v25  ;;  %vm1350_vm5 = vcmp.eq.f32.partialorder %v2507_v25, 0.0 }
 0x200   : > { %1438 = vst [vmem:[%s2276_s15 + $0xc8] sm:$0xff] %v1406_v15  ;;  %v1405_v16 = vmul.f32 %v1331_v13, %v2199_v56  ;;  %vm1341_vm6 = vcmp.eq.f32.partialorder %v2510_v28, inf  ;;  %v1344_v12 = vand.u32 2147483648, %v2510_v28  ;;  %vm1343_vm7 = vcmp.eq.f32.partialorder %v2510_v28, 0.0 }
 0x201   : > { %v1898_v39 = vpop.eup %1897  ;;  %v1349_v26 = vsel %vm1348_vm4, %v2507_v25, %v1347_v49  ;;  %vm1362_vm8 = vcmp.eq.f32.partialorder %v2524_v36, inf  ;;  %v1365_v20 = vand.u32 2147483648, %v2524_v36  ;;  %vm1364_vm9 = vcmp.eq.f32.partialorder %v2524_v36, 0.0 }
 0x202   : > { %v1340_v1 = vmul.f32 %v1898_v39, %v2510_v28  ;;  %1437 = vst [vmem:[%s2276_s15 + $0xc0] sm:$0xff] %v1405_v16  ;;  %v1352_v62 = vsel %vm1350_vm5, %v1351_v32, %v1349_v26  ;;  %vm1355_vm10 = vcmp.eq.f32.partialorder %v2532_v59, inf  ;;  %v1358_v33 = vand.u32 2147483648, %v2532_v59 }
 0x203   : > { %v1900_v7 = vpop.eup %1899  ;;  %v1408_v56 = vmul.f32 %v1352_v62, %v2214_v5  ;;  %vm1357_vm11 = vcmp.eq.f32.partialorder %v2532_v59, 0.0  ;;  %vm1376_vm12 = vcmp.eq.f32.partialorder %v2563_v23, inf  ;;  %v1379_v48 = vand.u32 2147483648, %v2563_v23 }
 0x204   : > { %v1342_v30 = vsel %vm1341_vm6, %v2510_v28, %v1340_v1  ;;  %v1361_v57 = vmul.f32 %v1900_v7, %v2524_v36  ;;  %v1902_v37 = vpop.eup %1901  ;;  %vm1378_vm13 = vcmp.eq.f32.partialorder %v2563_v23, 0.0  ;;  %vm1369_vm14 = vcmp.eq.f32.partialorder %v2566_v6, inf }
 0x205   : > { %v1345_v25 = vsel %vm1343_vm7, %v1344_v12, %v1342_v30  ;;  %1440 = vst [vmem:[%s2276_s15 + $0xd8] sm:$0xff] %v1408_v56  ;;  %v1354_v5 = vmul.f32 %v1902_v37, %v2532_v59  ;;  %vm1371_vm15 = vcmp.eq.f32.partialorder %v2566_v6, 0.0 }
 0x206   : > { %v1407_v21 = vmul.f32 %v1345_v25, %v2206_v0  ;;  %v1363_v29 = vsel %vm1362_vm8, %v2524_v36, %v1361_v57 }
 0x207   : > { %v1366_v28 = vsel %vm1364_vm9, %v1365_v20, %v1363_v29  ;;  %v1356_v41 = vsel %vm1355_vm10, %v2532_v59, %v1354_v5 }
 0x208   : > { %1439 = vst [vmem:[%s2276_s15 + $0xd0] sm:$0xff] %v1407_v21  ;;  %v1410_v14 = vmul.f32 %v1366_v28, %v2229_v18  ;;  %v1904_v0 = vpop.eup %1903  ;;  %v1359_v47 = vsel %vm1357_vm11, %v1358_v33, %v1356_v41 }
 0x209   : > { %v1409_v36 = vmul.f32 %v1359_v47, %v2219_v10  ;;  %v1375_v35 = vmul.f32 %v1904_v0, %v2563_v23  ;;  %v1372_v10 = vand.u32 2147483648, %v2566_v6 }
 0x20a   : > { %1442 = vst [vmem:[%s2276_s15 + $0xe8] sm:$0xff] %v1410_v14  ;;  %v1906_v40 = vpop.eup %1905 }
 0x20b   : > { %1441 = vst [vmem:[%s2276_s15 + $0xe0] sm:$0xff] %v1409_v36  ;;  %v1377_v18 = vsel %vm1376_vm12, %v2563_v23, %v1375_v35  ;;  %v1368_v59 = vmul.f32 %v1906_v40, %v2566_v6 }
 0x20c   : > { %v1380_v60 = vsel %vm1378_vm13, %v1379_v48, %v1377_v18 }
 0x20d   : > { %v1412_v61 = vmul.f32 %v1380_v60, %v2234_v22  ;;  %v1370_v53 = vsel %vm1369_vm14, %v2566_v6, %v1368_v59 }
 0x20e   : > { %v1373_v24 = vsel %vm1371_vm15, %v1372_v10, %v1370_v53 }
 0x20f   : > { %1444 = vst [vmem:[%s2276_s15 + $0xf8] sm:$0xff] %v1412_v61  ;;  %v1411_v31 = vmul.f32 %v1373_v24, %v2226_v17 }
 0x211   : > { %1443 = vst [vmem:[%s2276_s15 + $0xf0] sm:$0xff] %v1411_v31 }
 0x212 PF: > { %s15_s20 = sadd.s32 1, %s1929_s20   ;;  %s2647_s18 = smov %s1925_s19 }
 0x213   : > { %p12_p5 = scmp.ge.s32.totalorder %s15_s20, 4   ;;  %s2648_s19 = smov %s2650_s21 }
 0x215   :  { %14 = sbr.rel (!%p12_p5) target bundleno = 2 (0x2), region = 88 }

// kernel: _lambda_.29
= control target key start
LH: loop header
LB: loop body
LE: loop exit
PB: predicated region body
PF: predicated region fallthrough
CT: control target
= control target key end

     0   :  { %s2864_s12 = smov 0   ;;  %s2866_s13 = smov 0   ;;  %s3254_s0 = inlined_call_operand.vmem [shape: bf16[2048,128], index: 0, kind: input, shape index: {}]   ;;  %s3255_s1 = inlined_call_operand.vmem [shape: bf16[128,128], index: 1, kind: input, shape index: {}]   ;;  %s3256_s2 = inlined_call_operand.vmem [shape: f32[1,128], index: 2, kind: input, shape index: {}]   ;;  %s3257_s3 = inlined_call_operand.vmem [shape: f32[2048,128], index: 3, kind: output, shape index: {}]  }
   0x1   :  { %s2868_s14 = smov 0  }
   0x2 LB: > { %s32_s15 = sadd.s32 1, %s2838_s13  ;;  %p2412_p0 = scmp.ge.s32.totalorder %s2842_s14, 1  ;;  %s2842_s14 = sphi %s2868_s14, %s13_s14   ;;  %s2838_s13 = sphi %s2866_s13, %s3259_s13   ;;  %s2834_s12 = sphi %s2864_s12, %s3258_s12  }
   0x3   : > { %p34_p1 = scmp.ge.s32.totalorder %s32_s15, 2  ;;  %p188_p2 = scmp.lt.s32.totalorder %s2842_s14, 3 }
   0x5   : > { %s3261_s15 = smov (%p34_p1, %s32_s15), 0  ;;  %p189_p3 = pnand %p2412_p0, %p188_p2 }
   0x6   : > { %s2413_s18 = sshll.u32 (!%p189_p3), %s2834_s12, 7 }
   0x7   : > { %192 = sbr.rel (%p189_p3) target bundleno = 367 (0x16f), region = 32  ;;  %p230_p4 = scmp.lt.s32.totalorder (!%p189_p3), %s2413_s18, 255 }
   0xc   : > { %v2748_v0 = vld [vmem:[%s3255_s1 + $0x38] sm:$0xff]   ;;  %v2749_v1 = vld [vmem:[%s3255_s1 + $0x30] sm:$0xff]   ;;  %s3263_s18 = smov (!%p230_p4, %s2413_s18), 255  ;;  %v2750_v2 = vld [vmem:[%s3255_s1 + $0x28] sm:$0xff]  }
   0xd   : > { %2564 = vmatprep.subr.bf16.mxu0 %v2748_v0  ;;  %2708 = vmatprep.subr.bf16.mxu1 %v2748_v0  ;;  %s2414_s23 = sshll.u32 %s3263_s18, 2  ;;  %v2751_v3 = vld [vmem:[%s3255_s1 + $0x20] sm:$0xff]   ;;  %v2752_v6 = vld [vmem:[%s3255_s1 + $0x18] sm:$0xff]   ;;  %v2753_v7 = vld [vmem:[%s3255_s1 + $0x10] sm:$0xff]   ;;  %s2416_s10 = sshll.u32 %s3263_s18, 3 }
   0xe   : > { %2565 = vmatpush3.bf16.msra.mxu0 %v2748_v0  ;;  %2716 = vmatpush3.bf16.msra.mxu1 %v2748_v0  ;;  %s2897_s26 = scalar_lea.vmem %s3254_s0, %s2414_s23  ;;  %v2754_v8 = vld [vmem:[%s3255_s1 + $0x8] sm:$0xff]   ;;  %v2755_v9 = vld [vmem:[%s3255_s1] sm:$0xff]   ;;  %s2987_s19 = scalar_lea.vmem %s3257_s3, %s2416_s10 }
   0xf   : > { %2566 = vmatprep.subr.bf16.mxu0 %v2749_v1  ;;  %2709 = vmatprep.subr.bf16.mxu1 %v2749_v1  ;;  %v2756_v4 = vld [vmem:[%s2897_s26] sm:$0xff]   ;;  %v2758_v10 = vld [vmem:[%s2897_s26 + $0x8] sm:$0xff]   ;;  %v2760_v12 = vld [vmem:[%s2897_s26 + $0x10] sm:$0xff]  }
  0x10   : > { %v2757_v5 = vld [vmem:[%s2897_s26 + $0x100] sm:$0xff]   ;;  %2580 = vmatprep.mubr.bf16.mxu0 %v2756_v4  ;;  %v2759_v11 = vld [vmem:[%s2897_s26 + $0x108] sm:$0xff]   ;;  %v2761_v13 = vld [vmem:[%s2897_s26 + $0x110] sm:$0xff]  }
  0x11   : > { %2644 = vmatprep.mubr.bf16.mxu1 %v2757_v5  ;;  %v2762_v14 = vld [vmem:[%s2897_s26 + $0x18] sm:$0xff]   ;;  %v2764_v16 = vld [vmem:[%s2897_s26 + $0x20] sm:$0xff]   ;;  %v2766_v18 = vld [vmem:[%s2897_s26 + $0x28] sm:$0xff]  }
  0x12   : > { %2567 = vmatpush3.bf16.msra.mxu0 %v2749_v1  ;;  %2717 = vmatpush3.bf16.msra.mxu1 %v2749_v1  ;;  %v2763_v15 = vld [vmem:[%s2897_s26 + $0x118] sm:$0xff]   ;;  %v2765_v17 = vld [vmem:[%s2897_s26 + $0x120] sm:$0xff]   ;;  %v2767_v19 = vld [vmem:[%s2897_s26 + $0x128] sm:$0xff]  }
  0x13   : > { %2568 = vmatprep.subr.bf16.mxu0 %v2750_v2  ;;  %2710 = vmatprep.subr.bf16.mxu1 %v2750_v2  ;;  %v2768_v20 = vld [vmem:[%s2897_s26 + $0x30] sm:$0xff]   ;;  %v2770_v22 = vld [vmem:[%s2897_s26 + $0x38] sm:$0xff]   ;;  %v2772_v24 = vld [vmem:[%s2897_s26 + $0x40] sm:$0xff]  }
  0x14   : > { %v2769_v21 = vld [vmem:[%s2897_s26 + $0x130] sm:$0xff]   ;;  %v2771_v23 = vld [vmem:[%s2897_s26 + $0x138] sm:$0xff]   ;;  %v2773_v25 = vld [vmem:[%s2897_s26 + $0x140] sm:$0xff]  }
  0x15   : > { %v2774_v26 = vld [vmem:[%s2897_s26 + $0x48] sm:$0xff]   ;;  %v2776_v28 = vld [vmem:[%s2897_s26 + $0x50] sm:$0xff]   ;;  %v2778_v30 = vld [vmem:[%s2897_s26 + $0x58] sm:$0xff]  }
  0x16   : > { %2569 = vmatpush3.bf16.msra.mxu0 %v2750_v2  ;;  %2718 = vmatpush3.bf16.msra.mxu1 %v2750_v2  ;;  %v2775_v27 = vld [vmem:[%s2897_s26 + $0x148] sm:$0xff]   ;;  %v2777_v29 = vld [vmem:[%s2897_s26 + $0x150] sm:$0xff]   ;;  %v2779_v31 = vld [vmem:[%s2897_s26 + $0x158] sm:$0xff]  }
  0x17   : > { %2570 = vmatprep.subr.bf16.mxu0 %v2751_v3  ;;  %2711 = vmatprep.subr.bf16.mxu1 %v2751_v3  ;;  %v2780_v32 = vld [vmem:[%s2897_s26 + $0x60] sm:$0xff]   ;;  %v2782_v34 = vld [vmem:[%s2897_s26 + $0x68] sm:$0xff]   ;;  %v2784_v36 = vld [vmem:[%s2897_s26 + $0x70] sm:$0xff]  }
  0x18   : > { %v2781_v33 = vld [vmem:[%s2897_s26 + $0x160] sm:$0xff]   ;;  %v2783_v35 = vld [vmem:[%s2897_s26 + $0x168] sm:$0xff]   ;;  %v2785_v37 = vld [vmem:[%s2897_s26 + $0x170] sm:$0xff]  }
  0x19   : > { %v2786_v38 = vld [vmem:[%s2897_s26 + $0x78] sm:$0xff]   ;;  %v2788_v40 = vld [vmem:[%s2897_s26 + $0x80] sm:$0xff]   ;;  %v2790_v42 = vld [vmem:[%s2897_s26 + $0x88] sm:$0xff]  }
  0x1a   : > { %2571 = vmatpush3.bf16.msra.mxu0 %v2751_v3  ;;  %2719 = vmatpush3.bf16.msra.mxu1 %v2751_v3  ;;  %v2787_v39 = vld [vmem:[%s2897_s26 + $0x178] sm:$0xff]   ;;  %v2789_v41 = vld [vmem:[%s2897_s26 + $0x180] sm:$0xff]   ;;  %v2791_v43 = vld [vmem:[%s2897_s26 + $0x188] sm:$0xff]  }
  0x1b   : > { %2572 = vmatprep.subr.bf16.mxu0 %v2752_v6  ;;  %2712 = vmatprep.subr.bf16.mxu1 %v2752_v6  ;;  %v2792_v44 = vld [vmem:[%s2897_s26 + $0x90] sm:$0xff]   ;;  %v2794_v46 = vld [vmem:[%s2897_s26 + $0x98] sm:$0xff]   ;;  %v2796_v48 = vld [vmem:[%s2897_s26 + $0xa0] sm:$0xff]  }
  0x1c   : > { %v2793_v45 = vld [vmem:[%s2897_s26 + $0x190] sm:$0xff]   ;;  %v2795_v47 = vld [vmem:[%s2897_s26 + $0x198] sm:$0xff]   ;;  %v2797_v49 = vld [vmem:[%s2897_s26 + $0x1a0] sm:$0xff]  }
  0x1d   : > { %v2798_v50 = vld [vmem:[%s2897_s26 + $0xa8] sm:$0xff]   ;;  %v2800_v52 = vld [vmem:[%s2897_s26 + $0xb0] sm:$0xff]   ;;  %v2802_v54 = vld [vmem:[%s2897_s26 + $0xb8] sm:$0xff]  }
  0x1e   : > { %2573 = vmatpush3.bf16.msra.mxu0 %v2752_v6  ;;  %2720 = vmatpush3.bf16.msra.mxu1 %v2752_v6  ;;  %v2799_v51 = vld [vmem:[%s2897_s26 + $0x1a8] sm:$0xff]   ;;  %v2801_v53 = vld [vmem:[%s2897_s26 + $0x1b0] sm:$0xff]   ;;  %v2803_v55 = vld [vmem:[%s2897_s26 + $0x1b8] sm:$0xff]  }
  0x1f   : > { %2574 = vmatprep.subr.bf16.mxu0 %v2753_v7  ;;  %2713 = vmatprep.subr.bf16.mxu1 %v2753_v7  ;;  %v2804_v56 = vld [vmem:[%s2897_s26 + $0xc0] sm:$0xff]   ;;  %v2806_v58 = vld [vmem:[%s2897_s26 + $0xc8] sm:$0xff]   ;;  %v2808_v60 = vld [vmem:[%s2897_s26 + $0xd0] sm:$0xff]  }
  0x20   : > { %v2805_v57 = vld [vmem:[%s2897_s26 + $0x1c0] sm:$0xff]   ;;  %v2807_v59 = vld [vmem:[%s2897_s26 + $0x1c8] sm:$0xff]   ;;  %v2809_v61 = vld [vmem:[%s2897_s26 + $0x1d0] sm:$0xff]  }
  0x21   : > { %v2810_v62 = vld [vmem:[%s2897_s26 + $0xd8] sm:$0xff]   ;;  %v2812_v0 = vld [vmem:[%s2897_s26 + $0xe0] sm:$0xff]   ;;  %v2814_v2 = vld [vmem:[%s2897_s26 + $0xe8] sm:$0xff]  }
  0x22   : > { %2575 = vmatpush3.bf16.msra.mxu0 %v2753_v7  ;;  %2721 = vmatpush3.bf16.msra.mxu1 %v2753_v7  ;;  %v2811_v63 = vld [vmem:[%s2897_s26 + $0x1d8] sm:$0xff]   ;;  %v2813_v1 = vld [vmem:[%s2897_s26 + $0x1e0] sm:$0xff]   ;;  %v2815_v3 = vld [vmem:[%s2897_s26 + $0x1e8] sm:$0xff]  }
  0x23   : > { %2576 = vmatprep.subr.bf16.mxu0 %v2754_v8  ;;  %2714 = vmatprep.subr.bf16.mxu1 %v2754_v8  ;;  %v2816_v4 = vld [vmem:[%s2897_s26 + $0xf0] sm:$0xff]   ;;  %v2818_v6 = vld [vmem:[%s2897_s26 + $0xf8] sm:$0xff]  }
  0x24   : > { %v2817_v5 = vld [vmem:[%s2897_s26 + $0x1f0] sm:$0xff]   ;;  %v2819_v7 = vld [vmem:[%s2897_s26 + $0x1f8] sm:$0xff]  }
  0x26   : > { %2577 = vmatpush3.bf16.msra.mxu0 %v2754_v8  ;;  %2722 = vmatpush3.bf16.msra.mxu1 %v2754_v8  ;;  %v2982_v8 = vld [vmem:[%s3256_s2] ss:$0 sm:$0xff] }
  0x27   : > { %2578 = vmatprep.subr.bf16.mxu0 %v2755_v9  ;;  %2715 = vmatprep.subr.bf16.mxu1 %v2755_v9 }
  0x2a   : > { %2579 = vmatpush3.bf16.msra.mxu0 %v2755_v9  ;;  %2723 = vmatpush3.bf16.msra.mxu1 %v2755_v9 }
  0x2d   : > { %2581 = vmatmul.mubr.bf16.vlgmr.msra.gmra.mxu0 %v2758_v10  ;;  %2645 = vmatmul.mubr.bf16.vlgmr.msra.gmra.mxu1 %v2759_v11 }
  0x2e   : > { %2584 = vmatprep.mubr.bf16.mxu0 %v2760_v12  ;;  %2648 = vmatprep.mubr.bf16.mxu1 %v2761_v13 }
  0x35   : > { %2585 = vmatmul.mubr.bf16.gmra.mxu0 %v2762_v14  ;;  %2649 = vmatmul.mubr.bf16.gmra.mxu1 %v2763_v15 }
  0x36   : > { %2588 = vmatprep.mubr.bf16.mxu0 %v2764_v16  ;;  %2652 = vmatprep.mubr.bf16.mxu1 %v2765_v17 }
  0x3d   : > { %2589 = vmatmul.mubr.bf16.gmra.mxu0 %v2766_v18  ;;  %2653 = vmatmul.mubr.bf16.gmra.mxu1 %v2767_v19 }
  0x3e   : > { %2592 = vmatprep.mubr.bf16.mxu0 %v2768_v20  ;;  %2656 = vmatprep.mubr.bf16.mxu1 %v2769_v21 }
  0x45   : > { %2593 = vmatmul.mubr.bf16.gmra.mxu0 %v2770_v22  ;;  %2657 = vmatmul.mubr.bf16.gmra.mxu1 %v2771_v23 }
  0x46   : > { %2596 = vmatprep.mubr.bf16.mxu0 %v2772_v24  ;;  %2660 = vmatprep.mubr.bf16.mxu1 %v2773_v25 }
  0x4d   : > { %2597 = vmatmul.mubr.bf16.gmra.mxu0 %v2774_v26  ;;  %2661 = vmatmul.mubr.bf16.gmra.mxu1 %v2775_v27 }
  0x4e   : > { %2600 = vmatprep.mubr.bf16.mxu0 %v2776_v28  ;;  %2664 = vmatprep.mubr.bf16.mxu1 %v2777_v29 }
  0x55   : > { %2601 = vmatmul.mubr.bf16.gmra.mxu0 %v2778_v30  ;;  %2665 = vmatmul.mubr.bf16.gmra.mxu1 %v2779_v31 }
  0x56   : > { %2604 = vmatprep.mubr.bf16.mxu0 %v2780_v32  ;;  %2668 = vmatprep.mubr.bf16.mxu1 %v2781_v33 }
  0x5d   : > { %2605 = vmatmul.mubr.bf16.gmra.mxu0 %v2782_v34  ;;  %2669 = vmatmul.mubr.bf16.gmra.mxu1 %v2783_v35 }
  0x5e   : > { %2608 = vmatprep.mubr.bf16.mxu0 %v2784_v36  ;;  %2672 = vmatprep.mubr.bf16.mxu1 %v2785_v37 }
  0x65   : > { %2609 = vmatmul.mubr.bf16.gmra.mxu0 %v2786_v38  ;;  %2673 = vmatmul.mubr.bf16.gmra.mxu1 %v2787_v39 }
  0x66   : > { %2612 = vmatprep.mubr.bf16.mxu0 %v2788_v40  ;;  %2676 = vmatprep.mubr.bf16.mxu1 %v2789_v41 }
  0x6d   : > { %2613 = vmatmul.mubr.bf16.gmra.mxu0 %v2790_v42  ;;  %2677 = vmatmul.mubr.bf16.gmra.mxu1 %v2791_v43 }
  0x6e   : > { %2616 = vmatprep.mubr.bf16.mxu0 %v2792_v44  ;;  %2680 = vmatprep.mubr.bf16.mxu1 %v2793_v45 }
  0x75   : > { %2617 = vmatmul.mubr.bf16.gmra.mxu0 %v2794_v46  ;;  %2681 = vmatmul.mubr.bf16.gmra.mxu1 %v2795_v47 }
  0x76   : > { %2620 = vmatprep.mubr.bf16.mxu0 %v2796_v48  ;;  %2684 = vmatprep.mubr.bf16.mxu1 %v2797_v49 }
  0x7d   : > { %2621 = vmatmul.mubr.bf16.gmra.mxu0 %v2798_v50  ;;  %2685 = vmatmul.mubr.bf16.gmra.mxu1 %v2799_v51 }
  0x7e   : > { %2624 = vmatprep.mubr.bf16.mxu0 %v2800_v52  ;;  %2688 = vmatprep.mubr.bf16.mxu1 %v2801_v53 }
  0x85   : > { %2625 = vmatmul.mubr.bf16.gmra.mxu0 %v2802_v54  ;;  %2689 = vmatmul.mubr.bf16.gmra.mxu1 %v2803_v55 }
  0x86   : > { %2628 = vmatprep.mubr.bf16.mxu0 %v2804_v56  ;;  %2692 = vmatprep.mubr.bf16.mxu1 %v2805_v57 }
  0x8d   : > { %2629 = vmatmul.mubr.bf16.gmra.mxu0 %v2806_v58  ;;  %2693 = vmatmul.mubr.bf16.gmra.mxu1 %v2807_v59 }
  0x8e   : > { %2632 = vmatprep.mubr.bf16.mxu0 %v2808_v60  ;;  %2696 = vmatprep.mubr.bf16.mxu1 %v2809_v61 }
  0x95   : > { %2633 = vmatmul.mubr.bf16.gmra.mxu0 %v2810_v62  ;;  %2697 = vmatmul.mubr.bf16.gmra.mxu1 %v2811_v63 }
  0x96   : > { %2636 = vmatprep.mubr.bf16.mxu0 %v2812_v0  ;;  %2700 = vmatprep.mubr.bf16.mxu1 %v2813_v1 }
  0x9d   : > { %2637 = vmatmul.mubr.bf16.gmra.mxu0 %v2814_v2  ;;  %2701 = vmatmul.mubr.bf16.gmra.mxu1 %v2815_v3 }
  0x9e   : > { %2640 = vmatprep.mubr.bf16.mxu0 %v2816_v4  ;;  %2704 = vmatprep.mubr.bf16.mxu1 %v2817_v5 }
  0xa5   : > { %2641 = vmatmul.mubr.bf16.gmra.mxu0 %v2818_v6  ;;  %2705 = vmatmul.mubr.bf16.gmra.mxu1 %v2819_v7 }
  0xed   : > { %v2582_v9 = vpop.f32.mrf.mxu0  ;;  %v2646_v10 = vpop.f32.mrf.mxu1 }
  0xee   : > { %v2041_v11 = vadd.f32 %v2582_v9, %v2982_v8  ;;  %v2105_v12 = vadd.f32 %v2646_v10, %v2982_v8 }
  0xef   : > { %v870_v13 = vpop.f32.mrf.mxu0  ;;  %v1126_v14 = vpop.f32.mrf.mxu1 }
  0xf0   : > { %2169 = vst [vmem:[%s2987_s19 + $0x10] sm:$0xff] %v2041_v11  ;;  %2233 = vst [vmem:[%s2987_s19 + $0x210] sm:$0xff] %v2105_v12  ;;  %v2039_v15 = vadd.f32 %v2982_v8, %v870_v13  ;;  %v2103_v16 = vadd.f32 %v2982_v8, %v1126_v14 }
  0xf1   : > { %v2583_v17 = vpop.f32.mrf.mxu0  ;;  %v2647_v18 = vpop.f32.mrf.mxu1 }
  0xf2   : > { %2167 = vst [vmem:[%s2987_s19] sm:$0xff] %v2039_v15  ;;  %2231 = vst [vmem:[%s2987_s19 + $0x200] sm:$0xff] %v2103_v16  ;;  %v2042_v19 = vadd.f32 %v2583_v17, %v2982_v8  ;;  %v2106_v20 = vadd.f32 %v2647_v18, %v2982_v8 }
  0xf3   : > { %v873_v21 = vpop.f32.mrf.mxu0  ;;  %v1129_v22 = vpop.f32.mrf.mxu1 }
  0xf4   : > { %2170 = vst [vmem:[%s2987_s19 + $0x18] sm:$0xff] %v2042_v19  ;;  %2234 = vst [vmem:[%s2987_s19 + $0x218] sm:$0xff] %v2106_v20  ;;  %v2040_v23 = vadd.f32 %v2982_v8, %v873_v21  ;;  %v2104_v24 = vadd.f32 %v2982_v8, %v1129_v22 }
  0xf5   : > { %v2586_v25 = vpop.f32.mrf.mxu0  ;;  %v2650_v26 = vpop.f32.mrf.mxu1 }
  0xf6   : > { %2168 = vst [vmem:[%s2987_s19 + $0x8] sm:$0xff] %v2040_v23  ;;  %2232 = vst [vmem:[%s2987_s19 + $0x208] sm:$0xff] %v2104_v24  ;;  %v2045_v27 = vadd.f32 %v2586_v25, %v2982_v8  ;;  %v2109_v28 = vadd.f32 %v2650_v26, %v2982_v8 }
  0xf7   : > { %v886_v29 = vpop.f32.mrf.mxu0  ;;  %v1142_v30 = vpop.f32.mrf.mxu1 }
  0xf8   : > { %2173 = vst [vmem:[%s2987_s19 + $0x30] sm:$0xff] %v2045_v27  ;;  %2237 = vst [vmem:[%s2987_s19 + $0x230] sm:$0xff] %v2109_v28  ;;  %v2043_v31 = vadd.f32 %v2982_v8, %v886_v29  ;;  %v2107_v32 = vadd.f32 %v2982_v8, %v1142_v30 }
  0xf9   : > { %v2587_v33 = vpop.f32.mrf.mxu0  ;;  %v2651_v34 = vpop.f32.mrf.mxu1 }
  0xfa   : > { %2171 = vst [vmem:[%s2987_s19 + $0x20] sm:$0xff] %v2043_v31  ;;  %2235 = vst [vmem:[%s2987_s19 + $0x220] sm:$0xff] %v2107_v32  ;;  %v2046_v35 = vadd.f32 %v2587_v33, %v2982_v8  ;;  %v2110_v36 = vadd.f32 %v2651_v34, %v2982_v8 }
  0xfb   : > { %v889_v37 = vpop.f32.mrf.mxu0  ;;  %v1145_v38 = vpop.f32.mrf.mxu1 }
  0xfc   : > { %2174 = vst [vmem:[%s2987_s19 + $0x38] sm:$0xff] %v2046_v35  ;;  %2238 = vst [vmem:[%s2987_s19 + $0x238] sm:$0xff] %v2110_v36  ;;  %v2044_v39 = vadd.f32 %v2982_v8, %v889_v37  ;;  %v2108_v40 = vadd.f32 %v2982_v8, %v1145_v38 }
  0xfd   : > { %v2590_v41 = vpop.f32.mrf.mxu0  ;;  %v2654_v42 = vpop.f32.mrf.mxu1 }
  0xfe   : > { %2172 = vst [vmem:[%s2987_s19 + $0x28] sm:$0xff] %v2044_v39  ;;  %2236 = vst [vmem:[%s2987_s19 + $0x228] sm:$0xff] %v2108_v40  ;;  %v2049_v43 = vadd.f32 %v2590_v41, %v2982_v8  ;;  %v2113_v44 = vadd.f32 %v2654_v42, %v2982_v8 }
  0xff   : > { %v902_v45 = vpop.f32.mrf.mxu0  ;;  %v1158_v46 = vpop.f32.mrf.mxu1 }
 0x100   : > { %2177 = vst [vmem:[%s2987_s19 + $0x50] sm:$0xff] %v2049_v43  ;;  %2241 = vst [vmem:[%s2987_s19 + $0x250] sm:$0xff] %v2113_v44  ;;  %v2047_v47 = vadd.f32 %v2982_v8, %v902_v45  ;;  %v2111_v48 = vadd.f32 %v2982_v8, %v1158_v46 }
 0x101   : > { %v2591_v49 = vpop.f32.mrf.mxu0  ;;  %v2655_v50 = vpop.f32.mrf.mxu1 }
 0x102   : > { %2175 = vst [vmem:[%s2987_s19 + $0x40] sm:$0xff] %v2047_v47  ;;  %2239 = vst [vmem:[%s2987_s19 + $0x240] sm:$0xff] %v2111_v48  ;;  %v2050_v51 = vadd.f32 %v2591_v49, %v2982_v8  ;;  %v2114_v52 = vadd.f32 %v2655_v50, %v2982_v8 }
 0x103   : > { %v905_v53 = vpop.f32.mrf.mxu0  ;;  %v1161_v54 = vpop.f32.mrf.mxu1 }
 0x104   : > { %2178 = vst [vmem:[%s2987_s19 + $0x58] sm:$0xff] %v2050_v51  ;;  %2242 = vst [vmem:[%s2987_s19 + $0x258] sm:$0xff] %v2114_v52  ;;  %v2048_v55 = vadd.f32 %v2982_v8, %v905_v53  ;;  %v2112_v56 = vadd.f32 %v2982_v8, %v1161_v54 }
 0x105   : > { %v2594_v57 = vpop.f32.mrf.mxu0  ;;  %v2658_v58 = vpop.f32.mrf.mxu1 }
 0x106   : > { %2176 = vst [vmem:[%s2987_s19 + $0x48] sm:$0xff] %v2048_v55  ;;  %2240 = vst [vmem:[%s2987_s19 + $0x248] sm:$0xff] %v2112_v56  ;;  %v2053_v59 = vadd.f32 %v2594_v57, %v2982_v8  ;;  %v2117_v60 = vadd.f32 %v2658_v58, %v2982_v8 }
 0x107   : > { %v918_v61 = vpop.f32.mrf.mxu0  ;;  %v1174_v62 = vpop.f32.mrf.mxu1 }
 0x108   : > { %2181 = vst [vmem:[%s2987_s19 + $0x70] sm:$0xff] %v2053_v59  ;;  %2245 = vst [vmem:[%s2987_s19 + $0x270] sm:$0xff] %v2117_v60  ;;  %v2051_v63 = vadd.f32 %v2982_v8, %v918_v61  ;;  %v2115_v0 = vadd.f32 %v2982_v8, %v1174_v62 }
 0x109   : > { %v2595_v1 = vpop.f32.mrf.mxu0  ;;  %v2659_v2 = vpop.f32.mrf.mxu1 }
 0x10a   : > { %2179 = vst [vmem:[%s2987_s19 + $0x60] sm:$0xff] %v2051_v63  ;;  %2243 = vst [vmem:[%s2987_s19 + $0x260] sm:$0xff] %v2115_v0  ;;  %v2054_v3 = vadd.f32 %v2595_v1, %v2982_v8  ;;  %v2118_v4 = vadd.f32 %v2659_v2, %v2982_v8 }
 0x10b   : > { %v921_v5 = vpop.f32.mrf.mxu0  ;;  %v1177_v6 = vpop.f32.mrf.mxu1 }
 0x10c   : > { %2182 = vst [vmem:[%s2987_s19 + $0x78] sm:$0xff] %v2054_v3  ;;  %2246 = vst [vmem:[%s2987_s19 + $0x278] sm:$0xff] %v2118_v4  ;;  %v2052_v7 = vadd.f32 %v2982_v8, %v921_v5  ;;  %v2116_v9 = vadd.f32 %v2982_v8, %v1177_v6 }
 0x10d   : > { %v2598_v10 = vpop.f32.mrf.mxu0  ;;  %v2662_v11 = vpop.f32.mrf.mxu1 }
 0x10e   : > { %2180 = vst [vmem:[%s2987_s19 + $0x68] sm:$0xff] %v2052_v7  ;;  %2244 = vst [vmem:[%s2987_s19 + $0x268] sm:$0xff] %v2116_v9  ;;  %v2057_v12 = vadd.f32 %v2598_v10, %v2982_v8  ;;  %v2121_v13 = vadd.f32 %v2662_v11, %v2982_v8 }
 0x10f   : > { %v934_v14 = vpop.f32.mrf.mxu0  ;;  %v1190_v15 = vpop.f32.mrf.mxu1 }
 0x110   : > { %2185 = vst [vmem:[%s2987_s19 + $0x90] sm:$0xff] %v2057_v12  ;;  %2249 = vst [vmem:[%s2987_s19 + $0x290] sm:$0xff] %v2121_v13  ;;  %v2055_v16 = vadd.f32 %v2982_v8, %v934_v14  ;;  %v2119_v17 = vadd.f32 %v2982_v8, %v1190_v15 }
 0x111   : > { %v2599_v18 = vpop.f32.mrf.mxu0  ;;  %v2663_v19 = vpop.f32.mrf.mxu1 }
 0x112   : > { %2183 = vst [vmem:[%s2987_s19 + $0x80] sm:$0xff] %v2055_v16  ;;  %2247 = vst [vmem:[%s2987_s19 + $0x280] sm:$0xff] %v2119_v17  ;;  %v2058_v20 = vadd.f32 %v2599_v18, %v2982_v8  ;;  %v2122_v21 = vadd.f32 %v2663_v19, %v2982_v8 }
 0x113   : > { %v937_v22 = vpop.f32.mrf.mxu0  ;;  %v1193_v23 = vpop.f32.mrf.mxu1 }
 0x114   : > { %2186 = vst [vmem:[%s2987_s19 + $0x98] sm:$0xff] %v2058_v20  ;;  %2250 = vst [vmem:[%s2987_s19 + $0x298] sm:$0xff] %v2122_v21  ;;  %v2056_v24 = vadd.f32 %v2982_v8, %v937_v22  ;;  %v2120_v25 = vadd.f32 %v2982_v8, %v1193_v23 }
 0x115   : > { %v2602_v26 = vpop.f32.mrf.mxu0  ;;  %v2666_v27 = vpop.f32.mrf.mxu1 }
 0x116   : > { %2184 = vst [vmem:[%s2987_s19 + $0x88] sm:$0xff] %v2056_v24  ;;  %2248 = vst [vmem:[%s2987_s19 + $0x288] sm:$0xff] %v2120_v25  ;;  %v2061_v28 = vadd.f32 %v2602_v26, %v2982_v8  ;;  %v2125_v29 = vadd.f32 %v2666_v27, %v2982_v8 }
 0x117   : > { %v950_v30 = vpop.f32.mrf.mxu0  ;;  %v1206_v31 = vpop.f32.mrf.mxu1 }
 0x118   : > { %2189 = vst [vmem:[%s2987_s19 + $0xb0] sm:$0xff] %v2061_v28  ;;  %2253 = vst [vmem:[%s2987_s19 + $0x2b0] sm:$0xff] %v2125_v29  ;;  %v2059_v32 = vadd.f32 %v2982_v8, %v950_v30  ;;  %v2123_v33 = vadd.f32 %v2982_v8, %v1206_v31 }
 0x119   : > { %v2603_v34 = vpop.f32.mrf.mxu0  ;;  %v2667_v35 = vpop.f32.mrf.mxu1 }
 0x11a   : > { %2187 = vst [vmem:[%s2987_s19 + $0xa0] sm:$0xff] %v2059_v32  ;;  %2251 = vst [vmem:[%s2987_s19 + $0x2a0] sm:$0xff] %v2123_v33  ;;  %v2062_v36 = vadd.f32 %v2603_v34, %v2982_v8  ;;  %v2126_v37 = vadd.f32 %v2667_v35, %v2982_v8 }
 0x11b   : > { %v953_v38 = vpop.f32.mrf.mxu0  ;;  %v1209_v39 = vpop.f32.mrf.mxu1 }
 0x11c   : > { %2190 = vst [vmem:[%s2987_s19 + $0xb8] sm:$0xff] %v2062_v36  ;;  %2254 = vst [vmem:[%s2987_s19 + $0x2b8] sm:$0xff] %v2126_v37  ;;  %v2060_v40 = vadd.f32 %v2982_v8, %v953_v38  ;;  %v2124_v41 = vadd.f32 %v2982_v8, %v1209_v39 }
 0x11d   : > { %v2606_v42 = vpop.f32.mrf.mxu0  ;;  %v2670_v43 = vpop.f32.mrf.mxu1 }
 0x11e   : > { %2188 = vst [vmem:[%s2987_s19 + $0xa8] sm:$0xff] %v2060_v40  ;;  %2252 = vst [vmem:[%s2987_s19 + $0x2a8] sm:$0xff] %v2124_v41  ;;  %v2065_v44 = vadd.f32 %v2606_v42, %v2982_v8  ;;  %v2129_v45 = vadd.f32 %v2670_v43, %v2982_v8 }
 0x11f   : > { %v966_v46 = vpop.f32.mrf.mxu0  ;;  %v1222_v47 = vpop.f32.mrf.mxu1 }
 0x120   : > { %2193 = vst [vmem:[%s2987_s19 + $0xd0] sm:$0xff] %v2065_v44  ;;  %2257 = vst [vmem:[%s2987_s19 + $0x2d0] sm:$0xff] %v2129_v45  ;;  %v2063_v48 = vadd.f32 %v2982_v8, %v966_v46  ;;  %v2127_v49 = vadd.f32 %v2982_v8, %v1222_v47 }
 0x121   : > { %v2607_v50 = vpop.f32.mrf.mxu0  ;;  %v2671_v51 = vpop.f32.mrf.mxu1 }
 0x122   : > { %2191 = vst [vmem:[%s2987_s19 + $0xc0] sm:$0xff] %v2063_v48  ;;  %2255 = vst [vmem:[%s2987_s19 + $0x2c0] sm:$0xff] %v2127_v49  ;;  %v2066_v52 = vadd.f32 %v2607_v50, %v2982_v8  ;;  %v2130_v53 = vadd.f32 %v2671_v51, %v2982_v8 }
 0x123   : > { %v969_v54 = vpop.f32.mrf.mxu0  ;;  %v1225_v55 = vpop.f32.mrf.mxu1 }
 0x124   : > { %2194 = vst [vmem:[%s2987_s19 + $0xd8] sm:$0xff] %v2066_v52  ;;  %2258 = vst [vmem:[%s2987_s19 + $0x2d8] sm:$0xff] %v2130_v53  ;;  %v2064_v56 = vadd.f32 %v2982_v8, %v969_v54  ;;  %v2128_v57 = vadd.f32 %v2982_v8, %v1225_v55 }
 0x125   : > { %v2610_v58 = vpop.f32.mrf.mxu0  ;;  %v2674_v59 = vpop.f32.mrf.mxu1 }
 0x126   : > { %2192 = vst [vmem:[%s2987_s19 + $0xc8] sm:$0xff] %v2064_v56  ;;  %2256 = vst [vmem:[%s2987_s19 + $0x2c8] sm:$0xff] %v2128_v57  ;;  %v2069_v60 = vadd.f32 %v2610_v58, %v2982_v8  ;;  %v2133_v61 = vadd.f32 %v2674_v59, %v2982_v8 }
 0x127   : > { %v982_v62 = vpop.f32.mrf.mxu0  ;;  %v1238_v63 = vpop.f32.mrf.mxu1 }
 0x128   : > { %2197 = vst [vmem:[%s2987_s19 + $0xf0] sm:$0xff] %v2069_v60  ;;  %2261 = vst [vmem:[%s2987_s19 + $0x2f0] sm:$0xff] %v2133_v61  ;;  %v2067_v0 = vadd.f32 %v2982_v8, %v982_v62  ;;  %v2131_v1 = vadd.f32 %v2982_v8, %v1238_v63 }
 0x129   : > { %v2611_v2 = vpop.f32.mrf.mxu0  ;;  %v2675_v3 = vpop.f32.mrf.mxu1 }
 0x12a   : > { %2195 = vst [vmem:[%s2987_s19 + $0xe0] sm:$0xff] %v2067_v0  ;;  %2259 = vst [vmem:[%s2987_s19 + $0x2e0] sm:$0xff] %v2131_v1  ;;  %v2070_v4 = vadd.f32 %v2611_v2, %v2982_v8  ;;  %v2134_v5 = vadd.f32 %v2675_v3, %v2982_v8 }
 0x12b   : > { %v985_v6 = vpop.f32.mrf.mxu0  ;;  %v1241_v7 = vpop.f32.mrf.mxu1 }
 0x12c   : > { %2198 = vst [vmem:[%s2987_s19 + $0xf8] sm:$0xff] %v2070_v4  ;;  %2262 = vst [vmem:[%s2987_s19 + $0x2f8] sm:$0xff] %v2134_v5  ;;  %v2068_v9 = vadd.f32 %v2982_v8, %v985_v6  ;;  %v2132_v10 = vadd.f32 %v2982_v8, %v1241_v7 }
 0x12d   : > { %v2614_v11 = vpop.f32.mrf.mxu0  ;;  %v2678_v12 = vpop.f32.mrf.mxu1 }
 0x12e   : > { %2196 = vst [vmem:[%s2987_s19 + $0xe8] sm:$0xff] %v2068_v9  ;;  %2260 = vst [vmem:[%s2987_s19 + $0x2e8] sm:$0xff] %v2132_v10  ;;  %v2073_v13 = vadd.f32 %v2614_v11, %v2982_v8  ;;  %v2137_v14 = vadd.f32 %v2678_v12, %v2982_v8 }
 0x12f   : > { %v998_v15 = vpop.f32.mrf.mxu0  ;;  %v1254_v16 = vpop.f32.mrf.mxu1 }
 0x130   : > { %2201 = vst [vmem:[%s2987_s19 + $0x110] sm:$0xff] %v2073_v13  ;;  %2265 = vst [vmem:[%s2987_s19 + $0x310] sm:$0xff] %v2137_v14  ;;  %v2071_v17 = vadd.f32 %v2982_v8, %v998_v15  ;;  %v2135_v18 = vadd.f32 %v2982_v8, %v1254_v16 }
 0x131   : > { %v2615_v19 = vpop.f32.mrf.mxu0  ;;  %v2679_v20 = vpop.f32.mrf.mxu1 }
 0x132   : > { %2199 = vst [vmem:[%s2987_s19 + $0x100] sm:$0xff] %v2071_v17  ;;  %2263 = vst [vmem:[%s2987_s19 + $0x300] sm:$0xff] %v2135_v18  ;;  %v2074_v21 = vadd.f32 %v2615_v19, %v2982_v8  ;;  %v2138_v22 = vadd.f32 %v2679_v20, %v2982_v8 }
 0x133   : > { %v1001_v23 = vpop.f32.mrf.mxu0  ;;  %v1257_v24 = vpop.f32.mrf.mxu1 }
 0x134   : > { %2202 = vst [vmem:[%s2987_s19 + $0x118] sm:$0xff] %v2074_v21  ;;  %2266 = vst [vmem:[%s2987_s19 + $0x318] sm:$0xff] %v2138_v22  ;;  %v2072_v25 = vadd.f32 %v2982_v8, %v1001_v23  ;;  %v2136_v26 = vadd.f32 %v2982_v8, %v1257_v24 }
 0x135   : > { %v2618_v27 = vpop.f32.mrf.mxu0  ;;  %v2682_v28 = vpop.f32.mrf.mxu1 }
 0x136   : > { %2200 = vst [vmem:[%s2987_s19 + $0x108] sm:$0xff] %v2072_v25  ;;  %2264 = vst [vmem:[%s2987_s19 + $0x308] sm:$0xff] %v2136_v26  ;;  %v2077_v29 = vadd.f32 %v2618_v27, %v2982_v8  ;;  %v2141_v30 = vadd.f32 %v2682_v28, %v2982_v8 }
 0x137   : > { %v1014_v31 = vpop.f32.mrf.mxu0  ;;  %v1270_v32 = vpop.f32.mrf.mxu1 }
 0x138   : > { %2205 = vst [vmem:[%s2987_s19 + $0x130] sm:$0xff] %v2077_v29  ;;  %2269 = vst [vmem:[%s2987_s19 + $0x330] sm:$0xff] %v2141_v30  ;;  %v2075_v33 = vadd.f32 %v2982_v8, %v1014_v31  ;;  %v2139_v34 = vadd.f32 %v2982_v8, %v1270_v32 }
 0x139   : > { %v2619_v35 = vpop.f32.mrf.mxu0  ;;  %v2683_v36 = vpop.f32.mrf.mxu1 }
 0x13a   : > { %2203 = vst [vmem:[%s2987_s19 + $0x120] sm:$0xff] %v2075_v33  ;;  %2267 = vst [vmem:[%s2987_s19 + $0x320] sm:$0xff] %v2139_v34  ;;  %v2078_v37 = vadd.f32 %v2619_v35, %v2982_v8  ;;  %v2142_v38 = vadd.f32 %v2683_v36, %v2982_v8 }
 0x13b   : > { %v1017_v39 = vpop.f32.mrf.mxu0  ;;  %v1273_v40 = vpop.f32.mrf.mxu1 }
 0x13c   : > { %2206 = vst [vmem:[%s2987_s19 + $0x138] sm:$0xff] %v2078_v37  ;;  %2270 = vst [vmem:[%s2987_s19 + $0x338] sm:$0xff] %v2142_v38  ;;  %v2076_v41 = vadd.f32 %v2982_v8, %v1017_v39  ;;  %v2140_v42 = vadd.f32 %v2982_v8, %v1273_v40 }
 0x13d   : > { %v2622_v43 = vpop.f32.mrf.mxu0  ;;  %v2686_v44 = vpop.f32.mrf.mxu1 }
 0x13e   : > { %2204 = vst [vmem:[%s2987_s19 + $0x128] sm:$0xff] %v2076_v41  ;;  %2268 = vst [vmem:[%s2987_s19 + $0x328] sm:$0xff] %v2140_v42  ;;  %v2081_v45 = vadd.f32 %v2622_v43, %v2982_v8  ;;  %v2145_v46 = vadd.f32 %v2686_v44, %v2982_v8 }
 0x13f   : > { %v1030_v47 = vpop.f32.mrf.mxu0  ;;  %v1286_v48 = vpop.f32.mrf.mxu1 }
 0x140   : > { %2209 = vst [vmem:[%s2987_s19 + $0x150] sm:$0xff] %v2081_v45  ;;  %2273 = vst [vmem:[%s2987_s19 + $0x350] sm:$0xff] %v2145_v46  ;;  %v2079_v49 = vadd.f32 %v2982_v8, %v1030_v47  ;;  %v2143_v50 = vadd.f32 %v2982_v8, %v1286_v48 }
 0x141   : > { %v2623_v51 = vpop.f32.mrf.mxu0  ;;  %v2687_v52 = vpop.f32.mrf.mxu1 }
 0x142   : > { %2207 = vst [vmem:[%s2987_s19 + $0x140] sm:$0xff] %v2079_v49  ;;  %2271 = vst [vmem:[%s2987_s19 + $0x340] sm:$0xff] %v2143_v50  ;;  %v2082_v53 = vadd.f32 %v2623_v51, %v2982_v8  ;;  %v2146_v54 = vadd.f32 %v2687_v52, %v2982_v8 }
 0x143   : > { %v1033_v55 = vpop.f32.mrf.mxu0  ;;  %v1289_v56 = vpop.f32.mrf.mxu1 }
 0x144   : > { %2210 = vst [vmem:[%s2987_s19 + $0x158] sm:$0xff] %v2082_v53  ;;  %2274 = vst [vmem:[%s2987_s19 + $0x358] sm:$0xff] %v2146_v54  ;;  %v2080_v57 = vadd.f32 %v2982_v8, %v1033_v55  ;;  %v2144_v58 = vadd.f32 %v2982_v8, %v1289_v56 }
 0x145   : > { %v2626_v59 = vpop.f32.mrf.mxu0  ;;  %v2690_v60 = vpop.f32.mrf.mxu1 }
 0x146   : > { %2208 = vst [vmem:[%s2987_s19 + $0x148] sm:$0xff] %v2080_v57  ;;  %2272 = vst [vmem:[%s2987_s19 + $0x348] sm:$0xff] %v2144_v58  ;;  %v2085_v61 = vadd.f32 %v2626_v59, %v2982_v8  ;;  %v2149_v62 = vadd.f32 %v2690_v60, %v2982_v8 }
 0x147   : > { %v1046_v63 = vpop.f32.mrf.mxu0  ;;  %v1302_v0 = vpop.f32.mrf.mxu1 }
 0x148   : > { %2213 = vst [vmem:[%s2987_s19 + $0x170] sm:$0xff] %v2085_v61  ;;  %2277 = vst [vmem:[%s2987_s19 + $0x370] sm:$0xff] %v2149_v62  ;;  %v2083_v1 = vadd.f32 %v2982_v8, %v1046_v63  ;;  %v2147_v2 = vadd.f32 %v2982_v8, %v1302_v0 }
 0x149   : > { %v2627_v3 = vpop.f32.mrf.mxu0  ;;  %v2691_v4 = vpop.f32.mrf.mxu1 }
 0x14a   : > { %2211 = vst [vmem:[%s2987_s19 + $0x160] sm:$0xff] %v2083_v1  ;;  %2275 = vst [vmem:[%s2987_s19 + $0x360] sm:$0xff] %v2147_v2  ;;  %v2086_v5 = vadd.f32 %v2627_v3, %v2982_v8  ;;  %v2150_v6 = vadd.f32 %v2691_v4, %v2982_v8 }
 0x14b   : > { %v1049_v7 = vpop.f32.mrf.mxu0  ;;  %v1305_v9 = vpop.f32.mrf.mxu1 }
 0x14c   : > { %2214 = vst [vmem:[%s2987_s19 + $0x178] sm:$0xff] %v2086_v5  ;;  %2278 = vst [vmem:[%s2987_s19 + $0x378] sm:$0xff] %v2150_v6  ;;  %v2084_v10 = vadd.f32 %v2982_v8, %v1049_v7  ;;  %v2148_v11 = vadd.f32 %v2982_v8, %v1305_v9 }
 0x14d   : > { %v2630_v12 = vpop.f32.mrf.mxu0  ;;  %v2694_v13 = vpop.f32.mrf.mxu1 }
 0x14e   : > { %2212 = vst [vmem:[%s2987_s19 + $0x168] sm:$0xff] %v2084_v10  ;;  %2276 = vst [vmem:[%s2987_s19 + $0x368] sm:$0xff] %v2148_v11  ;;  %v2089_v14 = vadd.f32 %v2630_v12, %v2982_v8  ;;  %v2153_v15 = vadd.f32 %v2694_v13, %v2982_v8 }
 0x14f   : > { %v1062_v16 = vpop.f32.mrf.mxu0  ;;  %v1318_v17 = vpop.f32.mrf.mxu1 }
 0x150   : > { %2217 = vst [vmem:[%s2987_s19 + $0x190] sm:$0xff] %v2089_v14  ;;  %2281 = vst [vmem:[%s2987_s19 + $0x390] sm:$0xff] %v2153_v15  ;;  %v2087_v18 = vadd.f32 %v2982_v8, %v1062_v16  ;;  %v2151_v19 = vadd.f32 %v2982_v8, %v1318_v17 }
 0x151   : > { %v2631_v20 = vpop.f32.mrf.mxu0  ;;  %v2695_v21 = vpop.f32.mrf.mxu1 }
 0x152   : > { %2215 = vst [vmem:[%s2987_s19 + $0x180] sm:$0xff] %v2087_v18  ;;  %2279 = vst [vmem:[%s2987_s19 + $0x380] sm:$0xff] %v2151_v19  ;;  %v2090_v22 = vadd.f32 %v2631_v20, %v2982_v8  ;;  %v2154_v23 = vadd.f32 %v2695_v21, %v2982_v8 }
 0x153   : > { %v1065_v24 = vpop.f32.mrf.mxu0  ;;  %v1321_v25 = vpop.f32.mrf.mxu1 }
 0x154   : > { %2218 = vst [vmem:[%s2987_s19 + $0x198] sm:$0xff] %v2090_v22  ;;  %2282 = vst [vmem:[%s2987_s19 + $0x398] sm:$0xff] %v2154_v23  ;;  %v2088_v26 = vadd.f32 %v2982_v8, %v1065_v24  ;;  %v2152_v27 = vadd.f32 %v2982_v8, %v1321_v25 }
 0x155   : > { %v2634_v28 = vpop.f32.mrf.mxu0  ;;  %v2698_v29 = vpop.f32.mrf.mxu1 }
 0x156   : > { %2216 = vst [vmem:[%s2987_s19 + $0x188] sm:$0xff] %v2088_v26  ;;  %2280 = vst [vmem:[%s2987_s19 + $0x388] sm:$0xff] %v2152_v27  ;;  %v2093_v30 = vadd.f32 %v2634_v28, %v2982_v8  ;;  %v2157_v31 = vadd.f32 %v2698_v29, %v2982_v8 }
 0x157   : > { %v1078_v32 = vpop.f32.mrf.mxu0  ;;  %v1334_v33 = vpop.f32.mrf.mxu1 }
 0x158   : > { %2221 = vst [vmem:[%s2987_s19 + $0x1b0] sm:$0xff] %v2093_v30  ;;  %2285 = vst [vmem:[%s2987_s19 + $0x3b0] sm:$0xff] %v2157_v31  ;;  %v2091_v34 = vadd.f32 %v2982_v8, %v1078_v32  ;;  %v2155_v35 = vadd.f32 %v2982_v8, %v1334_v33 }
 0x159   : > { %v2635_v36 = vpop.f32.mrf.mxu0  ;;  %v2699_v37 = vpop.f32.mrf.mxu1 }
 0x15a   : > { %2219 = vst [vmem:[%s2987_s19 + $0x1a0] sm:$0xff] %v2091_v34  ;;  %2283 = vst [vmem:[%s2987_s19 + $0x3a0] sm:$0xff] %v2155_v35  ;;  %v2094_v38 = vadd.f32 %v2635_v36, %v2982_v8  ;;  %v2158_v39 = vadd.f32 %v2699_v37, %v2982_v8 }
 0x15b   : > { %v1081_v40 = vpop.f32.mrf.mxu0  ;;  %v1337_v41 = vpop.f32.mrf.mxu1 }
 0x15c   : > { %2222 = vst [vmem:[%s2987_s19 + $0x1b8] sm:$0xff] %v2094_v38  ;;  %2286 = vst [vmem:[%s2987_s19 + $0x3b8] sm:$0xff] %v2158_v39  ;;  %v2092_v42 = vadd.f32 %v2982_v8, %v1081_v40  ;;  %v2156_v43 = vadd.f32 %v2982_v8, %v1337_v41 }
 0x15d   : > { %v2638_v44 = vpop.f32.mrf.mxu0  ;;  %v2702_v45 = vpop.f32.mrf.mxu1 }
 0x15e   : > { %2220 = vst [vmem:[%s2987_s19 + $0x1a8] sm:$0xff] %v2092_v42  ;;  %2284 = vst [vmem:[%s2987_s19 + $0x3a8] sm:$0xff] %v2156_v43  ;;  %v2097_v46 = vadd.f32 %v2638_v44, %v2982_v8  ;;  %v2161_v47 = vadd.f32 %v2702_v45, %v2982_v8 }
 0x15f   : > { %v1094_v48 = vpop.f32.mrf.mxu0  ;;  %v1350_v49 = vpop.f32.mrf.mxu1 }
 0x160   : > { %2225 = vst [vmem:[%s2987_s19 + $0x1d0] sm:$0xff] %v2097_v46  ;;  %2289 = vst [vmem:[%s2987_s19 + $0x3d0] sm:$0xff] %v2161_v47  ;;  %v2095_v50 = vadd.f32 %v2982_v8, %v1094_v48  ;;  %v2159_v51 = vadd.f32 %v2982_v8, %v1350_v49 }
 0x161   : > { %v2639_v52 = vpop.f32.mrf.mxu0  ;;  %v2703_v53 = vpop.f32.mrf.mxu1 }
 0x162   : > { %2223 = vst [vmem:[%s2987_s19 + $0x1c0] sm:$0xff] %v2095_v50  ;;  %2287 = vst [vmem:[%s2987_s19 + $0x3c0] sm:$0xff] %v2159_v51  ;;  %v2098_v54 = vadd.f32 %v2639_v52, %v2982_v8  ;;  %v2162_v55 = vadd.f32 %v2703_v53, %v2982_v8 }
 0x163   : > { %v1097_v56 = vpop.f32.mrf.mxu0  ;;  %v1353_v57 = vpop.f32.mrf.mxu1 }
 0x164   : > { %2226 = vst [vmem:[%s2987_s19 + $0x1d8] sm:$0xff] %v2098_v54  ;;  %2290 = vst [vmem:[%s2987_s19 + $0x3d8] sm:$0xff] %v2162_v55  ;;  %v2096_v58 = vadd.f32 %v2982_v8, %v1097_v56  ;;  %v2160_v59 = vadd.f32 %v2982_v8, %v1353_v57 }
 0x165   : > { %v2642_v60 = vpop.f32.mrf.mxu0  ;;  %v2706_v61 = vpop.f32.mrf.mxu1 }
 0x166   : > { %2224 = vst [vmem:[%s2987_s19 + $0x1c8] sm:$0xff] %v2096_v58  ;;  %2288 = vst [vmem:[%s2987_s19 + $0x3c8] sm:$0xff] %v2160_v59  ;;  %v2101_v62 = vadd.f32 %v2642_v60, %v2982_v8  ;;  %v2165_v63 = vadd.f32 %v2706_v61, %v2982_v8 }
 0x167   : > { %v1110_v0 = vpop.f32.mrf.mxu0  ;;  %v1366_v1 = vpop.f32.mrf.mxu1 }
 0x168   : > { %2229 = vst [vmem:[%s2987_s19 + $0x1f0] sm:$0xff] %v2101_v62  ;;  %2293 = vst [vmem:[%s2987_s19 + $0x3f0] sm:$0xff] %v2165_v63  ;;  %v2099_v2 = vadd.f32 %v2982_v8, %v1110_v0  ;;  %v2163_v3 = vadd.f32 %v2982_v8, %v1366_v1 }
 0x169   : > { %v2643_v4 = vpop.f32.mrf.mxu0  ;;  %v2707_v5 = vpop.f32.mrf.mxu1 }
 0x16a   : > { %2227 = vst [vmem:[%s2987_s19 + $0x1e0] sm:$0xff] %v2099_v2  ;;  %2291 = vst [vmem:[%s2987_s19 + $0x3e0] sm:$0xff] %v2163_v3  ;;  %v2102_v6 = vadd.f32 %v2643_v4, %v2982_v8  ;;  %v2166_v7 = vadd.f32 %v2707_v5, %v2982_v8 }
 0x16b   : > { %v1113_v9 = vpop.f32.mrf.mxu0  ;;  %v1369_v10 = vpop.f32.mrf.mxu1 }
 0x16c   : > { %2230 = vst [vmem:[%s2987_s19 + $0x1f8] sm:$0xff] %v2102_v6  ;;  %2294 = vst [vmem:[%s2987_s19 + $0x3f8] sm:$0xff] %v2166_v7  ;;  %v2100_v11 = vadd.f32 %v2982_v8, %v1113_v9  ;;  %v2164_v12 = vadd.f32 %v2982_v8, %v1369_v10 }
 0x16e   : > { %2228 = vst [vmem:[%s2987_s19 + $0x1e8] sm:$0xff] %v2100_v11  ;;  %2292 = vst [vmem:[%s2987_s19 + $0x3e8] sm:$0xff] %v2164_v12 }
 0x16f PF: > { %s13_s14 = sadd.s32 1, %s2842_s14   ;;  %s3258_s12 = smov %s2838_s13 }
 0x170   : > { %p10_p5 = scmp.ge.s32.totalorder %s13_s14, 4   ;;  %s3259_s13 = smov %s3261_s15 }
 0x172   :  { %12 = sbr.rel (!%p10_p5) target bundleno = 2 (0x2), region = 80 }

// kernel: _lambda_.19
= control target key start
LH: loop header
LB: loop body
LE: loop exit
PB: predicated region body
PF: predicated region fallthrough
CT: control target
= control target key end

     0   :  { %s769_s12 = smov 0   ;;  %s771_s13 = smov 0   ;;  %s879_s0 = inlined_call_operand.vmem [shape: bf16[32,384], index: 0, kind: input, shape index: {}]   ;;  %s880_s1 = inlined_call_operand.vmem [shape: bf16[384,128], index: 1, kind: input, shape index: {}]   ;;  %s881_s2 = inlined_call_operand.vmem [shape: f32[1,128], index: 2, kind: input, shape index: {}]   ;;  %s882_s3 = inlined_call_operand.vmem [shape: f32[32,128], index: 3, kind: output, shape index: {}]  }
   0x1   :  { %s773_s14 = smov 0   ;;  %s775_s15 = smov 0  }
   0x2   :  { %s777_s16 = smov 0   ;;  %s779_s17 = smov 0  }
   0x3   :  { %s781_s18 = smov 0  }
   0x4 LB: > { %s25_s19 = sadd.s32 1, %s737_s16  ;;  %s32_s20 = sadd.s32 1, %s741_s17  ;;  %s745_s18 = sphi %s781_s18, %s13_s18   ;;  %s741_s17 = sphi %s779_s17, %s888_s17   ;;  %s737_s16 = sphi %s777_s16, %s887_s16   ;;  %s733_s15 = sphi %s775_s15, %s886_s15   ;;  %s729_s14 = sphi %s773_s14, %s885_s14   ;;  %s725_s13 = sphi %s771_s13, %s884_s13   ;;  %s721_s12 = sphi %s769_s12, %s883_s12  }
   0x5   : > { %p26_p0 = scmp.ge.s32.totalorder %s25_s19, 3  ;;  %p48_p1 = scmp.ne.s32.totalorder %s725_s13, %s721_s12 }
   0x6   : > { %p49_p2 = scmp.eq.s32.totalorder %s745_s18, 0  ;;  %s41_s24 = sadd.s32 1, %s725_s13 }
   0x7   : > { %s890_s19 = smov (%p26_p0, %s25_s19), 0  ;;  %s892_s20 = smov (!%p26_p0, %s32_s20), %s741_s17 }
   0x8   : > { %p50_p3 = por %p49_p2, %p48_p1  ;;  %p34_p4 = scmp.ge.s32.totalorder %s892_s20, 2 }
   0x9   : > { %s37_s21 = ssub.s32 %s737_s16, %s890_s19  ;;  %p568_p6 = scmp.ge.s32.totalorder %s745_s18, 6 }
   0xa   : > { %s894_s20 = smov (%p34_p4, %s892_s20), 0 }
   0xb   : > { %s36_s22 = ssub.s32 %s741_s17, %s894_s20  ;;  %162 = sbr.rel (%p568_p6) target bundleno = 24 (0x18), region = 20 }
   0xc   : > { %s38_s23 = sor.u32 %s37_s21, %s36_s22 }
   0xd   : > { %p39_p5 = scmp.eq.s32.totalorder %s38_s23, 0 }
   0xf   : > { %s820_s25 = scalar_select %p39_p5, %s725_s13, %s41_s24  }
  0x10   : > { %165 = sbr.rel (!%p50_p3) target bundleno = 24 (0x18), region = 24  ;;  %s167_s26 = sand.u32 (%p50_p3), 1, %s725_s13  }
  0x11   : > { %s623_s27 = smul.u32 (%p50_p3), 6, %s741_s17  ;;  %s569_s28 = sshll.u32 (%p50_p3), %s167_s26, 3 }
  0x12   : > { %s169_s7 = scalar_lea.vmem (%p50_p3), [#allocation2], %s569_s28 }
  0x13   : > { %s172_s29 = sadd.s32 (%p50_p3), %s737_s16, %s623_s27 }
  0x14   : > { %s572_s30 = sshll.u32 (%p50_p3), %s172_s29, 2 }
  0x15   : > { %s174_s6 = scalar_lea.vmem %s879_s0, %s572_s30 }
  0x16   : > { %v191_v0 = vld [vmem:[%s174_s6] sm:$0xf]  ;;  %v193_v1 = vld [vmem:[%s174_s6 + $0xc] sm:$0xf] }
  0x17   : > { %192 = vst [vmem:[%s169_s7] sm:$0xf] %v191_v0  ;;  %194 = vst [vmem:[%s169_s7 + $0x4] sm:$0xf] %v193_v1 }
  0x18 PF: > { %p573_p7 = scmp.ge.s32.totalorder %s745_s18, 1  ;;  %p233_p8 = scmp.lt.s32.totalorder %s745_s18, 7 }
  0x1a   : > { %p234_p9 = pnand %p573_p7, %p233_p8 }
  0x1b   : > { %s577_s8 = sshll.u32 (!%p234_p9), %s733_s15, 1  ;;  %s575_s9 = sshll.u32 (!%p234_p9), %s729_s14, 4 }
  0x1c   : > { %237 = sbr.rel (%p234_p9) target bundleno = 293 (0x125), region = 69  ;;  %p291_p10 = scmp.lt.s32.totalorder (!%p234_p9), %s577_s8, 3 }
  0x1d   : > { %p279_p11 = scmp.lt.s32.totalorder (!%p234_p9), %s575_s9, 47  ;;  %s240_s27 = sand.u32 (!%p234_p9), 1, %s721_s12  }
  0x1e   : > { %s574_s28 = sshll.u32 (!%p234_p9), %s240_s27, 3  ;;  %p588_p12 = scmp.ne.s32.totalorder (!%p234_p9), %s729_s14, 0 }
  0x1f   : > { %s242_s29 = scalar_lea.vmem (!%p234_p9), [#allocation2], %s574_s28 }
  0x21   : > { %v747_v2 = vmov 0.0   ;;  %vm748_vm0 = vmmov 0   ;;  %s896_s8 = smov (!%p291_p10, %s577_s8), 3  ;;  %s898_s9 = smov (!%p279_p11, %s575_s9), 47  ;;  %v690_v11 = vld [vmem:[%s242_s29] sm:$0xff]  }
  0x22   : > { %603 = vmatprep.subr.bf16.mxu0 %v747_v2  ;;  %619 = vmatprep.mubr.msk.bf16.mxu0 %vm748_vm0, %v747_v2  ;;  %s578_s10 = sshll.u32 %s896_s8, 3  ;;  %s576_s23 = sshll.u32 %s898_s9, 2 }
  0x23   : > { %s836_s22 = scalar_lea.vmem %s882_s3, %s578_s10  ;;  %s285_s15 = scalar_lea.vmem %s880_s1, %s576_s23 }
  0x24   : > { %v682_v3 = vld [vmem:[%s285_s15 + $0x38] sm:$0xff]   ;;  %v683_v4 = vld [vmem:[%s285_s15 + $0x30] sm:$0xff]   ;;  %v684_v5 = vld [vmem:[%s285_s15 + $0x28] sm:$0xff]  }
  0x25   : > { %604 = vmatpush3.bf16.msra.mxu0 %v682_v3  ;;  %v685_v6 = vld [vmem:[%s285_s15 + $0x20] sm:$0xff]   ;;  %v686_v7 = vld [vmem:[%s285_s15 + $0x18] sm:$0xff]   ;;  %v687_v8 = vld [vmem:[%s285_s15 + $0x10] sm:$0xff]  }
  0x26   : > { %605 = vmatprep.subr.bf16.mxu0 %v747_v2  ;;  %v688_v9 = vld [vmem:[%s285_s15 + $0x8] sm:$0xff]   ;;  %v689_v10 = vld [vmem:[%s285_s15] sm:$0xff]  }
  0x29   : > { %606 = vmatpush3.bf16.msra.mxu0 %v683_v4 }
  0x2a   : > { %607 = vmatprep.subr.bf16.mxu0 %v747_v2 }
  0x2d   : > { %608 = vmatpush3.bf16.msra.mxu0 %v684_v5 }
  0x2e   : > { %609 = vmatprep.subr.bf16.mxu0 %v747_v2 }
  0x31   : > { %610 = vmatpush3.bf16.msra.mxu0 %v685_v6 }
  0x32   : > { %611 = vmatprep.subr.bf16.mxu0 %v747_v2 }
  0x35   : > { %612 = vmatpush3.bf16.msra.mxu0 %v686_v7 }
  0x36   : > { %613 = vmatprep.subr.bf16.mxu0 %v747_v2 }
  0x39   : > { %614 = vmatpush3.bf16.msra.mxu0 %v687_v8 }
  0x3a   : > { %615 = vmatprep.subr.bf16.mxu0 %v747_v2 }
  0x3d   : > { %616 = vmatpush3.bf16.msra.mxu0 %v688_v9 }
  0x3e   : > { %617 = vmatprep.subr.bf16.mxu0 %v747_v2 }
  0x41   : > { %618 = vmatpush3.bf16.msra.mxu0 %v689_v10 }
  0x44   : > { %620 = vmatmul.mubr.bf16.vlgmr.msra.gmra.mxu0 %v690_v11 }
 0x104   : > { %v406_v12 = vpop.f32.mrf.mxu0 }
 0x106   : > { %v621_v13 = vpop.f32.mrf.mxu0  ;;  %416 = sbr.rel (%p588_p12) target bundleno = 268 (0x10c), region = 77 }
 0x108   : > { %v409_v14 = vpop.f32.mrf.mxu0 }
 0x10a   : > { %v622_v15 = vpop.f32.mrf.mxu0 }
 0x10b   : > { %417 = vst [vmem:[%s836_s22] sm:$0xff] %v406_v12  ;;  %418 = vst [vmem:[%s836_s22 + $0x8] sm:$0xff] %v409_v14 }
 0x10c PF: > { %p589_p13 = scmp.le.s32.totalorder %s729_s14, 0 }
 0x10e   : > { %422 = sbr.rel (%p589_p13) target bundleno = 279 (0x117), region = 81 }
 0x113   : > { %v423_v16 = vld [vmem:[%s836_s22] sm:$0xff]  ;;  %v424_v17 = vld [vmem:[%s836_s22 + $0x8] sm:$0xff] }
 0x114   : > { %v425_v18 = vadd.f32 %v423_v16, %v406_v12  ;;  %v426_v19 = vadd.f32 %v424_v17, %v409_v14 }
 0x116   : > { %427 = vst [vmem:[%s836_s22] sm:$0xff] %v425_v18  ;;  %428 = vst [vmem:[%s836_s22 + $0x8] sm:$0xff] %v426_v19 }
 0x117 PF: > { %p590_p0 = scmp.ne.s32.totalorder %s729_s14, 2 }
 0x119   : > { %432 = sbr.rel (%p590_p0) target bundleno = 293 (0x125), region = 85 }
 0x11e   : > { %v433_v20 = vld [vmem:[%s836_s22] sm:$0xff]  ;;  %v434_v21 = vld [vmem:[%s836_s22 + $0x8] sm:$0xff] }
 0x11f   : > { %v591_v22 = vld [vmem:[%s881_s2] ss:$0 sm:$0xff] }
 0x120   : > { %v442_v23 = vadd.f32 %v591_v22, %v433_v20  ;;  %v443_v24 = vadd.f32 %v591_v22, %v434_v21 }
 0x122   : > { %v444_v25 = vmax.f32 %v442_v23, 0.0  ;;  %v445_v26 = vmax.f32 %v443_v24, 0.0 }
 0x124   : > { %446 = vst [vmem:[%s836_s22] sm:$0xff] %v444_v25  ;;  %447 = vst [vmem:[%s836_s22 + $0x8] sm:$0xff] %v445_v26 }
 0x125 PF: > { %s13_s18 = sadd.s32 1, %s745_s18   ;;  %s883_s12 = smov %s725_s13 }
 0x126   : > { %p10_p1 = scmp.ge.s32.totalorder %s13_s18, 8   ;;  %s884_s13 = smov %s820_s25 }
 0x127   : > { %s885_s14 = smov %s737_s16  ;;  %s886_s15 = smov %s741_s17 }
 0x128   : > { %s887_s16 = smov %s890_s19  ;;  %s888_s17 = smov %s894_s20 }
 0x129   :  { %12 = sbr.rel (!%p10_p1) target bundleno = 4 (0x4), region = 126 }

// kernel: _lambda_.20
= control target key start
LH: loop header
LB: loop body
LE: loop exit
PB: predicated region body
PF: predicated region fallthrough
CT: control target
= control target key end

     0   :  { %s357_s1 = inlined_call_operand.vmem [shape: bf16[256,128], index: 1, kind: input, shape index: {}]   ;;  %s358_s0 = inlined_call_operand.vmem [shape: bf16[8,256], index: 0, kind: input, shape index: {}]   ;;  %s359_s2 = inlined_call_operand.vmem [shape: f32[1,128], index: 2, kind: input, shape index: {}]   ;;  %s360_s3 = inlined_call_operand.vmem [shape: f32[8,128], index: 3, kind: output, shape index: {}]  }
   0x1   :  { %v262_v0 = vld [vmem:[%s357_s1 + $0x78] sm:$0xff]   ;;  %v264_v2 = vld [vmem:[%s357_s1 + $0x70] sm:$0xff]   ;;  %v266_v4 = vld [vmem:[%s357_s1 + $0x68] sm:$0xff]  }
   0x2   :  { %v263_v1 = vld [vmem:[%s357_s1 + $0x38] sm:$0xff]   ;;  %240 = vmatprep.subr.bf16.mxu0 %v262_v0  ;;  %v265_v3 = vld [vmem:[%s357_s1 + $0x30] sm:$0xff]   ;;  %v267_v5 = vld [vmem:[%s357_s1 + $0x28] sm:$0xff]  }
   0x3   :  { %241 = vmatpush3.bf16.msra.mxu0 %v263_v1  ;;  %v268_v6 = vld [vmem:[%s357_s1 + $0x60] sm:$0xff]   ;;  %v270_v8 = vld [vmem:[%s357_s1 + $0x58] sm:$0xff]   ;;  %v272_v10 = vld [vmem:[%s357_s1 + $0x50] sm:$0xff]  }
   0x4   :  { %242 = vmatprep.subr.bf16.mxu0 %v264_v2  ;;  %v269_v7 = vld [vmem:[%s357_s1 + $0x20] sm:$0xff]   ;;  %v271_v9 = vld [vmem:[%s357_s1 + $0x18] sm:$0xff]   ;;  %v273_v13 = vld [vmem:[%s357_s1 + $0x10] sm:$0xff]  }
   0x5   :  { %v15_v11 = vld [vmem:[%s358_s0] sm:$0xff]  ;;  %v274_v14 = vld [vmem:[%s357_s1 + $0x48] sm:$0xff]  }
   0x6   :  { %v222_v12 = vcombine.high %v15_v11, %v15_v11  ;;  %v275_v15 = vld [vmem:[%s357_s1 + $0x8] sm:$0xff]   ;;  %v276_v16 = vld [vmem:[%s357_s1 + $0x40] sm:$0xff]   ;;  %v221_v18 = vcombine.low %v15_v11, %v15_v11 }
   0x7   :  { %243 = vmatpush3.bf16.msra.mxu0 %v265_v3  ;;  %v277_v17 = vld [vmem:[%s357_s1] sm:$0xff]  }
   0x8   :  { %244 = vmatprep.subr.bf16.mxu0 %v266_v4  ;;  %183 = vmatprep.mubr.bf16.mxu0 %v222_v12  ;;  %v239_v21 = vld [vmem:[%s359_s2] ss:$0 sm:$0xff] }
   0xb   :  { %245 = vmatpush3.bf16.msra.mxu0 %v267_v5 }
   0xc   :  { %246 = vmatprep.subr.bf16.mxu0 %v268_v6 }
   0xf   :  { %247 = vmatpush3.bf16.msra.mxu0 %v269_v7 }
  0x10   :  { %248 = vmatprep.subr.bf16.mxu0 %v270_v8 }
  0x13   :  { %249 = vmatpush3.bf16.msra.mxu0 %v271_v9 }
  0x14   :  { %250 = vmatprep.subr.bf16.mxu0 %v272_v10 }
  0x17   :  { %251 = vmatpush3.bf16.msra.mxu0 %v273_v13 }
  0x18   :  { %252 = vmatprep.subr.bf16.mxu0 %v274_v14 }
  0x1b   :  { %253 = vmatpush3.bf16.msra.mxu0 %v275_v15 }
  0x1c   :  { %254 = vmatprep.subr.bf16.mxu0 %v276_v16 }
  0x1f   :  { %255 = vmatpush3.bf16.msra.mxu0 %v277_v17 }
  0x22   :  { %184 = vmatmul.mubr.bf16.vlgmr.msra.gmra.mxu0 %v221_v18 }
  0xe2   :  { %v256_v19 = vpop.f32.mrf.mxu0 }
  0xe4   :  { %v257_v20 = vpop.f32.mrf.mxu0 }
  0xe5   :  { %v258_v22 = vadd.f32 %v257_v20, %v256_v19 }
  0xe6   :  { %v259_v23 = vpop.f32.mrf.mxu0 }
  0xe7   :  { %v214_v24 = vadd.f32 %v258_v22, %v239_v21 }
  0xe8   :  { %v260_v25 = vpop.f32.mrf.mxu0 }
  0xe9   :  { %v215_v26 = vmax.f32 %v214_v24, 0.0 }
  0xeb   :  { %216 = vst [vmem:[%s360_s3] sm:$0xff] %v215_v26 }

// kernel: _lambda_.21
= control target key start
LH: loop header
LB: loop body
LE: loop exit
PB: predicated region body
PF: predicated region fallthrough
CT: control target
= control target key end

     0   :  { %v295_v6 = vmov 1966171168   ;;  %v60_v8 = vlaneseq  ;;  %s379_s1 = inlined_call_operand.vmem [shape: bf16[256,128], index: 1, kind: input, shape index: {}]   ;;  %s380_s0 = inlined_call_operand.vmem [shape: bf16[2,256], index: 0, kind: input, shape index: {}]   ;;  %s381_s3 = inlined_call_operand.vmem [shape: f32[2,128], index: 3, kind: output, shape index: {}]   ;;  %s382_s2 = inlined_call_operand.vmem [shape: f32[1,128], index: 2, kind: input, shape index: {}]  }
   0x1   :  { %v279_v0 = vld [vmem:[%s379_s1 + $0x78] sm:$0xff]   ;;  %v281_v2 = vld [vmem:[%s379_s1 + $0x70] sm:$0xff]   ;;  %v283_v4 = vld [vmem:[%s379_s1 + $0x68] sm:$0xff]   ;;  %v58_v7 = vunpack.c.l.s4 %v295_v6 }
   0x2   :  { %v280_v1 = vld [vmem:[%s379_s1 + $0x38] sm:$0xff]   ;;  %256 = vmatprep.subr.bf16.mxu0 %v279_v0  ;;  %v282_v3 = vld [vmem:[%s379_s1 + $0x30] sm:$0xff]   ;;  %v284_v5 = vld [vmem:[%s379_s1 + $0x28] sm:$0xff]   ;;  %v61_v12 = vshrl.u32 %v60_v8, 7 }
   0x3   :  { %257 = vmatpush3.bf16.msra.mxu0 %v280_v1  ;;  %v285_v9 = vld [vmem:[%s379_s1 + $0x60] sm:$0xff]   ;;  %v59_v11 = vunpack.c.0.s8 %v58_v7  ;;  %v287_v13 = vld [vmem:[%s379_s1 + $0x58] sm:$0xff]   ;;  %v289_v16 = vld [vmem:[%s379_s1 + $0x50] sm:$0xff]  }
   0x4   :  { %258 = vmatprep.subr.bf16.mxu0 %v281_v2  ;;  %v286_v10 = vld [vmem:[%s379_s1 + $0x20] sm:$0xff]   ;;  %v288_v14 = vld [vmem:[%s379_s1 + $0x18] sm:$0xff]   ;;  %v290_v19 = vld [vmem:[%s379_s1 + $0x10] sm:$0xff]  }
   0x5   :  { %v62_v15 = vsub.s32 %v59_v11, %v61_v12  ;;  %v238_v17 = vld.sshfl [vmem:[%s380_s0] sm:$0x11 pattern:$0x75316420]  ;;  %v291_v21 = vld [vmem:[%s379_s1 + $0x48] sm:$0xff]  }
   0x6   :  { %v56_v18 = vcombine.high %v238_v17, %v238_v17  ;;  %v292_v22 = vld [vmem:[%s379_s1 + $0x8] sm:$0xff]   ;;  %v293_v23 = vld [vmem:[%s379_s1 + $0x40] sm:$0xff]  }
   0x7   :  { %259 = vmatpush3.bf16.msra.mxu0 %v282_v3  ;;  %v294_v24 = vld [vmem:[%s379_s1] sm:$0xff]   ;;  %v63_v25 = vrot.slane %v238_v17, %v62_v15 }
   0x8   :  { %260 = vmatprep.subr.bf16.mxu0 %v283_v4  ;;  %v70_v20 = vrot.slane %v56_v18, %v62_v15  ;;  %v255_v31 = vld [vmem:[%s382_s2] ss:$0 sm:$0xff] }
   0xa   :  { %201 = vmatprep.mubr.bf16.mxu0 %v70_v20 }
   0xb   :  { %261 = vmatpush3.bf16.msra.mxu0 %v284_v5 }
   0xc   :  { %262 = vmatprep.subr.bf16.mxu0 %v285_v9 }
   0xf   :  { %263 = vmatpush3.bf16.msra.mxu0 %v286_v10 }
  0x10   :  { %264 = vmatprep.subr.bf16.mxu0 %v287_v13 }
  0x13   :  { %265 = vmatpush3.bf16.msra.mxu0 %v288_v14 }
  0x14   :  { %266 = vmatprep.subr.bf16.mxu0 %v289_v16 }
  0x17   :  { %267 = vmatpush3.bf16.msra.mxu0 %v290_v19 }
  0x18   :  { %268 = vmatprep.subr.bf16.mxu0 %v291_v21 }
  0x1b   :  { %269 = vmatpush3.bf16.msra.mxu0 %v292_v22 }
  0x1c   :  { %270 = vmatprep.subr.bf16.mxu0 %v293_v23 }
  0x1f   :  { %271 = vmatpush3.bf16.msra.mxu0 %v294_v24 }
  0x22   :  { %202 = vmatmul.mubr.bf16.vlgmr.msra.gmra.mxu0 %v63_v25 }
  0xe2   :  { %v272_v26 = vpop.f32.mrf.mxu0 }
  0xe4   :  { %v273_v27 = vpop.f32.mrf.mxu0 }
  0xe5   :  { %v274_v28 = vadd.f32 %v273_v27, %v272_v26 }
  0xe6   :  { %v275_v29 = vpop.f32.mrf.mxu0 }
  0xe7   :  { %213 = vst [vmem:[%s381_s3] sm:$0x3] %v274_v28 }
  0xe8   :  { %v276_v30 = vpop.f32.mrf.mxu0 }
  0xee   :  { %v224_v32 = vld [vmem:[%s381_s3] sm:$0x3] }
  0xef   :  { %v232_v33 = vadd.f32 %v255_v31, %v224_v32 }
  0xf1   :  { %233 = vst [vmem:[%s381_s3] sm:$0x3] %v232_v33 }

// kernel: _lambda_.22
= control target key start
LH: loop header
LB: loop body
LE: loop exit
PB: predicated region body
PF: predicated region fallthrough
CT: control target
= control target key end

     0   :  { %v198_v0 = vmov 0.0   ;;  %vm199_vm0 = vmmov 0   ;;  %s259_s1 = inlined_call_operand.vmem [shape: bf16[128,128], index: 1, kind: input, shape index: {}]   ;;  %s260_s0 = inlined_call_operand.vmem [shape: bf16[2,128], index: 0, kind: input, shape index: {}]   ;;  %s261_s3 = inlined_call_operand.vmem [shape: f32[2,128], index: 3, kind: output, shape index: {}]   ;;  %s262_s2 = inlined_call_operand.vmem [shape: f32[1,128], index: 2, kind: input, shape index: {}]  }
   0x1   :  { %168 = vmatprep.subr.bf16.mxu0 %v198_v0  ;;  %v190_v1 = vld [vmem:[%s259_s1 + $0x38] sm:$0xff]   ;;  %184 = vmatprep.mubr.msk.bf16.mxu0 %vm199_vm0, %v198_v0  ;;  %v191_v2 = vld [vmem:[%s259_s1 + $0x30] sm:$0xff]   ;;  %v192_v3 = vld [vmem:[%s259_s1 + $0x28] sm:$0xff]  }
   0x2   :  { %169 = vmatpush3.bf16.msra.mxu0 %v190_v1  ;;  %v193_v4 = vld [vmem:[%s259_s1 + $0x20] sm:$0xff]   ;;  %v194_v5 = vld [vmem:[%s259_s1 + $0x18] sm:$0xff]   ;;  %v195_v6 = vld [vmem:[%s259_s1 + $0x10] sm:$0xff]  }
   0x3   :  { %170 = vmatprep.subr.bf16.mxu0 %v198_v0  ;;  %v196_v7 = vld [vmem:[%s259_s1 + $0x8] sm:$0xff]   ;;  %v197_v8 = vld [vmem:[%s259_s1] sm:$0xff]  }
   0x4   :  { %v15_v9 = vld [vmem:[%s260_s0] sm:$0x1] }
   0x5   :  { %v158_v13 = vld [vmem:[%s262_s2] ss:$0 sm:$0xff] }
   0x6   :  { %171 = vmatpush3.bf16.msra.mxu0 %v191_v2 }
   0x7   :  { %172 = vmatprep.subr.bf16.mxu0 %v198_v0 }
   0xa   :  { %173 = vmatpush3.bf16.msra.mxu0 %v192_v3 }
   0xb   :  { %174 = vmatprep.subr.bf16.mxu0 %v198_v0 }
   0xe   :  { %175 = vmatpush3.bf16.msra.mxu0 %v193_v4 }
   0xf   :  { %176 = vmatprep.subr.bf16.mxu0 %v198_v0 }
  0x12   :  { %177 = vmatpush3.bf16.msra.mxu0 %v194_v5 }
  0x13   :  { %178 = vmatprep.subr.bf16.mxu0 %v198_v0 }
  0x16   :  { %179 = vmatpush3.bf16.msra.mxu0 %v195_v6 }
  0x17   :  { %180 = vmatprep.subr.bf16.mxu0 %v198_v0 }
  0x1a   :  { %181 = vmatpush3.bf16.msra.mxu0 %v196_v7 }
  0x1b   :  { %182 = vmatprep.subr.bf16.mxu0 %v198_v0 }
  0x1e   :  { %183 = vmatpush3.bf16.msra.mxu0 %v197_v8 }
  0x21   :  { %185 = vmatmul.mubr.bf16.vlgmr.msra.gmra.mxu0 %v15_v9 }
  0xe1   :  { %v114_v10 = vpop.f32.mrf.mxu0 }
  0xe2   :  { %124 = vst [vmem:[%s261_s3] sm:$0x3] %v114_v10 }
  0xe3   :  { %v186_v11 = vpop.f32.mrf.mxu0 }
  0xe5   :  { %v117_v12 = vpop.f32.mrf.mxu0 }
  0xe7   :  { %v187_v14 = vpop.f32.mrf.mxu0 }
  0xe9   :  { %v135_v15 = vld [vmem:[%s261_s3] sm:$0x3] }
  0xea   :  { %v143_v16 = vadd.f32 %v158_v13, %v135_v15 }
  0xec   :  { %v144_v17 = vmax.f32 %v143_v16, 0.0 }
  0xee   :  { %145 = vst [vmem:[%s261_s3] sm:$0x3] %v144_v17 }

// kernel: _lambda_.23
= control target key start
LH: loop header
LB: loop body
LE: loop exit
PB: predicated region body
PF: predicated region fallthrough
CT: control target
= control target key end

     0   :  { %v198_v0 = vmov 0.0   ;;  %vm199_vm0 = vmmov 0   ;;  %s253_s1 = inlined_call_operand.vmem [shape: bf16[128,128], index: 1, kind: input, shape index: {}]   ;;  %s254_s0 = inlined_call_operand.vmem [shape: bf16[8,128], index: 0, kind: input, shape index: {}]   ;;  %s255_s2 = inlined_call_operand.vmem [shape: f32[1,128], index: 2, kind: input, shape index: {}]   ;;  %s256_s3 = inlined_call_operand.vmem [shape: f32[8,128], index: 3, kind: output, shape index: {}]  }
   0x1   :  { %168 = vmatprep.subr.bf16.mxu0 %v198_v0  ;;  %v190_v1 = vld [vmem:[%s253_s1 + $0x38] sm:$0xff]   ;;  %184 = vmatprep.mubr.msk.bf16.mxu0 %vm199_vm0, %v198_v0  ;;  %v191_v2 = vld [vmem:[%s253_s1 + $0x30] sm:$0xff]   ;;  %v192_v3 = vld [vmem:[%s253_s1 + $0x28] sm:$0xff]  }
   0x2   :  { %169 = vmatpush3.bf16.msra.mxu0 %v190_v1  ;;  %v193_v4 = vld [vmem:[%s253_s1 + $0x20] sm:$0xff]   ;;  %v194_v5 = vld [vmem:[%s253_s1 + $0x18] sm:$0xff]   ;;  %v195_v6 = vld [vmem:[%s253_s1 + $0x10] sm:$0xff]  }
   0x3   :  { %170 = vmatprep.subr.bf16.mxu0 %v198_v0  ;;  %v196_v7 = vld [vmem:[%s253_s1 + $0x8] sm:$0xff]   ;;  %v197_v8 = vld [vmem:[%s253_s1] sm:$0xff]  }
   0x4   :  { %v15_v9 = vld [vmem:[%s254_s0] sm:$0xf] }
   0x5   :  { %v158_v10 = vld [vmem:[%s255_s2] ss:$0 sm:$0xff] }
   0x6   :  { %171 = vmatpush3.bf16.msra.mxu0 %v191_v2 }
   0x7   :  { %172 = vmatprep.subr.bf16.mxu0 %v198_v0 }
   0xa   :  { %173 = vmatpush3.bf16.msra.mxu0 %v192_v3 }
   0xb   :  { %174 = vmatprep.subr.bf16.mxu0 %v198_v0 }
   0xe   :  { %175 = vmatpush3.bf16.msra.mxu0 %v193_v4 }
   0xf   :  { %176 = vmatprep.subr.bf16.mxu0 %v198_v0 }
  0x12   :  { %177 = vmatpush3.bf16.msra.mxu0 %v194_v5 }
  0x13   :  { %178 = vmatprep.subr.bf16.mxu0 %v198_v0 }
  0x16   :  { %179 = vmatpush3.bf16.msra.mxu0 %v195_v6 }
  0x17   :  { %180 = vmatprep.subr.bf16.mxu0 %v198_v0 }
  0x1a   :  { %181 = vmatpush3.bf16.msra.mxu0 %v196_v7 }
  0x1b   :  { %182 = vmatprep.subr.bf16.mxu0 %v198_v0 }
  0x1e   :  { %183 = vmatpush3.bf16.msra.mxu0 %v197_v8 }
  0x21   :  { %185 = vmatmul.mubr.bf16.vlgmr.msra.gmra.mxu0 %v15_v9 }
  0xe1   :  { %v114_v11 = vpop.f32.mrf.mxu0 }
  0xe2   :  { %v143_v12 = vadd.f32 %v158_v10, %v114_v11 }
  0xe3   :  { %v186_v13 = vpop.f32.mrf.mxu0 }
  0xe4   :  { %v144_v14 = vmax.f32 %v143_v12, 0.0 }
  0xe5   :  { %v117_v15 = vpop.f32.mrf.mxu0 }
  0xe6   :  { %145 = vst [vmem:[%s256_s3] sm:$0xff] %v144_v14 }
  0xe7   :  { %v187_v16 = vpop.f32.mrf.mxu0 }

// kernel: _lambda_.24
= control target key start
LH: loop header
LB: loop body
LE: loop exit
PB: predicated region body
PF: predicated region fallthrough
CT: control target
= control target key end

     0   :  { %s651_s12 = smov 0   ;;  %s653_s13 = smov 0   ;;  %s711_s0 = inlined_call_operand.vmem [shape: bf16[32,128], index: 0, kind: input, shape index: {}]   ;;  %s712_s1 = inlined_call_operand.vmem [shape: bf16[128,128], index: 1, kind: input, shape index: {}]   ;;  %s713_s2 = inlined_call_operand.vmem [shape: f32[1,128], index: 2, kind: input, shape index: {}]   ;;  %s714_s3 = inlined_call_operand.vmem [shape: f32[32,128], index: 3, kind: output, shape index: {}]  }
   0x1   :  { %s655_s14 = smov 0  }
   0x2 LB: > { %s32_s15 = sadd.s32 1, %s623_s13  ;;  %p524_p0 = scmp.ge.s32.totalorder %s627_s14, 1  ;;  %s627_s14 = sphi %s655_s14, %s13_s14   ;;  %s623_s13 = sphi %s653_s13, %s716_s13   ;;  %s619_s12 = sphi %s651_s12, %s715_s12  }
   0x3   : > { %p34_p1 = scmp.ge.s32.totalorder %s32_s15, 2  ;;  %p188_p2 = scmp.lt.s32.totalorder %s627_s14, 3 }
   0x5   : > { %s718_s15 = smov (%p34_p1, %s32_s15), 0  ;;  %p189_p3 = pnand %p524_p0, %p188_p2 }
   0x6   : > { %s525_s20 = sshll.u32 (!%p189_p3), %s619_s12, 1 }
   0x7   : > { %192 = sbr.rel (%p189_p3) target bundleno = 251 (0xfb), region = 32  ;;  %p230_p4 = scmp.lt.s32.totalorder (!%p189_p3), %s525_s20, 3 }
   0xc   : > { %v596_v0 = vld [vmem:[%s712_s1 + $0x38] sm:$0xff]   ;;  %v629_v1 = vmov 0.0   ;;  %v597_v2 = vld [vmem:[%s712_s1 + $0x30] sm:$0xff]   ;;  %vm630_vm0 = vmmov 0   ;;  %s720_s20 = smov (!%p230_p4, %s525_s20), 3  ;;  %v598_v3 = vld [vmem:[%s712_s1 + $0x28] sm:$0xff]  }
   0xd   : > { %550 = vmatprep.subr.bf16.mxu0 %v629_v1  ;;  %566 = vmatprep.mubr.msk.bf16.mxu0 %vm630_vm0, %v629_v1  ;;  %s526_s23 = sshll.u32 %s720_s20, 2  ;;  %v599_v4 = vld [vmem:[%s712_s1 + $0x20] sm:$0xff]   ;;  %v600_v5 = vld [vmem:[%s712_s1 + $0x18] sm:$0xff]   ;;  %v601_v6 = vld [vmem:[%s712_s1 + $0x10] sm:$0xff]   ;;  %s528_s10 = sshll.u32 %s720_s20, 3 }
   0xe   : > { %551 = vmatpush3.bf16.msra.mxu0 %v596_v0  ;;  %s236_s26 = scalar_lea.vmem %s711_s0, %s526_s23  ;;  %v602_v7 = vld [vmem:[%s712_s1 + $0x8] sm:$0xff]   ;;  %v603_v8 = vld [vmem:[%s712_s1] sm:$0xff]   ;;  %s257_s16 = scalar_lea.vmem %s714_s3, %s528_s10 }
   0xf   : > { %552 = vmatprep.subr.bf16.mxu0 %v629_v1  ;;  %v604_v9 = vld [vmem:[%s236_s26] sm:$0xff]  }
  0x10   : > { %v538_v14 = vld [vmem:[%s713_s2] ss:$0 sm:$0xff] }
  0x12   : > { %553 = vmatpush3.bf16.msra.mxu0 %v597_v2 }
  0x13   : > { %554 = vmatprep.subr.bf16.mxu0 %v629_v1 }
  0x16   : > { %555 = vmatpush3.bf16.msra.mxu0 %v598_v3 }
  0x17   : > { %556 = vmatprep.subr.bf16.mxu0 %v629_v1 }
  0x1a   : > { %557 = vmatpush3.bf16.msra.mxu0 %v599_v4 }
  0x1b   : > { %558 = vmatprep.subr.bf16.mxu0 %v629_v1 }
  0x1e   : > { %559 = vmatpush3.bf16.msra.mxu0 %v600_v5 }
  0x1f   : > { %560 = vmatprep.subr.bf16.mxu0 %v629_v1 }
  0x22   : > { %561 = vmatpush3.bf16.msra.mxu0 %v601_v6 }
  0x23   : > { %562 = vmatprep.subr.bf16.mxu0 %v629_v1 }
  0x26   : > { %563 = vmatpush3.bf16.msra.mxu0 %v602_v7 }
  0x27   : > { %564 = vmatprep.subr.bf16.mxu0 %v629_v1 }
  0x2a   : > { %565 = vmatpush3.bf16.msra.mxu0 %v603_v8 }
  0x2d   : > { %567 = vmatmul.mubr.bf16.vlgmr.msra.gmra.mxu0 %v604_v9 }
  0xed   : > { %v366_v10 = vpop.f32.mrf.mxu0 }
  0xee   : > { %377 = vst [vmem:[%s257_s16] sm:$0xff] %v366_v10 }
  0xef   : > { %v568_v11 = vpop.f32.mrf.mxu0 }
  0xf1   : > { %v369_v12 = vpop.f32.mrf.mxu0 }
  0xf2   : > { %378 = vst [vmem:[%s257_s16 + $0x8] sm:$0xff] %v369_v12  ;;  %v402_v16 = vadd.f32 %v538_v14, %v369_v12 }
  0xf3   : > { %v569_v13 = vpop.f32.mrf.mxu0 }
  0xf4   : > { %v404_v19 = vmax.f32 %v402_v16, 0.0 }
  0xf5   : > { %v392_v15 = vld [vmem:[%s257_s16] sm:$0xff] }
  0xf6   : > { %v401_v17 = vadd.f32 %v538_v14, %v392_v15  ;;  %406 = vst [vmem:[%s257_s16 + $0x8] sm:$0xff] %v404_v19 }
  0xf8   : > { %v403_v18 = vmax.f32 %v401_v17, 0.0 }
  0xfa   : > { %405 = vst [vmem:[%s257_s16] sm:$0xff] %v403_v18 }
  0xfb PF: > { %s13_s14 = sadd.s32 1, %s627_s14   ;;  %s715_s12 = smov %s623_s13 }
  0xfc   : > { %p10_p5 = scmp.ge.s32.totalorder %s13_s14, 4   ;;  %s716_s13 = smov %s718_s15 }
  0xfe   :  { %12 = sbr.rel (!%p10_p5) target bundleno = 2 (0x2), region = 80 }

// kernel: _lambda_.25
= control target key start
LH: loop header
LB: loop body
LE: loop exit
PB: predicated region body
PF: predicated region fallthrough
CT: control target
= control target key end

     0   :  { %s488_s1 = inlined_call_operand.vmem [shape: f32[8,512], index: 1, kind: input, shape index: {}]   ;;  %s489_s0 = inlined_call_operand.vmem [shape: f32[8,512], index: 0, kind: input, shape index: {}]   ;;  %s490_s2 = inlined_call_operand.vmem [shape: f32[8,512], index: 2, kind: output, shape index: {}]  }
   0x1   :  { %v19_v0 = vld [vmem:[%s488_s1] sm:$0xff]  ;;  %v20_v2 = vld [vmem:[%s488_s1 + $0x8] sm:$0xff]  ;;  %v21_v3 = vld [vmem:[%s488_s1 + $0x10] sm:$0xff] }
   0x2   :  { %v23_v1 = vmax.f32 %v19_v0, 0.11  ;;  %v24_v4 = vmax.f32 %v20_v2, 0.11  ;;  %v25_v5 = vmax.f32 %v21_v3, 0.11 }
   0x3   :  { %v11_v6 = vld [vmem:[%s489_s0] sm:$0xff]  ;;  %v22_v7 = vld [vmem:[%s488_s1 + $0x18] sm:$0xff]  ;;  %v12_v8 = vld [vmem:[%s489_s0 + $0x8] sm:$0xff] }
   0x4   :  { %280 = vrcp.f32 %v23_v1  ;;  %v15_v9 = vand.u32 2147483647, %v11_v6  ;;  %v26_v10 = vmax.f32 %v22_v7, 0.11  ;;  %v16_v11 = vand.u32 2147483647, %v12_v8 }
   0x5   :  { %282 = vrcp.f32 %v24_v4  ;;  %v13_v14 = vld [vmem:[%s489_s0 + $0x10] sm:$0xff]  ;;  %v14_v26 = vld [vmem:[%s489_s0 + $0x18] sm:$0xff] }
   0x6   :  { %284 = vrcp.f32 %v25_v5  ;;  %v31_v12 = vsub.f32 0.5, %v15_v9  ;;  %v139_v13 = vsub.f32 -0.5, %v15_v9  ;;  %v32_v15 = vsub.f32 0.5, %v16_v11 }
   0x7   :  { %286 = vrcp.f32 %v26_v10  ;;  %v140_v16 = vsub.f32 -0.5, %v16_v11  ;;  %v17_v20 = vand.u32 2147483647, %v13_v14  ;;  %v18_v34 = vand.u32 2147483647, %v14_v26 }
   0x8   :  { %v320_v14 = vmov -1.0  }
   0x9   :  { %v33_v29 = vsub.f32 0.5, %v17_v20  ;;  %v141_v30 = vsub.f32 -0.5, %v17_v20  ;;  %v34_v44 = vsub.f32 0.5, %v18_v34  ;;  %v142_v52 = vsub.f32 -0.5, %v18_v34 }
  0x11   :  { %v281_v17 = vpop.eup %280 }
  0x12   :  { %v35_v18 = vmul.f32 %v281_v17, %v31_v12  ;;  %v143_v19 = vmul.f32 %v281_v17, %v139_v13  ;;  %v283_v21 = vpop.eup %282 }
  0x13   :  { %v36_v24 = vmul.f32 %v283_v21, %v32_v15  ;;  %v144_v25 = vmul.f32 %v283_v21, %v140_v16  ;;  %v285_v31 = vpop.eup %284 }
  0x14   :  { %v357_v22 = vmul.f32 0.70710677, %v35_v18  ;;  %v359_v23 = vmul.f32 0.70710677, %v143_v19  ;;  %v37_v41 = vmul.f32 %v285_v31, %v33_v29  ;;  %v145_v42 = vmul.f32 %v285_v31, %v141_v30  ;;  %v287_v45 = vpop.eup %286 }
  0x15   :  { %v366_v32 = vmul.f32 0.70710677, %v36_v24  ;;  %v368_v33 = vmul.f32 0.70710677, %v144_v25  ;;  %v38_v51 = vmul.f32 %v287_v45, %v34_v44  ;;  %v146_v59 = vmul.f32 %v287_v45, %v142_v52 }
  0x16   :  { %v51_v27 = vand.u32 2147483647, %v357_v22  ;;  %v159_v28 = vand.u32 2147483647, %v359_v23  ;;  %v372_v49 = vmul.f32 0.70710677, %v37_v41 }
  0x17   :  { %v52_v37 = vand.u32 2147483647, %v366_v32  ;;  %v160_v38 = vand.u32 2147483647, %v368_v33  ;;  %v374_v50 = vmul.f32 0.70710677, %v145_v42 }
  0x18   :  { %v55_v35 = vmul.f32 0.3275911, %v51_v27  ;;  %v163_v36 = vmul.f32 0.3275911, %v159_v28  ;;  %v103_v53 = vsub.f32 0.0, %v51_v27  ;;  %v211_v55 = vsub.f32 0.0, %v159_v28 }
  0x19   :  { %v56_v43 = vmul.f32 0.3275911, %v52_v37  ;;  %v164_v46 = vmul.f32 0.3275911, %v160_v38  ;;  %v53_v54 = vand.u32 2147483647, %v372_v49 }
  0x1a   :  { %v59_v39 = vadd.f32 1.0, %v55_v35  ;;  %v167_v40 = vadd.f32 1.0, %v163_v36  ;;  %v161_v57 = vand.u32 2147483647, %v374_v50  ;;  %v378_v58 = vmul.f32 0.70710677, %v38_v51 }
  0x1b   :  { %v60_v47 = vadd.f32 1.0, %v56_v43  ;;  %v168_v48 = vadd.f32 1.0, %v164_v46  ;;  %v57_v56 = vmul.f32 0.3275911, %v53_v54  ;;  %v107_v60 = vmul.f32 %v103_v53, %v51_v27 }
  0x1c   :  { %288 = vrcp.f32 %v59_v39  ;;  %v104_v61 = vsub.f32 0.0, %v52_v37  ;;  %v165_v63 = vmul.f32 0.3275911, %v161_v57  ;;  %v215_v0 = vmul.f32 %v211_v55, %v159_v28 }
  0x1d   :  { %290 = vrcp.f32 %v167_v40  ;;  %v61_v62 = vadd.f32 1.0, %v57_v56  ;;  %v54_v1 = vand.u32 2147483647, %v378_v58  ;;  %v381_v2 = vmul.f32 0.70710677, %v146_v59 }
  0x1e   :  { %292 = vrcp.f32 %v60_v47  ;;  %v212_v3 = vsub.f32 0.0, %v160_v38  ;;  %v169_v4 = vadd.f32 1.0, %v165_v63  ;;  %vm43_vm0 = vcmp.ge.f32.partialorder %v357_v22, 0.0 }
  0x1f   :  { %294 = vrcp.f32 %v168_v48  ;;  %v58_v5 = vmul.f32 0.3275911, %v54_v1  ;;  %v111_v6 = vmul.f32 1.442695, %v107_v60  ;;  %vm151_vm1 = vcmp.ge.f32.partialorder %v359_v23, 0.0 }
  0x20   :  { %296 = vrcp.f32 %v61_v62  ;;  %v108_v7 = vmul.f32 %v104_v61, %v52_v37  ;;  %v162_v8 = vand.u32 2147483647, %v381_v2  ;;  %v219_v10 = vmul.f32 1.442695, %v215_v0 }
  0x21   :  { %v105_v11 = vsub.f32 0.0, %v53_v54  ;;  %298 = vrcp.f32 %v169_v4  ;;  %v62_v12 = vadd.f32 1.0, %v58_v5  ;;  %v391_v15 = vsel %vm43_vm0, 1.0, %v320_v14 }
  0x22   :  { %v216_v17 = vmul.f32 %v212_v3, %v160_v38  ;;  %v166_v18 = vmul.f32 0.3275911, %v162_v8  ;;  %v395_v19 = vsel %vm151_vm1, 1.0, %v320_v14  ;;  %v213_v21 = vsub.f32 0.0, %v161_v57 }
  0x23   :  { %300 = vrcp.f32 %v62_v12  ;;  %v113_v23 = vmul.f32 1.442695, %v108_v7  ;;  %v109_v27 = vmul.f32 %v105_v11, %v53_v54  ;;  %v106_v28 = vsub.f32 0.0, %v54_v1 }
  0x24   :  { %302 = vpow2.f32 %v111_v6  ;;  %v170_v24 = vadd.f32 1.0, %v166_v18  ;;  %v221_v31 = vmul.f32 1.442695, %v216_v17  ;;  %vm44_vm2 = vcmp.ge.f32.partialorder %v366_v32, 0.0 }
  0x25   :  { %304 = vpow2.f32 %v219_v10  ;;  %v217_v36 = vmul.f32 %v213_v21, %v161_v57  ;;  %v214_v37 = vsub.f32 0.0, %v162_v8  ;;  %vm152_vm3 = vcmp.ge.f32.partialorder %v368_v33, 0.0 }
  0x26   :  { %306 = vrcp.f32 %v170_v24  ;;  %v115_v42 = vmul.f32 1.442695, %v109_v27  ;;  %v110_v43 = vmul.f32 %v106_v28, %v54_v1  ;;  %v416_v51 = vsel %vm44_vm2, 1.0, %v320_v14 }
  0x27   :  { %308 = vpow2.f32 %v113_v23  ;;  %v223_v52 = vmul.f32 1.442695, %v217_v36  ;;  %v218_v53 = vmul.f32 %v214_v37, %v162_v8  ;;  %v423_v60 = vsel %vm152_vm3, 1.0, %v320_v14 }
  0x28   :  { %310 = vpow2.f32 %v221_v31  ;;  %v117_v61 = vmul.f32 1.442695, %v110_v43  ;;  %vm45_vm4 = vcmp.ge.f32.partialorder %v372_v49, 0.0  ;;  %vm153_vm5 = vcmp.ge.f32.partialorder %v374_v50, 0.0 }
  0x29   :  { %v386_v9 = vpop.eup %288  ;;  %312 = vpow2.f32 %v115_v42  ;;  %v225_v5 = vmul.f32 1.442695, %v218_v53  ;;  %vm46_vm6 = vcmp.ge.f32.partialorder %v378_v58, 0.0  ;;  %vm154_vm7 = vcmp.ge.f32.partialorder %v381_v2, 0.0 }
  0x2a   :  { %v388_v13 = vpop.eup %290  ;;  %v67_v16 = vmul.f32 1.0614054, %v386_v9  ;;  %314 = vpow2.f32 %v223_v52 }
  0x2b   :  { %v175_v20 = vmul.f32 1.0614054, %v388_v13  ;;  %v398_v25 = vpop.eup %292  ;;  %316 = vpow2.f32 %v117_v61 }
  0x2c   :  { %v263_v22 = vadd.f32 -1.4531521, %v67_v16  ;;  %v68_v30 = vmul.f32 1.0614054, %v398_v25  ;;  %v402_v34 = vpop.eup %294  ;;  %318 = vpow2.f32 %v225_v5 }
  0x2d   :  { %v271_v26 = vadd.f32 -1.4531521, %v175_v20  ;;  %v176_v40 = vmul.f32 1.0614054, %v402_v34  ;;  %v410_v47 = vpop.eup %296 }
  0x2e   :  { %v75_v29 = vmul.f32 %v386_v9, %v263_v22  ;;  %v264_v39 = vadd.f32 -1.4531521, %v68_v30  ;;  %v69_v57 = vmul.f32 1.0614054, %v410_v47  ;;  %v425_v62 = vpop.eup %298 }
  0x2f   :  { %v183_v35 = vmul.f32 %v388_v13, %v271_v26  ;;  %v272_v46 = vadd.f32 -1.4531521, %v176_v40  ;;  %v177_v4 = vmul.f32 1.0614054, %v425_v62 }
  0x30   :  { %v79_v38 = vadd.f32 1.4214138, %v75_v29  ;;  %v76_v45 = vmul.f32 %v398_v25, %v264_v39  ;;  %v265_v1 = vadd.f32 -1.4531521, %v69_v57  ;;  %v431_v6 = vpop.eup %300 }
  0x31   :  { %v187_v41 = vadd.f32 1.4214138, %v183_v35  ;;  %v184_v56 = vmul.f32 %v402_v34, %v272_v46  ;;  %v303_v11 = vpop.eup %302  ;;  %v273_v16 = vadd.f32 -1.4531521, %v177_v4  ;;  %v70_v17 = vmul.f32 1.0614054, %v431_v6 }
  0x32   :  { %v83_v44 = vmul.f32 %v386_v9, %v79_v38  ;;  %v80_v55 = vadd.f32 1.4214138, %v76_v45  ;;  %v77_v10 = vmul.f32 %v410_v47, %v265_v1  ;;  %v305_v18 = vpop.eup %304 }
  0x33   :  { %v191_v48 = vmul.f32 %v388_v13, %v187_v41  ;;  %v188_v0 = vadd.f32 1.4214138, %v184_v56  ;;  %v438_v24 = vpop.eup %306  ;;  %v185_v27 = vmul.f32 %v425_v62, %v273_v16  ;;  %v266_v28 = vadd.f32 -1.4531521, %v70_v17 }
  0x34   :  { %v267_v54 = vadd.f32 -0.28449672, %v83_v44  ;;  %v84_v63 = vmul.f32 %v398_v25, %v80_v55  ;;  %v81_v23 = vadd.f32 1.4214138, %v77_v10  ;;  %v309_v35 = vpop.eup %308  ;;  %v178_v39 = vmul.f32 1.0614054, %v438_v24 }
  0x35   :  { %v275_v59 = vadd.f32 -0.28449672, %v191_v48  ;;  %v192_v8 = vmul.f32 %v402_v34, %v188_v0  ;;  %v189_v37 = vadd.f32 1.4214138, %v185_v27  ;;  %v78_v38 = vmul.f32 %v431_v6, %v266_v28  ;;  %v311_v43 = vpop.eup %310 }
  0x36   :  { %v91_v32 = vmul.f32 %v386_v9, %v267_v54  ;;  %v268_v7 = vadd.f32 -0.28449672, %v84_v63  ;;  %v274_v48 = vadd.f32 -1.4531521, %v178_v39  ;;  %v313_v61 = vpop.eup %312 }
  0x37   :  { %v199_v3 = vmul.f32 %v388_v13, %v275_v59  ;;  %v276_v22 = vadd.f32 -0.28449672, %v192_v8  ;;  %v193_v45 = vmul.f32 %v425_v62, %v189_v37  ;;  %v82_v46 = vadd.f32 1.4214138, %v78_v38 }
  0x38   :  { %v95_v33 = vadd.f32 0.2548296, %v91_v32  ;;  %v92_v21 = vmul.f32 %v398_v25, %v268_v7  ;;  %v186_v59 = vmul.f32 %v438_v24, %v274_v48  ;;  %v158_v48 = vsel %vm154_vm7, 1.0, %v320_v14 }
  0x39   :  { %v203_v12 = vadd.f32 0.2548296, %v199_v3  ;;  %v200_v31 = vmul.f32 %v402_v34, %v276_v22  ;;  %v86_v57 = vmul.f32 %v431_v6, %v82_v46 }
  0x3a   :  { %v99_v20 = vmul.f32 %v386_v9, %v95_v33  ;;  %v96_v30 = vadd.f32 0.2548296, %v92_v21  ;;  %v85_v9 = vmul.f32 %v410_v47, %v81_v23  ;;  %v190_v5 = vadd.f32 1.4214138, %v186_v59 }
  0x3b   :  { %v207_v26 = vmul.f32 %v388_v13, %v203_v12  ;;  %v204_v41 = vadd.f32 0.2548296, %v200_v31  ;;  %v270_v4 = vadd.f32 -0.28449672, %v86_v57  ;;  %v49_v21 = vsel %vm45_vm4, 1.0, %v320_v14 }
  0x3c   :  { %v119_v29 = vmul.f32 %v303_v11, %v99_v20  ;;  %v100_v40 = vmul.f32 %v398_v25, %v96_v30  ;;  %v269_v42 = vadd.f32 -0.28449672, %v85_v9  ;;  %v277_v25 = vadd.f32 -0.28449672, %v193_v45 }
  0x3d   :  { %v227_v36 = vmul.f32 %v305_v18, %v207_v26  ;;  %v208_v54 = vmul.f32 %v402_v34, %v204_v41  ;;  %v315_v34 = vpop.eup %314  ;;  %v94_v12 = vmul.f32 %v431_v6, %v270_v4  ;;  %v194_v16 = vmul.f32 %v438_v24, %v190_v5 }
  0x3e   :  { %v123_v13 = vsub.f32 1.0, %v119_v29  ;;  %v120_v53 = vmul.f32 %v309_v35, %v100_v40  ;;  %v93_v55 = vmul.f32 %v410_v47, %v269_v42  ;;  %v317_v17 = vpop.eup %316  ;;  %v50_v40 = vsel %vm46_vm6, 1.0, %v320_v14 }
  0x3f   :  { %v231_v44 = vsub.f32 1.0, %v227_v36  ;;  %v228_v0 = vmul.f32 %v311_v43, %v208_v54  ;;  %v98_v26 = vadd.f32 0.2548296, %v94_v12  ;;  %v319_v27 = vpop.eup %318 }
  0x40   :  { %v127_v52 = vmul.f32 %v123_v13, %v391_v15  ;;  %v124_v63 = vsub.f32 1.0, %v120_v53  ;;  %v97_v1 = vadd.f32 0.2548296, %v93_v55  ;;  %v201_v15 = vmul.f32 %v425_v62, %v277_v25 }
  0x41   :  { %v235_v56 = vmul.f32 %v231_v44, %v395_v19  ;;  %v232_v19 = vsub.f32 1.0, %v228_v0 }
  0x42   :  { %v131_v32 = vadd.f32 1.0, %v127_v52  ;;  %v128_v7 = vmul.f32 %v124_v63, %v416_v51  ;;  %v101_v8 = vmul.f32 %v410_v47, %v97_v1  ;;  %v205_v11 = vadd.f32 0.2548296, %v201_v15 }
  0x43   :  { %v239_v3 = vadd.f32 1.0, %v235_v56  ;;  %v236_v20 = vmul.f32 %v232_v19, %v423_v60  ;;  %v278_v47 = vadd.f32 -0.28449672, %v194_v16  ;;  %v102_v60 = vmul.f32 %v431_v6, %v98_v26 }
  0x44   :  { %v135_v33 = vmul.f32 0.5, %v131_v32  ;;  %v132_v18 = vadd.f32 1.0, %v128_v7  ;;  %v121_v22 = vmul.f32 %v313_v61, %v101_v8  ;;  %v209_v51 = vmul.f32 %v425_v62, %v205_v11 }
  0x45   :  { %v243_v10 = vmul.f32 0.5, %v239_v3  ;;  %v240_v29 = vadd.f32 1.0, %v236_v20  ;;  %v202_v35 = vmul.f32 %v438_v24, %v278_v47  ;;  %v157_v62 = vsel %vm153_vm5, 1.0, %v320_v14 }
  0x46   :  { %v136_v28 = vmul.f32 0.5, %v132_v18  ;;  %v125_v30 = vsub.f32 1.0, %v121_v22  ;;  %v229_v9 = vmul.f32 %v315_v34, %v209_v51  ;;  %v122_v38 = vmul.f32 %v317_v17, %v102_v60 }
  0x47   :  { %v247_v23 = vsub.f32 %v135_v33, %v243_v10  ;;  %v244_v49 = vmul.f32 0.5, %v240_v29  ;;  %v206_v39 = vadd.f32 0.2548296, %v202_v35 }
  0x48   :  { %v129_v36 = vmul.f32 %v125_v30, %v49_v21  ;;  %v233_v37 = vsub.f32 1.0, %v229_v9  ;;  %v126_v41 = vsub.f32 1.0, %v122_v38 }
  0x49   :  { %v251_v31 = vmax.f32 %v247_v23, 1e-09  ;;  %v248_v58 = vsub.f32 %v136_v28, %v244_v49  ;;  %v210_v42 = vmul.f32 %v438_v24, %v206_v39 }
  0x4a   :  { %v133_v13 = vadd.f32 1.0, %v129_v36  ;;  %v237_v6 = vmul.f32 %v233_v37, %v157_v62  ;;  %v130_v45 = vmul.f32 %v126_v41, %v50_v40 }
  0x4b   :  { %255 = vst [vmem:[%s490_s2] sm:$0xff] %v251_v31  ;;  %v252_v43 = vmax.f32 %v248_v58, 1e-09  ;;  %v230_v46 = vmul.f32 %v319_v27, %v210_v42 }
  0x4c   :  { %v137_v50 = vmul.f32 0.5, %v133_v13  ;;  %v241_v44 = vadd.f32 1.0, %v237_v6  ;;  %v134_v53 = vadd.f32 1.0, %v130_v45 }
  0x4d   :  { %256 = vst [vmem:[%s490_s2 + $0x8] sm:$0xff] %v252_v43  ;;  %v234_v54 = vsub.f32 1.0, %v230_v46 }
  0x4e   :  { %v245_v52 = vmul.f32 0.5, %v241_v44  ;;  %v138_v2 = vmul.f32 0.5, %v134_v53 }
  0x4f   :  { %v238_v56 = vmul.f32 %v234_v54, %v158_v48 }
  0x50   :  { %v249_v55 = vsub.f32 %v137_v50, %v245_v52 }
  0x51   :  { %v242_v57 = vadd.f32 1.0, %v238_v56 }
  0x52   :  { %v253_v25 = vmax.f32 %v249_v55, 1e-09 }
  0x53   :  { %v246_v24 = vmul.f32 0.5, %v242_v57 }
  0x54   :  { %257 = vst [vmem:[%s490_s2 + $0x10] sm:$0xff] %v253_v25 }
  0x55   :  { %v250_v59 = vsub.f32 %v138_v2, %v246_v24 }
  0x57   :  { %v254_v61 = vmax.f32 %v250_v59, 1e-09 }
  0x59   :  { %258 = vst [vmem:[%s490_s2 + $0x18] sm:$0xff] %v254_v61 }

</bundles_post_ra>
